<compile_context>
chip_gen: v7x
topology: tpu7x:2x2x1
jax: 0.10.0
libtpu: 0.0.40
codegen_flags: <defaults>
</compile_context>

<pallas_src>
import functools

import jax
import jax.numpy as jnp
from jax.experimental import pallas as pl
from jax.experimental.pallas import tpu as pltpu


def _round_up(x, m):
    return (x + m - 1) // m * m


@functools.lru_cache(maxsize=None)
def _num_tensorcores():
    """Best-effort TensorCores-per-device (v7x megacore = 2, v5e/v6e = 1).
    Defaults to 2 so v7x is never pessimized; on single-core chips the extra
    grid step costs only ~0.35us/layer."""
    try:
        dev = jax.devices()[0]
    except Exception:
        return 2
    for attr in ("num_cores", "core_count", "num_tensorcores"):
        val = getattr(dev, attr, None)
        if isinstance(val, int) and val >= 1:
            return val
    return 2


# ----------------------------------------------------------------------------
# Fused conv kernel: in-kernel im2col (contiguous tap slices) + matmul + bias
# + ReLU.  Stride is always 1 (stride-2/4 layers are space-to-depth'd by the
# caller), so every tap is one contiguous row-slice of the flattened
# (H*W, Cin) activation:
#     out_row[m] += x_flat[m + i*W + j] @ w_tap[i, j]
# Rows m = oh*W + ow with ow >= OW mix neighbouring taps and are garbage; the
# caller's inter-layer reshuffle drops them.
# ----------------------------------------------------------------------------
def _conv_kernel(x_ref, w_ref, b_ref, o_ref, *, tap_offsets, cin, n_rows):
    npad = w_ref.shape[1]
    bias = b_ref[...]                                     # (1, Np) f32
    for b in range(x_ref.shape[0]):                       # static 1 or 2
        acc = jnp.zeros((n_rows, npad), jnp.float32)
        for t, off in enumerate(tap_offsets):
            acc = acc + jnp.dot(
                x_ref[b, off:off + n_rows, :],            # (n_rows, cin) bf16
                w_ref[t * cin:(t + 1) * cin, :],          # (cin, Np)     bf16
                preferred_element_type=jnp.float32)
        o_ref[b] = jnp.maximum(acc + bias, 0.0).astype(o_ref.dtype)


def conv_layer(x, wk, b, *, W, kh, kw):
    """x: (B, H*W, Cin) bf16 flattened NHWC; wk: (kh*kw*Cin, Np) bf16;
    b: (1, Np) f32.  Returns (B, (OH-1)*W + OW, Np) bf16 in full-width rows."""
    B, HW, cin = x.shape
    H = HW // W
    assert H * W == HW
    OH, OW = H - kh + 1, W - kw + 1
    n_rows = (OH - 1) * W + OW
    Np = wk.shape[1]
    taps = tuple(i * W + j for i in range(kh) for j in range(kw))
    assert wk.shape[0] == len(taps) * cin

    nb = 2 if (B >= 2 and B % 2 == 0 and _num_tensorcores() >= 2) else 1
    bb = B // nb

    kernel = functools.partial(_conv_kernel, tap_offsets=taps, cin=cin,
                               n_rows=n_rows)
    return pl.pallas_call(
        kernel,
        out_shape=jax.ShapeDtypeStruct((B, n_rows, Np), jnp.bfloat16),
        grid_spec=pltpu.PrefetchScalarGridSpec(
            num_scalar_prefetch=0,
            grid=(nb,),
            in_specs=[
                pl.BlockSpec((bb, HW, cin), lambda i: (i, 0, 0)),
                pl.BlockSpec((len(taps) * cin, Np), lambda i: (0, 0)),
                pl.BlockSpec((1, Np), lambda i: (0, 0)),
            ],
            out_specs=pl.BlockSpec((bb, n_rows, Np), lambda i: (i, 0, 0)),
        ),
        compiler_params=pltpu.CompilerParams(
            dimension_semantics=("parallel",)),
        cost_estimate=pl.CostEstimate(
            flops=2 * B * len(taps) * n_rows * cin * Np,
            transcendentals=0,
            bytes_accessed=(B * HW * cin * 2 + len(taps) * cin * Np * 2
                            + Np * 4 + B * n_rows * Np * 2),
        ),
    )(x, wk, b)


# ----------------------------------------------------------------------------
# Fused fc1 (+bias+ReLU) + fc2 kernel.  fc1's 512 output columns are split
# into `nt` tiles ("parallel" -> both v7x TensorCores, and the 1.6 MB weight
# halves are double-buffered); fc2 is folded into the epilogue per tile, the
# per-tile partial results are summed by the caller (trivial).
# ----------------------------------------------------------------------------
def _fc_kernel(x_ref, w1_ref, b1_ref, w2_ref, o_ref):
    h = jnp.dot(x_ref[...], w1_ref[...], preferred_element_type=jnp.float32)
    h = jnp.maximum(h + b1_ref[...], 0.0)                 # (Bp, tn) f32
    # fc2 folded into the epilogue (f32: ~0.1 MFLOP, keeps numerics tight).
    o_ref[0] = jnp.dot(h, w2_ref[...], preferred_element_type=jnp.float32)


def fc_block(x, w1, b1, w2):
    """x: (Bp, K) bf16; w1: (K, 512) bf16; b1: (1, 512) f32; w2: (512, Ap) f32.
    Returns per-column-tile partial fc2 results (nt, Bp, Ap) f32."""
    Bp, K = x.shape
    N = w1.shape[1]
    Ap = w2.shape[1]
    nt = 2 if _num_tensorcores() >= 2 else 1
    tn = N // nt
    return pl.pallas_call(
        _fc_kernel,
        out_shape=jax.ShapeDtypeStruct((nt, Bp, Ap), jnp.float32),
        grid_spec=pltpu.PrefetchScalarGridSpec(
            num_scalar_prefetch=0,
            grid=(nt,),
            in_specs=[
                pl.BlockSpec((Bp, K), lambda n: (0, 0)),
                pl.BlockSpec((K, tn), lambda n: (0, n)),
                pl.BlockSpec((1, tn), lambda n: (0, n)),
                pl.BlockSpec((tn, Ap), lambda n: (n, 0)),
            ],
            out_specs=pl.BlockSpec((1, Bp, Ap), lambda n: (n, 0, 0)),
        ),
        compiler_params=pltpu.CompilerParams(
            dimension_semantics=("parallel",)),
        cost_estimate=pl.CostEstimate(
            flops=2 * Bp * K * N + 2 * Bp * N * Ap,
            transcendentals=0,
            bytes_accessed=(Bp * K * 2 + K * N * 2 + N * 4 + N * Ap * 4
                            + nt * Bp * Ap * 4),
        ),
    )(x, w1, b1, w2)


# ----------------------------------------------------------------------------
# One-time weight preparation (layout, space-to-depth reorder, pad, dtype).
# ----------------------------------------------------------------------------
def prepare_params(params):
    """Invariant relied on downstream: all channel-padding weight columns AND
    the matching bias lanes are zero and ReLU is applied, so the padded output
    lanes of every conv are exactly zero.  conv3 additionally zeroes the
    matching *input-channel rows*, so junk in lanes 64..127 could never leak."""
    bf16, f32 = jnp.bfloat16, jnp.float32

    def pad_cols(w, n):
        return jnp.pad(w, ((0, 0), (0, n - w.shape[1])))

    def pad_bias(b, n=128):
        return jnp.pad(b, (0, n - b.shape[0])).astype(f32).reshape(1, n)

    # conv1 (8x8 / s4, cin 4)  ==  2x2 / s1 over the 4x4 space-to-depth input;
    # s2d channel order (hi, wi, c) -> hi*16 + wi*4 + c.  Tap-major rows.
    w1 = params["w1"]                                      # (32, 4, 8, 8) OIHW
    w1k = (w1.reshape(32, 4, 2, 4, 2, 4)                   # (o, c, ti, hi, tj, wi)
             .transpose(2, 4, 3, 5, 1, 0)                  # (ti, tj, hi, wi, c, o)
             .reshape(2 * 2 * 64, 32))
    w1k = pad_cols(w1k, 128).astype(bf16)                  # (256, 128)

    # conv2 (4x4 / s2, cin 32)  ==  2x2 / s1 over the 2x2 space-to-depth input;
    # s2d channel order (hi, wi, c) -> hi*64 + wi*32 + c.
    w2 = params["w2"]                                      # (64, 32, 4, 4)
    w2k = (w2.reshape(64, 32, 2, 2, 2, 2)                  # (o, c, ti, hi, tj, wi)
             .transpose(2, 4, 3, 5, 1, 0)
             .reshape(2 * 2 * 128, 64))
    w2k = pad_cols(w2k, 128).astype(bf16)                  # (512, 128)

    # conv3 (3x3 / s1, cin 64): consumes conv2's 128-lane output directly;
    # rows for input channels 64..127 are zero.
    w3 = params["w3"]                                      # (64, 64, 3, 3)
    w3k = w3.transpose(2, 3, 1, 0).reshape(9, 64, 64)      # (tap, cin, cout)
    w3k = jnp.pad(w3k, ((0, 0), (0, 64), (0, 64)))
    w3k = w3k.reshape(9 * 128, 128).astype(bf16)           # (1152, 128)

    # fc1: permute columns once so the NHWC flatten matches torch's NCHW view.
    wf1 = (params["wf1"].reshape(512, 64, 7, 7)
                        .transpose(0, 2, 3, 1)             # (512, 7, 7, 64)
                        .reshape(512, 64 * 7 * 7)
                        .T).astype(bf16)                   # (3136, 512)

    # fc2 folded into the fc kernel epilogue: (512, A_pad) f32.
    a_pad = _round_up(params["wf2"].shape[0], 128)
    wf2 = pad_cols(params["wf2"].T, a_pad).astype(f32)     # (512, 128)

    return {
        "w1": w1k, "b1": pad_bias(params["b1"]),
        "w2": w2k, "b2": pad_bias(params["b2"]),
        "w3": w3k, "b3": pad_bias(params["b3"]),
        "wf1": wf1, "bf1": params["bf1"].astype(f32).reshape(1, 512),
        "wf2": wf2, "bf2": params["bf2"].astype(f32),
    }


# ----------------------------------------------------------------------------
# DQN forward (x is NCHW f32, like the torch module)
# ----------------------------------------------------------------------------
def dqn_forward(x, prep):
    B = x.shape[0]
    bf16 = jnp.bfloat16

    # Input: NCHW -> NHWC -> 4x4 space-to-depth -> flat (B, 21*21, 64) bf16.
    h = jnp.transpose(x, (0, 2, 3, 1))                              # (B,84,84,4)
    h = (h.reshape(B, 21, 4, 21, 4, 4)
          .transpose(0, 1, 3, 2, 4, 5)
          .reshape(B, 21 * 21, 64)).astype(bf16)

    # conv1: 2x2/s1 over W=21 -> 20x20x32 (full-width: 419 rows, 128 lanes).
    h = conv_layer(h, prep["w1"], prep["b1"], W=21, kh=2, kw=2)

    # conv1 -> conv2 glue: drop garbage rows/lanes + 2x2 space-to-depth.
    h = jnp.pad(h, ((0, 0), (0, 1), (0, 0))).reshape(B, 20, 21, 128)[:, :, :20, :32]
    h = (h.reshape(B, 10, 2, 10, 2, 32)
          .transpose(0, 1, 3, 2, 4, 5)
          .reshape(B, 10 * 10, 128))

    # conv2: 2x2/s1 over W=10 -> 9x9x64 (89 rows; upper 64 lanes exactly zero).
    h = conv_layer(h, prep["w2"], prep["b2"], W=10, kh=2, kw=2)

    # conv2 -> conv3 glue: drop garbage rows (keep all 128 lanes).
    h = jnp.pad(h, ((0, 0), (0, 1), (0, 0))).reshape(B, 9, 10, 128)[:, :, :9, :]
    h = h.reshape(B, 9 * 9, 128)

    # conv3: 3x3/s1 over W=9 -> 7x7x64 (61 rows, 128 lanes).
    h = conv_layer(h, prep["w3"], prep["b3"], W=9, kh=3, kw=3)

    # conv3 -> fc glue: drop garbage rows/lanes, NHWC flatten, pad batch rows.
    h = jnp.pad(h, ((0, 0), (0, 2), (0, 0))).reshape(B, 7, 9, 128)[:, :, :7, :64]
    h = h.reshape(B, 7 * 7 * 64)
    Bp = _round_up(B, 8)
    h = jnp.pad(h, ((0, Bp - B), (0, 0)))

    # fc1 (+bias+ReLU) with fc2 folded into the epilogue; N split across TCs.
    parts = fc_block(h, prep["wf1"], prep["bf1"], prep["wf2"])      # (nt,Bp,Ap)
    A = prep["bf2"].shape[0]
    return parts.sum(axis=0)[:B, :A] + prep["bf2"]


# ----------------------------------------------------------------------------
# Params + pure-JAX reference (original torch-layout weights -> validates all
# the space-to-depth / padding / permutation plumbing in prepare_params)
# ----------------------------------------------------------------------------
def init_params(key, action_dim):
    ks = jax.random.split(key, 10)

    def u(k, shape, fan_in):
        bound = 1.0 / jnp.sqrt(float(fan_in))
        return jax.random.uniform(k, shape, jnp.float32, -bound, bound)

    return {
        "w1": u(ks[0], (32, 4, 8, 8), 4 * 8 * 8),
        "b1": u(ks[1], (32,), 4 * 8 * 8),
        "w2": u(ks[2], (64, 32, 4, 4), 32 * 4 * 4),
        "b2": u(ks[3], (64,), 32 * 4 * 4),
        "w3": u(ks[4], (64, 64, 3, 3), 64 * 3 * 3),
        "b3": u(ks[5], (64,), 64 * 3 * 3),
        "wf1": u(ks[6], (512, 64 * 7 * 7), 64 * 7 * 7),   # torch Linear: (out, in)
        "bf1": u(ks[7], (512,), 64 * 7 * 7),
        "wf2": u(ks[8], (9, 512), 512),
        "bf2": u(ks[9], (9,), 512),
    }


def dqn_forward_reference(x, params):
    """Pure-JAX reference with matching bf16-operand / f32-accumulate numerics
    and torch-style NCHW flatten."""
    bf16 = jnp.bfloat16

    def conv(h, w, b, s):
        y = jax.lax.conv_general_dilated(
            h.astype(bf16), w.astype(bf16), (s, s), "VALID",
            dimension_numbers=("NHWC", "OIHW", "NHWC"),
            preferred_element_type=jnp.float32)
        y = y + b[None, None, None, :]
        return jax.nn.relu(y).astype(bf16)

    h = jnp.transpose(x, (0, 2, 3, 1)).astype(bf16)
    h = conv(h, params["w1"], params["b1"], 4)
    h = conv(h, params["w2"], params["b2"], 2)
    h = conv(h, params["w3"], params["b3"], 1)
    hf = jnp.transpose(h, (0, 3, 1, 2)).reshape(h.shape[0], -1)       # NCHW flatten
    f1 = jnp.dot(hf.astype(bf16), params["wf1"].T.astype(bf16),
                 preferred_element_type=jnp.float32) + params["bf1"]
    f1 = jax.nn.relu(f1)
    return f1 @ params["wf2"].T + params["bf2"]


if __name__ == "__main__":
    key = jax.random.PRNGKey(0)
    k_x, k_p = jax.random.split(key)

    action_dim = 9                       # MsPacman action space size
    batch = 2
    # 84x84 spatial is required by the architecture (fc1 expects 64*7*7).
    x = jax.random.uniform(k_x, (batch, 4, 84, 84), jnp.float32)
    params = init_params(k_p, action_dim)
    prep = prepare_params(params)        # one-time weight layout/pad/bf16 prep

    fwd = jax.jit(dqn_forward)
    out = jax.block_until_ready(fwd(x, prep))
    ref = jax.block_until_ready(jax.jit(dqn_forward_reference)(x, params))

    assert out.shape == (batch, action_dim), out.shape
    max_diff = jnp.max(jnp.abs(out - ref))
    assert jnp.allclose(out, ref, atol=2e-2, rtol=2e-2), f"max abs diff {max_diff}"
    print("KERNEL_OK")
</pallas_src>

<mosaic_0001>
module attributes {stable_mosaic.version = 11 : i64} {
  func.func @_conv_kernel(%arg0: i32, %arg1: memref<1x441x64xbf16, #tpu.memory_space<vmem>>, %arg2: memref<256x128xbf16, #tpu.memory_space<vmem>>, %arg3: memref<1x128xf32, #tpu.memory_space<vmem>>, %arg4: memref<1x419x128xbf16, #tpu.memory_space<vmem>>) attributes {dimension_semantics = [#tpu.dimension_semantics<parallel>], iteration_bounds = array<i64: 2>, scalar_prefetch = 0 : i64, scratch_operands = 0 : i64, tpu.core_type = #tpu.core_type<tc>, window_params = [{transform_indices = @transform_0, window_bounds = array<i64: 1, 441, 64>}, {pipeline_mode = #tpu.pipeline_mode<synchronous>, transform_indices = @transform_1, window_bounds = array<i64: 256, 128>}, {pipeline_mode = #tpu.pipeline_mode<synchronous>, transform_indices = @transform_2, window_bounds = array<i64: 1, 128>}, {transform_indices = @transform_3, window_bounds = array<i64: 1, 419, 128>}]} {
    %c0 = arith.constant 0 : index
    %c0_0 = arith.constant 0 : index
    %0 = vector.load %arg3[%c0, %c0_0] : memref<1x128xf32, #tpu.memory_space<vmem>>, vector<1x128xf32>
    %cst = arith.constant 0.000000e+00 : f32
    %1 = vector.broadcast %cst : f32 to vector<419x128xf32>
    %c0_1 = arith.constant 0 : index
    %c0_2 = arith.constant 0 : index
    %c0_3 = arith.constant 0 : index
    %2 = vector.load %arg1[%c0_1, %c0_2, %c0_3] : memref<1x441x64xbf16, #tpu.memory_space<vmem>>, vector<1x419x64xbf16>
    %3 = vector.shape_cast %2 : vector<1x419x64xbf16> to vector<419x64xbf16>
    %c0_4 = arith.constant 0 : index
    %c0_5 = arith.constant 0 : index
    %4 = vector.load %arg2[%c0_4, %c0_5] : memref<256x128xbf16, #tpu.memory_space<vmem>>, vector<64x128xbf16>
    %cst_6 = arith.constant dense<0.000000e+00> : vector<419x128xf32>
    %5 = tpu.matmul %3, %4, %cst_6 {dimension_numbers = #tpu.dot_dimension_numbers<[1], [0], [0], [1], [0, 0, 1, 1], [], []>} : vector<419x64xbf16>, vector<64x128xbf16>, vector<419x128xf32> -> vector<419x128xf32>
    %6 = arith.addf %1, %5 : vector<419x128xf32>
    %c0_7 = arith.constant 0 : index
    %c1 = arith.constant 1 : index
    %c0_8 = arith.constant 0 : index
    %7 = vector.load %arg1[%c0_7, %c1, %c0_8] : memref<1x441x64xbf16, #tpu.memory_space<vmem>>, vector<1x419x64xbf16>
    %8 = vector.shape_cast %7 : vector<1x419x64xbf16> to vector<419x64xbf16>
    %c64 = arith.constant 64 : index
    %c0_9 = arith.constant 0 : index
    %9 = vector.load %arg2[%c64, %c0_9] : memref<256x128xbf16, #tpu.memory_space<vmem>>, vector<64x128xbf16>
    %cst_10 = arith.constant dense<0.000000e+00> : vector<419x128xf32>
    %10 = tpu.matmul %8, %9, %cst_10 {dimension_numbers = #tpu.dot_dimension_numbers<[1], [0], [0], [1], [0, 0, 1, 1], [], []>} : vector<419x64xbf16>, vector<64x128xbf16>, vector<419x128xf32> -> vector<419x128xf32>
    %11 = arith.addf %6, %10 : vector<419x128xf32>
    %c0_11 = arith.constant 0 : index
    %c21 = arith.constant 21 : index
    %c0_12 = arith.constant 0 : index
    %12 = vector.load %arg1[%c0_11, %c21, %c0_12] : memref<1x441x64xbf16, #tpu.memory_space<vmem>>, vector<1x419x64xbf16>
    %13 = vector.shape_cast %12 : vector<1x419x64xbf16> to vector<419x64xbf16>
    %c128 = arith.constant 128 : index
    %c0_13 = arith.constant 0 : index
    %14 = vector.load %arg2[%c128, %c0_13] : memref<256x128xbf16, #tpu.memory_space<vmem>>, vector<64x128xbf16>
    %cst_14 = arith.constant dense<0.000000e+00> : vector<419x128xf32>
    %15 = tpu.matmul %13, %14, %cst_14 {dimension_numbers = #tpu.dot_dimension_numbers<[1], [0], [0], [1], [0, 0, 1, 1], [], []>} : vector<419x64xbf16>, vector<64x128xbf16>, vector<419x128xf32> -> vector<419x128xf32>
    %16 = arith.addf %11, %15 : vector<419x128xf32>
    %c0_15 = arith.constant 0 : index
    %c22 = arith.constant 22 : index
    %c0_16 = arith.constant 0 : index
    %17 = vector.load %arg1[%c0_15, %c22, %c0_16] : memref<1x441x64xbf16, #tpu.memory_space<vmem>>, vector<1x419x64xbf16>
    %18 = vector.shape_cast %17 : vector<1x419x64xbf16> to vector<419x64xbf16>
    %c192 = arith.constant 192 : index
    %c0_17 = arith.constant 0 : index
    %19 = vector.load %arg2[%c192, %c0_17] : memref<256x128xbf16, #tpu.memory_space<vmem>>, vector<64x128xbf16>
    %cst_18 = arith.constant dense<0.000000e+00> : vector<419x128xf32>
    %20 = tpu.matmul %18, %19, %cst_18 {dimension_numbers = #tpu.dot_dimension_numbers<[1], [0], [0], [1], [0, 0, 1, 1], [], []>} : vector<419x64xbf16>, vector<64x128xbf16>, vector<419x128xf32> -> vector<419x128xf32>
    %21 = arith.addf %16, %20 : vector<419x128xf32>
    %22 = vector.broadcast %0 : vector<1x128xf32> to vector<419x128xf32>
    %23 = arith.addf %21, %22 : vector<419x128xf32>
    %cst_19 = arith.constant 0.000000e+00 : f32
    %24 = vector.broadcast %cst_19 : f32 to vector<419x128xf32>
    %25 = arith.maximumf %23, %24 : vector<419x128xf32>
    %26 = arith.truncf %25 : vector<419x128xf32> to vector<419x128xbf16>
    %c0_20 = arith.constant 0 : index
    %c0_21 = arith.constant 0 : index
    %c0_22 = arith.constant 0 : index
    %27 = vector.load %arg4[%c0_20, %c0_21, %c0_22] : memref<1x419x128xbf16, #tpu.memory_space<vmem>>, vector<1x419x128xbf16>
    %28 = vector.shape_cast %27 : vector<1x419x128xbf16> to vector<419x128xbf16>
    %29 = vector.shape_cast %26 : vector<419x128xbf16> to vector<1x419x128xbf16>
    tpu.vector_store %arg4[%c0_20, %c0_21, %c0_22], %29 {strides = array<i32>} : memref<1x419x128xbf16, #tpu.memory_space<vmem>>, vector<1x419x128xbf16>,
    return
  }
  func.func @transform_0(%arg0: i32) -> (i32, i32, i32) {
    %c0_i32 = arith.constant 0 : i32
    %c0_i32_0 = arith.constant 0 : i32
    %c0_i32_1 = arith.constant 0 : i32
    return %arg0, %c0_i32, %c0_i32_0 : i32, i32, i32
  }
  func.func @transform_1(%arg0: i32) -> (i32, i32) {
    %c0_i32 = arith.constant 0 : i32
    %c0_i32_0 = arith.constant 0 : i32
    %c0_i32_1 = arith.constant 0 : i32
    return %c0_i32, %c0_i32_0 : i32, i32
  }
  func.func @transform_2(%arg0: i32) -> (i32, i32) {
    %c0_i32 = arith.constant 0 : i32
    %c0_i32_0 = arith.constant 0 : i32
    %c0_i32_1 = arith.constant 0 : i32
    return %c0_i32, %c0_i32_0 : i32, i32
  }
  func.func @transform_3(%arg0: i32) -> (i32, i32, i32) {
    %c0_i32 = arith.constant 0 : i32
    %c0_i32_0 = arith.constant 0 : i32
    %c0_i32_1 = arith.constant 0 : i32
    return %arg0, %c0_i32, %c0_i32_0 : i32, i32, i32
  }
}

module attributes {stable_mosaic.version = 11 : i64} {
  func.func @_conv_kernel(%arg0: i32, %arg1: memref<1x100x128xbf16, #tpu.memory_space<vmem>>, %arg2: memref<512x128xbf16, #tpu.memory_space<vmem>>, %arg3: memref<1x128xf32, #tpu.memory_space<vmem>>, %arg4: memref<1x89x128xbf16, #tpu.memory_space<vmem>>) attributes {dimension_semantics = [#tpu.dimension_semantics<parallel>], iteration_bounds = array<i64: 2>, scalar_prefetch = 0 : i64, scratch_operands = 0 : i64, tpu.core_type = #tpu.core_type<tc>, window_params = [{transform_indices = @transform_0, window_bounds = array<i64: 1, 100, 128>}, {pipeline_mode = #tpu.pipeline_mode<synchronous>, transform_indices = @transform_1, window_bounds = array<i64: 512, 128>}, {pipeline_mode = #tpu.pipeline_mode<synchronous>, transform_indices = @transform_2, window_bounds = array<i64: 1, 128>}, {transform_indices = @transform_3, window_bounds = array<i64: 1, 89, 128>}]} {
    %c0 = arith.constant 0 : index
    %c0_0 = arith.constant 0 : index
    %0 = vector.load %arg3[%c0, %c0_0] : memref<1x128xf32, #tpu.memory_space<vmem>>, vector<1x128xf32>
    %cst = arith.constant 0.000000e+00 : f32
    %1 = vector.broadcast %cst : f32 to vector<89x128xf32>
    %c0_1 = arith.constant 0 : index
    %c0_2 = arith.constant 0 : index
    %c0_3 = arith.constant 0 : index
    %2 = vector.load %arg1[%c0_1, %c0_2, %c0_3] : memref<1x100x128xbf16, #tpu.memory_space<vmem>>, vector<1x89x128xbf16>
    %3 = vector.shape_cast %2 : vector<1x89x128xbf16> to vector<89x128xbf16>
    %c0_4 = arith.constant 0 : index
    %c0_5 = arith.constant 0 : index
    %4 = vector.load %arg2[%c0_4, %c0_5] : memref<512x128xbf16, #tpu.memory_space<vmem>>, vector<128x128xbf16>
    %cst_6 = arith.constant dense<0.000000e+00> : vector<89x128xf32>
    %5 = tpu.matmul %3, %4, %cst_6 {dimension_numbers = #tpu.dot_dimension_numbers<[1], [0], [0], [1], [0, 0, 1, 1], [], []>} : vector<89x128xbf16>, vector<128x128xbf16>, vector<89x128xf32> -> vector<89x128xf32>
    %6 = arith.addf %1, %5 : vector<89x128xf32>
    %c0_7 = arith.constant 0 : index
    %c1 = arith.constant 1 : index
    %c0_8 = arith.constant 0 : index
    %7 = vector.load %arg1[%c0_7, %c1, %c0_8] : memref<1x100x128xbf16, #tpu.memory_space<vmem>>, vector<1x89x128xbf16>
    %8 = vector.shape_cast %7 : vector<1x89x128xbf16> to vector<89x128xbf16>
    %c128 = arith.constant 128 : index
    %c0_9 = arith.constant 0 : index
    %9 = vector.load %arg2[%c128, %c0_9] : memref<512x128xbf16, #tpu.memory_space<vmem>>, vector<128x128xbf16>
    %cst_10 = arith.constant dense<0.000000e+00> : vector<89x128xf32>
    %10 = tpu.matmul %8, %9, %cst_10 {dimension_numbers = #tpu.dot_dimension_numbers<[1], [0], [0], [1], [0, 0, 1, 1], [], []>} : vector<89x128xbf16>, vector<128x128xbf16>, vector<89x128xf32> -> vector<89x128xf32>
    %11 = arith.addf %6, %10 : vector<89x128xf32>
    %c0_11 = arith.constant 0 : index
    %c10 = arith.constant 10 : index
    %c0_12 = arith.constant 0 : index
    %12 = vector.load %arg1[%c0_11, %c10, %c0_12] : memref<1x100x128xbf16, #tpu.memory_space<vmem>>, vector<1x89x128xbf16>
    %13 = vector.shape_cast %12 : vector<1x89x128xbf16> to vector<89x128xbf16>
    %c256 = arith.constant 256 : index
    %c0_13 = arith.constant 0 : index
    %14 = vector.load %arg2[%c256, %c0_13] : memref<512x128xbf16, #tpu.memory_space<vmem>>, vector<128x128xbf16>
    %cst_14 = arith.constant dense<0.000000e+00> : vector<89x128xf32>
    %15 = tpu.matmul %13, %14, %cst_14 {dimension_numbers = #tpu.dot_dimension_numbers<[1], [0], [0], [1], [0, 0, 1, 1], [], []>} : vector<89x128xbf16>, vector<128x128xbf16>, vector<89x128xf32> -> vector<89x128xf32>
    %16 = arith.addf %11, %15 : vector<89x128xf32>
    %c0_15 = arith.constant 0 : index
    %c11 = arith.constant 11 : index
    %c0_16 = arith.constant 0 : index
    %17 = vector.load %arg1[%c0_15, %c11, %c0_16] : memref<1x100x128xbf16, #tpu.memory_space<vmem>>, vector<1x89x128xbf16>
    %18 = vector.shape_cast %17 : vector<1x89x128xbf16> to vector<89x128xbf16>
    %c384 = arith.constant 384 : index
    %c0_17 = arith.constant 0 : index
    %19 = vector.load %arg2[%c384, %c0_17] : memref<512x128xbf16, #tpu.memory_space<vmem>>, vector<128x128xbf16>
    %cst_18 = arith.constant dense<0.000000e+00> : vector<89x128xf32>
    %20 = tpu.matmul %18, %19, %cst_18 {dimension_numbers = #tpu.dot_dimension_numbers<[1], [0], [0], [1], [0, 0, 1, 1], [], []>} : vector<89x128xbf16>, vector<128x128xbf16>, vector<89x128xf32> -> vector<89x128xf32>
    %21 = arith.addf %16, %20 : vector<89x128xf32>
    %22 = vector.broadcast %0 : vector<1x128xf32> to vector<89x128xf32>
    %23 = arith.addf %21, %22 : vector<89x128xf32>
    %cst_19 = arith.constant 0.000000e+00 : f32
    %24 = vector.broadcast %cst_19 : f32 to vector<89x128xf32>
    %25 = arith.maximumf %23, %24 : vector<89x128xf32>
    %26 = arith.truncf %25 : vector<89x128xf32> to vector<89x128xbf16>
    %c0_20 = arith.constant 0 : index
    %c0_21 = arith.constant 0 : index
    %c0_22 = arith.constant 0 : index
    %27 = vector.load %arg4[%c0_20, %c0_21, %c0_22] : memref<1x89x128xbf16, #tpu.memory_space<vmem>>, vector<1x89x128xbf16>
    %28 = vector.shape_cast %27 : vector<1x89x128xbf16> to vector<89x128xbf16>
    %29 = vector.shape_cast %26 : vector<89x128xbf16> to vector<1x89x128xbf16>
    tpu.vector_store %arg4[%c0_20, %c0_21, %c0_22], %29 {strides = array<i32>} : memref<1x89x128xbf16, #tpu.memory_space<vmem>>, vector<1x89x128xbf16>,
    return
  }
  func.func @transform_0(%arg0: i32) -> (i32, i32, i32) {
    %c0_i32 = arith.constant 0 : i32
    %c0_i32_0 = arith.constant 0 : i32
    %c0_i32_1 = arith.constant 0 : i32
    return %arg0, %c0_i32, %c0_i32_0 : i32, i32, i32
  }
  func.func @transform_1(%arg0: i32) -> (i32, i32) {
    %c0_i32 = arith.constant 0 : i32
    %c0_i32_0 = arith.constant 0 : i32
    %c0_i32_1 = arith.constant 0 : i32
    return %c0_i32, %c0_i32_0 : i32, i32
  }
  func.func @transform_2(%arg0: i32) -> (i32, i32) {
    %c0_i32 = arith.constant 0 : i32
    %c0_i32_0 = arith.constant 0 : i32
    %c0_i32_1 = arith.constant 0 : i32
    return %c0_i32, %c0_i32_0 : i32, i32
  }
  func.func @transform_3(%arg0: i32) -> (i32, i32, i32) {
    %c0_i32 = arith.constant 0 : i32
    %c0_i32_0 = arith.constant 0 : i32
    %c0_i32_1 = arith.constant 0 : i32
    return %arg0, %c0_i32, %c0_i32_0 : i32, i32, i32
  }
}

module attributes {stable_mosaic.version = 11 : i64} {
  func.func @_conv_kernel(%arg0: i32, %arg1: memref<1x81x128xbf16, #tpu.memory_space<vmem>>, %arg2: memref<1152x128xbf16, #tpu.memory_space<vmem>>, %arg3: memref<1x128xf32, #tpu.memory_space<vmem>>, %arg4: memref<1x61x128xbf16, #tpu.memory_space<vmem>>) attributes {dimension_semantics = [#tpu.dimension_semantics<parallel>], iteration_bounds = array<i64: 2>, scalar_prefetch = 0 : i64, scratch_operands = 0 : i64, tpu.core_type = #tpu.core_type<tc>, window_params = [{transform_indices = @transform_0, window_bounds = array<i64: 1, 81, 128>}, {pipeline_mode = #tpu.pipeline_mode<synchronous>, transform_indices = @transform_1, window_bounds = array<i64: 1152, 128>}, {pipeline_mode = #tpu.pipeline_mode<synchronous>, transform_indices = @transform_2, window_bounds = array<i64: 1, 128>}, {transform_indices = @transform_3, window_bounds = array<i64: 1, 61, 128>}]} {
    %c0 = arith.constant 0 : index
    %c0_0 = arith.constant 0 : index
    %0 = vector.load %arg3[%c0, %c0_0] : memref<1x128xf32, #tpu.memory_space<vmem>>, vector<1x128xf32>
    %cst = arith.constant 0.000000e+00 : f32
    %1 = vector.broadcast %cst : f32 to vector<61x128xf32>
    %c0_1 = arith.constant 0 : index
    %c0_2 = arith.constant 0 : index
    %c0_3 = arith.constant 0 : index
    %2 = vector.load %arg1[%c0_1, %c0_2, %c0_3] : memref<1x81x128xbf16, #tpu.memory_space<vmem>>, vector<1x61x128xbf16>
    %3 = vector.shape_cast %2 : vector<1x61x128xbf16> to vector<61x128xbf16>
    %c0_4 = arith.constant 0 : index
    %c0_5 = arith.constant 0 : index
    %4 = vector.load %arg2[%c0_4, %c0_5] : memref<1152x128xbf16, #tpu.memory_space<vmem>>, vector<128x128xbf16>
    %cst_6 = arith.constant dense<0.000000e+00> : vector<61x128xf32>
    %5 = tpu.matmul %3, %4, %cst_6 {dimension_numbers = #tpu.dot_dimension_numbers<[1], [0], [0], [1], [0, 0, 1, 1], [], []>} : vector<61x128xbf16>, vector<128x128xbf16>, vector<61x128xf32> -> vector<61x128xf32>
    %6 = arith.addf %1, %5 : vector<61x128xf32>
    %c0_7 = arith.constant 0 : index
    %c1 = arith.constant 1 : index
    %c0_8 = arith.constant 0 : index
    %7 = vector.load %arg1[%c0_7, %c1, %c0_8] : memref<1x81x128xbf16, #tpu.memory_space<vmem>>, vector<1x61x128xbf16>
    %8 = vector.shape_cast %7 : vector<1x61x128xbf16> to vector<61x128xbf16>
    %c128 = arith.constant 128 : index
    %c0_9 = arith.constant 0 : index
    %9 = vector.load %arg2[%c128, %c0_9] : memref<1152x128xbf16, #tpu.memory_space<vmem>>, vector<128x128xbf16>
    %cst_10 = arith.constant dense<0.000000e+00> : vector<61x128xf32>
    %10 = tpu.matmul %8, %9, %cst_10 {dimension_numbers = #tpu.dot_dimension_numbers<[1], [0], [0], [1], [0, 0, 1, 1], [], []>} : vector<61x128xbf16>, vector<128x128xbf16>, vector<61x128xf32> -> vector<61x128xf32>
    %11 = arith.addf %6, %10 : vector<61x128xf32>
    %c0_11 = arith.constant 0 : index
    %c2 = arith.constant 2 : index
    %c0_12 = arith.constant 0 : index
    %12 = vector.load %arg1[%c0_11, %c2, %c0_12] : memref<1x81x128xbf16, #tpu.memory_space<vmem>>, vector<1x61x128xbf16>
    %13 = vector.shape_cast %12 : vector<1x61x128xbf16> to vector<61x128xbf16>
    %c256 = arith.constant 256 : index
    %c0_13 = arith.constant 0 : index
    %14 = vector.load %arg2[%c256, %c0_13] : memref<1152x128xbf16, #tpu.memory_space<vmem>>, vector<128x128xbf16>
    %cst_14 = arith.constant dense<0.000000e+00> : vector<61x128xf32>
    %15 = tpu.matmul %13, %14, %cst_14 {dimension_numbers = #tpu.dot_dimension_numbers<[1], [0], [0], [1], [0, 0, 1, 1], [], []>} : vector<61x128xbf16>, vector<128x128xbf16>, vector<61x128xf32> -> vector<61x128xf32>
    %16 = arith.addf %11, %15 : vector<61x128xf32>
    %c0_15 = arith.constant 0 : index
    %c9 = arith.constant 9 : index
    %c0_16 = arith.constant 0 : index
    %17 = vector.load %arg1[%c0_15, %c9, %c0_16] : memref<1x81x128xbf16, #tpu.memory_space<vmem>>, vector<1x61x128xbf16>
    %18 = vector.shape_cast %17 : vector<1x61x128xbf16> to vector<61x128xbf16>
    %c384 = arith.constant 384 : index
    %c0_17 = arith.constant 0 : index
    %19 = vector.load %arg2[%c384, %c0_17] : memref<1152x128xbf16, #tpu.memory_space<vmem>>, vector<128x128xbf16>
    %cst_18 = arith.constant dense<0.000000e+00> : vector<61x128xf32>
    %20 = tpu.matmul %18, %19, %cst_18 {dimension_numbers = #tpu.dot_dimension_numbers<[1], [0], [0], [1], [0, 0, 1, 1], [], []>} : vector<61x128xbf16>, vector<128x128xbf16>, vector<61x128xf32> -> vector<61x128xf32>
    %21 = arith.addf %16, %20 : vector<61x128xf32>
    %c0_19 = arith.constant 0 : index
    %c10 = arith.constant 10 : index
    %c0_20 = arith.constant 0 : index
    %22 = vector.load %arg1[%c0_19, %c10, %c0_20] : memref<1x81x128xbf16, #tpu.memory_space<vmem>>, vector<1x61x128xbf16>
    %23 = vector.shape_cast %22 : vector<1x61x128xbf16> to vector<61x128xbf16>
    %c512 = arith.constant 512 : index
    %c0_21 = arith.constant 0 : index
    %24 = vector.load %arg2[%c512, %c0_21] : memref<1152x128xbf16, #tpu.memory_space<vmem>>, vector<128x128xbf16>
    %cst_22 = arith.constant dense<0.000000e+00> : vector<61x128xf32>
    %25 = tpu.matmul %23, %24, %cst_22 {dimension_numbers = #tpu.dot_dimension_numbers<[1], [0], [0], [1], [0, 0, 1, 1], [], []>} : vector<61x128xbf16>, vector<128x128xbf16>, vector<61x128xf32> -> vector<61x128xf32>
    %26 = arith.addf %21, %25 : vector<61x128xf32>
    %c0_23 = arith.constant 0 : index
    %c11 = arith.constant 11 : index
    %c0_24 = arith.constant 0 : index
    %27 = vector.load %arg1[%c0_23, %c11, %c0_24] : memref<1x81x128xbf16, #tpu.memory_space<vmem>>, vector<1x61x128xbf16>
    %28 = vector.shape_cast %27 : vector<1x61x128xbf16> to vector<61x128xbf16>
    %c640 = arith.constant 640 : index
    %c0_25 = arith.constant 0 : index
    %29 = vector.load %arg2[%c640, %c0_25] : memref<1152x128xbf16, #tpu.memory_space<vmem>>, vector<128x128xbf16>
    %cst_26 = arith.constant dense<0.000000e+00> : vector<61x128xf32>
    %30 = tpu.matmul %28, %29, %cst_26 {dimension_numbers = #tpu.dot_dimension_numbers<[1], [0], [0], [1], [0, 0, 1, 1], [], []>} : vector<61x128xbf16>, vector<128x128xbf16>, vector<61x128xf32> -> vector<61x128xf32>
    %31 = arith.addf %26, %30 : vector<61x128xf32>
    %c0_27 = arith.constant 0 : index
    %c18 = arith.constant 18 : index
    %c0_28 = arith.constant 0 : index
    %32 = vector.load %arg1[%c0_27, %c18, %c0_28] : memref<1x81x128xbf16, #tpu.memory_space<vmem>>, vector<1x61x128xbf16>
    %33 = vector.shape_cast %32 : vector<1x61x128xbf16> to vector<61x128xbf16>
    %c768 = arith.constant 768 : index
    %c0_29 = arith.constant 0 : index
    %34 = vector.load %arg2[%c768, %c0_29] : memref<1152x128xbf16, #tpu.memory_space<vmem>>, vector<128x128xbf16>
    %cst_30 = arith.constant dense<0.000000e+00> : vector<61x128xf32>
    %35 = tpu.matmul %33, %34, %cst_30 {dimension_numbers = #tpu.dot_dimension_numbers<[1], [0], [0], [1], [0, 0, 1, 1], [], []>} : vector<61x128xbf16>, vector<128x128xbf16>, vector<61x128xf32> -> vector<61x128xf32>
    %36 = arith.addf %31, %35 : vector<61x128xf32>
    %c0_31 = arith.constant 0 : index
    %c19 = arith.constant 19 : index
    %c0_32 = arith.constant 0 : index
    %37 = vector.load %arg1[%c0_31, %c19, %c0_32] : memref<1x81x128xbf16, #tpu.memory_space<vmem>>, vector<1x61x128xbf16>
    %38 = vector.shape_cast %37 : vector<1x61x128xbf16> to vector<61x128xbf16>
    %c896 = arith.constant 896 : index
    %c0_33 = arith.constant 0 : index
    %39 = vector.load %arg2[%c896, %c0_33] : memref<1152x128xbf16, #tpu.memory_space<vmem>>, vector<128x128xbf16>
    %cst_34 = arith.constant dense<0.000000e+00> : vector<61x128xf32>
    %40 = tpu.matmul %38, %39, %cst_34 {dimension_numbers = #tpu.dot_dimension_numbers<[1], [0], [0], [1], [0, 0, 1, 1], [], []>} : vector<61x128xbf16>, vector<128x128xbf16>, vector<61x128xf32> -> vector<61x128xf32>
    %41 = arith.addf %36, %40 : vector<61x128xf32>
    %c0_35 = arith.constant 0 : index
    %c20 = arith.constant 20 : index
    %c0_36 = arith.constant 0 : index
    %42 = vector.load %arg1[%c0_35, %c20, %c0_36] : memref<1x81x128xbf16, #tpu.memory_space<vmem>>, vector<1x61x128xbf16>
    %43 = vector.shape_cast %42 : vector<1x61x128xbf16> to vector<61x128xbf16>
    %c1024 = arith.constant 1024 : index
    %c0_37 = arith.constant 0 : index
    %44 = vector.load %arg2[%c1024, %c0_37] : memref<1152x128xbf16, #tpu.memory_space<vmem>>, vector<128x128xbf16>
    %cst_38 = arith.constant dense<0.000000e+00> : vector<61x128xf32>
    %45 = tpu.matmul %43, %44, %cst_38 {dimension_numbers = #tpu.dot_dimension_numbers<[1], [0], [0], [1], [0, 0, 1, 1], [], []>} : vector<61x128xbf16>, vector<128x128xbf16>, vector<61x128xf32> -> vector<61x128xf32>
    %46 = arith.addf %41, %45 : vector<61x128xf32>
    %47 = vector.broadcast %0 : vector<1x128xf32> to vector<61x128xf32>
    %48 = arith.addf %46, %47 : vector<61x128xf32>
    %cst_39 = arith.constant 0.000000e+00 : f32
    %49 = vector.broadcast %cst_39 : f32 to vector<61x128xf32>
    %50 = arith.maximumf %48, %49 : vector<61x128xf32>
    %51 = arith.truncf %50 : vector<61x128xf32> to vector<61x128xbf16>
    %c0_40 = arith.constant 0 : index
    %c0_41 = arith.constant 0 : index
    %c0_42 = arith.constant 0 : index
    %52 = vector.load %arg4[%c0_40, %c0_41, %c0_42] : memref<1x61x128xbf16, #tpu.memory_space<vmem>>, vector<1x61x128xbf16>
    %53 = vector.shape_cast %52 : vector<1x61x128xbf16> to vector<61x128xbf16>
    %54 = vector.shape_cast %51 : vector<61x128xbf16> to vector<1x61x128xbf16>
    tpu.vector_store %arg4[%c0_40, %c0_41, %c0_42], %54 {strides = array<i32>} : memref<1x61x128xbf16, #tpu.memory_space<vmem>>, vector<1x61x128xbf16>,
    return
  }
  func.func @transform_0(%arg0: i32) -> (i32, i32, i32) {
    %c0_i32 = arith.constant 0 : i32
    %c0_i32_0 = arith.constant 0 : i32
    %c0_i32_1 = arith.constant 0 : i32
    return %arg0, %c0_i32, %c0_i32_0 : i32, i32, i32
  }
  func.func @transform_1(%arg0: i32) -> (i32, i32) {
    %c0_i32 = arith.constant 0 : i32
    %c0_i32_0 = arith.constant 0 : i32
    %c0_i32_1 = arith.constant 0 : i32
    return %c0_i32, %c0_i32_0 : i32, i32
  }
  func.func @transform_2(%arg0: i32) -> (i32, i32) {
    %c0_i32 = arith.constant 0 : i32
    %c0_i32_0 = arith.constant 0 : i32
    %c0_i32_1 = arith.constant 0 : i32
    return %c0_i32, %c0_i32_0 : i32, i32
  }
  func.func @transform_3(%arg0: i32) -> (i32, i32, i32) {
    %c0_i32 = arith.constant 0 : i32
    %c0_i32_0 = arith.constant 0 : i32
    %c0_i32_1 = arith.constant 0 : i32
    return %arg0, %c0_i32, %c0_i32_0 : i32, i32, i32
  }
}

module attributes {stable_mosaic.version = 11 : i64} {
  func.func @_fc_kernel(%arg0: i32, %arg1: memref<8x3136xbf16, #tpu.memory_space<vmem>>, %arg2: memref<3136x256xbf16, #tpu.memory_space<vmem>>, %arg3: memref<1x256xf32, #tpu.memory_space<vmem>>, %arg4: memref<256x128xf32, #tpu.memory_space<vmem>>, %arg5: memref<1x8x128xf32, #tpu.memory_space<vmem>>) attributes {dimension_semantics = [#tpu.dimension_semantics<parallel>], iteration_bounds = array<i64: 2>, scalar_prefetch = 0 : i64, scratch_operands = 0 : i64, tpu.core_type = #tpu.core_type<tc>, window_params = [{pipeline_mode = #tpu.pipeline_mode<synchronous>, transform_indices = @transform_0, window_bounds = array<i64: 8, 3136>}, {transform_indices = @transform_1, window_bounds = array<i64: 3136, 256>}, {transform_indices = @transform_2, window_bounds = array<i64: 1, 256>}, {transform_indices = @transform_3, window_bounds = array<i64: 256, 128>}, {transform_indices = @transform_4, window_bounds = array<i64: 1, 8, 128>}]} {
    %c0 = arith.constant 0 : index
    %c0_0 = arith.constant 0 : index
    %0 = vector.load %arg1[%c0, %c0_0] : memref<8x3136xbf16, #tpu.memory_space<vmem>>, vector<8x3136xbf16>
    %c0_1 = arith.constant 0 : index
    %c0_2 = arith.constant 0 : index
    %1 = vector.load %arg2[%c0_1, %c0_2] : memref<3136x256xbf16, #tpu.memory_space<vmem>>, vector<3136x256xbf16>
    %cst = arith.constant dense<0.000000e+00> : vector<8x256xf32>
    %2 = tpu.matmul %0, %1, %cst {dimension_numbers = #tpu.dot_dimension_numbers<[1], [0], [0], [1], [0, 0, 1, 1], [], []>} : vector<8x3136xbf16>, vector<3136x256xbf16>, vector<8x256xf32> -> vector<8x256xf32>
    %c0_3 = arith.constant 0 : index
    %c0_4 = arith.constant 0 : index
    %3 = vector.load %arg3[%c0_3, %c0_4] : memref<1x256xf32, #tpu.memory_space<vmem>>, vector<1x256xf32>
    %4 = vector.broadcast %3 : vector<1x256xf32> to vector<8x256xf32>
    %5 = arith.addf %2, %4 : vector<8x256xf32>
    %cst_5 = arith.constant 0.000000e+00 : f32
    %6 = vector.broadcast %cst_5 : f32 to vector<8x256xf32>
    %7 = arith.maximumf %5, %6 : vector<8x256xf32>
    %c0_6 = arith.constant 0 : index
    %c0_7 = arith.constant 0 : index
    %8 = vector.load %arg4[%c0_6, %c0_7] : memref<256x128xf32, #tpu.memory_space<vmem>>, vector<256x128xf32>
    %cst_8 = arith.constant dense<0.000000e+00> : vector<8x128xf32>
    %9 = tpu.matmul %7, %8, %cst_8 {dimension_numbers = #tpu.dot_dimension_numbers<[1], [0], [0], [1], [0, 0, 1, 1], [], []>} : vector<8x256xf32>, vector<256x128xf32>, vector<8x128xf32> -> vector<8x128xf32>
    %c0_9 = arith.constant 0 : index
    %c0_10 = arith.constant 0 : index
    %c0_11 = arith.constant 0 : index
    %10 = vector.load %arg5[%c0_9, %c0_10, %c0_11] : memref<1x8x128xf32, #tpu.memory_space<vmem>>, vector<1x8x128xf32>
    %11 = vector.shape_cast %10 : vector<1x8x128xf32> to vector<8x128xf32>
    %12 = vector.shape_cast %9 : vector<8x128xf32> to vector<1x8x128xf32>
    tpu.vector_store %arg5[%c0_9, %c0_10, %c0_11], %12 {strides = array<i32>} : memref<1x8x128xf32, #tpu.memory_space<vmem>>, vector<1x8x128xf32>,
    return
  }
  func.func @transform_0(%arg0: i32) -> (i32, i32) {
    %c0_i32 = arith.constant 0 : i32
    %c0_i32_0 = arith.constant 0 : i32
    %c0_i32_1 = arith.constant 0 : i32
    return %c0_i32, %c0_i32_0 : i32, i32
  }
  func.func @transform_1(%arg0: i32) -> (i32, i32) {
    %c0_i32 = arith.constant 0 : i32
    %c0_i32_0 = arith.constant 0 : i32
    return %c0_i32, %arg0 : i32, i32
  }
  func.func @transform_2(%arg0: i32) -> (i32, i32) {
    %c0_i32 = arith.constant 0 : i32
    %c0_i32_0 = arith.constant 0 : i32
    return %c0_i32, %arg0 : i32, i32
  }
  func.func @transform_3(%arg0: i32) -> (i32, i32) {
    %c0_i32 = arith.constant 0 : i32
    %c0_i32_0 = arith.constant 0 : i32
    return %arg0, %c0_i32 : i32, i32
  }
  func.func @transform_4(%arg0: i32) -> (i32, i32, i32) {
    %c0_i32 = arith.constant 0 : i32
    %c0_i32_0 = arith.constant 0 : i32
    %c0_i32_1 = arith.constant 0 : i32
    return %arg0, %c0_i32, %c0_i32_0 : i32, i32, i32
  }
}

</mosaic_0001>

<bundles_post_ra>
// kernel: dqn_forward.4
= control target key start
LH: loop header
LB: loop body
LE: loop exit
PB: predicated region body
PF: predicated region fallthrough
CT: control target
= control target key end

     0   :  { %s4412_s12 = smov 0   ;;  %s5229_s0 = inlined_call_operand.vmem [shape: bf16[2,441,64], index: 0, kind: input, shape index: {}]   ;;  %s5230_s1 = inlined_call_operand.vmem [shape: bf16[256,128], index: 1, kind: input, shape index: {}]   ;;  %s5231_s2 = inlined_call_operand.vmem [shape: f32[1,128], index: 2, kind: input, shape index: {}]   ;;  %s5232_s3 = inlined_call_operand.vmem [shape: bf16[2,419,128], index: 3, kind: output, shape index: {}]  }
   0x1 LB: > { %s3209_s13 = sadd.s32 4294967295, %s4388_s12   ;;  %p3213_p0 = scmp.ge.s32.totalorder %s4388_s12, 1  ;;  %s4388_s12 = sphi %s4412_s12, %s13_s12  }
   0x2   : > { %p137_p1 = scmp.lt.s32.totalorder %s4388_s12, 3 }
   0x4   : > { %p138_p2 = pnand %p3213_p0, %p137_p1 }
   0x6   : > { %141 = sbr.rel (%p138_p2) target bundleno = 678 (0x2a6), region = 32 }
   0xd   : > { %v4285_v0 = vld [vmem:[%s5230_s1 + $0x20] sm:$0xff]   ;;  %v5233_v1 = vmov 0.0   ;;  %v4287_v3 = vld [vmem:[%s5230_s1 + $0x28] sm:$0xff]   ;;  %vm4391_vm0 = vmmov 0   ;;  %p161_p3 = scmp.lt.s32.totalorder %s3209_s13, 1  ;;  %v4289_v5 = vld [vmem:[%s5230_s1 + $0x30] sm:$0xff]  }
   0xe   : > { %3809 = vmatprep.subr.bf16.mxu0 %v5233_v1  ;;  %3925 = vmatprep.subr.bf16.mxu1 %v5233_v1  ;;  %v4286_v2 = vld [vmem:[%s5230_s1] sm:$0xff]   ;;  %v4288_v4 = vld [vmem:[%s5230_s1 + $0x8] sm:$0xff]   ;;  %v4290_v6 = vld [vmem:[%s5230_s1 + $0x10] sm:$0xff]   ;;  %vm375_vm1 = vsmask.f32 7424  ;;  %vm615_vm2 = vcmask 523264  }
   0xf   : > { %3810 = vmatpush3.bf16.msra.mxu0 %v4285_v0  ;;  %3817 = vmatprep.mubr.msk.bf16.mxu0 %vm4391_vm0, %v5233_v1  ;;  %s5253_s13 = smov (!%p161_p3, %s3209_s13), 1  ;;  %v4291_v7 = vld [vmem:[%s5230_s1 + $0x38] sm:$0xff]   ;;  %v4295_v17 = vld [vmem:[%s5230_s1 + $0x40] sm:$0xff]   ;;  %v4303_v26 = vld [vmem:[%s5230_s1 + $0x48] sm:$0xff]   ;;  %vm2311_vm3 = vcmask 1044480   ;;  %vm3148_vm5 = vcmask 1041408  }
  0x10   : > { %3926 = vmatpush3.bf16.msra.mxu1 %v4286_v2  ;;  %3811 = vmatprep.subr.bf16.mxu0 %v5233_v1  ;;  %s4273_s24 = smul.u32 224, %s5253_s13  ;;  %v4292_v8 = vld [vmem:[%s5230_s1 + $0x18] sm:$0xff]   ;;  %v4296_v18 = vld [vmem:[%s5230_s1 + $0x60] sm:$0xff]   ;;  %v4305_v27 = vld [vmem:[%s5230_s1 + $0x68] sm:$0xff]   ;;  %vm1465_vm4 = vsmask.f32 5376 }
  0x11   : > { %3927 = vmatprep.subr.bf16.mxu1 %v5233_v1  ;;  %3933 = vmatprep.mubr.msk.bf16.mxu1 %vm4391_vm0, %v5233_v1  ;;  %v4312_v37 = vld [vmem:[%s5230_s1 + $0x50] sm:$0xff]   ;;  %v4321_v51 = vld [vmem:[%s5230_s1 + $0x58] sm:$0xff]   ;;  %s4274_s27 = smul.u32 212, %s5253_s13  ;;  %vm3149_vm6 = vsmask.f32 1280 }
  0x12   : > { %s4457_s4 = scalar_lea.vmem %s5229_s0, %s4273_s24  ;;  %v4313_v38 = vld [vmem:[%s5230_s1 + $0x70] sm:$0xff]   ;;  %v4322_v52 = vld [vmem:[%s5230_s1 + $0x78] sm:$0xff]   ;;  %vm3150_vm7 = vmand %vm3148_vm5, %vm3149_vm6 }
  0x13   : > { %3812 = vmatpush3.bf16.msra.mxu0 %v4287_v3  ;;  %v4293_v9 = vld [vmem:[%s4457_s4] sm:$0xff]   ;;  %v4294_v10 = vld [vmem:[%s4457_s4 + $0x8] sm:$0xff]   ;;  %v4297_v14 = vld [vmem:[%s4457_s4 + $0x10] sm:$0xff]   ;;  %s5095_s30 = scalar_lea.vmem %s5232_s3, %s4274_s27 }
  0x14   : > { %3928 = vmatpush3.bf16.msra.mxu1 %v4288_v4  ;;  %3813 = vmatprep.subr.bf16.mxu0 %v5233_v1  ;;  %v377_v11 = vshrl.u32 %v4293_v9, 16  ;;  %v379_v12 = vshll.u32 %v4293_v9, 16  ;;  %v384_v13 = vshll.u32 %v4294_v10, 16  ;;  %v388_v20 = vshrl.u32 %v4294_v10, 16  ;;  %v4298_v25 = vld [vmem:[%s4457_s4 + $0x18] sm:$0xff]   ;;  %v4299_v31 = vld [vmem:[%s4457_s4 + $0x20] sm:$0xff]  }
  0x15   : > { %3929 = vmatprep.subr.bf16.mxu1 %v5233_v1  ;;  %v392_v21 = vshll.u32 %v4297_v14, 16  ;;  %v396_v29 = vshrl.u32 %v4297_v14, 16  ;;  %v400_v30 = vshll.u32 %v4298_v25, 16  ;;  %v408_v34 = vshll.u32 %v4299_v31, 16  ;;  %v4300_v40 = vld [vmem:[%s4457_s4 + $0x28] sm:$0xff]   ;;  %v4301_v47 = vld [vmem:[%s4457_s4 + $0x30] sm:$0xff]  }
  0x16   : > { %v381_v15 = vrot.slane %v379_v12, 1  ;;  %v386_v16 = vrot.slane %v384_v13, 1  ;;  %v404_v36 = vshrl.u32 %v4298_v25, 16  ;;  %v412_v43 = vshrl.u32 %v4299_v31, 16  ;;  %v4302_v55 = vld [vmem:[%s4457_s4 + $0x38] sm:$0xff]   ;;  %v4304_v61 = vld [vmem:[%s4457_s4 + $0x40] sm:$0xff]  }
  0x17   : > { %3814 = vmatpush3.bf16.msra.mxu0 %v4289_v5  ;;  %v394_v24 = vrot.slane %v392_v21, 1  ;;  %v402_v33 = vrot.slane %v400_v30, 1  ;;  %v410_v39 = vrot.slane %v408_v34, 1  ;;  %v416_v44 = vshll.u32 %v4300_v40, 16  ;;  %v4306_v4 = vld [vmem:[%s4457_s4 + $0x48] sm:$0xff]   ;;  %v4311_v34 = vld [vmem:[%s4457_s4 + $0x70] sm:$0xff]  }
  0x18   : > { %3930 = vmatpush3.bf16.msra.mxu1 %v4290_v6  ;;  %3815 = vmatprep.subr.bf16.mxu0 %v5233_v1  ;;  %v382_v19 = vor.u32 %v381_v15, %v377_v11  ;;  %v390_v23 = vor.u32 %v388_v20, %v386_v16  ;;  %v420_v49 = vshrl.u32 %v4300_v40, 16  ;;  %v424_v50 = vshll.u32 %v4301_v47, 16 }
  0x19   : > { %3931 = vmatprep.subr.bf16.mxu1 %v5233_v1  ;;  %v398_v32 = vor.u32 %v396_v29, %v394_v24  ;;  %v406_v41 = vor.u32 %v404_v36, %v402_v33  ;;  %v414_v45 = vor.u32 %v412_v43, %v410_v39  ;;  %v418_v46 = vrot.slane %v416_v44, 1 }
  0x1a   : > { %v387_v22 = vsel %vm375_vm1, %v382_v19, %v386_v16  ;;  %v395_v28 = vsel %vm375_vm1, %v390_v23, %v394_v24  ;;  %v426_v54 = vrot.slane %v424_v50, 1  ;;  %v428_v57 = vshrl.u32 %v4301_v47, 16  ;;  %v4308_v16 = vld [vmem:[%s4457_s4 + $0x58] sm:$0xff]  }
  0x1b   : > { %3816 = vmatpush3.bf16.msra.mxu0 %v4291_v7  ;;  %v403_v35 = vsel %vm375_vm1, %v398_v32, %v402_v33  ;;  %v411_v42 = vsel %vm375_vm1, %v406_v41, %v410_v39  ;;  %v419_v48 = vsel %vm375_vm1, %v414_v45, %v418_v46  ;;  %v422_v53 = vor.u32 %v420_v49, %v418_v46  ;;  %v4315_v46 = vld [vmem:[%s4457_s4 + $0x80] sm:$0xff]  }
  0x1c   : > { %3932 = vmatpush3.bf16.msra.mxu1 %v4292_v8  ;;  %4041 = vmatprep.subr.bf16.mxu0 %v5233_v1  ;;  %v432_v58 = vshll.u32 %v4302_v55, 16  ;;  %v430_v59 = vor.u32 %v428_v57, %v426_v54  ;;  %v436_v63 = vshrl.u32 %v4302_v55, 16  ;;  %v440_v0 = vshll.u32 %v4304_v61, 16 }
  0x1d   : > { %4157 = vmatprep.subr.bf16.mxu1 %v5233_v1  ;;  %v427_v56 = vsel %vm375_vm1, %v422_v53, %v426_v54  ;;  %v444_v6 = vshrl.u32 %v4304_v61, 16  ;;  %v448_v7 = vshll.u32 %v4306_v4, 16  ;;  %v452_v12 = vshrl.u32 %v4306_v4, 16 }
  0x1e   : > { %3818 = vmatmul.mubr.msk.bf16.vlgmr.msra.gmra.mrb[0].mxu0 %vm615_vm2, %v387_v22  ;;  %v434_v60 = vrot.slane %v432_v58, 1  ;;  %v442_v3 = vrot.slane %v440_v0, 1  ;;  %v464_v19 = vshll.u32 %v4308_v16, 16  ;;  %v4309_v22 = vld [vmem:[%s4457_s4 + $0x60] sm:$0xff]   ;;  %v468_v24 = vshrl.u32 %v4308_v16, 16  ;;  %v4317_v58 = vld [vmem:[%s4457_s4 + $0x90] sm:$0xff]  }
  0x1f   : > { %3934 = vmatmul.mubr.msk.bf16.vlgmr.msra.gmra.mrb[0].mxu1 %vm615_vm2, %v4293_v9  ;;  %4042 = vmatpush3.bf16.msra.mxu0 %v4295_v17  ;;  %v450_v9 = vrot.slane %v448_v7, 1  ;;  %v476_v30 = vshrl.u32 %v4309_v22, 16  ;;  %v504_v49 = vshll.u32 %v4315_v46, 16  ;;  %v508_v54 = vshrl.u32 %v4315_v46, 16  ;;  %v4318_v0 = vld [vmem:[%s4457_s4 + $0x98] sm:$0xff]   ;;  %v4319_v7 = vld [vmem:[%s4457_s4 + $0xa0] sm:$0xff]  }
  0x20   : > { %4158 = vmatpush3.bf16.msra.mxu1 %v4296_v18  ;;  %3821 = vmatprep.mubr.msk.bf16.mxu0 %vm4391_vm0, %v5233_v1  ;;  %v435_v62 = vsel %vm375_vm1, %v430_v59, %v434_v60  ;;  %v438_v2 = vor.u32 %v436_v63, %v434_v60  ;;  %v446_v8 = vor.u32 %v444_v6, %v442_v3  ;;  %v466_v21 = vrot.slane %v464_v19, 1  ;;  %v4323_v19 = vld [vmem:[%s4457_s4 + $0xb0] sm:$0xff]  }
  0x21   : > { %3937 = vmatprep.mubr.msk.bf16.mxu1 %vm4391_vm0, %v5233_v1  ;;  %4043 = vmatprep.subr.bf16.mxu0 %v5233_v1 }
  0x22   : > { %4159 = vmatprep.subr.bf16.mxu1 %v5233_v1  ;;  %v443_v5 = vsel %vm375_vm1, %v438_v2, %v442_v3  ;;  %v451_v11 = vsel %vm375_vm1, %v446_v8, %v450_v9  ;;  %v524_v3 = vshrl.u32 %v4317_v58, 16 }
  0x23   : > { %4044 = vmatpush3.bf16.msra.mxu0 %v4303_v26  ;;  %v470_v26 = vor.u32 %v468_v24, %v466_v21 }
  0x24   : > { %4160 = vmatpush3.bf16.msra.mxu1 %v4305_v27  ;;  %4045 = vmatprep.subr.bf16.mxu0 %v5233_v1 }
  0x25   : > { %4161 = vmatprep.subr.bf16.mxu1 %v5233_v1 }
  0x26   : > { %3822 = vmatmul.mubr.msk.bf16.gmra.mrb[4].mxu0 %vm615_vm2, %v395_v28  ;;  %v4310_v28 = vld [vmem:[%s4457_s4 + $0x68] sm:$0xff]  }
  0x27   : > { %3938 = vmatmul.mubr.msk.bf16.gmra.mrb[4].mxu1 %vm615_vm2, %v4294_v10  ;;  %3825 = vmatprep.mubr.msk.bf16.mxu0 %vm4391_vm0, %v5233_v1  ;;  %v4307_v10 = vld [vmem:[%s4457_s4 + $0x50] sm:$0xff]   ;;  %v484_v36 = vshrl.u32 %v4310_v28, 16 }
  0x28   : > { %3941 = vmatprep.mubr.msk.bf16.mxu1 %vm4391_vm0, %v5233_v1  ;;  %4046 = vmatpush3.bf16.msra.mxu0 %v4312_v37  ;;  %v456_v13 = vshll.u32 %v4307_v10, 16  ;;  %v460_v18 = vshrl.u32 %v4307_v10, 16  ;;  %v488_v37 = vshll.u32 %v4311_v34, 16 }
  0x29   : > { %4162 = vmatpush3.bf16.msra.mxu1 %v4313_v38  ;;  %4047 = vmatprep.subr.bf16.mxu0 %v5233_v1 }
  0x2a   : > { %4163 = vmatprep.subr.bf16.mxu1 %v5233_v1  ;;  %v458_v15 = vrot.slane %v456_v13, 1  ;;  %v490_v39 = vrot.slane %v488_v37, 1  ;;  %v4320_v13 = vld [vmem:[%s4457_s4 + $0xa8] sm:$0xff]  }
  0x2b   : > { %v4326_v37 = vld [vmem:[%s4457_s4 + $0xc8] sm:$0xff]  }
  0x2c   : > { %4048 = vmatpush3.bf16.msra.mxu0 %v4321_v51  ;;  %v462_v20 = vor.u32 %v460_v18, %v458_v15  ;;  %v506_v51 = vrot.slane %v504_v49, 1  ;;  %v4328_v49 = vld [vmem:[%s4457_s4 + $0x8] sm:$0xfc]  }
  0x2d   : > { %4164 = vmatpush3.bf16.msra.mxu1 %v4322_v52  ;;  %v4316_v52 = vld [vmem:[%s4457_s4 + $0x88] sm:$0xff]  }
  0x2e   : > { %3826 = vmatmul.mubr.msk.bf16.gmra.mrb[8].mxu0 %vm615_vm2, %v403_v35  ;;  %v467_v23 = vsel %vm375_vm1, %v462_v20, %v466_v21  ;;  %v516_v60 = vshrl.u32 %v4316_v52, 16  ;;  %v548_v21 = vshrl.u32 %v4320_v13, 16 }
  0x2f   : > { %3942 = vmatmul.mubr.msk.bf16.gmra.mrb[8].mxu1 %vm615_vm2, %v4297_v14  ;;  %3829 = vmatprep.mubr.msk.bf16.mxu0 %vm4391_vm0, %v5233_v1  ;;  %v454_v14 = vor.u32 %v452_v12, %v450_v9  ;;  %v532_v9 = vshrl.u32 %v4318_v0, 16 }
  0x30   : > { %3945 = vmatprep.mubr.msk.bf16.mxu1 %vm4391_vm0, %v5233_v1 }
  0x31   : > { %v459_v17 = vsel %vm375_vm1, %v454_v14, %v458_v15  ;;  %v540_v15 = vshrl.u32 %v4319_v7, 16 }
  0x36   : > { %3830 = vmatmul.mubr.msk.bf16.gmra.mrb[12].mxu0 %vm615_vm2, %v411_v42  ;;  %v492_v42 = vshrl.u32 %v4311_v34, 16 }
  0x37   : > { %3946 = vmatmul.mubr.msk.bf16.gmra.mrb[12].mxu1 %vm615_vm2, %v4298_v25  ;;  %3833 = vmatprep.mubr.msk.bf16.mxu0 %vm4391_vm0, %v5233_v1  ;;  %v472_v25 = vshll.u32 %v4309_v22, 16 }
  0x38   : > { %3949 = vmatprep.mubr.msk.bf16.mxu1 %vm4391_vm0, %v5233_v1  ;;  %v494_v44 = vor.u32 %v492_v42, %v490_v39 }
  0x39   : > { %v474_v27 = vrot.slane %v472_v25, 1  ;;  %v4324_v25 = vld [vmem:[%s4457_s4 + $0xb8] sm:$0xff]  }
  0x3b   : > { %v475_v29 = vsel %vm375_vm1, %v470_v26, %v474_v27  ;;  %v478_v32 = vor.u32 %v476_v30, %v474_v27  ;;  %v556_v27 = vshrl.u32 %v4323_v19, 16 }
  0x3e   : > { %3834 = vmatmul.mubr.msk.bf16.gmra.mrb[16].mxu0 %vm615_vm2, %v419_v48 }
  0x3f   : > { %3950 = vmatmul.mubr.msk.bf16.gmra.mrb[16].mxu1 %vm615_vm2, %v4299_v31  ;;  %3837 = vmatprep.mubr.msk.bf16.mxu0 %vm4391_vm0, %v5233_v1  ;;  %v480_v31 = vshll.u32 %v4310_v28, 16 }
  0x40   : > { %3953 = vmatprep.mubr.msk.bf16.mxu1 %vm4391_vm0, %v5233_v1 }
  0x41   : > { %v482_v33 = vrot.slane %v480_v31, 1  ;;  %v4325_v31 = vld [vmem:[%s4457_s4 + $0xc0] sm:$0xff]  }
  0x43   : > { %v483_v35 = vsel %vm375_vm1, %v478_v32, %v482_v33  ;;  %v486_v38 = vor.u32 %v484_v36, %v482_v33  ;;  %v564_v33 = vshrl.u32 %v4324_v25, 16 }
  0x45   : > { %v491_v41 = vsel %vm375_vm1, %v486_v38, %v490_v39  ;;  %v572_v39 = vshrl.u32 %v4325_v31, 16 }
  0x46   : > { %3838 = vmatmul.mubr.msk.bf16.gmra.mrb[20].mxu0 %vm615_vm2, %v427_v56  ;;  %v510_v56 = vor.u32 %v508_v54, %v506_v51  ;;  %v1470_v54 = vshll.u32 %v4328_v49, 16 }
  0x47   : > { %3954 = vmatmul.mubr.msk.bf16.gmra.mrb[20].mxu1 %vm615_vm2, %v4300_v40  ;;  %3841 = vmatprep.mubr.msk.bf16.mxu0 %vm4391_vm0, %v5233_v1  ;;  %v4314_v40 = vld [vmem:[%s4457_s4 + $0x78] sm:$0xff]  }
  0x48   : > { %3957 = vmatprep.mubr.msk.bf16.mxu1 %vm4391_vm0, %v5233_v1  ;;  %v496_v43 = vshll.u32 %v4314_v40, 16  ;;  %v500_v48 = vshrl.u32 %v4314_v40, 16 }
  0x4a   : > { %v498_v45 = vrot.slane %v496_v43, 1  ;;  %v4327_v43 = vld [vmem:[%s4457_s4 + $0xd0] ss:$0 sps:$4 sm:$0x33]  }
  0x4c   : > { %v502_v50 = vor.u32 %v500_v48, %v498_v45 }
  0x4e   : > { %3842 = vmatmul.mubr.msk.bf16.gmra.mrb[24].mxu0 %vm615_vm2, %v435_v62  ;;  %v507_v53 = vsel %vm375_vm1, %v502_v50, %v506_v51  ;;  %v4329_v51 = vld [vmem:[%s4457_s4 + $0x10] sm:$0xff]  }
  0x4f   : > { %3958 = vmatmul.mubr.msk.bf16.gmra.mrb[24].mxu1 %vm615_vm2, %v4301_v47  ;;  %3845 = vmatprep.mubr.msk.bf16.mxu0 %vm4391_vm0, %v5233_v1  ;;  %v499_v47 = vsel %vm375_vm1, %v494_v44, %v498_v45  ;;  %v580_v45 = vshrl.u32 %v4326_v37, 16 }
  0x50   : > { %3961 = vmatprep.mubr.msk.bf16.mxu1 %vm4391_vm0, %v5233_v1 }
  0x56   : > { %3846 = vmatmul.mubr.msk.bf16.gmra.mrb[28].mxu0 %vm615_vm2, %v443_v5 }
  0x57   : > { %3962 = vmatmul.mubr.msk.bf16.gmra.mrb[28].mxu1 %vm615_vm2, %v4302_v55  ;;  %3849 = vmatprep.mubr.msk.bf16.mxu0 %vm4391_vm0, %v5233_v1  ;;  %v512_v55 = vshll.u32 %v4316_v52, 16 }
  0x58   : > { %3965 = vmatprep.mubr.msk.bf16.mxu1 %vm4391_vm0, %v5233_v1 }
  0x59   : > { %v514_v57 = vrot.slane %v512_v55, 1  ;;  %v1475_v55 = vshrl.u32 %v4329_v51, 16 }
  0x5b   : > { %v515_v59 = vsel %vm375_vm1, %v510_v56, %v514_v57  ;;  %v518_v62 = vor.u32 %v516_v60, %v514_v57  ;;  %v1478_v56 = vshll.u32 %v4329_v51, 16  ;;  %v4330_v60 = vld [vmem:[%s4457_s4 + $0x8] sm:$0xf8]  }
  0x5e   : > { %3850 = vmatmul.mubr.msk.bf16.gmra.mrb[32].mxu0 %vm615_vm2, %v451_v11 }
  0x5f   : > { %3966 = vmatmul.mubr.msk.bf16.gmra.mrb[32].mxu1 %vm615_vm2, %v4304_v61  ;;  %3853 = vmatprep.mubr.msk.bf16.mxu0 %vm4391_vm0, %v5233_v1  ;;  %v520_v61 = vshll.u32 %v4317_v58, 16 }
  0x60   : > { %3969 = vmatprep.mubr.msk.bf16.mxu1 %vm4391_vm0, %v5233_v1 }
  0x61   : > { %v522_v63 = vrot.slane %v520_v61, 1  ;;  %v4331_v61 = vld [vmem:[%s4457_s4 + $0x10] sm:$0xff]  }
  0x63   : > { %v523_v2 = vsel %vm375_vm1, %v518_v62, %v522_v63  ;;  %v526_v5 = vor.u32 %v524_v3, %v522_v63  ;;  %v1477_v62 = vrot.slane %v1475_v55, 2  ;;  %v1480_v63 = vrot.slane %v1478_v56, 3  ;;  %v4337_v55 = vld [vmem:[%s4457_s4 + $0x28] sm:$0xff]  }
  0x64   : > { %v2312_v3 = vrot.slane %v4330_v60, 3 }
  0x66   : > { %3854 = vmatmul.mubr.msk.bf16.gmra.mrb[36].mxu0 %vm615_vm2, %v459_v17 }
  0x67   : > { %3970 = vmatmul.mubr.msk.bf16.gmra.mrb[36].mxu1 %vm615_vm2, %v4306_v4  ;;  %3857 = vmatprep.mubr.msk.bf16.mxu0 %vm4391_vm0, %v5233_v1  ;;  %v528_v4 = vshll.u32 %v4318_v0, 16 }
  0x68   : > { %3973 = vmatprep.mubr.msk.bf16.mxu1 %vm4391_vm0, %v5233_v1 }
  0x69   : > { %v530_v6 = vrot.slane %v528_v4, 1  ;;  %v2313_v4 = vrot.slane %v4331_v61, 3  ;;  %v4338_v61 = vld [vmem:[%s4457_s4 + $0x30] sm:$0xff]  }
  0x6b   : > { %v531_v8 = vsel %vm375_vm1, %v526_v5, %v530_v6  ;;  %v534_v11 = vor.u32 %v532_v9, %v530_v6  ;;  %v1481_v5 = vor.u32 %v1480_v63, %v1477_v62 }
  0x6e   : > { %3858 = vmatmul.mubr.msk.bf16.gmra.mrb[40].mxu0 %vm615_vm2, %v467_v23 }
  0x6f   : > { %3974 = vmatmul.mubr.msk.bf16.gmra.mrb[40].mxu1 %vm615_vm2, %v4307_v10  ;;  %3861 = vmatprep.mubr.msk.bf16.mxu0 %vm4391_vm0, %v5233_v1  ;;  %v536_v10 = vshll.u32 %v4319_v7, 16 }
  0x70   : > { %3977 = vmatprep.mubr.msk.bf16.mxu1 %vm4391_vm0, %v5233_v1 }
  0x71   : > { %v538_v12 = vrot.slane %v536_v10, 1 }
  0x73   : > { %v539_v14 = vsel %vm375_vm1, %v534_v11, %v538_v12  ;;  %v542_v17 = vor.u32 %v540_v15, %v538_v12  ;;  %v4333_v15 = vld [vmem:[%s4457_s4 + $0x18] sm:$0xff]  }
  0x76   : > { %3862 = vmatmul.mubr.msk.bf16.gmra.mrb[44].mxu0 %vm615_vm2, %v475_v29 }
  0x77   : > { %3978 = vmatmul.mubr.msk.bf16.gmra.mrb[44].mxu1 %vm615_vm2, %v4308_v16  ;;  %3865 = vmatprep.mubr.msk.bf16.mxu0 %vm4391_vm0, %v5233_v1  ;;  %v544_v16 = vshll.u32 %v4320_v13, 16 }
  0x78   : > { %3981 = vmatprep.mubr.msk.bf16.mxu1 %vm4391_vm0, %v5233_v1 }
  0x79   : > { %v546_v18 = vrot.slane %v544_v16, 1 }
  0x7b   : > { %v547_v20 = vsel %vm375_vm1, %v542_v17, %v546_v18  ;;  %v550_v23 = vor.u32 %v548_v21, %v546_v18  ;;  %v4334_v21 = vld [vmem:[%s4457_s4 + $0x20] sm:$0xff]  }
  0x7e   : > { %3866 = vmatmul.mubr.msk.bf16.gmra.mrb[48].mxu0 %vm615_vm2, %v483_v35 }
  0x7f   : > { %3982 = vmatmul.mubr.msk.bf16.gmra.mrb[48].mxu1 %vm615_vm2, %v4309_v22  ;;  %3869 = vmatprep.mubr.msk.bf16.mxu0 %vm4391_vm0, %v5233_v1  ;;  %v552_v22 = vshll.u32 %v4323_v19, 16 }
  0x80   : > { %3985 = vmatprep.mubr.msk.bf16.mxu1 %vm4391_vm0, %v5233_v1 }
  0x81   : > { %v554_v24 = vrot.slane %v552_v22, 1 }
  0x83   : > { %v555_v26 = vsel %vm375_vm1, %v550_v23, %v554_v24  ;;  %v558_v29 = vor.u32 %v556_v27, %v554_v24  ;;  %v2315_v24 = vrot.slane %v4333_v15, 3  ;;  %v1496_v27 = vshll.u32 %v4334_v21, 16 }
  0x86   : > { %3870 = vmatmul.mubr.msk.bf16.gmra.mrb[52].mxu0 %vm615_vm2, %v491_v41 }
  0x87   : > { %3986 = vmatmul.mubr.msk.bf16.gmra.mrb[52].mxu1 %vm615_vm2, %v4310_v28  ;;  %3873 = vmatprep.mubr.msk.bf16.mxu0 %vm4391_vm0, %v5233_v1  ;;  %v560_v28 = vshll.u32 %v4324_v25, 16 }
  0x88   : > { %3989 = vmatprep.mubr.msk.bf16.mxu1 %vm4391_vm0, %v5233_v1 }
  0x89   : > { %v562_v30 = vrot.slane %v560_v28, 1 }
  0x8b   : > { %v563_v32 = vsel %vm375_vm1, %v558_v29, %v562_v30  ;;  %v566_v35 = vor.u32 %v564_v33, %v562_v30 }
  0x8e   : > { %3874 = vmatmul.mubr.msk.bf16.gmra.mrb[56].mxu0 %vm615_vm2, %v499_v47 }
  0x8f   : > { %3990 = vmatmul.mubr.msk.bf16.gmra.mrb[56].mxu1 %vm615_vm2, %v4311_v34  ;;  %3877 = vmatprep.mubr.msk.bf16.mxu0 %vm4391_vm0, %v5233_v1  ;;  %v568_v34 = vshll.u32 %v4325_v31, 16 }
  0x90   : > { %3993 = vmatprep.mubr.msk.bf16.mxu1 %vm4391_vm0, %v5233_v1 }
  0x91   : > { %v570_v36 = vrot.slane %v568_v34, 1  ;;  %v2316_v34 = vsel %vm2311_vm3, %v2313_v4, %v2315_v24 }
  0x93   : > { %v571_v38 = vsel %vm375_vm1, %v566_v35, %v570_v36  ;;  %v574_v41 = vor.u32 %v572_v39, %v570_v36  ;;  %v4335_v35 = vld [vmem:[%s4457_s4 + $0x20] sm:$0xff]  }
  0x96   : > { %3878 = vmatmul.mubr.msk.bf16.gmra.mrb[60].mxu0 %vm615_vm2, %v507_v53  ;;  %v1467_v53 = vshrl.u32 %v4328_v49, 16 }
  0x97   : > { %3994 = vmatmul.mubr.msk.bf16.gmra.mrb[60].mxu1 %vm615_vm2, %v4314_v40  ;;  %3881 = vmatprep.mubr.msk.bf16.mxu0 %vm4391_vm0, %v5233_v1  ;;  %v576_v40 = vshll.u32 %v4326_v37, 16 }
  0x98   : > { %3997 = vmatprep.mubr.msk.bf16.mxu1 %vm4391_vm0, %v5233_v1 }
  0x99   : > { %v578_v42 = vrot.slane %v576_v40, 1  ;;  %v1498_v40 = vrot.slane %v1496_v27, 3 }
  0x9b   : > { %v579_v44 = vsel %vm375_vm1, %v574_v41, %v578_v42  ;;  %v582_v47 = vor.u32 %v580_v45, %v578_v42  ;;  %v4336_v41 = vld [vmem:[%s4457_s4 + $0x28] sm:$0xff]  }
  0x9e   : > { %3882 = vmatmul.mubr.msk.bf16.gmra.mrb[64].mxu0 %vm615_vm2, %v515_v59  ;;  %v1472_v59 = vrot.slane %v1470_v54, 3 }
  0x9f   : > { %3998 = vmatmul.mubr.msk.bf16.gmra.mrb[64].mxu1 %vm615_vm2, %v4315_v46  ;;  %3885 = vmatprep.mubr.msk.bf16.mxu0 %vm4391_vm0, %v5233_v1  ;;  %v584_v46 = vshll.u32 %v4327_v43, 16 }
  0xa0   : > { %4001 = vmatprep.mubr.msk.bf16.mxu1 %vm4391_vm0, %v5233_v1 }
  0xa1   : > { %v586_v48 = vrot.slane %v584_v46, 1  ;;  %v1502_v46 = vshrl.u32 %v4336_v41, 16 }
  0xa3   : > { %v587_v50 = vsel %vm375_vm1, %v582_v47, %v586_v48  ;;  %v1505_v47 = vshll.u32 %v4336_v41, 16  ;;  %v4342_v41 = vld [vmem:[%s4457_s4 + $0x40] sm:$0xff]  }
  0xa5   : > { %v1507_v60 = vrot.slane %v1505_v47, 3  ;;  %v1529_v47 = vshrl.u32 %v4342_v41, 16 }
  0xa6   : > { %3886 = vmatmul.mubr.msk.bf16.gmra.mrb[68].mxu0 %vm615_vm2, %v523_v2 }
  0xa7   : > { %4002 = vmatmul.mubr.msk.bf16.gmra.mrb[68].mxu1 %vm615_vm2, %v4316_v52  ;;  %3889 = vmatprep.mubr.msk.bf16.mxu0 %vm4391_vm0, %v5233_v1  ;;  %v588_v52 = vshrl.u32 %v4327_v43, 16 }
  0xa8   : > { %4005 = vmatprep.mubr.msk.bf16.mxu1 %vm4391_vm0, %v5233_v1 }
  0xa9   : > { %v590_v57 = vor.u32 %v588_v52, %v586_v48 }
  0xae   : > { %3890 = vmatmul.mubr.msk.bf16.gmra.mrb[72].mxu0 %vm615_vm2, %v531_v8 }
  0xaf   : > { %4006 = vmatmul.mubr.msk.bf16.gmra.mrb[72].mxu1 %vm615_vm2, %v4317_v58  ;;  %3893 = vmatprep.mubr.msk.bf16.mxu0 %vm4391_vm0, %v5233_v1  ;;  %v1469_v58 = vrot.slane %v1467_v53, 2 }
  0xb0   : > { %4009 = vmatprep.mubr.msk.bf16.mxu1 %vm4391_vm0, %v5233_v1 }
  0xb1   : > { %v1473_v2 = vor.u32 %v1472_v59, %v1469_v58  ;;  %v1504_v59 = vrot.slane %v1502_v46, 2 }
  0xb3   : > { %v1482_v18 = vsel %vm1465_vm4, %v1473_v2, %v1481_v5  ;;  %v1508_v2 = vor.u32 %v1507_v60, %v1504_v59 }
  0xb6   : > { %3894 = vmatmul.mubr.msk.bf16.gmra.mrb[76].mxu0 %vm615_vm2, %v539_v14  ;;  %v2314_v14 = vsel %vm2311_vm3, %v2312_v3, %v2313_v4  ;;  %v1511_v3 = vshrl.u32 %v4338_v61, 16  ;;  %v1514_v4 = vshll.u32 %v4338_v61, 16  ;;  %v1531_v61 = vrot.slane %v1529_v47, 2 }
  0xb7   : > { %4010 = vmatmul.mubr.msk.bf16.gmra.mrb[76].mxu1 %vm615_vm2, %v4318_v0  ;;  %3897 = vmatprep.mubr.msk.bf16.mxu0 %vm4391_vm0, %v5233_v1  ;;  %v4332_v0 = vld [vmem:[%s4457_s4 + $0x18] sm:$0xff]  }
  0xb8   : > { %4013 = vmatprep.mubr.msk.bf16.mxu1 %vm4391_vm0, %v5233_v1  ;;  %v1484_v6 = vshrl.u32 %v4332_v0, 16 }
  0xbe   : > { %3898 = vmatmul.mubr.msk.bf16.gmra.mrb[80].mxu0 %vm615_vm2, %v547_v20 }
  0xbf   : > { %4014 = vmatmul.mubr.msk.bf16.gmra.mrb[80].mxu1 %vm615_vm2, %v4319_v7  ;;  %3901 = vmatprep.mubr.msk.bf16.mxu0 %vm4391_vm0, %v5233_v1  ;;  %v1487_v7 = vshll.u32 %v4332_v0, 16  ;;  %v2319_v0 = vrot.slane %v4337_v55, 3 }
  0xc0   : > { %4017 = vmatprep.mubr.msk.bf16.mxu1 %vm4391_vm0, %v5233_v1 }
  0xc1   : > { %v1489_v20 = vrot.slane %v1487_v7, 3 }
  0xc6   : > { %3902 = vmatmul.mubr.msk.bf16.gmra.mrb[84].mxu0 %vm615_vm2, %v555_v26  ;;  %v1493_v26 = vshrl.u32 %v4334_v21, 16 }
  0xc7   : > { %4018 = vmatmul.mubr.msk.bf16.gmra.mrb[84].mxu1 %vm615_vm2, %v4320_v13  ;;  %3905 = vmatprep.mubr.msk.bf16.mxu0 %vm4391_vm0, %v5233_v1 }
  0xc8   : > { %4021 = vmatprep.mubr.msk.bf16.mxu1 %vm4391_vm0, %v5233_v1  ;;  %v1495_v39 = vrot.slane %v1493_v26, 2 }
  0xca   : > { %v1499_v45 = vor.u32 %v1498_v40, %v1495_v39 }
  0xce   : > { %3906 = vmatmul.mubr.msk.bf16.gmra.mrb[88].mxu0 %vm615_vm2, %v563_v32 }
  0xcf   : > { %4022 = vmatmul.mubr.msk.bf16.gmra.mrb[88].mxu1 %vm615_vm2, %v4323_v19  ;;  %3909 = vmatprep.mubr.msk.bf16.mxu0 %vm4391_vm0, %v5233_v1  ;;  %v1486_v19 = vrot.slane %v1484_v6, 2 }
  0xd0   : > { %4025 = vmatprep.mubr.msk.bf16.mxu1 %vm4391_vm0, %v5233_v1 }
  0xd6   : > { %3910 = vmatmul.mubr.msk.bf16.gmra.mrb[92].mxu0 %vm615_vm2, %v571_v38 }
  0xd7   : > { %4026 = vmatmul.mubr.msk.bf16.gmra.mrb[92].mxu1 %vm615_vm2, %v4324_v25  ;;  %3913 = vmatprep.mubr.msk.bf16.mxu0 %vm4391_vm0, %v5233_v1  ;;  %v1490_v25 = vor.u32 %v1489_v20, %v1486_v19  ;;  %v4340_v19 = vld [vmem:[%s4457_s4 + $0x38] sm:$0xff]  }
  0xd8   : > { %4029 = vmatprep.mubr.msk.bf16.mxu1 %vm4391_vm0, %v5233_v1  ;;  %v1523_v26 = vshll.u32 %v4340_v19, 16 }
  0xd9   : > { %v1491_v38 = vsel %vm1465_vm4, %v1481_v5, %v1490_v25  ;;  %v1500_v58 = vsel %vm1465_vm4, %v1490_v25, %v1499_v45  ;;  %v1520_v25 = vshrl.u32 %v4340_v19, 16 }
  0xda   : > { %v1525_v40 = vrot.slane %v1523_v26, 3 }
  0xdb   : > { %v1522_v39 = vrot.slane %v1520_v25, 2  ;;  %v4346_v25 = vld [vmem:[%s4457_s4 + $0x50] sm:$0xff]  }
  0xdd   : > { %v1526_v46 = vor.u32 %v1525_v40, %v1522_v39 }
  0xde   : > { %3914 = vmatmul.mubr.msk.bf16.gmra.mrb[96].mxu0 %vm615_vm2, %v579_v44  ;;  %v2317_v44 = vrot.slane %v4335_v35, 3  ;;  %v4341_v35 = vld [vmem:[%s4457_s4 + $0x38] sm:$0xff]  }
  0xdf   : > { %4030 = vmatmul.mubr.msk.bf16.gmra.mrb[96].mxu1 %vm615_vm2, %v4325_v31  ;;  %3917 = vmatprep.mubr.msk.bf16.mxu0 %vm4391_vm0, %v5233_v1 }
  0xe0   : > { %4033 = vmatprep.mubr.msk.bf16.mxu1 %vm4391_vm0, %v5233_v1  ;;  %v2318_v54 = vsel %vm2311_vm3, %v2315_v24, %v2317_v44 }
  0xe6   : > { %3918 = vmatmul.mubr.msk.bf16.gmra.mrb[100].mxu0 %vm615_vm2, %v587_v50 }
  0xe7   : > { %4034 = vmatmul.mubr.msk.bf16.gmra.mrb[100].mxu1 %vm615_vm2, %v4326_v37  ;;  %3921 = vmatprep.mubr.msk.bf16.mxu0 %vm4391_vm0, %v5233_v1 }
  0xe8   : > { %4037 = vmatprep.mubr.msk.bf16.mxu1 %vm4391_vm0, %v5233_v1 }
  0xee   : > { %3922 = vmatmul.mubr.msk.bf16.gmra.mrb[104].mxu0 %vm615_vm2, %v590_v57 }
  0xef   : > { %4038 = vmatmul.mubr.msk.bf16.gmra.mrb[104].mxu1 %vm615_vm2, %v4327_v43  ;;  %4049 = vmatprep.mubr.msk.bf16.mxu0 %vm4391_vm0, %v5233_v1 }
  0xf0   : > { %4165 = vmatprep.mubr.msk.bf16.mxu1 %vm4391_vm0, %v5233_v1 }
  0xf1   : > { %v731_v9 = vpop.f32.mrb[0].mxu0 }
  0xf2   : > { %v1057_v8 = vpop.f32.mrb[0].mxu1  ;;  %v3819_v12 = vpop.f32.mrb[1].mxu0 }
  0xf3   : > { %v3935_v10 = vpop.f32.mrb[1].mxu1  ;;  %v4716_v11 = vadd.f32 %v1057_v8, %v731_v9  ;;  %v734_v16 = vpop.f32.mrb[2].mxu0  ;;  %v2320_v12 = vsel %vm2311_vm3, %v2317_v44, %v2319_v0 }
  0xf4   : > { %v1060_v13 = vpop.f32.mrb[2].mxu1  ;;  %v3820_v23 = vpop.f32.mrb[3].mxu0 }
  0xf5   : > { %v3936_v17 = vpop.f32.mrb[3].mxu1  ;;  %v4722_v22 = vadd.f32 %v1060_v13, %v734_v16  ;;  %v4339_v13 = vld [vmem:[%s4457_s4 + $0x30] sm:$0xff]   ;;  %v1509_v16 = vsel %vm1465_vm4, %v1499_v45, %v1508_v2  ;;  %v2323_v45 = vrot.slane %v4341_v35, 3 }
  0xf6   : > { %4050 = vmatmul.mubr.msk.bf16.vlgmr.msra.gmra.mrb[108].mxu0 %vm615_vm2, %v1482_v18  ;;  %v1513_v17 = vrot.slane %v1511_v3, 2  ;;  %v1516_v18 = vrot.slane %v1514_v4, 3  ;;  %v2321_v23 = vrot.slane %v4339_v13, 3 }
  0xf7   : > { %4166 = vmatmul.mubr.msk.bf16.vlgmr.msra.gmra.mrb[108].mxu1 %vm615_vm2, %v2314_v14  ;;  %4053 = vmatprep.mubr.msk.bf16.mxu0 %vm4391_vm0, %v5233_v1 }
  0xf8   : > { %4169 = vmatprep.mubr.msk.bf16.mxu1 %vm4391_vm0, %v5233_v1  ;;  %v1517_v24 = vor.u32 %v1516_v18, %v1513_v17  ;;  %v4345_v17 = vld [vmem:[%s4457_s4 + $0x48] sm:$0xff]  }
  0xf9   : > { %v739_v29 = vpop.f32.mrb[4].mxu0 }
  0xfa   : > { %v1065_v28 = vpop.f32.mrb[4].mxu1  ;;  %v3823_v32 = vpop.f32.mrb[5].mxu0  ;;  %v1527_v60 = vsel %vm1465_vm4, %v1517_v24, %v1526_v46 }
  0xfb   : > { %v3939_v30 = vpop.f32.mrb[5].mxu1  ;;  %v4730_v31 = vadd.f32 %v1065_v28, %v739_v29  ;;  %v742_v36 = vpop.f32.mrb[6].mxu0 }
  0xfc   : > { %v1068_v33 = vpop.f32.mrb[6].mxu1  ;;  %v3824_v43 = vpop.f32.mrb[7].mxu0 }
  0xfd   : > { %v3940_v37 = vpop.f32.mrb[7].mxu1  ;;  %v4736_v42 = vadd.f32 %v1068_v33, %v742_v36 }
  0xfe   : > { %4054 = vmatmul.mubr.msk.bf16.gmra.mrb[112].mxu0 %vm615_vm2, %v1491_v38  ;;  %v1518_v38 = vsel %vm1465_vm4, %v1508_v2, %v1517_v24 }
  0xff   : > { %4170 = vmatmul.mubr.msk.bf16.gmra.mrb[112].mxu1 %vm615_vm2, %v2316_v34  ;;  %4057 = vmatprep.mubr.msk.bf16.mxu0 %vm4391_vm0, %v5233_v1  ;;  %v2322_v34 = vsel %vm2311_vm3, %v2319_v0, %v2321_v23  ;;  %v4344_v0 = vld [vmem:[%s4457_s4 + $0x48] sm:$0xff]  }
 0x100   : > { %4173 = vmatprep.mubr.msk.bf16.mxu1 %vm4391_vm0, %v5233_v1 }
 0x101   : > { %v747_v49 = vpop.f32.mrb[8].mxu0 }
 0x102   : > { %v1073_v48 = vpop.f32.mrb[8].mxu1  ;;  %v3827_v52 = vpop.f32.mrb[9].mxu0 }
 0x103   : > { %v3943_v50 = vpop.f32.mrb[9].mxu1  ;;  %v4744_v51 = vadd.f32 %v1073_v48, %v747_v49  ;;  %v750_v56 = vpop.f32.mrb[10].mxu0  ;;  %v1532_v48 = vshll.u32 %v4342_v41, 16  ;;  %v4347_v41 = vld [vmem:[%s4457_s4 + $0x50] sm:$0xff]  }
 0x104   : > { %v1076_v53 = vpop.f32.mrb[10].mxu1  ;;  %v3828_v63 = vpop.f32.mrb[11].mxu0 }
 0x105   : > { %v3944_v57 = vpop.f32.mrb[11].mxu1  ;;  %v4750_v62 = vadd.f32 %v1076_v53, %v750_v56  ;;  %v2324_v56 = vsel %vm2311_vm3, %v2321_v23, %v2323_v45  ;;  %v1534_v63 = vrot.slane %v1532_v48, 3 }
 0x106   : > { %4058 = vmatmul.mubr.msk.bf16.gmra.mrb[116].mxu0 %vm615_vm2, %v1500_v58  ;;  %v4343_v57 = vld [vmem:[%s4457_s4 + $0x40] sm:$0xff]  }
 0x107   : > { %4174 = vmatmul.mubr.msk.bf16.gmra.mrb[116].mxu1 %vm615_vm2, %v2318_v54  ;;  %4061 = vmatprep.mubr.msk.bf16.mxu0 %vm4391_vm0, %v5233_v1  ;;  %v2325_v4 = vrot.slane %v4343_v57, 3 }
 0x108   : > { %4177 = vmatprep.mubr.msk.bf16.mxu1 %vm4391_vm0, %v5233_v1 }
 0x109   : > { %v755_v6 = vpop.f32.mrb[12].mxu0 }
 0x10a   : > { %v1081_v5 = vpop.f32.mrb[12].mxu1  ;;  %v3831_v9 = vpop.f32.mrb[13].mxu0 }
 0x10b   : > { %v3947_v7 = vpop.f32.mrb[13].mxu1  ;;  %v4758_v8 = vadd.f32 %v1081_v5, %v755_v6  ;;  %v758_v14 = vpop.f32.mrb[14].mxu0  ;;  %v1535_v5 = vor.u32 %v1534_v63, %v1531_v61  ;;  %v1538_v6 = vshrl.u32 %v4344_v0, 16 }
 0x10c   : > { %v1084_v10 = vpop.f32.mrb[14].mxu1  ;;  %v3832_v21 = vpop.f32.mrb[15].mxu0  ;;  %v1541_v7 = vshll.u32 %v4344_v0, 16 }
 0x10d   : > { %v3948_v15 = vpop.f32.mrb[15].mxu1  ;;  %v4764_v20 = vadd.f32 %v1084_v10, %v758_v14  ;;  %v1536_v21 = vsel %vm1465_vm4, %v1526_v46, %v1535_v5  ;;  %v1540_v23 = vrot.slane %v1538_v6, 2 }
 0x10e   : > { %4062 = vmatmul.mubr.msk.bf16.gmra.mrb[120].mxu0 %vm615_vm2, %v1509_v16  ;;  %v2326_v16 = vsel %vm2311_vm3, %v2323_v45, %v2325_v4  ;;  %v1543_v24 = vrot.slane %v1541_v7, 3 }
 0x10f   : > { %4178 = vmatmul.mubr.msk.bf16.gmra.mrb[120].mxu1 %vm615_vm2, %v2320_v12  ;;  %4065 = vmatprep.mubr.msk.bf16.mxu0 %vm4391_vm0, %v5233_v1 }
 0x110   : > { %4181 = vmatprep.mubr.msk.bf16.mxu1 %vm4391_vm0, %v5233_v1 }
 0x111   : > { %v763_v28 = vpop.f32.mrb[16].mxu0 }
 0x112   : > { %v1089_v27 = vpop.f32.mrb[16].mxu1  ;;  %v3835_v32 = vpop.f32.mrb[17].mxu0 }
 0x113   : > { %v3951_v29 = vpop.f32.mrb[17].mxu1  ;;  %v4772_v30 = vadd.f32 %v1089_v27, %v763_v28  ;;  %v766_v36 = vpop.f32.mrb[18].mxu0  ;;  %v2327_v28 = vrot.slane %v4345_v17, 3  ;;  %v1547_v32 = vshrl.u32 %v4346_v25, 16 }
 0x114   : > { %v1092_v33 = vpop.f32.mrb[18].mxu1  ;;  %v3836_v44 = vpop.f32.mrb[19].mxu0  ;;  %v1544_v29 = vor.u32 %v1543_v24, %v1540_v23 }
 0x115   : > { %v3952_v37 = vpop.f32.mrb[19].mxu1  ;;  %v4778_v43 = vadd.f32 %v1092_v33, %v766_v36  ;;  %v1550_v33 = vshll.u32 %v4346_v25, 16  ;;  %v2328_v40 = vsel %vm2311_vm3, %v2325_v4, %v2327_v28  ;;  %v1549_v47 = vrot.slane %v1547_v32, 2  ;;  %v4349_v4 = vld [vmem:[%s4457_s4 + $0x58] sm:$0xff]   ;;  %v4351_v32 = vld [vmem:[%s4457_s4 + $0x60] sm:$0xff]  }
 0x116   : > { %4066 = vmatmul.mubr.msk.bf16.gmra.mrb[124].mxu0 %vm615_vm2, %v1518_v38  ;;  %v1545_v46 = vsel %vm1465_vm4, %v1535_v5, %v1544_v29 }
 0x117   : > { %4182 = vmatmul.mubr.msk.bf16.gmra.mrb[124].mxu1 %vm615_vm2, %v2322_v34  ;;  %4069 = vmatprep.mubr.msk.bf16.mxu0 %vm4391_vm0, %v5233_v1  ;;  %v1552_v48 = vrot.slane %v1550_v33, 3 }
 0x118   : > { %4185 = vmatprep.mubr.msk.bf16.mxu1 %vm4391_vm0, %v5233_v1 }
 0x119   : > { %v771_v50 = vpop.f32.mrb[20].mxu0 }
 0x11a   : > { %v1097_v49 = vpop.f32.mrb[20].mxu1  ;;  %v3839_v54 = vpop.f32.mrb[21].mxu0 }
 0x11b   : > { %v3955_v52 = vpop.f32.mrb[21].mxu1  ;;  %v4786_v53 = vadd.f32 %v1097_v49, %v771_v50  ;;  %v774_v58 = vpop.f32.mrb[22].mxu0  ;;  %v4348_v49 = vld [vmem:[%s4457_s4 + $0x58] sm:$0xff]   ;;  %v2329_v54 = vrot.slane %v4347_v41, 3 }
 0x11c   : > { %v1100_v55 = vpop.f32.mrb[22].mxu1  ;;  %v3840_v3 = vpop.f32.mrb[23].mxu0  ;;  %v1559_v57 = vshll.u32 %v4348_v49, 16 }
 0x11d   : > { %v3956_v59 = vpop.f32.mrb[23].mxu1  ;;  %v4792_v2 = vadd.f32 %v1100_v55, %v774_v58  ;;  %v1553_v55 = vor.u32 %v1552_v48, %v1549_v47  ;;  %v2330_v3 = vsel %vm2311_vm3, %v2327_v28, %v2329_v54 }
 0x11e   : > { %4070 = vmatmul.mubr.msk.bf16.gmra.mrb[128].mxu0 %vm615_vm2, %v1527_v60 }
 0x11f   : > { %4186 = vmatmul.mubr.msk.bf16.gmra.mrb[128].mxu1 %vm615_vm2, %v2324_v56  ;;  %4073 = vmatprep.mubr.msk.bf16.mxu0 %vm4391_vm0, %v5233_v1  ;;  %v1556_v56 = vshrl.u32 %v4348_v49, 16  ;;  %v1554_v7 = vsel %vm1465_vm4, %v1544_v29, %v1553_v55 }
 0x120   : > { %4189 = vmatprep.mubr.msk.bf16.mxu1 %vm4391_vm0, %v5233_v1 }
 0x121   : > { %v779_v10 = vpop.f32.mrb[24].mxu0 }
 0x122   : > { %v1105_v9 = vpop.f32.mrb[24].mxu1  ;;  %v3843_v14 = vpop.f32.mrb[25].mxu0 }
 0x123   : > { %v3959_v12 = vpop.f32.mrb[25].mxu1  ;;  %v4800_v13 = vadd.f32 %v1105_v9, %v779_v10  ;;  %v782_v18 = vpop.f32.mrb[26].mxu0  ;;  %v1558_v9 = vrot.slane %v1556_v56, 2  ;;  %v1561_v10 = vrot.slane %v1559_v57, 3 }
 0x124   : > { %v1108_v15 = vpop.f32.mrb[26].mxu1  ;;  %v3844_v27 = vpop.f32.mrb[27].mxu0  ;;  %v4350_v12 = vld [vmem:[%s4457_s4 + $0x60] sm:$0xff]  }
 0x125   : > { %v3960_v19 = vpop.f32.mrb[27].mxu1  ;;  %v4806_v26 = vadd.f32 %v1108_v15, %v782_v18  ;;  %v1562_v17 = vor.u32 %v1561_v10, %v1558_v9  ;;  %v1565_v18 = vshrl.u32 %v4350_v12, 16 }
 0x126   : > { %4074 = vmatmul.mubr.msk.bf16.gmra.mrb[132].mxu0 %vm615_vm2, %v1536_v21  ;;  %v1568_v19 = vshll.u32 %v4350_v12, 16 }
 0x127   : > { %4190 = vmatmul.mubr.msk.bf16.gmra.mrb[132].mxu1 %vm615_vm2, %v2326_v16  ;;  %4077 = vmatprep.mubr.msk.bf16.mxu0 %vm4391_vm0, %v5233_v1  ;;  %v2331_v16 = vrot.slane %v4349_v4, 3  ;;  %v4354_v4 = vld [vmem:[%s4457_s4 + $0x70] sm:$0xff]  }
 0x128   : > { %4193 = vmatprep.mubr.msk.bf16.mxu1 %vm4391_vm0, %v5233_v1  ;;  %v1583_v10 = vshrl.u32 %v4354_v4, 16  ;;  %v1586_v12 = vshll.u32 %v4354_v4, 16 }
 0x129   : > { %v787_v35 = vpop.f32.mrb[28].mxu0  ;;  %v2332_v29 = vsel %vm2311_vm3, %v2329_v54, %v2331_v16 }
 0x12a   : > { %v1113_v34 = vpop.f32.mrb[28].mxu1  ;;  %v3847_v38 = vpop.f32.mrb[29].mxu0 }
 0x12b   : > { %v3963_v36 = vpop.f32.mrb[29].mxu1  ;;  %v4814_v37 = vadd.f32 %v1113_v34, %v787_v35  ;;  %v790_v44 = vpop.f32.mrb[30].mxu0  ;;  %v1563_v35 = vsel %vm1465_vm4, %v1553_v55, %v1562_v17  ;;  %v1570_v38 = vrot.slane %v1568_v19, 3 }
 0x12c   : > { %v1116_v39 = vpop.f32.mrb[30].mxu1  ;;  %v3848_v52 = vpop.f32.mrb[31].mxu0  ;;  %v1567_v36 = vrot.slane %v1565_v18, 2 }
 0x12d   : > { %v3964_v45 = vpop.f32.mrb[31].mxu1  ;;  %v4820_v50 = vadd.f32 %v1116_v39, %v790_v44  ;;  %v4352_v39 = vld [vmem:[%s4457_s4 + $0x68] sm:$0xff]   ;;  %v2333_v44 = vrot.slane %v4351_v32, 3  ;;  %v1585_v32 = vrot.slane %v1583_v10, 2 }
 0x12e   : > { %4078 = vmatmul.mubr.msk.bf16.gmra.mrb[136].mxu0 %vm615_vm2, %v1545_v46  ;;  %v1571_v45 = vor.u32 %v1570_v38, %v1567_v36  ;;  %v1574_v46 = vshrl.u32 %v4352_v39, 16  ;;  %v1577_v47 = vshll.u32 %v4352_v39, 16 }
 0x12f   : > { %4194 = vmatmul.mubr.msk.bf16.gmra.mrb[136].mxu1 %vm615_vm2, %v2328_v40  ;;  %4081 = vmatprep.mubr.msk.bf16.mxu0 %vm4391_vm0, %v5233_v1  ;;  %v2334_v57 = vsel %vm2311_vm3, %v2331_v16, %v2333_v44 }
 0x130   : > { %4197 = vmatprep.mubr.msk.bf16.mxu1 %vm4391_vm0, %v5233_v1 }
 0x131   : > { %v795_v59 = vpop.f32.mrb[32].mxu0 }
 0x132   : > { %v1121_v58 = vpop.f32.mrb[32].mxu1  ;;  %v3851_v63 = vpop.f32.mrb[33].mxu0 }
 0x133   : > { %v3967_v60 = vpop.f32.mrb[33].mxu1  ;;  %v4828_v61 = vadd.f32 %v1121_v58, %v795_v59  ;;  %v798_v5 = vpop.f32.mrb[34].mxu0  ;;  %v4353_v58 = vld [vmem:[%s4457_s4 + $0x68] sm:$0xff]   ;;  %v1572_v63 = vsel %vm1465_vm4, %v1562_v17, %v1571_v45 }
 0x134   : > { %v1124_v0 = vpop.f32.mrb[34].mxu1  ;;  %v3852_v15 = vpop.f32.mrb[35].mxu0 }
 0x135   : > { %v3968_v6 = vpop.f32.mrb[35].mxu1  ;;  %v4834_v14 = vadd.f32 %v1124_v0, %v798_v5  ;;  %v1576_v0 = vrot.slane %v1574_v46, 2 }
 0x136   : > { %4082 = vmatmul.mubr.msk.bf16.gmra.mrb[140].mxu0 %vm615_vm2, %v1554_v7  ;;  %v2335_v7 = vrot.slane %v4353_v58, 3 }
 0x137   : > { %4198 = vmatmul.mubr.msk.bf16.gmra.mrb[140].mxu1 %vm615_vm2, %v2330_v3  ;;  %4085 = vmatprep.mubr.msk.bf16.mxu0 %vm4391_vm0, %v5233_v1  ;;  %v1579_v3 = vrot.slane %v1577_v47, 3 }
 0x138   : > { %4201 = vmatprep.mubr.msk.bf16.mxu1 %vm4391_vm0, %v5233_v1 }
 0x139   : > { %v803_v23 = vpop.f32.mrb[36].mxu0  ;;  %v1580_v9 = vor.u32 %v1579_v3, %v1576_v0  ;;  %v4358_v0 = vld [vmem:[%s4457_s4 + $0x80] sm:$0xff]  }
 0x13a   : > { %v1129_v21 = vpop.f32.mrb[36].mxu1  ;;  %v3855_v27 = vpop.f32.mrb[37].mxu0  ;;  %v1604_v10 = vshll.u32 %v4358_v0, 16 }
 0x13b   : > { %v3971_v24 = vpop.f32.mrb[37].mxu1  ;;  %v4842_v25 = vadd.f32 %v1129_v21, %v803_v23  ;;  %v806_v33 = vpop.f32.mrb[38].mxu0  ;;  %v2336_v23 = vsel %vm2311_vm3, %v2333_v44, %v2335_v7 }
 0x13c   : > { %v1132_v28 = vpop.f32.mrb[38].mxu1  ;;  %v3856_v41 = vpop.f32.mrb[39].mxu0  ;;  %v4355_v24 = vld [vmem:[%s4457_s4 + $0x70] sm:$0xff]  }
 0x13d   : > { %v3972_v34 = vpop.f32.mrb[39].mxu1  ;;  %v4848_v40 = vadd.f32 %v1132_v28, %v806_v33  ;;  %v1588_v33 = vrot.slane %v1586_v12, 3  ;;  %v2337_v38 = vrot.slane %v4355_v24, 3  ;;  %v4359_v24 = vld [vmem:[%s4457_s4 + $0x80] sm:$0xff]  }
 0x13e   : > { %4086 = vmatmul.mubr.msk.bf16.gmra.mrb[144].mxu0 %vm615_vm2, %v1563_v35  ;;  %v4356_v34 = vld [vmem:[%s4457_s4 + $0x78] sm:$0xff]  }
 0x13f   : > { %4202 = vmatmul.mubr.msk.bf16.gmra.mrb[144].mxu1 %vm615_vm2, %v2332_v29  ;;  %4089 = vmatprep.mubr.msk.bf16.mxu0 %vm4391_vm0, %v5233_v1  ;;  %v1581_v29 = vsel %vm1465_vm4, %v1571_v45, %v1580_v9  ;;  %v1589_v39 = vor.u32 %v1588_v33, %v1585_v32  ;;  %v1592_v41 = vshrl.u32 %v4356_v34, 16  ;;  %v1595_v44 = vshll.u32 %v4356_v34, 16  ;;  %v4360_v34 = vld [vmem:[%s4457_s4 + $0x88] sm:$0xff]  }
 0x140   : > { %4205 = vmatprep.mubr.msk.bf16.mxu1 %vm4391_vm0, %v5233_v1  ;;  %v1606_v33 = vrot.slane %v1604_v10, 3 }
 0x141   : > { %v811_v49 = vpop.f32.mrb[40].mxu0 }
 0x142   : > { %v1137_v48 = vpop.f32.mrb[40].mxu1  ;;  %v3859_v55 = vpop.f32.mrb[41].mxu0 }
 0x143   : > { %v3975_v52 = vpop.f32.mrb[41].mxu1  ;;  %v4856_v54 = vadd.f32 %v1137_v48, %v811_v49  ;;  %v814_v59 = vpop.f32.mrb[42].mxu0  ;;  %v2338_v55 = vsel %vm2311_vm3, %v2335_v7, %v2337_v38 }
 0x144   : > { %v1140_v56 = vpop.f32.mrb[42].mxu1  ;;  %v3860_v6 = vpop.f32.mrb[43].mxu0 }
 0x145   : > { %v3976_v60 = vpop.f32.mrb[43].mxu1  ;;  %v4862_v5 = vadd.f32 %v1140_v56, %v814_v59  ;;  %v4357_v56 = vld [vmem:[%s4457_s4 + $0x78] sm:$0xff]   ;;  %v1590_v59 = vsel %vm1465_vm4, %v1580_v9, %v1589_v39  ;;  %v1601_v9 = vshrl.u32 %v4358_v0, 16 }
 0x146   : > { %4090 = vmatmul.mubr.msk.bf16.gmra.mrb[148].mxu0 %vm615_vm2, %v1572_v63  ;;  %v1594_v60 = vrot.slane %v1592_v41, 2  ;;  %v1597_v63 = vrot.slane %v1595_v44, 3  ;;  %v2339_v6 = vrot.slane %v4357_v56, 3 }
 0x147   : > { %4206 = vmatmul.mubr.msk.bf16.gmra.mrb[148].mxu1 %vm615_vm2, %v2334_v57  ;;  %4093 = vmatprep.mubr.msk.bf16.mxu0 %vm4391_vm0, %v5233_v1  ;;  %v1603_v32 = vrot.slane %v1601_v9, 2  ;;  %v4362_v9 = vld [vmem:[%s4457_s4 + $0x90] sm:$0xff]  }
 0x148   : > { %4209 = vmatprep.mubr.msk.bf16.mxu1 %vm4391_vm0, %v5233_v1  ;;  %v1598_v7 = vor.u32 %v1597_v63, %v1594_v60 }
 0x149   : > { %v819_v16 = vpop.f32.mrb[44].mxu0  ;;  %v1607_v44 = vor.u32 %v1606_v33, %v1603_v32  ;;  %v4363_v32 = vld [vmem:[%s4457_s4 + $0x90] sm:$0xff]  }
 0x14a   : > { %v1145_v15 = vpop.f32.mrb[44].mxu1  ;;  %v3863_v19 = vpop.f32.mrb[45].mxu0 }
 0x14b   : > { %v3979_v17 = vpop.f32.mrb[45].mxu1  ;;  %v4870_v18 = vadd.f32 %v1145_v15, %v819_v16  ;;  %v822_v27 = vpop.f32.mrb[46].mxu0  ;;  %v1608_v63 = vsel %vm1465_vm4, %v1598_v7, %v1607_v44 }
 0x14c   : > { %v1148_v21 = vpop.f32.mrb[46].mxu1  ;;  %v3864_v36 = vpop.f32.mrb[47].mxu0 }
 0x14d   : > { %v3980_v28 = vpop.f32.mrb[47].mxu1  ;;  %v4876_v35 = vadd.f32 %v1148_v21, %v822_v27 }
 0x14e   : > { %4094 = vmatmul.mubr.msk.bf16.gmra.mrb[152].mxu0 %vm615_vm2, %v1581_v29  ;;  %v1599_v29 = vsel %vm1465_vm4, %v1589_v39, %v1598_v7  ;;  %v1610_v39 = vshrl.u32 %v4360_v34, 16  ;;  %v1619_v7 = vshrl.u32 %v4362_v9, 16 }
 0x14f   : > { %4210 = vmatmul.mubr.msk.bf16.gmra.mrb[152].mxu1 %vm615_vm2, %v2336_v23  ;;  %4097 = vmatprep.mubr.msk.bf16.mxu0 %vm4391_vm0, %v5233_v1  ;;  %v2340_v23 = vsel %vm2311_vm3, %v2337_v38, %v2339_v6  ;;  %v2341_v38 = vrot.slane %v4359_v24, 3 }
 0x150   : > { %4213 = vmatprep.mubr.msk.bf16.mxu1 %vm4391_vm0, %v5233_v1  ;;  %v1612_v0 = vrot.slane %v1610_v39, 2  ;;  %v1621_v39 = vrot.slane %v1619_v7, 2 }
 0x151   : > { %v827_v46 = vpop.f32.mrb[48].mxu0 }
 0x152   : > { %v1153_v45 = vpop.f32.mrb[48].mxu1  ;;  %v3867_v49 = vpop.f32.mrb[49].mxu0 }
 0x153   : > { %v3983_v47 = vpop.f32.mrb[49].mxu1  ;;  %v4884_v48 = vadd.f32 %v1153_v45, %v827_v46  ;;  %v830_v57 = vpop.f32.mrb[50].mxu0  ;;  %v1613_v45 = vshll.u32 %v4360_v34, 16 }
 0x154   : > { %v1156_v52 = vpop.f32.mrb[50].mxu1  ;;  %v3868_v4 = vpop.f32.mrb[51].mxu0 }
 0x155   : > { %v3984_v58 = vpop.f32.mrb[51].mxu1  ;;  %v4890_v3 = vadd.f32 %v1156_v52, %v830_v57  ;;  %v2342_v57 = vsel %vm2311_vm3, %v2339_v6, %v2341_v38  ;;  %v1615_v4 = vrot.slane %v1613_v45, 3 }
 0x156   : > { %4098 = vmatmul.mubr.msk.bf16.gmra.mrb[156].mxu0 %vm615_vm2, %v1590_v59  ;;  %v4361_v58 = vld [vmem:[%s4457_s4 + $0x88] sm:$0xff]  }
 0x157   : > { %4214 = vmatmul.mubr.msk.bf16.gmra.mrb[156].mxu1 %vm615_vm2, %v2338_v55  ;;  %4101 = vmatprep.mubr.msk.bf16.mxu0 %vm4391_vm0, %v5233_v1  ;;  %v2343_v6 = vrot.slane %v4361_v58, 3 }
 0x158   : > { %4217 = vmatprep.mubr.msk.bf16.mxu1 %vm4391_vm0, %v5233_v1 }
 0x159   : > { %v835_v15 = vpop.f32.mrb[52].mxu0 }
 0x15a   : > { %v1161_v12 = vpop.f32.mrb[52].mxu1  ;;  %v3871_v19 = vpop.f32.mrb[53].mxu0 }
 0x15b   : > { %v3987_v16 = vpop.f32.mrb[53].mxu1  ;;  %v4898_v17 = vadd.f32 %v1161_v12, %v835_v15  ;;  %v838_v27 = vpop.f32.mrb[54].mxu0  ;;  %v1616_v15 = vor.u32 %v1615_v4, %v1612_v0 }
 0x15c   : > { %v1164_v21 = vpop.f32.mrb[54].mxu1  ;;  %v3872_v41 = vpop.f32.mrb[55].mxu0  ;;  %v1622_v16 = vshll.u32 %v4362_v9, 16  ;;  %v4365_v9 = vld [vmem:[%s4457_s4 + $0x98] sm:$0xff]  }
 0x15d   : > { %v3988_v28 = vpop.f32.mrb[55].mxu1  ;;  %v4904_v36 = vadd.f32 %v1164_v21, %v838_v27  ;;  %v1617_v41 = vsel %vm1465_vm4, %v1607_v44, %v1616_v15 }
 0x15e   : > { %4102 = vmatmul.mubr.msk.bf16.gmra.mrb[160].mxu0 %vm615_vm2, %v1599_v29  ;;  %v2344_v29 = vsel %vm2311_vm3, %v2341_v38, %v2343_v6  ;;  %v1624_v45 = vrot.slane %v1622_v16, 3  ;;  %v2345_v38 = vrot.slane %v4363_v32, 3 }
 0x15f   : > { %4218 = vmatmul.mubr.msk.bf16.gmra.mrb[160].mxu1 %vm615_vm2, %v2340_v23  ;;  %4105 = vmatprep.mubr.msk.bf16.mxu0 %vm4391_vm0, %v5233_v1 }
 0x160   : > { %4221 = vmatprep.mubr.msk.bf16.mxu1 %vm4391_vm0, %v5233_v1  ;;  %v2346_v4 = vsel %vm2311_vm3, %v2343_v6, %v2345_v38  ;;  %v2347_v6 = vrot.slane %v4365_v9, 3 }
 0x161   : > { %v843_v47 = vpop.f32.mrb[56].mxu0 }
 0x162   : > { %v1169_v46 = vpop.f32.mrb[56].mxu1  ;;  %v3875_v55 = vpop.f32.mrb[57].mxu0 }
 0x163   : > { %v3991_v49 = vpop.f32.mrb[57].mxu1  ;;  %v4912_v52 = vadd.f32 %v1169_v46, %v843_v47  ;;  %v846_v59 = vpop.f32.mrb[58].mxu0  ;;  %v4364_v46 = vld [vmem:[%s4457_s4 + $0x98] sm:$0xff]   ;;  %v1625_v55 = vor.u32 %v1624_v45, %v1621_v39 }
 0x164   : > { %v1172_v56 = vpop.f32.mrb[58].mxu1  ;;  %v3876_v12 = vpop.f32.mrb[59].mxu0  ;;  %v1628_v44 = vshrl.u32 %v4364_v46, 16 }
 0x165   : > { %v3992_v60 = vpop.f32.mrb[59].mxu1  ;;  %v4918_v10 = vadd.f32 %v1172_v56, %v846_v59  ;;  %v1631_v56 = vshll.u32 %v4364_v46, 16  ;;  %v1626_v16 = vsel %vm1465_vm4, %v1616_v15, %v1625_v55 }
 0x166   : > { %4106 = vmatmul.mubr.msk.bf16.gmra.mrb[164].mxu0 %vm615_vm2, %v1608_v63 }
 0x167   : > { %4222 = vmatmul.mubr.msk.bf16.gmra.mrb[164].mxu1 %vm615_vm2, %v2342_v57  ;;  %4109 = vmatprep.mubr.msk.bf16.mxu0 %vm4391_vm0, %v5233_v1 }
 0x168   : > { %4225 = vmatprep.mubr.msk.bf16.mxu1 %vm4391_vm0, %v5233_v1 }
 0x169   : > { %v851_v21 = vpop.f32.mrb[60].mxu0 }
 0x16a   : > { %v1177_v19 = vpop.f32.mrb[60].mxu1  ;;  %v3879_v27 = vpop.f32.mrb[61].mxu0 }
 0x16b   : > { %v3995_v23 = vpop.f32.mrb[61].mxu1  ;;  %v4926_v24 = vadd.f32 %v1177_v19, %v851_v21  ;;  %v854_v33 = vpop.f32.mrb[62].mxu0  ;;  %v1630_v19 = vrot.slane %v1628_v44, 2  ;;  %v1633_v21 = vrot.slane %v1631_v56, 3  ;;  %v4367_v44 = vld [vmem:[%s4457_s4 + $0xa0] sm:$0xff]  }
 0x16c   : > { %v1180_v28 = vpop.f32.mrb[62].mxu1  ;;  %v3880_v49 = vpop.f32.mrb[63].mxu0  ;;  %v4366_v23 = vld [vmem:[%s4457_s4 + $0xa0] sm:$0xff]  }
 0x16d   : > { %v3996_v34 = vpop.f32.mrb[63].mxu1  ;;  %v4932_v47 = vadd.f32 %v1180_v28, %v854_v33  ;;  %v1637_v15 = vshrl.u32 %v4366_v23, 16  ;;  %v1640_v32 = vshll.u32 %v4366_v23, 16  ;;  %v2348_v49 = vsel %vm2311_vm3, %v2345_v38, %v2347_v6 }
 0x16e   : > { %4110 = vmatmul.mubr.msk.bf16.gmra.mrb[168].mxu0 %vm615_vm2, %v1617_v41  ;;  %v2349_v38 = vrot.slane %v4367_v44, 3  ;;  %v4370_v44 = vld [vmem:[%s4457_s4 + $0xb0] sm:$0xff]  }
 0x16f   : > { %4226 = vmatmul.mubr.msk.bf16.gmra.mrb[168].mxu1 %vm615_vm2, %v2344_v29  ;;  %4113 = vmatprep.mubr.msk.bf16.mxu0 %vm4391_vm0, %v5233_v1  ;;  %v1634_v29 = vor.u32 %v1633_v21, %v1630_v19 }
 0x170   : > { %4229 = vmatprep.mubr.msk.bf16.mxu1 %vm4391_vm0, %v5233_v1 }
 0x171   : > { %v859_v58 = vpop.f32.mrb[64].mxu0 }
 0x172   : > { %v1185_v57 = vpop.f32.mrb[64].mxu1  ;;  %v3883_v63 = vpop.f32.mrb[65].mxu0 }
 0x173   : > { %v3999_v59 = vpop.f32.mrb[65].mxu1  ;;  %v4940_v60 = vadd.f32 %v1185_v57, %v859_v58  ;;  %v862_v12 = vpop.f32.mrb[66].mxu0  ;;  %v1635_v58 = vsel %vm1465_vm4, %v1625_v55, %v1634_v29  ;;  %v1642_v63 = vrot.slane %v1640_v32, 3  ;;  %v2350_v32 = vsel %vm2311_vm3, %v2347_v6, %v2349_v38 }
 0x174   : > { %v1188_v0 = vpop.f32.mrb[66].mxu1  ;;  %v3884_v28 = vpop.f32.mrb[67].mxu0  ;;  %v1639_v59 = vrot.slane %v1637_v15, 2 }
 0x175   : > { %v4000_v7 = vpop.f32.mrb[67].mxu1  ;;  %v4946_v27 = vadd.f32 %v1188_v0, %v862_v12  ;;  %v4368_v0 = vld [vmem:[%s4457_s4 + $0xa8] sm:$0xff]  }
 0x176   : > { %4114 = vmatmul.mubr.msk.bf16.gmra.mrb[172].mxu0 %vm615_vm2, %v1626_v16  ;;  %v1643_v12 = vor.u32 %v1642_v63, %v1639_v59  ;;  %v1646_v55 = vshrl.u32 %v4368_v0, 16  ;;  %v1649_v7 = vshll.u32 %v4368_v0, 16  ;;  %v1658_v59 = vshll.u32 %v4370_v44, 16 }
 0x177   : > { %4230 = vmatmul.mubr.msk.bf16.gmra.mrb[172].mxu1 %vm615_vm2, %v2346_v4  ;;  %4117 = vmatprep.mubr.msk.bf16.mxu0 %vm4391_vm0, %v5233_v1 }
 0x178   : > { %4233 = vmatprep.mubr.msk.bf16.mxu1 %vm4391_vm0, %v5233_v1 }
 0x179   : > { %v867_v34 = vpop.f32.mrb[68].mxu0 }
 0x17a   : > { %v1193_v33 = vpop.f32.mrb[68].mxu1  ;;  %v3887_v45 = vpop.f32.mrb[69].mxu0 }
 0x17b   : > { %v4003_v41 = vpop.f32.mrb[69].mxu1  ;;  %v4954_v39 = vadd.f32 %v1193_v33, %v867_v34  ;;  %v870_v56 = vpop.f32.mrb[70].mxu0  ;;  %v4369_v33 = vld [vmem:[%s4457_s4 + $0xa8] sm:$0xff]   ;;  %v1644_v45 = vsel %vm1465_vm4, %v1634_v29, %v1643_v12  ;;  %v1655_v29 = vshrl.u32 %v4370_v44, 16 }
 0x17c   : > { %v1196_v46 = vpop.f32.mrb[70].mxu1  ;;  %v3888_v9 = vpop.f32.mrb[71].mxu0  ;;  %v2351_v6 = vrot.slane %v4369_v33, 3 }
 0x17d   : > { %v4004_v57 = vpop.f32.mrb[71].mxu1  ;;  %v4960_v4 = vadd.f32 %v1196_v46, %v870_v56  ;;  %v1648_v46 = vrot.slane %v1646_v55, 2  ;;  %v1657_v33 = vrot.slane %v1655_v29, 2 }
 0x17e   : > { %4118 = vmatmul.mubr.msk.bf16.gmra.mrb[176].mxu0 %vm615_vm2, %v1635_v58 }
 0x17f   : > { %4234 = vmatmul.mubr.msk.bf16.gmra.mrb[176].mxu1 %vm615_vm2, %v2348_v49  ;;  %4121 = vmatprep.mubr.msk.bf16.mxu0 %vm4391_vm0, %v5233_v1  ;;  %v1651_v49 = vrot.slane %v1649_v7, 3 }
 0x180   : > { %4237 = vmatprep.mubr.msk.bf16.mxu1 %vm4391_vm0, %v5233_v1 }
 0x181   : > { %v875_v19 = vpop.f32.mrb[72].mxu0  ;;  %v1652_v58 = vor.u32 %v1651_v49, %v1648_v46 }
 0x182   : > { %v1201_v16 = vpop.f32.mrb[72].mxu1  ;;  %v3891_v28 = vpop.f32.mrb[73].mxu0 }
 0x183   : > { %v4007_v21 = vpop.f32.mrb[73].mxu1  ;;  %v4968_v23 = vadd.f32 %v1201_v16, %v875_v19  ;;  %v878_v34 = vpop.f32.mrb[74].mxu0  ;;  %v2352_v19 = vsel %vm2311_vm3, %v2349_v38, %v2351_v6 }
 0x184   : > { %v1204_v15 = vpop.f32.mrb[74].mxu1  ;;  %v3892_v57 = vpop.f32.mrb[75].mxu0  ;;  %v4371_v21 = vld [vmem:[%s4457_s4 + $0xb0] sm:$0xff]  }
 0x185   : > { %v4008_v41 = vpop.f32.mrb[75].mxu1  ;;  %v4974_v56 = vadd.f32 %v1204_v15, %v878_v34  ;;  %v1660_v34 = vrot.slane %v1658_v59, 3  ;;  %v2353_v38 = vrot.slane %v4371_v21, 3 }
 0x186   : > { %4122 = vmatmul.mubr.msk.bf16.gmra.mrb[180].mxu0 %vm615_vm2, %v1644_v45  ;;  %v4372_v41 = vld [vmem:[%s4457_s4 + $0xb8] sm:$0xff]  }
 0x187   : > { %4238 = vmatmul.mubr.msk.bf16.gmra.mrb[180].mxu1 %vm615_vm2, %v2350_v32  ;;  %4125 = vmatprep.mubr.msk.bf16.mxu0 %vm4391_vm0, %v5233_v1  ;;  %v1653_v32 = vsel %vm1465_vm4, %v1643_v12, %v1652_v58  ;;  %v1661_v49 = vor.u32 %v1660_v34, %v1657_v33  ;;  %v1664_v12 = vshrl.u32 %v4372_v41, 16  ;;  %v1667_v44 = vshll.u32 %v4372_v41, 16  ;;  %v4374_v33 = vld [vmem:[%s4457_s4 + $0xc0] sm:$0xff]  }
 0x188   : > { %4241 = vmatprep.mubr.msk.bf16.mxu1 %vm4391_vm0, %v5233_v1 }
 0x189   : > { %v883_v0 = vpop.f32.mrb[76].mxu0  ;;  %v1662_v21 = vsel %vm1465_vm4, %v1652_v58, %v1661_v49  ;;  %v1673_v58 = vshrl.u32 %v4374_v33, 16 }
 0x18a   : > { %v1209_v63 = vpop.f32.mrb[76].mxu1  ;;  %v3895_v7 = vpop.f32.mrb[77].mxu0 }
 0x18b   : > { %v4011_v9 = vpop.f32.mrb[77].mxu1  ;;  %v4982_v55 = vadd.f32 %v1209_v63, %v883_v0  ;;  %v886_v28 = vpop.f32.mrb[78].mxu0  ;;  %v2354_v7 = vsel %vm2311_vm3, %v2351_v6, %v2353_v38 }
 0x18c   : > { %v1212_v16 = vpop.f32.mrb[78].mxu1  ;;  %v3896_v46 = vpop.f32.mrb[79].mxu0 }
 0x18d   : > { %v4012_v15 = vpop.f32.mrb[79].mxu1  ;;  %v4988_v45 = vadd.f32 %v1212_v16, %v886_v28  ;;  %v4373_v16 = vld [vmem:[%s4457_s4 + $0xb8] sm:$0xff]  }
 0x18e   : > { %4126 = vmatmul.mubr.msk.bf16.gmra.mrb[184].mxu0 %vm615_vm2, %v1653_v32  ;;  %v1666_v15 = vrot.slane %v1664_v12, 2  ;;  %v1669_v32 = vrot.slane %v1667_v44, 3  ;;  %v2355_v6 = vrot.slane %v4373_v16, 3  ;;  %v1676_v12 = vshll.u32 %v4374_v33, 16 }
 0x18f   : > { %4242 = vmatmul.mubr.msk.bf16.gmra.mrb[184].mxu1 %vm615_vm2, %v2352_v19  ;;  %4129 = vmatprep.mubr.msk.bf16.mxu0 %vm4391_vm0, %v5233_v1 }
 0x190   : > { %4245 = vmatprep.mubr.msk.bf16.mxu1 %vm4391_vm0, %v5233_v1  ;;  %v1670_v46 = vor.u32 %v1669_v32, %v1666_v15  ;;  %v4376_v15 = vld [vmem:[%s4457_s4 + $0xc8] sm:$0xff]  }
 0x191   : > { %v891_v29 = vpop.f32.mrb[80].mxu0 }
 0x192   : > { %v1217_v57 = vpop.f32.mrb[80].mxu1  ;;  %v3899_v0 = vpop.f32.mrb[81].mxu0  ;;  %v1671_v16 = vsel %vm1465_vm4, %v1661_v49, %v1670_v46  ;;  %v1682_v49 = vshrl.u32 %v4376_v15, 16 }
 0x193   : > { %v4015_v59 = vpop.f32.mrb[81].mxu1  ;;  %v4996_v63 = vadd.f32 %v1217_v57, %v891_v29  ;;  %v894_v19 = vpop.f32.mrb[82].mxu0 }
 0x194   : > { %v1220_v9 = vpop.f32.mrb[82].mxu1  ;;  %v3900_v41 = vpop.f32.mrb[83].mxu0 }
 0x195   : > { %5235 = vst [vmem:[#allocation2_spill] sm:$0xff] %v4996_v63  ;;  %v4016_v28 = vpop.f32.mrb[83].mxu1  ;;  %v5002_v34 = vadd.f32 %v1220_v9, %v894_v19  ;;  %v4375_v19 = vld [vmem:[%s4457_s4 + $0xc0] sm:$0xff]   ;;  %v1675_v41 = vrot.slane %v1673_v58, 2  ;;  %v1685_v58 = vshll.u32 %v4376_v15, 16 }
 0x196   : > { %4130 = vmatmul.mubr.msk.bf16.gmra.mrb[188].mxu0 %vm615_vm2, %v1662_v21 }
 0x197   : > { %5236 = vst [vmem:[#allocation3_spill] sm:$0xff] %v5002_v34  ;;  %4246 = vmatmul.mubr.msk.bf16.gmra.mrb[188].mxu1 %vm615_vm2, %v2354_v7  ;;  %4133 = vmatprep.mubr.msk.bf16.mxu0 %vm4391_vm0, %v5233_v1  ;;  %v2356_v7 = vsel %vm2311_vm3, %v2353_v38, %v2355_v6  ;;  %v2357_v38 = vrot.slane %v4375_v19, 3  ;;  %v1687_v34 = vrot.slane %v1685_v58, 3 }
 0x198   : > { %4249 = vmatprep.mubr.msk.bf16.mxu1 %vm4391_vm0, %v5233_v1  ;;  %v1678_v1 = vrot.slane %v1676_v12, 3 }
 0x199   : > { %v899_v57 = vpop.f32.mrb[84].mxu0 }
 0x19a   : > { %v1225_v44 = vpop.f32.mrb[84].mxu1  ;;  %v3903_v0 = vpop.f32.mrb[85].mxu0 }
 0x19b   : > { %v4019_v29 = vpop.f32.mrb[85].mxu1  ;;  %v5010_v59 = vadd.f32 %v1225_v44, %v899_v57  ;;  %v902_v28 = vpop.f32.mrb[86].mxu0  ;;  %v5239_v44 = vmov 0.0   ;;  %v1679_v57 = vor.u32 %v1678_v1, %v1675_v41  ;;  %v4378_v1 = vld [vmem:[%s4457_s4 + $0xd0] sm:$0xff]  }
 0x19c   : > { %v1228_v9 = vpop.f32.mrb[86].mxu1  ;;  %v3904_v33 = vpop.f32.mrb[87].mxu0 }
 0x19d   : > { %5237 = vst [vmem:[#allocation4_spill] sm:$0xff] %v5010_v59  ;;  %v4020_v21 = vpop.f32.mrb[87].mxu1  ;;  %v5016_v32 = vadd.f32 %v1228_v9, %v902_v28  ;;  %v1680_v19 = vsel %vm1465_vm4, %v1670_v46, %v1679_v57  ;;  %v1684_v59 = vrot.slane %v1682_v49, 2  ;;  %v1691_v46 = vshrl.u32 %v4378_v1, 16 }
 0x19e   : > { %4134 = vmatmul.mubr.msk.bf16.gmra.mrb[192].mxu0 %vm615_vm2, %v1671_v16  ;;  %v2358_v21 = vsel %vm2311_vm3, %v2355_v6, %v2357_v38  ;;  %v4377_v16 = vld [vmem:[%s4457_s4 + $0xc8] sm:$0xff]   ;;  %v1694_v49 = vshll.u32 %v4378_v1, 16 }
 0x19f   : > { %5238 = vst [vmem:[#allocation5_spill] sm:$0xff] %v5016_v32  ;;  %4250 = vmatmul.mubr.msk.bf16.gmra.mrb[192].mxu1 %vm615_vm2, %v2356_v7  ;;  %4137 = vmatprep.mubr.msk.bf16.mxu0 %vm4391_vm0, %v5239_v44  ;;  %v2359_v6 = vrot.slane %v4377_v16, 3 }
 0x1a0   : > { %4253 = vmatprep.mubr.msk.bf16.mxu1 %vm4391_vm0, %v5239_v44 }
 0x1a1   : > { %v907_v29 = vpop.f32.mrb[88].mxu0 }
 0x1a2   : > { %v1233_v12 = vpop.f32.mrb[88].mxu1  ;;  %v3907_v28 = vpop.f32.mrb[89].mxu0 }
 0x1a3   : > { %v4023_v0 = vpop.f32.mrb[89].mxu1  ;;  %v5024_v9 = vadd.f32 %v1233_v12, %v907_v29  ;;  %v910_v33 = vpop.f32.mrb[90].mxu0 }
 0x1a4   : > { %v1236_v7 = vpop.f32.mrb[90].mxu1  ;;  %v3908_v15 = vpop.f32.mrb[91].mxu0 }
 0x1a5   : > { %5240 = vst [vmem:[#allocation6_spill] sm:$0xff] %v5024_v9  ;;  %v4024_v32 = vpop.f32.mrb[91].mxu1  ;;  %v5030_v41 = vadd.f32 %v1236_v7, %v910_v33  ;;  %v4379_v33 = vld [vmem:[%s4457_s4 + $0xd0] sm:$0xff]   ;;  %v1696_v9 = vrot.slane %v1694_v49, 3 }
 0x1a6   : > { %4138 = vmatmul.mubr.msk.bf16.gmra.mrb[196].mxu0 %vm615_vm2, %v1680_v19  ;;  %v1688_v32 = vor.u32 %v1687_v34, %v1684_v59  ;;  %v4380_v34 = vld [vmem:[%s4457_s4 + $0xd8] ss:$0 sps:$4 sm:$0xff]  }
 0x1a7   : > { %5241 = vst [vmem:[#allocation7_spill] sm:$0xff] %v5030_v41  ;;  %4254 = vmatmul.mubr.msk.bf16.gmra.mrb[196].mxu1 %vm615_vm2, %v2358_v21  ;;  %4141 = vmatprep.mubr.msk.bf16.mxu0 %vm4391_vm0, %v5239_v44  ;;  %v2360_v21 = vsel %vm2311_vm3, %v2357_v38, %v2359_v6  ;;  %v1693_v41 = vrot.slane %v1691_v46, 2  ;;  %v2361_v38 = vrot.slane %v4379_v33, 3  ;;  %v1703_v46 = vshll.u32 %v4380_v34, 16 }
 0x1a8   : > { %4257 = vmatprep.mubr.msk.bf16.mxu1 %vm4391_vm0, %v5239_v44  ;;  %v1689_v16 = vsel %vm1465_vm4, %v1679_v57, %v1688_v32  ;;  %v1700_v57 = vshrl.u32 %v4380_v34, 16 }
 0x1a9   : > { %v915_v12 = vpop.f32.mrb[92].mxu0 }
 0x1aa   : > { %v1241_v58 = vpop.f32.mrb[92].mxu1  ;;  %v3911_v28 = vpop.f32.mrb[93].mxu0 }
 0x1ab   : > { %v4027_v29 = vpop.f32.mrb[93].mxu1  ;;  %v5038_v0 = vadd.f32 %v1241_v58, %v915_v12  ;;  %v918_v19 = vpop.f32.mrb[94].mxu0  ;;  %v1697_v58 = vor.u32 %v1696_v9, %v1693_v41 }
 0x1ac   : > { %v1244_v7 = vpop.f32.mrb[94].mxu1  ;;  %v3912_v1 = vpop.f32.mrb[95].mxu0 }
 0x1ad   : > { %5242 = vst [vmem:[#allocation8_spill] sm:$0xff] %v5038_v0  ;;  %v4028_v15 = vpop.f32.mrb[95].mxu1  ;;  %v5044_v59 = vadd.f32 %v1244_v7, %v918_v19  ;;  %v1698_v33 = vsel %vm1465_vm4, %v1688_v32, %v1697_v58  ;;  %v1705_v0 = vrot.slane %v1703_v46, 3 }
 0x1ae   : > { %4142 = vmatmul.mubr.msk.bf16.gmra.mrb[200].mxu0 %vm615_vm2, %v1689_v16  ;;  %v4381_v15 = vld [vmem:[%s4457_s4 + $0xd8] sm:$0x1f]  }
 0x1af   : > { %5243 = vst [vmem:[#allocation9_spill] sm:$0xff] %v5044_v59  ;;  %4258 = vmatmul.mubr.msk.bf16.gmra.mrb[200].mxu1 %vm615_vm2, %v2360_v21  ;;  %4145 = vmatprep.mubr.msk.bf16.mxu0 %vm4391_vm0, %v5239_v44  ;;  %v2362_v21 = vsel %vm2311_vm3, %v2359_v6, %v2361_v38  ;;  %v1702_v59 = vrot.slane %v1700_v57, 2  ;;  %v2363_v41 = vrot.slane %v4381_v15, 3 }
 0x1b0   : > { %4261 = vmatprep.mubr.msk.bf16.mxu1 %vm4391_vm0, %v5239_v44 }
 0x1b1   : > { %v923_v12 = vpop.f32.mrb[96].mxu0  ;;  %v1706_v6 = vor.u32 %v1705_v0, %v1702_v59 }
 0x1b2   : > { %v1249_v49 = vpop.f32.mrb[96].mxu1  ;;  %v3915_v7 = vpop.f32.mrb[97].mxu0 }
 0x1b3   : > { %v4031_v29 = vpop.f32.mrb[97].mxu1  ;;  %v5052_v28 = vadd.f32 %v1249_v49, %v923_v12  ;;  %v926_v16 = vpop.f32.mrb[98].mxu0 }
 0x1b4   : > { %v1252_v19 = vpop.f32.mrb[98].mxu1  ;;  %v3916_v9 = vpop.f32.mrb[99].mxu0  ;;  %v2364_v29 = vsel %vm2311_vm3, %v2361_v38, %v2363_v41 }
 0x1b5   : > { %v4032_v1 = vpop.f32.mrb[99].mxu1  ;;  %v5057_v63 = vadd.f32 %v1252_v19, %v926_v16 }
 0x1b6   : > { %4146 = vmatmul.mubr.msk.bf16.gmra.mrb[204].mxu0 %vm615_vm2, %v1698_v33 }
 0x1b7   : > { %4262 = vmatmul.mubr.msk.bf16.gmra.mrb[204].mxu1 %vm615_vm2, %v2362_v21  ;;  %4149 = vmatprep.mubr.msk.bf16.mxu0 %vm4391_vm0, %v5239_v44  ;;  %v1707_v21 = vsel %vm1465_vm4, %v1697_v58, %v1706_v6 }
 0x1b8   : > { %4265 = vmatprep.mubr.msk.bf16.mxu1 %vm4391_vm0, %v5239_v44 }
 0x1b9   : > { %v931_v49 = vpop.f32.mrb[100].mxu0 }
 0x1ba   : > { %v1257_v34 = vpop.f32.mrb[100].mxu1  ;;  %v3919_v46 = vpop.f32.mrb[101].mxu0 }
 0x1bb   : > { %v4035_v32 = vpop.f32.mrb[101].mxu1  ;;  %v5065_v57 = vadd.f32 %v1257_v34, %v931_v49  ;;  %v934_v7 = vpop.f32.mrb[102].mxu0 }
 0x1bc   : > { %v1260_v12 = vpop.f32.mrb[102].mxu1  ;;  %v3920_v15 = vpop.f32.mrb[103].mxu0 }
 0x1bd   : > { %v4036_v19 = vpop.f32.mrb[103].mxu1  ;;  %v5069_v16 = vadd.f32 %v1260_v12, %v934_v7 }
 0x1be   : > { %4150 = vmatmul.mubr.msk.bf16.gmra.mrb[208].mxu0 %vm615_vm2, %v1707_v21  ;;  %v5085_v19 = vld [vmem:[%s5231_s2] ss:$0 sm:$0xff] }
 0x1bf   : > { %4266 = vmatmul.mubr.msk.bf16.gmra.mrb[208].mxu1 %vm615_vm2, %v2364_v29  ;;  %4153 = vmatprep.mubr.msk.bf16.mxu0 %vm4391_vm0, %v5239_v44 }
 0x1c0   : > { %4269 = vmatprep.mubr.msk.bf16.mxu1 %vm4391_vm0, %v5239_v44 }
 0x1c1   : > { %v939_v59 = vpop.f32.mrb[104].mxu0 }
 0x1c2   : > { %v1265_v0 = vpop.f32.mrb[104].mxu1  ;;  %v3923_v33 = vpop.f32.mrb[105].mxu0 }
 0x1c3   : > { %v4039_v38 = vpop.f32.mrb[105].mxu1  ;;  %v5077_v1 = vadd.f32 %v1265_v0, %v939_v59  ;;  %v942_v9 = vpop.f32.mrb[106].mxu0 }
 0x1c4   : > { %v1268_v58 = vpop.f32.mrb[106].mxu1  ;;  %v3924_v49 = vpop.f32.mrb[107].mxu0 }
 0x1c5   : > { %v4040_v34 = vpop.f32.mrb[107].mxu1 }
 0x1c6   : > { %4154 = vmatmul.mubr.msk.bf16.gmra.mrb[212].mxu0 %vm615_vm2, %v1706_v6 }
 0x1c7   : > { %4270 = vmatmul.mubr.msk.bf16.gmra.mrb[212].mxu1 %vm615_vm2, %v2363_v41 }
 0x1c9   : > { %v1847_v46 = vpop.f32.mrb[108].mxu0 }
 0x1ca   : > { %v2504_v32 = vpop.f32.mrb[108].mxu1  ;;  %v2061_v44 = vadd.f32 %v1847_v46, %v4716_v11  ;;  %v4051_v29 = vpop.f32.mrb[109].mxu0 }
 0x1cb   : > { %v4167_v12 = vpop.f32.mrb[109].mxu1  ;;  %v1850_v21 = vpop.f32.mrb[110].mxu0 }
 0x1cc   : > { %v2507_v7 = vpop.f32.mrb[110].mxu1  ;;  %v2718_v0 = vadd.f32 %v2504_v32, %v2061_v44  ;;  %v2062_v41 = vadd.f32 %v1850_v21, %v4722_v22  ;;  %v4052_v59 = vpop.f32.mrb[111].mxu0 }
 0x1cd   : > { %v4168_v15 = vpop.f32.mrb[111].mxu1 }
 0x1ce   : > { %v2777_v6 = vadd.f32 %v5085_v19, %v2718_v0  ;;  %v2719_v38 = vadd.f32 %v2507_v7, %v2062_v41 }
 0x1d0   : > { %v2778_v33 = vadd.f32 %v5085_v19, %v2719_v38  ;;  %v2830_v34 = vmax.f32 %v2777_v6, 0.0 }
 0x1d1   : > { %v1855_v58 = vpop.f32.mrb[112].mxu0 }
 0x1d2   : > { %v2512_v11 = vpop.f32.mrb[112].mxu1  ;;  %v2831_v49 = vmax.f32 %v2778_v33, 0.0  ;;  %v2063_v46 = vadd.f32 %v1855_v58, %v4730_v31  ;;  %v4055_v12 = vpop.f32.mrb[113].mxu0 }
 0x1d3   : > { %v4171_v9 = vpop.f32.mrb[113].mxu1  ;;  %v1858_v22 = vpop.f32.mrb[114].mxu0 }
 0x1d4   : > { %v2515_v29 = vpop.f32.mrb[114].mxu1  ;;  %v3533_v44 = vpack.c.bf16 %v2831_v49, %v2830_v34  ;;  %v2720_v7 = vadd.f32 %v2512_v11, %v2063_v46  ;;  %v2064_v21 = vadd.f32 %v1858_v22, %v4736_v42  ;;  %v4056_v15 = vpop.f32.mrb[115].mxu0 }
 0x1d5   : > { %v4172_v32 = vpop.f32.mrb[115].mxu1 }
 0x1d6   : > { %3534 = vst [vmem:[%s5095_s30] sm:$0xff] %v3533_v44   ;;  %v2779_v0 = vadd.f32 %v5085_v19, %v2720_v7  ;;  %v2721_v41 = vadd.f32 %v2515_v29, %v2064_v21 }
 0x1d8   : > { %v2780_v31 = vadd.f32 %v5085_v19, %v2721_v41  ;;  %v2832_v33 = vmax.f32 %v2779_v0, 0.0 }
 0x1d9   : > { %v1863_v6 = vpop.f32.mrb[116].mxu0 }
 0x1da   : > { %v2520_v59 = vpop.f32.mrb[116].mxu1  ;;  %v2833_v58 = vmax.f32 %v2780_v31, 0.0  ;;  %v2065_v9 = vadd.f32 %v1863_v6, %v4744_v51  ;;  %v4059_v12 = vpop.f32.mrb[117].mxu0 }
 0x1db   : > { %v4175_v38 = vpop.f32.mrb[117].mxu1  ;;  %v1866_v11 = vpop.f32.mrb[118].mxu0 }
 0x1dc   : > { %v2523_v34 = vpop.f32.mrb[118].mxu1  ;;  %v3538_v42 = vpack.c.bf16 %v2833_v58, %v2832_v33  ;;  %v2722_v46 = vadd.f32 %v2520_v59, %v2065_v9  ;;  %v2066_v22 = vadd.f32 %v1866_v11, %v4750_v62  ;;  %v4060_v32 = vpop.f32.mrb[119].mxu0 }
 0x1dd   : > { %v4176_v49 = vpop.f32.mrb[119].mxu1 }
 0x1de   : > { %3660 = vst [vmem:[%s5095_s30 + $0x8] sm:$0xff] %v3538_v42   ;;  %v2781_v29 = vadd.f32 %v5085_v19, %v2722_v46  ;;  %v2723_v44 = vadd.f32 %v2523_v34, %v2066_v22 }
 0x1e0   : > { %v2782_v7 = vadd.f32 %v5085_v19, %v2723_v44  ;;  %v2834_v51 = vmax.f32 %v2781_v29, 0.0 }
 0x1e1   : > { %v1871_v15 = vpop.f32.mrb[120].mxu0 }
 0x1e2   : > { %v2528_v21 = vpop.f32.mrb[120].mxu1  ;;  %v2835_v41 = vmax.f32 %v2782_v7, 0.0  ;;  %v2067_v31 = vadd.f32 %v1871_v15, %v4758_v8  ;;  %v4063_v6 = vpop.f32.mrb[121].mxu0 }
 0x1e3   : > { %v4179_v0 = vpop.f32.mrb[121].mxu1  ;;  %v1874_v59 = vpop.f32.mrb[122].mxu0 }
 0x1e4   : > { %v2531_v38 = vpop.f32.mrb[122].mxu1  ;;  %v3543_v62 = vpack.c.bf16 %v2835_v41, %v2834_v51  ;;  %v2724_v58 = vadd.f32 %v2528_v21, %v2067_v31  ;;  %v2068_v9 = vadd.f32 %v1874_v59, %v4764_v20  ;;  %v4064_v12 = vpop.f32.mrb[123].mxu0 }
 0x1e5   : > { %v4180_v33 = vpop.f32.mrb[123].mxu1 }
 0x1e6   : > { %3661 = vst [vmem:[%s5095_s30 + $0x10] sm:$0xff] %v3543_v62   ;;  %v2783_v34 = vadd.f32 %v5085_v19, %v2724_v58  ;;  %v2725_v11 = vadd.f32 %v2531_v38, %v2068_v9 }
 0x1e8   : > { %v2784_v49 = vadd.f32 %v5085_v19, %v2725_v11  ;;  %v2836_v8 = vmax.f32 %v2783_v34, 0.0 }
 0x1e9   : > { %v1879_v46 = vpop.f32.mrb[124].mxu0 }
 0x1ea   : > { %v2536_v42 = vpop.f32.mrb[124].mxu1  ;;  %v2837_v32 = vmax.f32 %v2784_v49, 0.0  ;;  %v2069_v29 = vadd.f32 %v1879_v46, %v4772_v30  ;;  %v4067_v44 = vpop.f32.mrb[125].mxu0 }
 0x1eb   : > { %v4183_v22 = vpop.f32.mrb[125].mxu1  ;;  %v1882_v21 = vpop.f32.mrb[126].mxu0 }
 0x1ec   : > { %v2539_v7 = vpop.f32.mrb[126].mxu1  ;;  %v3548_v20 = vpack.c.bf16 %v2837_v32, %v2836_v8  ;;  %v2726_v0 = vadd.f32 %v2536_v42, %v2069_v29  ;;  %v2070_v51 = vadd.f32 %v1882_v21, %v4778_v43  ;;  %v4068_v41 = vpop.f32.mrb[127].mxu0 }
 0x1ed   : > { %v4184_v15 = vpop.f32.mrb[127].mxu1 }
 0x1ee   : > { %3662 = vst [vmem:[%s5095_s30 + $0x18] sm:$0xff] %v3548_v20   ;;  %v2785_v31 = vadd.f32 %v5085_v19, %v2726_v0  ;;  %v2727_v6 = vadd.f32 %v2539_v7, %v2070_v51 }
 0x1f0   : > { %v2786_v38 = vadd.f32 %v5085_v19, %v2727_v6  ;;  %v2838_v30 = vmax.f32 %v2785_v31, 0.0 }
 0x1f1   : > { %v1887_v33 = vpop.f32.mrb[128].mxu0 }
 0x1f2   : > { %v2544_v59 = vpop.f32.mrb[128].mxu1  ;;  %v2839_v58 = vmax.f32 %v2786_v38, 0.0  ;;  %v2071_v9 = vadd.f32 %v1887_v33, %v4786_v53  ;;  %v4071_v12 = vpop.f32.mrb[129].mxu0 }
 0x1f3   : > { %v4187_v62 = vpop.f32.mrb[129].mxu1  ;;  %v1890_v11 = vpop.f32.mrb[130].mxu0 }
 0x1f4   : > { %v2547_v34 = vpop.f32.mrb[130].mxu1  ;;  %v3553_v43 = vpack.c.bf16 %v2839_v58, %v2838_v30  ;;  %v2728_v42 = vadd.f32 %v2544_v59, %v2071_v9  ;;  %v2072_v46 = vadd.f32 %v1890_v11, %v4792_v2  ;;  %v4072_v22 = vpop.f32.mrb[131].mxu0 }
 0x1f5   : > { %v4188_v49 = vpop.f32.mrb[131].mxu1 }
 0x1f6   : > { %3663 = vst [vmem:[%s5095_s30 + $0x20] sm:$0xff] %v3553_v43   ;;  %v2787_v8 = vadd.f32 %v5085_v19, %v2728_v42  ;;  %v2729_v32 = vadd.f32 %v2547_v34, %v2072_v46 }
 0x1f8   : > { %v2788_v29 = vadd.f32 %v5085_v19, %v2729_v32  ;;  %v2840_v53 = vmax.f32 %v2787_v8, 0.0 }
 0x1f9   : > { %v1895_v7 = vpop.f32.mrb[132].mxu0 }
 0x1fa   : > { %v2552_v44 = vpop.f32.mrb[132].mxu1  ;;  %v2841_v15 = vmax.f32 %v2788_v29, 0.0  ;;  %v2073_v20 = vadd.f32 %v1895_v7, %v4800_v13  ;;  %v4075_v0 = vpop.f32.mrb[133].mxu0 }
 0x1fb   : > { %v4191_v21 = vpop.f32.mrb[133].mxu1  ;;  %v1898_v41 = vpop.f32.mrb[134].mxu0 }
 0x1fc   : > { %v2555_v51 = vpop.f32.mrb[134].mxu1  ;;  %v3558_v2 = vpack.c.bf16 %v2841_v15, %v2840_v53  ;;  %v2730_v6 = vadd.f32 %v2552_v44, %v2073_v20  ;;  %v2074_v38 = vadd.f32 %v1898_v41, %v4806_v26  ;;  %v4076_v59 = vpop.f32.mrb[135].mxu0 }
 0x1fd   : > { %v4192_v31 = vpop.f32.mrb[135].mxu1 }
 0x1fe   : > { %3664 = vst [vmem:[%s5095_s30 + $0x28] sm:$0xff] %v3558_v2   ;;  %v2789_v33 = vadd.f32 %v5085_v19, %v2730_v6  ;;  %v2731_v62 = vadd.f32 %v2555_v51, %v2074_v38 }
 0x200   : > { %v2790_v30 = vadd.f32 %v5085_v19, %v2731_v62  ;;  %v2842_v13 = vmax.f32 %v2789_v33, 0.0 }
 0x201   : > { %v1903_v9 = vpop.f32.mrb[136].mxu0 }
 0x202   : > { %v2560_v58 = vpop.f32.mrb[136].mxu1  ;;  %v2843_v34 = vmax.f32 %v2790_v30, 0.0  ;;  %v2075_v11 = vadd.f32 %v1903_v9, %v4814_v37  ;;  %v4079_v49 = vpop.f32.mrb[137].mxu0 }
 0x203   : > { %v4195_v12 = vpop.f32.mrb[137].mxu1  ;;  %v1906_v42 = vpop.f32.mrb[138].mxu0 }
 0x204   : > { %v2563_v43 = vpop.f32.mrb[138].mxu1  ;;  %v3563_v26 = vpack.c.bf16 %v2843_v34, %v2842_v13  ;;  %v2732_v22 = vadd.f32 %v2560_v58, %v2075_v11  ;;  %v2076_v8 = vadd.f32 %v1906_v42, %v4820_v50  ;;  %v4080_v32 = vpop.f32.mrb[139].mxu0 }
 0x205   : > { %v4196_v46 = vpop.f32.mrb[139].mxu1 }
 0x206   : > { %3665 = vst [vmem:[%s5095_s30 + $0x30] sm:$0xff] %v3563_v26   ;;  %v2791_v29 = vadd.f32 %v5085_v19, %v2732_v22  ;;  %v2733_v44 = vadd.f32 %v2563_v43, %v2076_v8 }
 0x208   : > { %v2792_v7 = vadd.f32 %v5085_v19, %v2733_v44  ;;  %v2844_v37 = vmax.f32 %v2791_v29, 0.0 }
 0x209   : > { %v1911_v53 = vpop.f32.mrb[140].mxu0 }
 0x20a   : > { %v2568_v21 = vpop.f32.mrb[140].mxu1  ;;  %v2845_v20 = vmax.f32 %v2792_v7, 0.0  ;;  %v2077_v0 = vadd.f32 %v1911_v53, %v4828_v61  ;;  %v4083_v51 = vpop.f32.mrb[141].mxu0 }
 0x20b   : > { %v4199_v15 = vpop.f32.mrb[141].mxu1  ;;  %v1914_v31 = vpop.f32.mrb[142].mxu0 }
 0x20c   : > { %v2571_v41 = vpop.f32.mrb[142].mxu1  ;;  %v3568_v50 = vpack.c.bf16 %v2845_v20, %v2844_v37  ;;  %v2734_v6 = vadd.f32 %v2568_v21, %v2077_v0  ;;  %v2078_v38 = vadd.f32 %v1914_v31, %v4834_v14  ;;  %v4084_v59 = vpop.f32.mrb[143].mxu0 }
 0x20d   : > { %v4200_v2 = vpop.f32.mrb[143].mxu1 }
 0x20e   : > { %3666 = vst [vmem:[%s5095_s30 + $0x38] sm:$0xff] %v3568_v50   ;;  %v2793_v33 = vadd.f32 %v5085_v19, %v2734_v6  ;;  %v2735_v62 = vadd.f32 %v2571_v41, %v2078_v38 }
 0x210   : > { %v2794_v30 = vadd.f32 %v5085_v19, %v2735_v62  ;;  %v2846_v61 = vmax.f32 %v2793_v33, 0.0 }
 0x211   : > { %v1919_v9 = vpop.f32.mrb[144].mxu0 }
 0x212   : > { %v2576_v58 = vpop.f32.mrb[144].mxu1  ;;  %v2847_v13 = vmax.f32 %v2794_v30, 0.0  ;;  %v2079_v34 = vadd.f32 %v1919_v9, %v4842_v25  ;;  %v4087_v11 = vpop.f32.mrb[145].mxu0 }
 0x213   : > { %v4203_v12 = vpop.f32.mrb[145].mxu1  ;;  %v1922_v43 = vpop.f32.mrb[146].mxu0 }
 0x214   : > { %v2579_v49 = vpop.f32.mrb[146].mxu1  ;;  %v3573_v14 = vpack.c.bf16 %v2847_v13, %v2846_v61  ;;  %v2736_v46 = vadd.f32 %v2576_v58, %v2079_v34  ;;  %v2080_v26 = vadd.f32 %v1922_v43, %v4848_v40  ;;  %v4088_v22 = vpop.f32.mrb[147].mxu0 }
 0x215   : > { %v4204_v42 = vpop.f32.mrb[147].mxu1 }
 0x216   : > { %3667 = vst [vmem:[%s5095_s30 + $0x40] sm:$0xff] %v3573_v14   ;;  %v2795_v8 = vadd.f32 %v5085_v19, %v2736_v46  ;;  %v2737_v32 = vadd.f32 %v2579_v49, %v2080_v26 }
 0x218   : > { %v2796_v29 = vadd.f32 %v5085_v19, %v2737_v32  ;;  %v2848_v25 = vmax.f32 %v2795_v8, 0.0 }
 0x219   : > { %v1927_v7 = vpop.f32.mrb[148].mxu0 }
 0x21a   : > { %v2584_v44 = vpop.f32.mrb[148].mxu1  ;;  %v2849_v53 = vmax.f32 %v2796_v29, 0.0  ;;  %v2081_v15 = vadd.f32 %v1927_v7, %v4856_v54  ;;  %v4091_v37 = vpop.f32.mrb[149].mxu0 }
 0x21b   : > { %v4207_v21 = vpop.f32.mrb[149].mxu1  ;;  %v1930_v0 = vpop.f32.mrb[150].mxu0 }
 0x21c   : > { %v2587_v20 = vpop.f32.mrb[150].mxu1  ;;  %v3578_v40 = vpack.c.bf16 %v2849_v53, %v2848_v25  ;;  %v2738_v41 = vadd.f32 %v2584_v44, %v2081_v15  ;;  %v2082_v31 = vadd.f32 %v1930_v0, %v4862_v5  ;;  %v4092_v2 = vpop.f32.mrb[151].mxu0 }
 0x21d   : > { %v4208_v51 = vpop.f32.mrb[151].mxu1 }
 0x21e   : > { %3668 = vst [vmem:[%s5095_s30 + $0x48] sm:$0xff] %v3578_v40   ;;  %v2797_v50 = vadd.f32 %v5085_v19, %v2738_v41  ;;  %v2739_v6 = vadd.f32 %v2587_v20, %v2082_v31 }
 0x220   : > { %v2798_v38 = vadd.f32 %v5085_v19, %v2739_v6  ;;  %v2850_v54 = vmax.f32 %v2797_v50, 0.0 }
 0x221   : > { %v1935_v33 = vpop.f32.mrb[152].mxu0 }
 0x222   : > { %v2592_v59 = vpop.f32.mrb[152].mxu1  ;;  %v2851_v30 = vmax.f32 %v2798_v38, 0.0  ;;  %v2083_v58 = vadd.f32 %v1935_v33, %v4870_v18  ;;  %v4095_v9 = vpop.f32.mrb[153].mxu0 }
 0x223   : > { %v4211_v62 = vpop.f32.mrb[153].mxu1  ;;  %v1938_v61 = vpop.f32.mrb[154].mxu0 }
 0x224   : > { %v2595_v12 = vpop.f32.mrb[154].mxu1  ;;  %v3583_v5 = vpack.c.bf16 %v2851_v30, %v2850_v54  ;;  %v2740_v34 = vadd.f32 %v2592_v59, %v2083_v58  ;;  %v2084_v11 = vadd.f32 %v1938_v61, %v4876_v35  ;;  %v4096_v49 = vpop.f32.mrb[155].mxu0 }
 0x225   : > { %v4212_v13 = vpop.f32.mrb[155].mxu1 }
 0x226   : > { %3669 = vst [vmem:[%s5095_s30 + $0x50] sm:$0xff] %v3583_v5   ;;  %v2799_v43 = vadd.f32 %v5085_v19, %v2740_v34  ;;  %v2741_v42 = vadd.f32 %v2595_v12, %v2084_v11 }
 0x228   : > { %v2800_v14 = vadd.f32 %v5085_v19, %v2741_v42  ;;  %v2852_v18 = vmax.f32 %v2799_v43, 0.0 }
 0x229   : > { %v1943_v26 = vpop.f32.mrb[156].mxu0 }
 0x22a   : > { %v2600_v46 = vpop.f32.mrb[156].mxu1  ;;  %v2853_v8 = vmax.f32 %v2800_v14, 0.0  ;;  %v2085_v32 = vadd.f32 %v1943_v26, %v4884_v48  ;;  %v4099_v29 = vpop.f32.mrb[157].mxu0 }
 0x22b   : > { %v4215_v22 = vpop.f32.mrb[157].mxu1  ;;  %v1946_v7 = vpop.f32.mrb[158].mxu0 }
 0x22c   : > { %v2603_v44 = vpop.f32.mrb[158].mxu1  ;;  %v3588_v35 = vpack.c.bf16 %v2853_v8, %v2852_v18  ;;  %v2742_v25 = vadd.f32 %v2600_v46, %v2085_v32  ;;  %v2086_v53 = vadd.f32 %v1946_v7, %v4890_v3  ;;  %v4100_v15 = vpop.f32.mrb[159].mxu0 }
 0x22d   : > { %v4216_v21 = vpop.f32.mrb[159].mxu1 }
 0x22e   : > { %3670 = vst [vmem:[%s5095_s30 + $0x58] sm:$0xff] %v3588_v35   ;;  %v2801_v37 = vadd.f32 %v5085_v19, %v2742_v25  ;;  %v2743_v20 = vadd.f32 %v2603_v44, %v2086_v53 }
 0x230   : > { %v2802_v0 = vadd.f32 %v5085_v19, %v2743_v20  ;;  %v2854_v48 = vmax.f32 %v2801_v37, 0.0 }
 0x231   : > { %v1951_v40 = vpop.f32.mrb[160].mxu0 }
 0x232   : > { %v2608_v51 = vpop.f32.mrb[160].mxu1  ;;  %v2855_v31 = vmax.f32 %v2802_v0, 0.0  ;;  %v2087_v2 = vadd.f32 %v1951_v40, %v4898_v17  ;;  %v4103_v50 = vpop.f32.mrb[161].mxu0 }
 0x233   : > { %v4219_v41 = vpop.f32.mrb[161].mxu1  ;;  %v1954_v38 = vpop.f32.mrb[162].mxu0 }
 0x234   : > { %v2611_v6 = vpop.f32.mrb[162].mxu1  ;;  %v3593_v3 = vpack.c.bf16 %v2855_v31, %v2854_v48  ;;  %v2744_v33 = vadd.f32 %v2608_v51, %v2087_v2  ;;  %v2088_v62 = vadd.f32 %v1954_v38, %v4904_v36  ;;  %v4104_v54 = vpop.f32.mrb[163].mxu0 }
 0x235   : > { %v4220_v59 = vpop.f32.mrb[163].mxu1 }
 0x236   : > { %3671 = vst [vmem:[%s5095_s30 + $0x60] sm:$0xff] %v3593_v3   ;;  %v2803_v30 = vadd.f32 %v5085_v19, %v2744_v33  ;;  %v2745_v58 = vadd.f32 %v2611_v6, %v2088_v62 }
 0x238   : > { %v2804_v9 = vadd.f32 %v5085_v19, %v2745_v58  ;;  %v2856_v17 = vmax.f32 %v2803_v30, 0.0 }
 0x239   : > { %v1959_v61 = vpop.f32.mrb[164].mxu0 }
 0x23a   : > { %v2616_v12 = vpop.f32.mrb[164].mxu1  ;;  %v2857_v5 = vmax.f32 %v2804_v9, 0.0  ;;  %v2089_v34 = vadd.f32 %v1959_v61, %v4912_v52  ;;  %v4107_v11 = vpop.f32.mrb[165].mxu0 }
 0x23b   : > { %v4223_v13 = vpop.f32.mrb[165].mxu1  ;;  %v1962_v43 = vpop.f32.mrb[166].mxu0 }
 0x23c   : > { %v2619_v49 = vpop.f32.mrb[166].mxu1  ;;  %v3598_v36 = vpack.c.bf16 %v2857_v5, %v2856_v17  ;;  %v2746_v14 = vadd.f32 %v2616_v12, %v2089_v34  ;;  %v2090_v46 = vadd.f32 %v1962_v43, %v4918_v10  ;;  %v4108_v26 = vpop.f32.mrb[167].mxu0 }
 0x23d   : > { %v4224_v42 = vpop.f32.mrb[167].mxu1 }
 0x23e   : > { %3672 = vst [vmem:[%s5095_s30 + $0x68] sm:$0xff] %v3598_v36   ;;  %v2805_v22 = vadd.f32 %v5085_v19, %v2746_v14  ;;  %v2747_v18 = vadd.f32 %v2619_v49, %v2090_v46 }
 0x240   : > { %v2806_v8 = vadd.f32 %v5085_v19, %v2747_v18  ;;  %v2858_v52 = vmax.f32 %v2805_v22, 0.0 }
 0x241   : > { %v1967_v29 = vpop.f32.mrb[168].mxu0 }
 0x242   : > { %v2624_v32 = vpop.f32.mrb[168].mxu1  ;;  %v2859_v7 = vmax.f32 %v2806_v8, 0.0  ;;  %v2091_v21 = vadd.f32 %v1967_v29, %v4926_v24  ;;  %v4111_v35 = vpop.f32.mrb[169].mxu0 }
 0x243   : > { %v4227_v44 = vpop.f32.mrb[169].mxu1  ;;  %v1970_v53 = vpop.f32.mrb[170].mxu0 }
 0x244   : > { %v2627_v25 = vpop.f32.mrb[170].mxu1  ;;  %v3603_v10 = vpack.c.bf16 %v2859_v7, %v2858_v52  ;;  %v2748_v37 = vadd.f32 %v2624_v32, %v2091_v21  ;;  %v2092_v20 = vadd.f32 %v1970_v53, %v4932_v47  ;;  %v4112_v0 = vpop.f32.mrb[171].mxu0 }
 0x245   : > { %v4228_v15 = vpop.f32.mrb[171].mxu1 }
 0x246   : > { %3673 = vst [vmem:[%s5095_s30 + $0x70] sm:$0xff] %v3603_v10   ;;  %v2807_v51 = vadd.f32 %v5085_v19, %v2748_v37  ;;  %v2749_v40 = vadd.f32 %v2627_v25, %v2092_v20 }
 0x248   : > { %v2808_v41 = vadd.f32 %v5085_v19, %v2749_v40  ;;  %v2860_v24 = vmax.f32 %v2807_v51, 0.0 }
 0x249   : > { %v1975_v31 = vpop.f32.mrb[172].mxu0 }
 0x24a   : > { %v2632_v48 = vpop.f32.mrb[172].mxu1  ;;  %v2861_v50 = vmax.f32 %v2808_v41, 0.0  ;;  %v2093_v6 = vadd.f32 %v1975_v31, %v4940_v60  ;;  %v4115_v38 = vpop.f32.mrb[173].mxu0 }
 0x24b   : > { %v4231_v2 = vpop.f32.mrb[173].mxu1  ;;  %v1978_v3 = vpop.f32.mrb[174].mxu0 }
 0x24c   : > { %v2635_v59 = vpop.f32.mrb[174].mxu1  ;;  %v3608_v47 = vpack.c.bf16 %v2861_v50, %v2860_v24  ;;  %v2750_v62 = vadd.f32 %v2632_v48, %v2093_v6  ;;  %v2094_v54 = vadd.f32 %v1978_v3, %v4946_v27  ;;  %v4116_v30 = vpop.f32.mrb[175].mxu0 }
 0x24d   : > { %v4232_v33 = vpop.f32.mrb[175].mxu1 }
 0x24e   : > { %3674 = vst [vmem:[%s5095_s30 + $0x78] sm:$0xff] %v3608_v47   ;;  %v2809_v58 = vadd.f32 %v5085_v19, %v2750_v62  ;;  %v2751_v9 = vadd.f32 %v2635_v59, %v2094_v54 }
 0x250   : > { %v2810_v12 = vadd.f32 %v5085_v19, %v2751_v9  ;;  %v2862_v60 = vmax.f32 %v2809_v58, 0.0 }
 0x251   : > { %v1983_v13 = vpop.f32.mrb[176].mxu0 }
 0x252   : > { %v2640_v61 = vpop.f32.mrb[176].mxu1  ;;  %v2863_v5 = vmax.f32 %v2810_v12, 0.0  ;;  %v2095_v34 = vadd.f32 %v1983_v13, %v4954_v39  ;;  %v4119_v11 = vpop.f32.mrb[177].mxu0  ;;  %v5244_v12 = vld [vmem:[#allocation2_spill] sm:$0xff] }
 0x253   : > { %v4235_v17 = vpop.f32.mrb[177].mxu1  ;;  %v1986_v43 = vpop.f32.mrb[178].mxu0  ;;  %v5245_v11 = vld [vmem:[#allocation3_spill] sm:$0xff] }
 0x254   : > { %v2643_v49 = vpop.f32.mrb[178].mxu1  ;;  %v3613_v27 = vpack.c.bf16 %v2863_v5, %v2862_v60  ;;  %v2752_v36 = vadd.f32 %v2640_v61, %v2095_v34  ;;  %v2096_v14 = vadd.f32 %v1986_v43, %v4960_v4  ;;  %v4120_v46 = vpop.f32.mrb[179].mxu0 }
 0x255   : > { %v4236_v42 = vpop.f32.mrb[179].mxu1 }
 0x256   : > { %3675 = vst [vmem:[%s5095_s30 + $0x80] sm:$0xff] %v3613_v27   ;;  %v2811_v26 = vadd.f32 %v5085_v19, %v2752_v36  ;;  %v2753_v22 = vadd.f32 %v2643_v49, %v2096_v14 }
 0x258   : > { %v2812_v18 = vadd.f32 %v5085_v19, %v2753_v22  ;;  %v2864_v39 = vmax.f32 %v2811_v26, 0.0 }
 0x259   : > { %v1991_v32 = vpop.f32.mrb[180].mxu0 }
 0x25a   : > { %v2648_v8 = vpop.f32.mrb[180].mxu1  ;;  %v2865_v44 = vmax.f32 %v2812_v18, 0.0  ;;  %v2097_v52 = vadd.f32 %v1991_v32, %v4968_v23  ;;  %v4123_v7 = vpop.f32.mrb[181].mxu0 }
 0x25b   : > { %v4239_v29 = vpop.f32.mrb[181].mxu1  ;;  %v1994_v35 = vpop.f32.mrb[182].mxu0 }
 0x25c   : > { %v2651_v21 = vpop.f32.mrb[182].mxu1  ;;  %v3618_v4 = vpack.c.bf16 %v2865_v44, %v2864_v39  ;;  %v2754_v53 = vadd.f32 %v2648_v8, %v2097_v52  ;;  %v2098_v15 = vadd.f32 %v1994_v35, %v4974_v56  ;;  %v4124_v10 = vpop.f32.mrb[183].mxu0  ;;  %v5246_v8 = vld [vmem:[#allocation4_spill] sm:$0xff]  ;;  %v5247_v35 = vld [vmem:[#allocation5_spill] sm:$0xff] }
 0x25d   : > { %v4240_v25 = vpop.f32.mrb[183].mxu1 }
 0x25e   : > { %3676 = vst [vmem:[%s5095_s30 + $0x88] sm:$0xff] %v3618_v4   ;;  %v2813_v37 = vadd.f32 %v5085_v19, %v2754_v53  ;;  %v2755_v20 = vadd.f32 %v2651_v21, %v2098_v15 }
 0x260   : > { %v2814_v0 = vadd.f32 %v5085_v19, %v2755_v20  ;;  %v2866_v23 = vmax.f32 %v2813_v37, 0.0 }
 0x261   : > { %v1999_v40 = vpop.f32.mrb[184].mxu0 }
 0x262   : > { %v2656_v51 = vpop.f32.mrb[184].mxu1  ;;  %v2867_v48 = vmax.f32 %v2814_v0, 0.0  ;;  %v2099_v31 = vadd.f32 %v1999_v40, %v4982_v55  ;;  %v4127_v2 = vpop.f32.mrb[185].mxu0 }
 0x263   : > { %v4243_v41 = vpop.f32.mrb[185].mxu1  ;;  %v2002_v50 = vpop.f32.mrb[186].mxu0 }
 0x264   : > { %v2659_v24 = vpop.f32.mrb[186].mxu1  ;;  %v3623_v56 = vpack.c.bf16 %v2867_v48, %v2866_v23  ;;  %v2756_v38 = vadd.f32 %v2656_v51, %v2099_v31  ;;  %v2100_v59 = vadd.f32 %v2002_v50, %v4988_v45  ;;  %v4128_v3 = vpop.f32.mrb[187].mxu0  ;;  %v5248_v41 = vld [vmem:[#allocation6_spill] sm:$0xff] }
 0x265   : > { %v4244_v6 = vpop.f32.mrb[187].mxu1 }
 0x266   : > { %3677 = vst [vmem:[%s5095_s30 + $0x90] sm:$0xff] %v3623_v56   ;;  %v2815_v33 = vadd.f32 %v5085_v19, %v2756_v38  ;;  %v2757_v47 = vadd.f32 %v2659_v24, %v2100_v59  ;;  %v5249_v56 = vld [vmem:[#allocation7_spill] sm:$0xff] }
 0x268   : > { %v2816_v62 = vadd.f32 %v5085_v19, %v2757_v47  ;;  %v2868_v55 = vmax.f32 %v2815_v33, 0.0 }
 0x269   : > { %v2007_v30 = vpop.f32.mrb[188].mxu0 }
 0x26a   : > { %v2664_v54 = vpop.f32.mrb[188].mxu1  ;;  %v2869_v9 = vmax.f32 %v2816_v62, 0.0  ;;  %v2101_v61 = vadd.f32 %v2007_v30, %v5244_v12  ;;  %v4131_v13 = vpop.f32.mrb[189].mxu0 }
 0x26b   : > { %v4247_v58 = vpop.f32.mrb[189].mxu1  ;;  %v2010_v60 = vpop.f32.mrb[190].mxu0 }
 0x26c   : > { %v2667_v17 = vpop.f32.mrb[190].mxu1  ;;  %v3628_v45 = vpack.c.bf16 %v2869_v9, %v2868_v55  ;;  %v2758_v34 = vadd.f32 %v2664_v54, %v2101_v61  ;;  %v2102_v49 = vadd.f32 %v2010_v60, %v5245_v11  ;;  %v4132_v43 = vpop.f32.mrb[191].mxu0  ;;  %v5250_v9 = vld [vmem:[#allocation8_spill] sm:$0xff] }
 0x26d   : > { %v4248_v5 = vpop.f32.mrb[191].mxu1 }
 0x26e   : > { %3678 = vst [vmem:[%s5095_s30 + $0x98] sm:$0xff] %v3628_v45   ;;  %v2817_v42 = vadd.f32 %v5085_v19, %v2758_v34  ;;  %v2759_v27 = vadd.f32 %v2667_v17, %v2102_v49  ;;  %v5251_v34 = vld [vmem:[#allocation9_spill] sm:$0xff] }
 0x270   : > { %v2818_v36 = vadd.f32 %v5085_v19, %v2759_v27  ;;  %v2870_v22 = vmax.f32 %v2817_v42, 0.0 }
 0x271   : > { %v2015_v46 = vpop.f32.mrb[192].mxu0 }
 0x272   : > { %v2672_v14 = vpop.f32.mrb[192].mxu1  ;;  %v2871_v18 = vmax.f32 %v2818_v36, 0.0  ;;  %v2103_v32 = vadd.f32 %v2015_v46, %v5246_v8  ;;  %v4135_v29 = vpop.f32.mrb[193].mxu0 }
 0x273   : > { %v4251_v26 = vpop.f32.mrb[193].mxu1  ;;  %v2018_v44 = vpop.f32.mrb[194].mxu0 }
 0x274   : > { %v2675_v39 = vpop.f32.mrb[194].mxu1  ;;  %v3633_v7 = vpack.c.bf16 %v2871_v18, %v2870_v22  ;;  %v2760_v21 = vadd.f32 %v2672_v14, %v2103_v32  ;;  %v2104_v25 = vadd.f32 %v2018_v44, %v5247_v35  ;;  %v4136_v4 = vpop.f32.mrb[195].mxu0 }
 0x275   : > { %v4252_v52 = vpop.f32.mrb[195].mxu1 }
 0x276   : > { %3679 = vst [vmem:[%s5095_s30 + $0xa0] sm:$0xff] %v3633_v7   ;;  %v2819_v53 = vadd.f32 %v5085_v19, %v2760_v21  ;;  %v2761_v15 = vadd.f32 %v2675_v39, %v2104_v25 }
 0x278   : > { %v2820_v10 = vadd.f32 %v5085_v19, %v2761_v15  ;;  %v2872_v51 = vmax.f32 %v2819_v53, 0.0 }
 0x279   : > { %v2023_v20 = vpop.f32.mrb[196].mxu0 }
 0x27a   : > { %v2680_v37 = vpop.f32.mrb[196].mxu1  ;;  %v2873_v40 = vmax.f32 %v2820_v10, 0.0  ;;  %v2105_v23 = vadd.f32 %v2023_v20, %v5248_v41  ;;  %v4139_v48 = vpop.f32.mrb[197].mxu0 }
 0x27b   : > { %v4255_v0 = vpop.f32.mrb[197].mxu1  ;;  %v2026_v2 = vpop.f32.mrb[198].mxu0 }
 0x27c   : > { %v2683_v31 = vpop.f32.mrb[198].mxu1  ;;  %v3638_v50 = vpack.c.bf16 %v2873_v40, %v2872_v51  ;;  %v2762_v6 = vadd.f32 %v2680_v37, %v2105_v23  ;;  %v2106_v38 = vadd.f32 %v2026_v2, %v5249_v56  ;;  %v4140_v59 = vpop.f32.mrb[199].mxu0 }
 0x27d   : > { %v4256_v24 = vpop.f32.mrb[199].mxu1 }
 0x27e   : > { %3680 = vst [vmem:[%s5095_s30 + $0xa8] sm:$0xff] %v3638_v50   ;;  %v2821_v3 = vadd.f32 %v5085_v19, %v2762_v6  ;;  %v2763_v33 = vadd.f32 %v2683_v31, %v2106_v38 }
 0x280   : > { %v2822_v47 = vadd.f32 %v5085_v19, %v2763_v33  ;;  %v2874_v58 = vmax.f32 %v2821_v3, 0.0 }
 0x281   : > { %v2031_v54 = vpop.f32.mrb[200].mxu0 }
 0x282   : > { %v2688_v62 = vpop.f32.mrb[200].mxu1  ;;  %v2875_v55 = vmax.f32 %v2822_v47, 0.0  ;;  %v2107_v12 = vadd.f32 %v2031_v54, %v5250_v9  ;;  %v4143_v61 = vpop.f32.mrb[201].mxu0 }
 0x283   : > { %v4259_v30 = vpop.f32.mrb[201].mxu1  ;;  %v2034_v17 = vpop.f32.mrb[202].mxu0 }
 0x284   : > { %v2691_v13 = vpop.f32.mrb[202].mxu1  ;;  %v3643_v5 = vpack.c.bf16 %v2875_v55, %v2874_v58  ;;  %v2764_v45 = vadd.f32 %v2688_v62, %v2107_v12  ;;  %v2108_v11 = vadd.f32 %v2034_v17, %v5251_v34  ;;  %v4144_v49 = vpop.f32.mrb[203].mxu0  ;;  %v3151_v12 = vld [vmem:[%s5095_s30 + $0xd0] sm:$0x3] }
 0x285   : > { %v4260_v60 = vpop.f32.mrb[203].mxu1 }
 0x286   : > { %3681 = vst [vmem:[%s5095_s30 + $0xb0] sm:$0xff] %v3643_v5   ;;  %v2823_v43 = vadd.f32 %v5085_v19, %v2764_v45  ;;  %v2765_v42 = vadd.f32 %v2691_v13, %v2108_v11 }
 0x288   : > { %v2824_v27 = vadd.f32 %v5085_v19, %v2765_v42  ;;  %v2876_v26 = vmax.f32 %v2823_v43, 0.0 }
 0x289   : > { %v2039_v14 = vpop.f32.mrb[204].mxu0 }
 0x28a   : > { %v2696_v36 = vpop.f32.mrb[204].mxu1  ;;  %v2877_v22 = vmax.f32 %v2824_v27, 0.0  ;;  %v2109_v18 = vadd.f32 %v2039_v14, %v5052_v28  ;;  %v4147_v8 = vpop.f32.mrb[205].mxu0 }
 0x28b   : > { %v4263_v46 = vpop.f32.mrb[205].mxu1  ;;  %v2042_v29 = vpop.f32.mrb[206].mxu0 }
 0x28c   : > { %v2699_v32 = vpop.f32.mrb[206].mxu1  ;;  %v3648_v44 = vpack.c.bf16 %v2877_v22, %v2876_v26  ;;  %v2766_v52 = vadd.f32 %v2696_v36, %v2109_v18  ;;  %v2110_v7 = vadd.f32 %v2042_v29, %v5057_v63  ;;  %v4148_v21 = vpop.f32.mrb[207].mxu0 }
 0x28d   : > { %v4264_v39 = vpop.f32.mrb[207].mxu1 }
 0x28e   : > { %3682 = vst [vmem:[%s5095_s30 + $0xb8] sm:$0xff] %v3648_v44   ;;  %v2825_v35 = vadd.f32 %v5085_v19, %v2766_v52  ;;  %v2767_v25 = vadd.f32 %v2699_v32, %v2110_v7 }
 0x290   : > { %v2826_v4 = vadd.f32 %v5085_v19, %v2767_v25  ;;  %v2878_v28 = vmax.f32 %v2825_v35, 0.0 }
 0x291   : > { %v2047_v15 = vpop.f32.mrb[208].mxu0 }
 0x292   : > { %v2704_v53 = vpop.f32.mrb[208].mxu1  ;;  %v2879_v37 = vmax.f32 %v2826_v4, 0.0  ;;  %v2111_v20 = vadd.f32 %v2047_v15, %v5065_v57  ;;  %v4151_v0 = vpop.f32.mrb[209].mxu0 }
 0x293   : > { %v4267_v10 = vpop.f32.mrb[209].mxu1  ;;  %v2050_v40 = vpop.f32.mrb[210].mxu0 }
 0x294   : > { %v2707_v51 = vpop.f32.mrb[210].mxu1  ;;  %v3653_v63 = vpack.c.bf16 %v2879_v37, %v2878_v28  ;;  %v2768_v23 = vadd.f32 %v2704_v53, %v2111_v20  ;;  %v2112_v48 = vadd.f32 %v2050_v40, %v5069_v16  ;;  %v4152_v31 = vpop.f32.mrb[211].mxu0 }
 0x295   : > { %v4268_v41 = vpop.f32.mrb[211].mxu1 }
 0x296   : > { %3683 = vst [vmem:[%s5095_s30 + $0xc0] sm:$0xff] %v3653_v63   ;;  %v2827_v2 = vadd.f32 %v5085_v19, %v2768_v23  ;;  %v2769_v24 = vadd.f32 %v2707_v51, %v2112_v48 }
 0x298   : > { %v2828_v50 = vadd.f32 %v5085_v19, %v2769_v24  ;;  %v2880_v57 = vmax.f32 %v2827_v2, 0.0 }
 0x299   : > { %v2055_v56 = vpop.f32.mrb[212].mxu0 }
 0x29a   : > { %v2712_v6 = vpop.f32.mrb[212].mxu1  ;;  %v2881_v59 = vmax.f32 %v2828_v50, 0.0  ;;  %v2113_v3 = vadd.f32 %v2055_v56, %v5077_v1  ;;  %v4155_v33 = vpop.f32.mrb[213].mxu0 }
 0x29b   : > { %v4271_v38 = vpop.f32.mrb[213].mxu1  ;;  %v2058_v16 = vpop.f32.mrb[214].mxu0 }
 0x29c   : > { %v2715_v47 = vpop.f32.mrb[214].mxu1  ;;  %v3658_v54 = vpack.c.bf16 %v2881_v59, %v2880_v57  ;;  %v2770_v30 = vadd.f32 %v2712_v6, %v2113_v3  ;;  %v4156_v58 = vpop.f32.mrb[215].mxu0 }
 0x29d   : > { %v4272_v62 = vpop.f32.mrb[215].mxu1 }
 0x29e   : > { %3684 = vst [vmem:[%s5095_s30 + $0xc8] sm:$0xff] %v3658_v54   ;;  %v2829_v55 = vadd.f32 %v5085_v19, %v2770_v30 }
 0x2a0   : > { %v2882_v9 = vmax.f32 %v2829_v55, 0.0 }
 0x2a2   : > { %v3529_v61 = vpack.c.bf16 %v2882_v9, %v2882_v9 }
 0x2a4   : > { %v3152_v13 = vsel %vm3150_vm7, %v3529_v61, %v3151_v12 }
 0x2a5   : > { %3153 = vst [vmem:[%s5095_s30 + $0xd0] sm:$0x3] %v3152_v13 }
 0x2a6 PF: > { %s13_s12 = sadd.s32 1, %s4388_s12  }
 0x2a7   : > { %p10_p4 = scmp.ge.s32.totalorder %s13_s12, 4  }
 0x2a9   :  { %12 = sbr.rel (!%p10_p4) target bundleno = 1 (0x1), region = 62 }

// kernel: dqn_forward.5
= control target key start
LH: loop header
LB: loop body
LE: loop exit
PB: predicated region body
PF: predicated region fallthrough
CT: control target
= control target key end

     0   :  { %s1542_s12 = smov 0   ;;  %s1775_s0 = inlined_call_operand.vmem [shape: bf16[2,100,128], index: 0, kind: input, shape index: {}]   ;;  %s1776_s1 = inlined_call_operand.vmem [shape: bf16[512,128], index: 1, kind: input, shape index: {}]   ;;  %s1777_s2 = inlined_call_operand.vmem [shape: f32[1,128], index: 2, kind: input, shape index: {}]   ;;  %s1778_s3 = inlined_call_operand.vmem [shape: bf16[2,89,128], index: 3, kind: output, shape index: {}]  }
   0x1 LB: > { %s1149_s13 = sadd.s32 4294967295, %s1520_s12   ;;  %p1153_p0 = scmp.ge.s32.totalorder %s1520_s12, 1  ;;  %s1520_s12 = sphi %s1542_s12, %s13_s12  }
   0x2   : > { %p137_p1 = scmp.lt.s32.totalorder %s1520_s12, 3 }
   0x4   : > { %p138_p2 = pnand %p1153_p0, %p137_p1 }
   0x5   : > { %v1470_v0 = vld [vmem:[%s1776_s1 + $0x40] sm:$0xff] (!%p138_p2)   ;;  %v1472_v2 = vld [vmem:[%s1776_s1 + $0x48] sm:$0xff] (!%p138_p2)   ;;  %p161_p3 = scmp.lt.s32.totalorder (!%p138_p2), %s1149_s13, 1  ;;  %v1474_v4 = vld [vmem:[%s1776_s1 + $0x50] sm:$0xff] (!%p138_p2)   ;;  %vm623_vm0 = vcmask (!%p138_p2), 1046528   ;;  %vm1088_vm3 = vcmask (!%p138_p2), 1040384  }
   0x6   : > { %141 = sbr.rel (%p138_p2) target bundleno = 311 (0x137), region = 32  ;;  %v1471_v1 = vld [vmem:[%s1776_s1 + $0x80] sm:$0xff] (!%p138_p2)   ;;  %1312 = vmatprep.subr.bf16.mxu1 (!%p138_p2), %v1470_v0  ;;  %v1473_v3 = vld [vmem:[%s1776_s1 + $0x88] sm:$0xff] (!%p138_p2)   ;;  %v1475_v5 = vld [vmem:[%s1776_s1 + $0x90] sm:$0xff] (!%p138_p2)   ;;  %vm247_vm1 = vsmask.f32 (!%p138_p2), 7424 }
   0x7   : > { %1368 = vmatprep.subr.bf16.mxu0 (!%p138_p2), %v1471_v1  ;;  %1313 = vmatpush3.bf16.msra.mxu1 (!%p138_p2), %v1470_v0  ;;  %v1476_v6 = vld [vmem:[%s1776_s1 + $0x58] sm:$0xff] (!%p138_p2)   ;;  %v1478_v8 = vld [vmem:[%s1776_s1 + $0x60] sm:$0xff] (!%p138_p2)   ;;  %v1480_v10 = vld [vmem:[%s1776_s1 + $0x68] sm:$0xff] (!%p138_p2)   ;;  %vm798_vm2 = vsmask.f32 (!%p138_p2), 6400 }
   0x8   : > { %1369 = vmatpush3.bf16.msra.mxu0 (!%p138_p2), %v1471_v1  ;;  %1314 = vmatprep.subr.bf16.mxu1 (!%p138_p2), %v1472_v2  ;;  %v1477_v7 = vld [vmem:[%s1776_s1 + $0x98] sm:$0xff] (!%p138_p2)   ;;  %v1479_v9 = vld [vmem:[%s1776_s1 + $0xa0] sm:$0xff] (!%p138_p2)   ;;  %v1481_v11 = vld [vmem:[%s1776_s1 + $0xa8] sm:$0xff] (!%p138_p2)   ;;  %vm1089_vm4 = vsmask.f32 (!%p138_p2), 256 }
   0x9   : > { %1370 = vmatprep.subr.bf16.mxu0 (!%p138_p2), %v1473_v3  ;;  %v1482_v14 = vld [vmem:[%s1776_s1 + $0x70] sm:$0xff] (!%p138_p2)   ;;  %v1484_v24 = vld [vmem:[%s1776_s1 + $0x78] sm:$0xff] (!%p138_p2)   ;;  %v1488_v36 = vld [vmem:[%s1776_s1] sm:$0xff] (!%p138_p2)  }
   0xa   : > { %v1483_v19 = vld [vmem:[%s1776_s1 + $0xb0] sm:$0xff] (!%p138_p2)   ;;  %v1485_v30 = vld [vmem:[%s1776_s1 + $0xb8] sm:$0xff] (!%p138_p2)   ;;  %v1491_v38 = vld [vmem:[%s1776_s1 + $0xc0] sm:$0xff] (!%p138_p2)  }
   0xb   : > { %1315 = vmatpush3.bf16.msra.mxu1 (!%p138_p2), %v1472_v2  ;;  %v1494_v40 = vld [vmem:[%s1776_s1 + $0x8] sm:$0xff] (!%p138_p2)   ;;  %v1496_v50 = vld [vmem:[%s1776_s1 + $0x10] sm:$0xff] (!%p138_p2)   ;;  %v1498_v62 = vld [vmem:[%s1776_s1 + $0x18] sm:$0xff] (!%p138_p2)  }
   0xc   : > { %1371 = vmatpush3.bf16.msra.mxu0 (!%p138_p2), %v1473_v3  ;;  %1316 = vmatprep.subr.bf16.mxu1 (!%p138_p2), %v1474_v4  ;;  %v1495_v45 = vld [vmem:[%s1776_s1 + $0xc8] sm:$0xff] (!%p138_p2)   ;;  %v1497_v55 = vld [vmem:[%s1776_s1 + $0xd0] sm:$0xff] (!%p138_p2)   ;;  %v1499_v1 = vld [vmem:[%s1776_s1 + $0xd8] sm:$0xff] (!%p138_p2)  }
   0xd   : > { %s1780_s13 = smov (!%p161_p3, %s1149_s13), 1  ;;  %1372 = vmatprep.subr.bf16.mxu0 %v1475_v5  ;;  %vm1090_vm5 = vmand %vm1088_vm3, %vm1089_vm4 }
   0xe   : > { %s1460_s30 = smul.u32 52, %s1780_s13 }
   0xf   : > { %1317 = vmatpush3.bf16.msra.mxu1 %v1474_v4  ;;  %s1461_s7 = smul.u32 48, %s1780_s13 }
  0x10   : > { %1373 = vmatpush3.bf16.msra.mxu0 %v1475_v5  ;;  %1318 = vmatprep.subr.bf16.mxu1 %v1476_v6  ;;  %s1589_s14 = scalar_lea.vmem %s1775_s0, %s1460_s30 }
  0x11   : > { %1374 = vmatprep.subr.bf16.mxu0 %v1477_v7  ;;  %v1595_v12 = vld [vmem:[%s1589_s14] sm:$0xff]   ;;  %v1598_v13 = vld [vmem:[%s1589_s14 + $0x8] sm:$0xff]   ;;  %v1621_v27 = vld [vmem:[%s1589_s14 + $0x10] sm:$0xff]   ;;  %s1754_s10 = scalar_lea.vmem %s1778_s3, %s1461_s7 }
  0x12   : > { %v249_v15 = vshrl.u32 %v1595_v12, 16  ;;  %v251_v16 = vshll.u32 %v1595_v12, 16  ;;  %v256_v17 = vshll.u32 %v1598_v13, 16  ;;  %v1607_v18 = vld [vmem:[%s1589_s14 + $0xc] sm:$0xff]   ;;  %v1613_v22 = vld [vmem:[%s1589_s14 + $0x4] sm:$0xfe]  }
  0x13   : > { %1319 = vmatpush3.bf16.msra.mxu1 %v1476_v6  ;;  %v625_v23 = vrot.slane %v1607_v18, 1  ;;  %v624_v26 = vrot.slane %v1613_v22, 1  ;;  %v260_v28 = vshrl.u32 %v1598_v13, 16  ;;  %v1625_v29 = vld [vmem:[%s1589_s14 + $0x14] sm:$0xff]   ;;  %v264_v33 = vshll.u32 %v1621_v27, 16  ;;  %v1650_v44 = vld [vmem:[%s1589_s14 + $0x1c] sm:$0xff]  }
  0x14   : > { %1375 = vmatpush3.bf16.msra.mxu0 %v1477_v7  ;;  %1320 = vmatprep.subr.bf16.mxu1 %v1478_v8  ;;  %v253_v20 = vrot.slane %v251_v16, 1  ;;  %v258_v21 = vrot.slane %v256_v17, 1  ;;  %v627_v37 = vrot.slane %v1625_v29, 1  ;;  %v268_v39 = vshrl.u32 %v1621_v27, 16  ;;  %v1646_v42 = vld [vmem:[%s1589_s14 + $0x18] sm:$0xff]   ;;  %v1657_v48 = vld [vmem:[%s1589_s14 + $0x20] sm:$0xff]  }
  0x15   : > { %1376 = vmatprep.subr.bf16.mxu0 %v1479_v9  ;;  %v626_v32 = vsel %vm623_vm0, %v624_v26, %v625_v23  ;;  %v266_v35 = vrot.slane %v264_v33, 1  ;;  %v272_v47 = vshll.u32 %v1646_v42, 16  ;;  %v276_v49 = vshrl.u32 %v1646_v42, 16  ;;  %v1665_v52 = vld [vmem:[%s1589_s14 + $0x24] sm:$0xff]   ;;  %v1689_v5 = vld [vmem:[%s1589_s14 + $0x2c] sm:$0x3f]  }
  0x16   : > { %v254_v25 = vor.u32 %v253_v20, %v249_v15  ;;  %1384 = vmatprep.mubr.bf16.mxu0 %v626_v32  ;;  %v262_v34 = vor.u32 %v260_v28, %v258_v21  ;;  %v628_v43 = vsel %vm623_vm0, %v625_v23, %v627_v37  ;;  %v629_v51 = vrot.slane %v1650_v44, 1  ;;  %v1685_v3 = vld [vmem:[%s1589_s14 + $0x28] sm:$0x1f]   ;;  %v1503_v15 = vld [vmem:[%s1776_s1 + $0x20] sm:$0xff]  }
  0x17   : > { %1321 = vmatpush3.bf16.msra.mxu1 %v1478_v8  ;;  %v270_v46 = vor.u32 %v268_v39, %v266_v35  ;;  %v274_v53 = vrot.slane %v272_v47, 1  ;;  %v280_v54 = vshll.u32 %v1657_v48, 16  ;;  %v631_v57 = vrot.slane %v1665_v52, 1  ;;  %v1506_v26 = vld [vmem:[%s1776_s1 + $0x28] sm:$0xff]   ;;  %v1513_v39 = vld [vmem:[%s1776_s1 + $0xf8] sm:$0xff]  }
  0x18   : > { %1377 = vmatpush3.bf16.msra.mxu0 %v1479_v9  ;;  %1322 = vmatprep.subr.bf16.mxu1 %v1480_v10  ;;  %v259_v31 = vsel %vm247_vm1, %v254_v25, %v258_v21  ;;  %v267_v41 = vsel %vm247_vm1, %v262_v34, %v266_v35  ;;  %v630_v56 = vsel %vm623_vm0, %v627_v37, %v629_v51  ;;  %v800_v61 = vshrl.u32 %v1613_v22, 16  ;;  %v1507_v28 = vld [vmem:[%s1776_s1 + $0xe8] sm:$0xff]   ;;  %v1511_v34 = vld [vmem:[%s1776_s1 + $0xf0] sm:$0xff]   ;;  %v1512_v37 = vld [vmem:[%s1776_s1 + $0x38] sm:$0xff]  }
  0x19   : > { %1378 = vmatprep.subr.bf16.mxu0 %v1481_v11  ;;  %1328 = vmatprep.mubr.bf16.mxu1 %v259_v31  ;;  %v275_v58 = vsel %vm247_vm1, %v270_v46, %v274_v53  ;;  %v278_v59 = vor.u32 %v276_v49, %v274_v53  ;;  %v282_v60 = vrot.slane %v280_v54, 1  ;;  %v284_v63 = vshrl.u32 %v1657_v48, 16  ;;  %v1510_v31 = vld [vmem:[%s1776_s1 + $0x30] sm:$0xff]  }
  0x1a   : > { %v803_v0 = vshll.u32 %v1613_v22, 16  ;;  %v632_v4 = vsel %vm623_vm0, %v629_v51, %v631_v57  ;;  %v288_v7 = vshll.u32 %v1685_v3, 16  ;;  %v802_v8 = vrot.slane %v800_v61, 1 }
  0x1b   : > { %1323 = vmatpush3.bf16.msra.mxu1 %v1480_v10  ;;  %v283_v2 = vsel %vm247_vm1, %v278_v59, %v282_v60  ;;  %v286_v6 = vor.u32 %v284_v63, %v282_v60  ;;  %v633_v9 = vrot.slane %v1689_v5, 1  ;;  %v292_v10 = vshrl.u32 %v1685_v3, 16 }
  0x1c   : > { %1379 = vmatpush3.bf16.msra.mxu0 %v1481_v11  ;;  %1324 = vmatprep.subr.bf16.mxu1 %v1482_v14  ;;  %v290_v11 = vrot.slane %v288_v7, 1  ;;  %v808_v17 = vshrl.u32 %v1607_v18, 16  ;;  %v811_v21 = vshll.u32 %v1607_v18, 16  ;;  %v817_v32 = vshrl.u32 %v1625_v29, 16 }
  0x1d   : > { %1380 = vmatprep.subr.bf16.mxu0 %v1483_v19  ;;  %v634_v16 = vsel %vm623_vm0, %v631_v57, %v633_v9  ;;  %v820_v33 = vshll.u32 %v1625_v29, 16  ;;  %v826_v35 = vshrl.u32 %v1650_v44, 16  ;;  %v844_v46 = vshrl.u32 %v1689_v5, 16 }
  0x1e   : > { %v291_v20 = vsel %vm247_vm1, %v286_v6, %v290_v11  ;;  %v294_v22 = vor.u32 %v292_v10, %v290_v11  ;;  %v810_v23 = vrot.slane %v808_v17, 1  ;;  %v813_v25 = vrot.slane %v811_v21, 2 }
  0x1f   : > { %1325 = vmatpush3.bf16.msra.mxu1 %v1482_v14  ;;  %v805_v14 = vrot.slane %v803_v0, 2  ;;  %v819_v29 = vrot.slane %v817_v32, 1  ;;  %v847_v47 = vshll.u32 %v1689_v5, 16  ;;  %v846_v54 = vrot.slane %v844_v46, 1 }
  0x20   : > { %1381 = vmatpush3.bf16.msra.mxu0 %v1483_v19  ;;  %1326 = vmatprep.subr.bf16.mxu1 %v1484_v24  ;;  %v1505_v19 = vld [vmem:[%s1776_s1 + $0xe0] sm:$0xff]  }
  0x21   : > { %1382 = vmatprep.subr.bf16.mxu0 %v1485_v30 }
  0x23   : > { %1327 = vmatpush3.bf16.msra.mxu1 %v1484_v24  ;;  %v806_v24 = vor.u32 %v805_v14, %v802_v8 }
  0x24   : > { %1383 = vmatpush3.bf16.msra.mxu0 %v1485_v30  ;;  %1340 = vmatprep.subr.bf16.mxu1 %v1488_v36  ;;  %v814_v30 = vor.u32 %v813_v25, %v810_v23 }
  0x25   : > { %1396 = vmatprep.subr.bf16.mxu0 %v1491_v38 }
  0x26   : > { %1329 = vmatmul.mubr.bf16.vlgmr.msra.gmra.mrb[0].mxu1 %v267_v41  ;;  %v815_v18 = vsel %vm798_vm2, %v806_v24, %v814_v30 }
  0x27   : > { %1341 = vmatpush3.bf16.msra.mxu1 %v1488_v36  ;;  %1385 = vmatmul.mubr.bf16.vlgmr.msra.gmra.mrb[0].mxu0 %v628_v43  ;;  %v829_v36 = vshll.u32 %v1650_v44, 16  ;;  %v835_v43 = vshrl.u32 %v1665_v52, 16  ;;  %v838_v44 = vshll.u32 %v1665_v52, 16 }
  0x28   : > { %1397 = vmatpush3.bf16.msra.mxu0 %v1491_v38  ;;  %1342 = vmatprep.subr.bf16.mxu1 %v1494_v40  ;;  %v822_v38 = vrot.slane %v820_v33, 2 }
  0x29   : > { %1398 = vmatprep.subr.bf16.mxu0 %v1495_v45  ;;  %1388 = vmatprep.mubr.bf16.mxu0 %v630_v56  ;;  %v840_v51 = vrot.slane %v838_v44, 2 }
  0x2a   : > { %1332 = vmatprep.mubr.bf16.mxu1 %v275_v58  ;;  %v823_v41 = vor.u32 %v822_v38, %v819_v29 }
  0x2b   : > { %1343 = vmatpush3.bf16.msra.mxu1 %v1494_v40  ;;  %v831_v40 = vrot.slane %v829_v36, 2 }
  0x2c   : > { %1399 = vmatpush3.bf16.msra.mxu0 %v1495_v45  ;;  %1344 = vmatprep.subr.bf16.mxu1 %v1496_v50  ;;  %v824_v49 = vsel %vm798_vm2, %v814_v30, %v823_v41 }
  0x2d   : > { %1400 = vmatprep.subr.bf16.mxu0 %v1497_v55 }
  0x2e   : > { %1333 = vmatmul.mubr.bf16.gmra.mrb[4].mxu1 %v283_v2 }
  0x2f   : > { %1345 = vmatpush3.bf16.msra.mxu1 %v1496_v50  ;;  %1389 = vmatmul.mubr.bf16.gmra.mrb[4].mxu0 %v632_v4  ;;  %v837_v50 = vrot.slane %v835_v43, 1 }
  0x30   : > { %1401 = vmatpush3.bf16.msra.mxu0 %v1497_v55  ;;  %1346 = vmatprep.subr.bf16.mxu1 %v1498_v62  ;;  %v849_v55 = vrot.slane %v847_v47, 2 }
  0x31   : > { %1402 = vmatprep.subr.bf16.mxu0 %v1499_v1  ;;  %1392 = vmatprep.mubr.bf16.mxu0 %v634_v16  ;;  %v841_v52 = vor.u32 %v840_v51, %v837_v50 }
  0x32   : > { %1336 = vmatprep.mubr.bf16.mxu1 %v291_v20  ;;  %v850_v56 = vor.u32 %v849_v55, %v846_v54 }
  0x33   : > { %1347 = vmatpush3.bf16.msra.mxu1 %v1498_v62 }
  0x34   : > { %1403 = vmatpush3.bf16.msra.mxu0 %v1499_v1  ;;  %1348 = vmatprep.subr.bf16.mxu1 %v1503_v15  ;;  %v851_v58 = vsel %vm798_vm2, %v841_v52, %v850_v56 }
  0x35   : > { %1404 = vmatprep.subr.bf16.mxu0 %v1505_v19 }
  0x36   : > { %1337 = vmatmul.mubr.bf16.gmra.mrb[8].mxu1 %v294_v22 }
  0x37   : > { %1349 = vmatpush3.bf16.msra.mxu1 %v1503_v15  ;;  %1393 = vmatmul.mubr.bf16.gmra.mrb[8].mxu0 %v633_v9 }
  0x38   : > { %1405 = vmatpush3.bf16.msra.mxu0 %v1505_v19  ;;  %1350 = vmatprep.subr.bf16.mxu1 %v1506_v26 }
  0x39   : > { %1406 = vmatprep.subr.bf16.mxu0 %v1507_v28  ;;  %1356 = vmatprep.mubr.bf16.mxu1 %v1595_v12  ;;  %v828_v12 = vrot.slane %v826_v35, 1 }
  0x3a   : > { %1412 = vmatprep.mubr.bf16.mxu0 %v815_v18 }
  0x3b   : > { %1351 = vmatpush3.bf16.msra.mxu1 %v1506_v26  ;;  %v832_v45 = vor.u32 %v831_v40, %v828_v12 }
  0x3c   : > { %1407 = vmatpush3.bf16.msra.mxu0 %v1507_v28  ;;  %1352 = vmatprep.subr.bf16.mxu1 %v1510_v31 }
  0x3d   : > { %1408 = vmatprep.subr.bf16.mxu0 %v1511_v34  ;;  %v833_v53 = vsel %vm798_vm2, %v823_v41, %v832_v45  ;;  %v842_v57 = vsel %vm798_vm2, %v832_v45, %v841_v52 }
  0x3f   : > { %1353 = vmatpush3.bf16.msra.mxu1 %v1510_v31 }
  0x40   : > { %1409 = vmatpush3.bf16.msra.mxu0 %v1511_v34  ;;  %1354 = vmatprep.subr.bf16.mxu1 %v1512_v37 }
  0x41   : > { %1410 = vmatprep.subr.bf16.mxu0 %v1513_v39 }
  0x43   : > { %1355 = vmatpush3.bf16.msra.mxu1 %v1512_v37 }
  0x44   : > { %1411 = vmatpush3.bf16.msra.mxu0 %v1513_v39 }
  0x46   : > { %1357 = vmatmul.mubr.bf16.vlgmr.msra.gmra.mrb[0].mxu1 %v1598_v13 }
  0x47   : > { %1413 = vmatmul.mubr.bf16.vlgmr.msra.gmra.mrb[0].mxu0 %v824_v49  ;;  %1360 = vmatprep.mubr.bf16.mxu1 %v1621_v27  ;;  %v1744_v27 = vld [vmem:[%s1777_s2] ss:$0 sm:$0xff] }
  0x48   : > { %1416 = vmatprep.mubr.bf16.mxu0 %v833_v53 }
  0x4e   : > { %1361 = vmatmul.mubr.bf16.gmra.mrb[4].mxu1 %v1646_v42 }
  0x4f   : > { %1417 = vmatmul.mubr.bf16.gmra.mrb[4].mxu0 %v842_v57  ;;  %1364 = vmatprep.mubr.bf16.mxu1 %v1657_v48 }
  0x50   : > { %1420 = vmatprep.mubr.bf16.mxu0 %v851_v58 }
  0x56   : > { %1365 = vmatmul.mubr.bf16.gmra.mrb[8].mxu1 %v1685_v3 }
  0x57   : > { %1421 = vmatmul.mubr.bf16.gmra.mrb[8].mxu0 %v850_v56 }
 0x119   : > { %v1358_v13 = vpop.f32.mrb[0].mxu1 }
 0x11a   : > { %v1414_v59 = vpop.f32.mrb[0].mxu0  ;;  %v518_v60 = vpop.f32.mrb[1].mxu1 }
 0x11b   : > { %v1424_v61 = vadd.f32 %v1414_v59, %v1358_v13  ;;  %v940_v62 = vpop.f32.mrb[1].mxu0  ;;  %v1359_v63 = vpop.f32.mrb[2].mxu1  ;;  %v1091_v59 = vld [vmem:[%s1754_s10 + $0x2c] sm:$0x1] }
 0x11c   : > { %v1425_v42 = vadd.f32 %v940_v62, %v518_v60  ;;  %v1415_v0 = vpop.f32.mrb[2].mxu0  ;;  %v521_v1 = vpop.f32.mrb[3].mxu1 }
 0x11d   : > { %v1007_v48 = vadd.f32 %v1424_v61, %v1744_v27  ;;  %v1426_v2 = vadd.f32 %v1415_v0, %v1359_v63  ;;  %v943_v3 = vpop.f32.mrb[3].mxu0 }
 0x11e   : > { %v1005_v4 = vadd.f32 %v1425_v42, %v1744_v27  ;;  %v1427_v5 = vadd.f32 %v943_v3, %v521_v1 }
 0x11f   : > { %v1008_v6 = vadd.f32 %v1426_v2, %v1744_v27  ;;  %v1019_v8 = vmax.f32 %v1007_v48, 0.0 }
 0x120   : > { %v1006_v7 = vadd.f32 %v1427_v5, %v1744_v27  ;;  %v1017_v11 = vmax.f32 %v1005_v4, 0.0 }
 0x121   : > { %v1020_v9 = vmax.f32 %v1008_v6, 0.0  ;;  %v1362_v10 = vpop.f32.mrb[4].mxu1 }
 0x122   : > { %v1018_v14 = vmax.f32 %v1006_v7, 0.0  ;;  %v1418_v15 = vpop.f32.mrb[4].mxu0  ;;  %v534_v16 = vpop.f32.mrb[5].mxu1 }
 0x123   : > { %v1235_v17 = vpack.c.bf16 %v1020_v9, %v1019_v8  ;;  %v1428_v19 = vadd.f32 %v1418_v15, %v1362_v10  ;;  %v956_v20 = vpop.f32.mrb[5].mxu0  ;;  %v1363_v21 = vpop.f32.mrb[6].mxu1 }
 0x124   : > { %v1230_v22 = vpack.c.bf16 %v1018_v14, %v1017_v11  ;;  %v1429_v23 = vadd.f32 %v956_v20, %v534_v16  ;;  %v1419_v24 = vpop.f32.mrb[6].mxu0  ;;  %v537_v25 = vpop.f32.mrb[7].mxu1 }
 0x125   : > { %1252 = vst [vmem:[%s1754_s10 + $0x8] sm:$0xff] %v1235_v17   ;;  %v1011_v26 = vadd.f32 %v1428_v19, %v1744_v27  ;;  %v1430_v28 = vadd.f32 %v1419_v24, %v1363_v21  ;;  %v959_v30 = vpop.f32.mrb[7].mxu0 }
 0x126   : > { %1231 = vst [vmem:[%s1754_s10] sm:$0xff] %v1230_v22   ;;  %v1009_v18 = vadd.f32 %v1429_v23, %v1744_v27  ;;  %v1431_v31 = vadd.f32 %v959_v30, %v537_v25 }
 0x127   : > { %v1012_v32 = vadd.f32 %v1430_v28, %v1744_v27  ;;  %v1023_v34 = vmax.f32 %v1011_v26, 0.0 }
 0x128   : > { %v1010_v33 = vadd.f32 %v1431_v31, %v1744_v27  ;;  %v1021_v37 = vmax.f32 %v1009_v18, 0.0 }
 0x129   : > { %v1024_v35 = vmax.f32 %v1012_v32, 0.0  ;;  %v1366_v36 = vpop.f32.mrb[8].mxu1 }
 0x12a   : > { %v1022_v29 = vmax.f32 %v1010_v33, 0.0  ;;  %v1422_v38 = vpop.f32.mrb[8].mxu0  ;;  %v550_v39 = vpop.f32.mrb[9].mxu1 }
 0x12b   : > { %v1245_v12 = vpack.c.bf16 %v1024_v35, %v1023_v34  ;;  %v1432_v40 = vadd.f32 %v1422_v38, %v1366_v36  ;;  %v972_v41 = vpop.f32.mrb[9].mxu0  ;;  %v1367_v43 = vpop.f32.mrb[10].mxu1 }
 0x12c   : > { %v1240_v44 = vpack.c.bf16 %v1022_v29, %v1021_v37  ;;  %v1433_v45 = vadd.f32 %v972_v41, %v550_v39  ;;  %v1423_v46 = vpop.f32.mrb[10].mxu0  ;;  %v553_v47 = vpop.f32.mrb[11].mxu1 }
 0x12d   : > { %1254 = vst [vmem:[%s1754_s10 + $0x18] sm:$0xff] %v1245_v12   ;;  %v1015_v49 = vadd.f32 %v1432_v40, %v1744_v27  ;;  %v1434_v50 = vadd.f32 %v1423_v46, %v1367_v43  ;;  %v975_v51 = vpop.f32.mrb[11].mxu0 }
 0x12e   : > { %1253 = vst [vmem:[%s1754_s10 + $0x10] sm:$0xff] %v1240_v44   ;;  %v1013_v53 = vadd.f32 %v1433_v45, %v1744_v27  ;;  %v1435_v54 = vadd.f32 %v975_v51, %v553_v47 }
 0x12f   : > { %v1027_v55 = vmax.f32 %v1015_v49, 0.0  ;;  %v1016_v52 = vadd.f32 %v1434_v50, %v1744_v27 }
 0x130   : > { %v1014_v56 = vadd.f32 %v1435_v54, %v1744_v27  ;;  %v1025_v13 = vmax.f32 %v1013_v53, 0.0 }
 0x131   : > { %v1225_v57 = vpack.c.bf16 %v1027_v55, %v1027_v55  ;;  %v1028_v58 = vmax.f32 %v1016_v52, 0.0 }
 0x132   : > { %v1026_v60 = vmax.f32 %v1014_v56, 0.0 }
 0x133   : > { %1087 = vst [vmem:[%s1754_s10 + $0x28] sm:$0xf] %v1225_v57  ;;  %v1226_v61 = vpack.c.bf16 %v1028_v58, %v1028_v58 }
 0x134   : > { %v1250_v62 = vpack.c.bf16 %v1026_v60, %v1025_v13 }
 0x135   : > { %v1092_v63 = vsel %vm1090_vm5, %v1226_v61, %v1091_v59 }
 0x136   : > { %1093 = vst [vmem:[%s1754_s10 + $0x2c] sm:$0x1] %v1092_v63  ;;  %1255 = vst [vmem:[%s1754_s10 + $0x20] sm:$0xff] %v1250_v62  }
 0x137 PF: > { %s13_s12 = sadd.s32 1, %s1520_s12  }
 0x138   : > { %p10_p4 = scmp.ge.s32.totalorder %s13_s12, 4  }
 0x13a   :  { %12 = sbr.rel (!%p10_p4) target bundleno = 1 (0x1), region = 62 }

// kernel: dqn_forward.6
= control target key start
LH: loop header
LB: loop body
LE: loop exit
PB: predicated region body
PF: predicated region fallthrough
CT: control target
= control target key end

     0   :  { %s2508_s12 = smov 0   ;;  %s2926_s0 = inlined_call_operand.vmem [shape: bf16[2,81,128], index: 0, kind: input, shape index: {}]   ;;  %s2927_s1 = inlined_call_operand.vmem [shape: bf16[1152,128], index: 1, kind: input, shape index: {}]   ;;  %s2928_s2 = inlined_call_operand.vmem [shape: f32[1,128], index: 2, kind: input, shape index: {}]   ;;  %s2929_s3 = inlined_call_operand.vmem [shape: bf16[2,61,128], index: 3, kind: output, shape index: {}]  }
   0x1 LB: > { %s1836_s13 = sadd.s32 4294967295, %s2486_s12   ;;  %p1840_p0 = scmp.ge.s32.totalorder %s2486_s12, 1  ;;  %s2486_s12 = sphi %s2508_s12, %s13_s12  }
   0x2   : > { %p137_p1 = scmp.lt.s32.totalorder %s2486_s12, 3 }
   0x4   : > { %p138_p2 = pnand %p1840_p0, %p137_p1 }
   0x5   : > { %v2387_v0 = vld [vmem:[%s2927_s1 + $0x40] sm:$0xff] (!%p138_p2)   ;;  %p161_p3 = scmp.lt.s32.totalorder (!%p138_p2), %s1836_s13, 1  ;;  %v2389_v2 = vld [vmem:[%s2927_s1 + $0x48] sm:$0xff] (!%p138_p2)   ;;  %v2391_v4 = vld [vmem:[%s2927_s1 + $0x50] sm:$0xff] (!%p138_p2)   ;;  %vm233_vm0 = vsmask.f32 (!%p138_p2), 7424 }
   0x6   : > { %141 = sbr.rel (%p138_p2) target bundleno = 391 (0x187), region = 32  ;;  %v2388_v1 = vld [vmem:[%s2927_s1 + $0x100] sm:$0xff] (!%p138_p2)   ;;  %2082 = vmatprep.subr.bf16.mxu1 (!%p138_p2), %v2387_v0  ;;  %v2390_v3 = vld [vmem:[%s2927_s1 + $0x108] sm:$0xff] (!%p138_p2)   ;;  %v2392_v5 = vld [vmem:[%s2927_s1 + $0x110] sm:$0xff] (!%p138_p2)   ;;  %vm523_vm1 = vcmask (!%p138_p2), 1046528   ;;  %vm1579_vm3 = vcmask (!%p138_p2), 1045504  }
   0x7   : > { %2178 = vmatprep.subr.bf16.mxu0 (!%p138_p2), %v2388_v1  ;;  %2083 = vmatpush3.bf16.msra.mxu1 (!%p138_p2), %v2387_v0  ;;  %v2393_v6 = vld [vmem:[%s2927_s1 + $0x58] sm:$0xff] (!%p138_p2)   ;;  %v2395_v8 = vld [vmem:[%s2927_s1 + $0x60] sm:$0xff] (!%p138_p2)   ;;  %v2397_v10 = vld [vmem:[%s2927_s1 + $0x68] sm:$0xff] (!%p138_p2)   ;;  %vm1028_vm2 = vsmask.f32 (!%p138_p2), 6400  ;;  %vm1775_vm4 = vcmask (!%p138_p2), 1042432  }
   0x8   : > { %2179 = vmatpush3.bf16.msra.mxu0 (!%p138_p2), %v2388_v1  ;;  %2084 = vmatprep.subr.bf16.mxu1 (!%p138_p2), %v2389_v2  ;;  %v2394_v7 = vld [vmem:[%s2927_s1 + $0x118] sm:$0xff] (!%p138_p2)   ;;  %v2396_v9 = vld [vmem:[%s2927_s1 + $0x120] sm:$0xff] (!%p138_p2)   ;;  %v2398_v13 = vld [vmem:[%s2927_s1 + $0x128] sm:$0xff] (!%p138_p2)   ;;  %vm1776_vm5 = vsmask.f32 (!%p138_p2), 2304 }
   0x9   : > { %2180 = vmatprep.subr.bf16.mxu0 (!%p138_p2), %v2390_v3  ;;  %v2399_v16 = vld [vmem:[%s2927_s1 + $0x70] sm:$0xff] (!%p138_p2)   ;;  %v2401_v28 = vld [vmem:[%s2927_s1 + $0x78] sm:$0xff] (!%p138_p2)   ;;  %v2405_v40 = vld [vmem:[%s2927_s1] sm:$0xff] (!%p138_p2)  }
   0xa   : > { %v2400_v23 = vld [vmem:[%s2927_s1 + $0x130] sm:$0xff] (!%p138_p2)   ;;  %v2402_v35 = vld [vmem:[%s2927_s1 + $0x138] sm:$0xff] (!%p138_p2)   ;;  %v2408_v42 = vld [vmem:[%s2927_s1 + $0x140] sm:$0xff] (!%p138_p2)  }
   0xb   : > { %2085 = vmatpush3.bf16.msra.mxu1 (!%p138_p2), %v2389_v2  ;;  %v2411_v43 = vld [vmem:[%s2927_s1 + $0x8] sm:$0xff] (!%p138_p2)   ;;  %v2413_v52 = vld [vmem:[%s2927_s1 + $0x10] sm:$0xff] (!%p138_p2)   ;;  %vm1777_vm6 = vmand (!%p138_p2), %vm1775_vm4, %vm1776_vm5 }
   0xc   : > { %2181 = vmatpush3.bf16.msra.mxu0 (!%p138_p2), %v2390_v3  ;;  %2086 = vmatprep.subr.bf16.mxu1 (!%p138_p2), %v2391_v4  ;;  %v2412_v48 = vld [vmem:[%s2927_s1 + $0x148] sm:$0xff] (!%p138_p2)   ;;  %v2414_v61 = vld [vmem:[%s2927_s1 + $0x150] sm:$0xff] (!%p138_p2)  }
   0xd   : > { %s2931_s13 = smov (!%p161_p3, %s1836_s13), 1  ;;  %2182 = vmatprep.subr.bf16.mxu0 %v2392_v5 }
   0xe   : > { %s2378_s30 = smul.u32 44, %s2931_s13  ;;  %s1948_s18 = sshll.u32 %s2931_s13, 5 }
   0xf   : > { %2087 = vmatpush3.bf16.msra.mxu1 %v2391_v4  ;;  %v2415_v4 = vld [vmem:[%s2927_s1 + $0x18] sm:$0xff]   ;;  %s170_s21 = scalar_lea.vmem %s2929_s3, %s1948_s18 }
  0x10   : > { %2183 = vmatpush3.bf16.msra.mxu0 %v2392_v5  ;;  %2088 = vmatprep.subr.bf16.mxu1 %v2393_v6  ;;  %s2552_s10 = scalar_lea.vmem %s2926_s0, %s2378_s30  ;;  %v2416_v5 = vld [vmem:[%s2927_s1 + $0x158] sm:$0xff]  }
  0x11   : > { %2184 = vmatprep.subr.bf16.mxu0 %v2394_v7  ;;  %v173_v11 = vld [vmem:[%s2552_s10] sm:$0xf]  ;;  %v2559_v12 = vld [vmem:[%s2552_s10 + $0x4] sm:$0xf]  ;;  %v2568_v15 = vld [vmem:[%s2552_s10 + $0x8] sm:$0xff]  }
  0x12   : > { %v2565_v14 = vcombine.low %v173_v11, %v2559_v12  ;;  %v2574_v17 = vld [vmem:[%s2552_s10 + $0x8] sm:$0xf]  ;;  %v242_v20 = vshll.u32 %v2568_v15, 16  ;;  %v2580_v21 = vld [vmem:[%s2552_s10 + $0xc] sm:$0xff]   ;;  %v856_v22 = vld [vmem:[%s2552_s10 + $0x4] sm:$0xe] }
  0x13   : > { %2089 = vmatpush3.bf16.msra.mxu1 %v2393_v6  ;;  %v1886_v26 = vcombine.low %v856_v22, %v2574_v17  ;;  %v881_v27 = vrot.slane %v2580_v21, 1  ;;  %v2592_v29 = vld [vmem:[%s2552_s10 + $0x10] sm:$0xff]   ;;  %v246_v32 = vshrl.u32 %v2568_v15, 16  ;;  %v708_v50 = vshll.u32 %v2580_v21, 16  ;;  %v2626_v53 = vld [vmem:[%s2552_s10 + $0x18] sm:$0xf] }
  0x14   : > { %2185 = vmatpush3.bf16.msra.mxu0 %v2394_v7  ;;  %2090 = vmatprep.subr.bf16.mxu1 %v2395_v8  ;;  %v235_v18 = vshrl.u32 %v2565_v14, 16  ;;  %v237_v19 = vshll.u32 %v2565_v14, 16  ;;  %v244_v25 = vrot.slane %v242_v20, 1  ;;  %v250_v33 = vshll.u32 %v2592_v29, 16  ;;  %v2597_v34 = vld [vmem:[%s2552_s10 + $0x14] sm:$0xff]   ;;  %v2420_v20 = vld [vmem:[%s2927_s1 + $0x168] sm:$0xff]  }
  0x15   : > { %2186 = vmatprep.subr.bf16.mxu0 %v2396_v9  ;;  %v880_v31 = vrot.slane %v1886_v26, 1  ;;  %v883_v41 = vrot.slane %v2597_v34, 1  ;;  %v1030_v45 = vshrl.u32 %v1886_v26, 16  ;;  %v1033_v46 = vshll.u32 %v1886_v26, 16  ;;  %v180_v54 = vld [vmem:[%s2552_s10 + $0x1c] sm:$0x7] }
  0x16   : > { %v239_v24 = vrot.slane %v237_v19, 1  ;;  %v248_v38 = vor.u32 %v246_v32, %v244_v25  ;;  %v252_v39 = vrot.slane %v250_v33, 1  ;;  %v254_v49 = vshrl.u32 %v2592_v29, 16  ;;  %v2633_v56 = vld [vmem:[%s2552_s10 + $0x1c] sm:$0xf]  ;;  %v2419_v19 = vld [vmem:[%s2927_s1 + $0x28] sm:$0xff]  }
  0x17   : > { %2091 = vmatpush3.bf16.msra.mxu1 %v2395_v8  ;;  %v882_v37 = vsel %vm523_vm1, %v880_v31, %v881_v27  ;;  %v884_v47 = vsel %vm523_vm1, %v881_v27, %v883_v41  ;;  %v712_v51 = vshrl.u32 %v2580_v21, 16  ;;  %v2630_v55 = vcombine.low %v2626_v53, %v180_v54  ;;  %v857_v60 = vld [vmem:[%s2552_s10 + $0x20] sm:$0xf]  ;;  %v2422_v22 = vld [vmem:[%s2927_s1 + $0x30] sm:$0xff]   ;;  %v2425_v32 = vld [vmem:[%s2927_s1 + $0x38] sm:$0xff]  }
  0x18   : > { %2187 = vmatpush3.bf16.msra.mxu0 %v2396_v9  ;;  %2092 = vmatprep.subr.bf16.mxu1 %v2397_v10  ;;  %v240_v30 = vor.u32 %v239_v24, %v235_v18  ;;  %v253_v44 = vsel %vm233_vm0, %v248_v38, %v252_v39  ;;  %v1032_v57 = vrot.slane %v1030_v45, 1  ;;  %v1035_v58 = vrot.slane %v1033_v46, 2  ;;  %v2424_v27 = vld [vmem:[%s2927_s1 + $0x170] sm:$0xff]   ;;  %v2426_v33 = vld [vmem:[%s2927_s1 + $0x178] sm:$0xff]   ;;  %v499_v45 = vld [vmem:[%s2552_s10] sm:$0xe] }
  0x19   : > { %2188 = vmatprep.subr.bf16.mxu0 %v2398_v13  ;;  %2194 = vmatprep.mubr.bf16.mxu0 %v882_v37  ;;  %v256_v59 = vor.u32 %v254_v49, %v252_v39  ;;  %v258_v62 = vshll.u32 %v2630_v55, 16  ;;  %v2641_v63 = vcombine.low %v2633_v56, %v857_v60  ;;  %v262_v0 = vshrl.u32 %v2630_v55, 16  ;;  %v2431_v54 = vld [vmem:[%s2927_s1 + $0x90] sm:$0xff]   ;;  %v500_v60 = vld [vmem:[%s2552_s10 + $0x1c] sm:$0xf] }
  0x1a   : > { %v245_v36 = vsel %vm233_vm0, %v240_v30, %v244_v25  ;;  %v1037_v1 = vrot.slane %v712_v51, 1  ;;  %v1036_v6 = vor.u32 %v1035_v58, %v1032_v57  ;;  %v1038_v7 = vrot.slane %v708_v50, 2 }
  0x1b   : > { %2093 = vmatpush3.bf16.msra.mxu1 %v2397_v10  ;;  %2098 = vmatprep.mubr.bf16.mxu1 %v245_v36  ;;  %v260_v2 = vrot.slane %v258_v62, 1  ;;  %v885_v3 = vrot.slane %v2641_v63, 1  ;;  %v527_v24 = vrot.slane %v2592_v29, 1  ;;  %v720_v25 = vshrl.u32 %v2597_v34, 16 }
  0x1c   : > { %2189 = vmatpush3.bf16.msra.mxu0 %v2398_v13  ;;  %2094 = vmatprep.subr.bf16.mxu1 %v2399_v16  ;;  %v1039_v11 = vor.u32 %v1038_v7, %v1037_v1  ;;  %v2417_v13 = vld [vmem:[%s2927_s1 + $0x20] sm:$0xff]   ;;  %v2680_v26 = vrot.slane %v708_v50, 1  ;;  %v1864_v49 = vcombine.low %v499_v45, %v2559_v12  ;;  %v2725_v50 = vld [vmem:[%s2552_s10 + $0x8] sm:$0xfe]   ;;  %v2432_v12 = vld [vmem:[%s2927_s1 + $0x190] sm:$0xff]   ;;  %v1865_v62 = vcombine.low %v2626_v53, %v500_v60 }
  0x1d   : > { %2190 = vmatprep.subr.bf16.mxu0 %v2400_v23  ;;  %v261_v8 = vsel %vm233_vm0, %v256_v59, %v260_v2  ;;  %v886_v9 = vsel %vm523_vm1, %v883_v41, %v885_v3  ;;  %v264_v10 = vor.u32 %v262_v0, %v260_v2  ;;  %v1041_v21 = vrot.slane %v720_v25, 1  ;;  %v2427_v41 = vld [vmem:[%s2927_s1 + $0x80] sm:$0xff]   ;;  %v2453_v45 = vld [vmem:[%s2927_s1 + $0xd8] sm:$0xff]  }
  0x1e   : > { %v1040_v18 = vsel %vm1028_vm2, %v1036_v6, %v1039_v11  ;;  %v714_v31 = vor.u32 %v712_v51, %v2680_v26  ;;  %v524_v57 = vrot.slane %v1864_v49, 1  ;;  %v1223_v58 = vrot.slane %v2725_v50, 1  ;;  %v2435_v2 = vld [vmem:[%s2927_s1 + $0xa0] sm:$0xff]   ;;  %v2463_v60 = vld [vmem:[%s2927_s1 + $0xf8] sm:$0xff]  }
  0x1f   : > { %2095 = vmatpush3.bf16.msra.mxu1 %v2399_v16  ;;  %v2418_v16 = vld [vmem:[%s2927_s1 + $0x160] sm:$0xff]   ;;  %v2752_v1 = vrot.slane %v1865_v62, 1 }
  0x20   : > { %2191 = vmatpush3.bf16.msra.mxu0 %v2400_v23  ;;  %2096 = vmatprep.subr.bf16.mxu1 %v2401_v28  ;;  %v525_v23 = vrot.slane %v2568_v15, 1  ;;  %v663_v7 = vld [vmem:[%s2552_s10 + $0x20] sm:$0x7] }
  0x21   : > { %2192 = vmatprep.subr.bf16.mxu0 %v2402_v35  ;;  %v2456_v49 = vld [vmem:[%s2927_s1 + $0x1e0] sm:$0xff]  }
  0x22   : > { %v526_v0 = vsel %vm523_vm1, %v524_v57, %v525_v23  ;;  %v2462_v57 = vld [vmem:[%s2927_s1 + $0x1f0] sm:$0xff]  }
  0x23   : > { %2097 = vmatpush3.bf16.msra.mxu1 %v2401_v28  ;;  %v2690_v28 = vsel %vm523_vm1, %v525_v23, %v527_v24  ;;  %v2442_v23 = vld [vmem:[%s2927_s1 + $0x1b8] sm:$0xff]  }
  0x24   : > { %2193 = vmatpush3.bf16.msra.mxu0 %v2402_v35  ;;  %2106 = vmatprep.subr.bf16.mxu1 %v2405_v40  ;;  %v1049_v35 = vshll.u32 %v2641_v63, 16 }
  0x25   : > { %2202 = vmatprep.subr.bf16.mxu0 %v2408_v42 }
  0x26   : > { %2099 = vmatmul.mubr.bf16.vlgmr.msra.gmra.mrb[0].mxu1 %v253_v44 }
  0x27   : > { %2107 = vmatpush3.bf16.msra.mxu1 %v2405_v40  ;;  %2195 = vmatmul.mubr.bf16.vlgmr.msra.gmra.mrb[0].mxu0 %v884_v47  ;;  %v1051_v40 = vrot.slane %v1049_v35, 2  ;;  %v2429_v47 = vld [vmem:[%s2927_s1 + $0x88] sm:$0xff]  }
  0x28   : > { %2203 = vmatpush3.bf16.msra.mxu0 %v2408_v42  ;;  %2108 = vmatprep.subr.bf16.mxu1 %v2411_v43  ;;  %v2449_v35 = vld [vmem:[%s2927_s1 + $0xc8] sm:$0xff]  }
  0x29   : > { %2204 = vmatprep.subr.bf16.mxu0 %v2412_v48  ;;  %2102 = vmatprep.mubr.bf16.mxu1 %v261_v8  ;;  %v2776_v8 = vcombine.low %v2633_v56, %v663_v7  ;;  %v2477_v7 = vld [vmem:[%s2552_s10 + $0x18] sm:$0xff]  }
  0x2a   : > { %2198 = vmatprep.mubr.bf16.mxu0 %v886_v9 }
  0x2b   : > { %2109 = vmatpush3.bf16.msra.mxu1 %v2411_v43  ;;  %v2428_v43 = vld [vmem:[%s2927_s1 + $0x180] sm:$0xff]  }
  0x2c   : > { %2205 = vmatpush3.bf16.msra.mxu0 %v2412_v48  ;;  %2110 = vmatprep.subr.bf16.mxu1 %v2413_v52  ;;  %v2430_v48 = vld [vmem:[%s2927_s1 + $0x188] sm:$0xff]  }
  0x2d   : > { %2206 = vmatprep.subr.bf16.mxu0 %v2414_v61 }
  0x2e   : > { %2103 = vmatmul.mubr.bf16.gmra.mrb[4].mxu1 %v264_v10  ;;  %v724_v10 = vshll.u32 %v2776_v8, 16 }
  0x2f   : > { %2111 = vmatpush3.bf16.msra.mxu1 %v2413_v52  ;;  %2199 = vmatmul.mubr.bf16.gmra.mrb[4].mxu0 %v885_v3  ;;  %v2729_v52 = vld [vmem:[%s2552_s10 + $0x10] sm:$0xff]   ;;  %v2436_v3 = vld [vmem:[%s2927_s1 + $0x1a0] sm:$0xff]  }
  0x30   : > { %2207 = vmatpush3.bf16.msra.mxu0 %v2414_v61  ;;  %2112 = vmatprep.subr.bf16.mxu1 %v2415_v4  ;;  %v1224_v59 = vrot.slane %v2729_v52, 1  ;;  %v2433_v61 = vld [vmem:[%s2927_s1 + $0x98] sm:$0xff]   ;;  %v2785_v56 = vrot.slane %v724_v10, 1 }
  0x31   : > { %2208 = vmatprep.subr.bf16.mxu0 %v2416_v5  ;;  %2122 = vmatprep.mubr.bf16.mxu1 %v2565_v14  ;;  %v716_v14 = vshll.u32 %v2597_v34, 16  ;;  %v1046_v34 = vshrl.u32 %v2641_v63, 16  ;;  %v2434_v63 = vld [vmem:[%s2927_s1 + $0x198] sm:$0xff]  }
  0x32   : > { %2218 = vmatprep.mubr.bf16.mxu0 %v1040_v18  ;;  %v1225_v53 = vsel %vm523_vm1, %v1223_v58, %v1224_v59 }
  0x33   : > { %2113 = vmatpush3.bf16.msra.mxu1 %v2415_v4  ;;  %v718_v30 = vrot.slane %v716_v14, 1  ;;  %v1042_v37 = vrot.slane %v716_v14, 2  ;;  %v1048_v39 = vrot.slane %v1046_v34, 1  ;;  %v2807_v14 = vld [vmem:[%s2552_s10 + $0x20] sm:$0xff]  }
  0x34   : > { %2209 = vmatpush3.bf16.msra.mxu0 %v2416_v5  ;;  %2114 = vmatprep.subr.bf16.mxu1 %v2417_v13  ;;  %v2437_v5 = vld [vmem:[%s2927_s1 + $0xa8] sm:$0xff]   ;;  %v1398_v58 = vshrl.u32 %v2807_v14, 16 }
  0x35   : > { %2210 = vmatprep.subr.bf16.mxu0 %v2418_v16  ;;  %v2703_v36 = vor.u32 %v720_v25, %v718_v30  ;;  %v2706_v38 = vsel %vm233_vm0, %v714_v31, %v718_v30  ;;  %v1043_v42 = vor.u32 %v1042_v37, %v1041_v21  ;;  %v1052_v44 = vor.u32 %v1051_v40, %v1048_v39 }
  0x36   : > { %v1228_v30 = vrot.slane %v2807_v14, 1  ;;  %v1375_v31 = vshll.u32 %v2725_v50, 16 }
  0x37   : > { %2115 = vmatpush3.bf16.msra.mxu1 %v2417_v13  ;;  %v1044_v46 = vsel %vm1028_vm2, %v1039_v11, %v1043_v42  ;;  %v1053_v51 = vsel %vm1028_vm2, %v1043_v42, %v1052_v44  ;;  %v2439_v13 = vld [vmem:[%s2927_s1 + $0xb0] sm:$0xff]  }
  0x38   : > { %2211 = vmatpush3.bf16.msra.mxu0 %v2418_v16  ;;  %2116 = vmatprep.subr.bf16.mxu1 %v2419_v19  ;;  %v2440_v16 = vld [vmem:[%s2927_s1 + $0x1b0] sm:$0xff]   ;;  %v1377_v39 = vrot.slane %v1375_v31, 2 }
  0x39   : > { %2212 = vmatprep.subr.bf16.mxu0 %v2420_v20  ;;  %v2451_v42 = vld [vmem:[%s2927_s1 + $0xd0] sm:$0xff]  }
  0x3b   : > { %2117 = vmatpush3.bf16.msra.mxu1 %v2419_v19  ;;  %v2795_v19 = vsel %vm233_vm0, %v2703_v36, %v2785_v56  ;;  %v2450_v36 = vld [vmem:[%s2927_s1 + $0x1c8] sm:$0xff]  }
  0x3c   : > { %2213 = vmatpush3.bf16.msra.mxu0 %v2420_v20  ;;  %2118 = vmatprep.subr.bf16.mxu1 %v2422_v22  ;;  %v2441_v20 = vld [vmem:[%s2927_s1 + $0xb8] sm:$0xff]  }
  0x3d   : > { %2214 = vmatprep.subr.bf16.mxu0 %v2424_v27 }
  0x3f   : > { %2119 = vmatpush3.bf16.msra.mxu1 %v2422_v22  ;;  %v2801_v22 = vld [vmem:[%s2552_s10 + $0x18] sm:$0xff]  }
  0x40   : > { %2215 = vmatpush3.bf16.msra.mxu0 %v2424_v27  ;;  %2120 = vmatprep.subr.bf16.mxu1 %v2425_v32  ;;  %v1226_v25 = vrot.slane %v2801_v22, 1  ;;  %v1372_v27 = vshrl.u32 %v2725_v50, 16  ;;  %v2457_v50 = vld [vmem:[%s2927_s1 + $0xe8] sm:$0xff]  }
  0x41   : > { %2216 = vmatprep.subr.bf16.mxu0 %v2426_v33 }
  0x42   : > { %v1227_v34 = vsel %vm523_vm1, %v1224_v59, %v1226_v25  ;;  %v1374_v21 = vrot.slane %v1372_v27, 1  ;;  %v1229_v37 = vsel %vm523_vm1, %v1226_v25, %v1228_v30  ;;  %v1401_v59 = vshll.u32 %v2807_v14, 16  ;;  %v2474_v14 = vld [vmem:[%s2927_s1 + $0x238] sm:$0xff]  }
  0x43   : > { %2121 = vmatpush3.bf16.msra.mxu1 %v2425_v32  ;;  %v1380_v32 = vshrl.u32 %v2729_v52, 16 }
  0x44   : > { %2217 = vmatpush3.bf16.msra.mxu0 %v2426_v33  ;;  %2130 = vmatprep.subr.bf16.mxu1 %v2427_v41  ;;  %v1383_v33 = vshll.u32 %v2729_v52, 16  ;;  %v2461_v52 = vld [vmem:[%s2927_s1 + $0xf0] sm:$0xff]  }
  0x45   : > { %2226 = vmatprep.subr.bf16.mxu0 %v2428_v43  ;;  %v1382_v40 = vrot.slane %v1380_v32, 1 }
  0x46   : > { %2123 = vmatmul.mubr.bf16.vlgmr.msra.gmra.mrb[0].mxu1 %v2568_v15  ;;  %v2764_v15 = vsel %vm523_vm1, %v527_v24, %v2752_v1  ;;  %v2444_v24 = vld [vmem:[%s2927_s1 + $0xc0] sm:$0xff]  }
  0x47   : > { %2131 = vmatpush3.bf16.msra.mxu1 %v2427_v41  ;;  %2219 = vmatmul.mubr.bf16.vlgmr.msra.gmra.mrb[0].mxu0 %v1044_v46  ;;  %v1385_v41 = vrot.slane %v1383_v33, 2  ;;  %v2454_v46 = vld [vmem:[%s2927_s1 + $0x1d8] sm:$0xff]  }
  0x48   : > { %2227 = vmatpush3.bf16.msra.mxu0 %v2428_v43  ;;  %2132 = vmatprep.subr.bf16.mxu1 %v2429_v47  ;;  %v2452_v43 = vld [vmem:[%s2927_s1 + $0x1d0] sm:$0xff]  }
  0x49   : > { %2228 = vmatprep.subr.bf16.mxu0 %v2430_v48  ;;  %2126 = vmatprep.mubr.bf16.mxu1 %v2592_v29 }
  0x4a   : > { %2222 = vmatprep.mubr.bf16.mxu0 %v1053_v51  ;;  %v2458_v51 = vld [vmem:[%s2927_s1 + $0x1e8] sm:$0xff]  }
  0x4b   : > { %2133 = vmatpush3.bf16.msra.mxu1 %v2429_v47 }
  0x4c   : > { %2229 = vmatpush3.bf16.msra.mxu0 %v2430_v48  ;;  %2134 = vmatprep.subr.bf16.mxu1 %v2431_v54  ;;  %v2455_v48 = vld [vmem:[%s2927_s1 + $0xe0] sm:$0xff]  }
  0x4d   : > { %2230 = vmatprep.subr.bf16.mxu0 %v2432_v12 }
  0x4e   : > { %2127 = vmatmul.mubr.bf16.gmra.mrb[4].mxu1 %v2630_v55  ;;  %v656_v55 = vld [vmem:[%s2552_s10 + $0x4] sm:$0xf] }
  0x4f   : > { %2135 = vmatpush3.bf16.msra.mxu1 %v2431_v54  ;;  %2223 = vmatmul.mubr.bf16.gmra.mrb[4].mxu0 %v1052_v44  ;;  %v1874_v4 = vcombine.low %v656_v55, %v2574_v17  ;;  %v2438_v17 = vld [vmem:[%s2927_s1 + $0x1a8] sm:$0xff]   ;;  %v1386_v44 = vor.u32 %v1385_v41, %v1382_v40  ;;  %v1389_v54 = vshrl.u32 %v2801_v22, 16 }
  0x50   : > { %2231 = vmatpush3.bf16.msra.mxu0 %v2432_v12  ;;  %2136 = vmatprep.subr.bf16.mxu1 %v2433_v61  ;;  %v1392_v12 = vshll.u32 %v2801_v22, 16  ;;  %v2473_v22 = vld [vmem:[%s2927_s1 + $0x230] sm:$0xff]  }
  0x51   : > { %2232 = vmatprep.subr.bf16.mxu0 %v2434_v63  ;;  %2146 = vmatprep.mubr.bf16.mxu1 %v526_v0  ;;  %v701_v6 = vshrl.u32 %v1874_v4, 16  ;;  %v703_v29 = vshll.u32 %v1874_v4, 16  ;;  %v1400_v0 = vrot.slane %v1398_v58, 1  ;;  %v728_v4 = vshrl.u32 %v2776_v8, 16 }
  0x52   : > { %2242 = vmatprep.mubr.bf16.mxu0 %v1225_v53  ;;  %v1394_v62 = vrot.slane %v1392_v12, 2 }
  0x53   : > { %2137 = vmatpush3.bf16.msra.mxu1 %v2433_v61  ;;  %v705_v9 = vrot.slane %v703_v29, 1  ;;  %v1391_v61 = vrot.slane %v1389_v54, 1 }
  0x54   : > { %2233 = vmatpush3.bf16.msra.mxu0 %v2434_v63  ;;  %2138 = vmatprep.subr.bf16.mxu1 %v2435_v2  ;;  %v2464_v63 = vld [vmem:[%s2927_s1 + $0x1f8] sm:$0xff]  }
  0x55   : > { %2234 = vmatprep.subr.bf16.mxu0 %v2436_v3  ;;  %v706_v11 = vor.u32 %v705_v9, %v701_v6  ;;  %v1395_v53 = vor.u32 %v1394_v62, %v1391_v61  ;;  %v2476_v6 = vld [vmem:[%s2552_s10 + $0x10] sm:$0xff]  }
  0x56   : > { %v2469_v9 = vld [vmem:[%s2927_s1 + $0x210] sm:$0xff]   ;;  %v1581_v10 = vrot.slane %v2476_v6, 2 }
  0x57   : > { %2139 = vmatpush3.bf16.msra.mxu1 %v2435_v2  ;;  %v711_v18 = vsel %vm233_vm0, %v706_v11, %v2680_v26  ;;  %v2447_v26 = vld [vmem:[%s2927_s1 + $0x1c0] sm:$0xff]   ;;  %v1396_v55 = vsel %vm1028_vm2, %v1386_v44, %v1395_v53  ;;  %v1583_v11 = vrot.slane %v2477_v7, 2 }
  0x58   : > { %2235 = vmatpush3.bf16.msra.mxu0 %v2436_v3  ;;  %2140 = vmatprep.subr.bf16.mxu1 %v2437_v5  ;;  %v2466_v2 = vld [vmem:[%s2927_s1 + $0x200] sm:$0xff]   ;;  %v2467_v3 = vld [vmem:[%s2927_s1 + $0x208] sm:$0xff]  }
  0x59   : > { %2236 = vmatprep.subr.bf16.mxu0 %v2438_v17 }
  0x5b   : > { %2141 = vmatpush3.bf16.msra.mxu1 %v2437_v5  ;;  %v2475_v5 = vld [vmem:[%s2552_s10 + $0x8] sm:$0xfc]  }
  0x5c   : > { %2237 = vmatpush3.bf16.msra.mxu0 %v2438_v17  ;;  %2142 = vmatprep.subr.bf16.mxu1 %v2439_v13  ;;  %v2478_v17 = vld [vmem:[%s2552_s10 + $0x20] sm:$0xff]   ;;  %v1580_v8 = vrot.slane %v2475_v5, 2 }
  0x5d   : > { %2238 = vmatprep.subr.bf16.mxu0 %v2440_v16 }
  0x5f   : > { %2143 = vmatpush3.bf16.msra.mxu1 %v2439_v13  ;;  %v1585_v13 = vrot.slane %v2478_v17, 2 }
  0x60   : > { %2239 = vmatpush3.bf16.msra.mxu0 %v2440_v16  ;;  %2144 = vmatprep.subr.bf16.mxu1 %v2441_v20  ;;  %v2470_v16 = vld [vmem:[%s2927_s1 + $0x218] sm:$0xff]  }
  0x61   : > { %2240 = vmatprep.subr.bf16.mxu0 %v2442_v23 }
  0x63   : > { %2145 = vmatpush3.bf16.msra.mxu1 %v2441_v20  ;;  %v2472_v20 = vld [vmem:[%s2927_s1 + $0x228] sm:$0xff]  }
  0x64   : > { %2241 = vmatpush3.bf16.msra.mxu0 %v2442_v23  ;;  %2154 = vmatprep.subr.bf16.mxu1 %v2444_v24  ;;  %v2479_v23 = vld [vmem:[%s2552_s10 + $0x28] ss:$0 sps:$4 sm:$0x11]  }
  0x65   : > { %2250 = vmatprep.subr.bf16.mxu0 %v2447_v26 }
  0x66   : > { %2147 = vmatmul.mubr.bf16.vlgmr.msra.gmra.mrb[0].mxu1 %v2690_v28  ;;  %v1378_v28 = vor.u32 %v1377_v39, %v1374_v21 }
  0x67   : > { %2155 = vmatpush3.bf16.msra.mxu1 %v2444_v24  ;;  %2243 = vmatmul.mubr.bf16.vlgmr.msra.gmra.mrb[0].mxu0 %v1227_v34  ;;  %v1587_v24 = vrot.slane %v2479_v23, 2 }
  0x68   : > { %2251 = vmatpush3.bf16.msra.mxu0 %v2447_v26  ;;  %2156 = vmatprep.subr.bf16.mxu1 %v2449_v35  ;;  %v1387_v47 = vsel %vm1028_vm2, %v1378_v28, %v1386_v44  ;;  %v1584_v26 = vsel %vm1579_vm3, %v1581_v10, %v1583_v11  ;;  %v1937_v44 = vld [vmem:[%s2928_s2] ss:$0 sm:$0xff] }
  0x69   : > { %2252 = vmatprep.subr.bf16.mxu0 %v2450_v36  ;;  %2150 = vmatprep.mubr.bf16.mxu1 %v2764_v15  ;;  %v1588_v25 = vsel %vm1579_vm3, %v1585_v13, %v1587_v24 }
  0x6a   : > { %2246 = vmatprep.mubr.bf16.mxu0 %v1229_v37 }
  0x6b   : > { %2157 = vmatpush3.bf16.msra.mxu1 %v2449_v35 }
  0x6c   : > { %2253 = vmatpush3.bf16.msra.mxu0 %v2450_v36  ;;  %2158 = vmatprep.subr.bf16.mxu1 %v2451_v42 }
  0x6d   : > { %2254 = vmatprep.subr.bf16.mxu0 %v2452_v43 }
  0x6e   : > { %2151 = vmatmul.mubr.bf16.gmra.mrb[4].mxu1 %v2752_v1  ;;  %v1403_v1 = vrot.slane %v1401_v59, 2 }
  0x6f   : > { %2159 = vmatpush3.bf16.msra.mxu1 %v2451_v42  ;;  %2247 = vmatmul.mubr.bf16.gmra.mrb[4].mxu0 %v1228_v30 }
  0x70   : > { %2255 = vmatpush3.bf16.msra.mxu0 %v2452_v43  ;;  %2160 = vmatprep.subr.bf16.mxu1 %v2453_v45  ;;  %v1404_v15 = vor.u32 %v1403_v1, %v1400_v0 }
  0x71   : > { %2256 = vmatprep.subr.bf16.mxu0 %v2454_v46  ;;  %2170 = vmatprep.mubr.bf16.mxu1 %v711_v18  ;;  %v1582_v18 = vsel %vm1579_vm3, %v1580_v8, %v1581_v10 }
  0x72   : > { %2266 = vmatprep.mubr.bf16.mxu0 %v1387_v47  ;;  %v1405_v29 = vsel %vm1028_vm2, %v1395_v53, %v1404_v15 }
  0x73   : > { %2161 = vmatpush3.bf16.msra.mxu1 %v2453_v45 }
  0x74   : > { %2257 = vmatpush3.bf16.msra.mxu0 %v2454_v46  ;;  %2162 = vmatprep.subr.bf16.mxu1 %v2455_v48 }
  0x75   : > { %2258 = vmatprep.subr.bf16.mxu0 %v2456_v49 }
  0x77   : > { %2163 = vmatpush3.bf16.msra.mxu1 %v2455_v48 }
  0x78   : > { %2259 = vmatpush3.bf16.msra.mxu0 %v2456_v49  ;;  %2164 = vmatprep.subr.bf16.mxu1 %v2457_v50 }
  0x79   : > { %2260 = vmatprep.subr.bf16.mxu0 %v2458_v51 }
  0x7b   : > { %2165 = vmatpush3.bf16.msra.mxu1 %v2457_v50 }
  0x7c   : > { %2261 = vmatpush3.bf16.msra.mxu0 %v2458_v51  ;;  %2166 = vmatprep.subr.bf16.mxu1 %v2461_v52 }
  0x7d   : > { %2262 = vmatprep.subr.bf16.mxu0 %v2462_v57 }
  0x7f   : > { %2167 = vmatpush3.bf16.msra.mxu1 %v2461_v52 }
  0x80   : > { %2263 = vmatpush3.bf16.msra.mxu0 %v2462_v57  ;;  %2168 = vmatprep.subr.bf16.mxu1 %v2463_v60 }
  0x81   : > { %2264 = vmatprep.subr.bf16.mxu0 %v2464_v63 }
  0x83   : > { %2169 = vmatpush3.bf16.msra.mxu1 %v2463_v60 }
  0x84   : > { %2265 = vmatpush3.bf16.msra.mxu0 %v2464_v63  ;;  %2298 = vmatprep.subr.bf16.mxu1 %v2466_v2 }
  0x85   : > { %2274 = vmatprep.subr.bf16.mxu0 %v2466_v2 }
  0x86   : > { %2171 = vmatmul.mubr.bf16.vlgmr.msra.gmra.mrb[0].mxu1 %v2706_v38  ;;  %v730_v38 = vor.u32 %v728_v4, %v2785_v56  ;;  %v1586_v56 = vsel %vm1579_vm3, %v1583_v11, %v1585_v13 }
  0x87   : > { %2267 = vmatmul.mubr.bf16.vlgmr.msra.gmra.mrb[0].mxu0 %v1396_v55  ;;  %2306 = vmatpush3.bf16.msra.mxu1 %v2466_v2 }
  0x88   : > { %2275 = vmatpush3.bf16.msra.mxu0 %v2466_v2  ;;  %2299 = vmatprep.subr.bf16.mxu1 %v2467_v3 }
  0x89   : > { %2276 = vmatprep.subr.bf16.mxu0 %v2467_v3  ;;  %2174 = vmatprep.mubr.bf16.mxu1 %v2795_v19  ;;  %v2471_v19 = vld [vmem:[%s2927_s1 + $0x220] sm:$0xff]  }
  0x8a   : > { %2270 = vmatprep.mubr.bf16.mxu0 %v1405_v29 }
  0x8b   : > { %2307 = vmatpush3.bf16.msra.mxu1 %v2467_v3 }
  0x8c   : > { %2277 = vmatpush3.bf16.msra.mxu0 %v2467_v3  ;;  %2300 = vmatprep.subr.bf16.mxu1 %v2469_v9 }
  0x8d   : > { %2278 = vmatprep.subr.bf16.mxu0 %v2469_v9 }
  0x8e   : > { %2175 = vmatmul.mubr.bf16.gmra.mrb[4].mxu1 %v730_v38 }
  0x8f   : > { %2271 = vmatmul.mubr.bf16.gmra.mrb[4].mxu0 %v1404_v15  ;;  %2308 = vmatpush3.bf16.msra.mxu1 %v2469_v9 }
  0x90   : > { %2279 = vmatpush3.bf16.msra.mxu0 %v2469_v9  ;;  %2301 = vmatprep.subr.bf16.mxu1 %v2470_v16  ;;  %v1778_v9 = vld [vmem:[%s170_s21 + $0x1c] sm:$0x7] }
  0x91   : > { %2280 = vmatprep.subr.bf16.mxu0 %v2470_v16  ;;  %2290 = vmatprep.mubr.bf16.mxu0 %v1582_v18 }
  0x92   : > { %2294 = vmatprep.mubr.bf16.mxu1 %v1586_v56 }
  0x93   : > { %2309 = vmatpush3.bf16.msra.mxu1 %v2470_v16 }
  0x94   : > { %2281 = vmatpush3.bf16.msra.mxu0 %v2470_v16  ;;  %2302 = vmatprep.subr.bf16.mxu1 %v2471_v19 }
  0x95   : > { %2282 = vmatprep.subr.bf16.mxu0 %v2471_v19 }
  0x97   : > { %2310 = vmatpush3.bf16.msra.mxu1 %v2471_v19 }
  0x98   : > { %2283 = vmatpush3.bf16.msra.mxu0 %v2471_v19  ;;  %2303 = vmatprep.subr.bf16.mxu1 %v2472_v20 }
  0x99   : > { %2284 = vmatprep.subr.bf16.mxu0 %v2472_v20 }
  0x9b   : > { %2311 = vmatpush3.bf16.msra.mxu1 %v2472_v20 }
  0x9c   : > { %2285 = vmatpush3.bf16.msra.mxu0 %v2472_v20  ;;  %2304 = vmatprep.subr.bf16.mxu1 %v2473_v22 }
  0x9d   : > { %2286 = vmatprep.subr.bf16.mxu0 %v2473_v22 }
  0x9f   : > { %2312 = vmatpush3.bf16.msra.mxu1 %v2473_v22 }
  0xa0   : > { %2287 = vmatpush3.bf16.msra.mxu0 %v2473_v22  ;;  %2305 = vmatprep.subr.bf16.mxu1 %v2474_v14 }
  0xa1   : > { %2288 = vmatprep.subr.bf16.mxu0 %v2474_v14 }
  0xa3   : > { %2313 = vmatpush3.bf16.msra.mxu1 %v2474_v14 }
  0xa4   : > { %2289 = vmatpush3.bf16.msra.mxu0 %v2474_v14 }
  0xa6   : > { %2295 = vmatmul.mubr.bf16.vlgmr.msra.gmra.mrb[8].mxu1 %v1588_v25 }
  0xa7   : > { %2291 = vmatmul.mubr.bf16.vlgmr.msra.gmra.mrb[0].mxu0 %v1584_v26 }
 0x159   : > { %v2172_v27 = vpop.f32.mrb[0].mxu1 }
 0x15a   : > { %v817_v30 = vpop.f32.mrb[1].mxu1 }
 0x15b   : > { %v2173_v31 = vpop.f32.mrb[2].mxu1 }
 0x15c   : > { %v820_v32 = vpop.f32.mrb[3].mxu1 }
 0x161   : > { %v2176_v33 = vpop.f32.mrb[4].mxu1 }
 0x162   : > { %v2272_v34 = vpop.f32.mrb[4].mxu0  ;;  %v833_v35 = vpop.f32.mrb[5].mxu1 }
 0x163   : > { %v2318_v36 = vadd.f32 %v2272_v34, %v2176_v33  ;;  %v1508_v21 = vpop.f32.mrb[5].mxu0  ;;  %v2177_v37 = vpop.f32.mrb[6].mxu1 }
 0x164   : > { %v2320_v39 = vadd.f32 %v1508_v21, %v833_v35  ;;  %v2273_v40 = vpop.f32.mrb[6].mxu0  ;;  %v836_v41 = vpop.f32.mrb[7].mxu1 }
 0x165   : > { %v2322_v42 = vadd.f32 %v2273_v40, %v2177_v37  ;;  %v1511_v43 = vpop.f32.mrb[7].mxu0 }
 0x166   : > { %v2324_v28 = vadd.f32 %v1511_v43, %v836_v41 }
 0x179   : > { %v2296_v45 = vpop.f32.mrb[8].mxu1 }
 0x17a   : > { %v2292_v46 = vpop.f32.mrb[0].mxu0  ;;  %v2319_v47 = vadd.f32 %v2318_v36, %v2296_v45  ;;  %v1691_v48 = vpop.f32.mrb[9].mxu1 }
 0x17b   : > { %v2314_v49 = vadd.f32 %v2292_v46, %v2172_v27  ;;  %v1675_v50 = vpop.f32.mrb[1].mxu0  ;;  %v2321_v51 = vadd.f32 %v2320_v39, %v1691_v48  ;;  %v2297_v52 = vpop.f32.mrb[10].mxu1 }
 0x17c   : > { %v1726_v54 = vadd.f32 %v2319_v47, %v1937_v44  ;;  %v2315_v12 = vadd.f32 %v1675_v50, %v817_v30  ;;  %v2293_v57 = vpop.f32.mrb[2].mxu0  ;;  %v2323_v58 = vadd.f32 %v2322_v42, %v2297_v52  ;;  %v1694_v59 = vpop.f32.mrb[11].mxu1 }
 0x17d   : > { %v1722_v60 = vadd.f32 %v2314_v49, %v1937_v44  ;;  %v1724_v61 = vadd.f32 %v2321_v51, %v1937_v44  ;;  %v2316_v62 = vadd.f32 %v2293_v57, %v2173_v31  ;;  %v1678_v63 = vpop.f32.mrb[3].mxu0  ;;  %v2325_v0 = vadd.f32 %v2324_v28, %v1694_v59 }
 0x17e   : > { %v1734_v1 = vmax.f32 %v1726_v54, 0.0  ;;  %v1720_v53 = vadd.f32 %v2315_v12, %v1937_v44  ;;  %v1727_v2 = vadd.f32 %v2323_v58, %v1937_v44  ;;  %v2317_v15 = vadd.f32 %v1678_v63, %v820_v32 }
 0x17f   : > { %v1723_v55 = vadd.f32 %v2316_v62, %v1937_v44  ;;  %v1725_v3 = vadd.f32 %v2325_v0, %v1937_v44  ;;  %v1730_v29 = vmax.f32 %v1722_v60, 0.0  ;;  %v1732_v7 = vmax.f32 %v1724_v61, 0.0 }
 0x180   : > { %v1955_v4 = vpack.c.bf16 %v1734_v1, %v1734_v1  ;;  %v1735_v5 = vmax.f32 %v1727_v2, 0.0  ;;  %v1721_v6 = vadd.f32 %v2317_v15, %v1937_v44  ;;  %v1728_v8 = vmax.f32 %v1720_v53, 0.0 }
 0x181   : > { %v1731_v17 = vmax.f32 %v1723_v55, 0.0  ;;  %v1733_v38 = vmax.f32 %v1725_v3, 0.0 }
 0x182   : > { %1774 = vst [vmem:[%s170_s21 + $0x18] sm:$0xf] %v1955_v4  ;;  %v1956_v10 = vpack.c.bf16 %v1735_v5, %v1735_v5  ;;  %v1729_v11 = vmax.f32 %v1721_v6, 0.0 }
 0x183   : > { %v1965_v13 = vpack.c.bf16 %v1731_v17, %v1730_v29  ;;  %v1970_v16 = vpack.c.bf16 %v1733_v38, %v1732_v7 }
 0x184   : > { %v1779_v18 = vsel %vm1777_vm6, %v1956_v10, %v1778_v9  ;;  %v1960_v56 = vpack.c.bf16 %v1729_v11, %v1728_v8 }
 0x185   : > { %1972 = vst [vmem:[%s170_s21 + $0x8] sm:$0xff] %v1965_v13   ;;  %1780 = vst [vmem:[%s170_s21 + $0x1c] sm:$0x7] %v1779_v18 }
 0x186   : > { %1973 = vst [vmem:[%s170_s21 + $0x10] sm:$0xff] %v1970_v16   ;;  %1961 = vst [vmem:[%s170_s21] sm:$0xff] %v1960_v56  }
 0x187 PF: > { %s13_s12 = sadd.s32 1, %s2486_s12  }
 0x188   : > { %p10_p4 = scmp.ge.s32.totalorder %s13_s12, 4  }
 0x18a   :  { %12 = sbr.rel (!%p10_p4) target bundleno = 1 (0x1), region = 62 }

// kernel: dqn_forward.7
= control target key start
LH: loop header
LB: loop body
LE: loop exit
PB: predicated region body
PF: predicated region fallthrough
CT: control target
= control target key end

     0   :  { %s6261_s15 = smov 0   ;;  %s6263_s16 = smov 0   ;;  %s7650_s0 = inlined_call_operand.vmem [shape: bf16[8,3136], index: 0, kind: input, shape index: {}]   ;;  %s7651_s1 = inlined_call_operand.vmem [shape: bf16[3136,512], index: 1, kind: input, shape index: {}]   ;;  %s7652_s2 = inlined_call_operand.vmem [shape: f32[1,512], index: 2, kind: input, shape index: {}]   ;;  %s7653_s3 = inlined_call_operand.vmem [shape: f32[512,128], index: 3, kind: input, shape index: {}]   ;;  %s7654_s4 = inlined_call_operand.vmem [shape: f32[2,8,128], index: 4, kind: output, shape index: {}]  }
   0x1   :  { %s6265_s17 = smov 0  }
   0x2 LB: > { %s6277_s18 = sadd.s32 4294967295, %s6233_s17   ;;  %s6280_s19 = sadd.s32 1, %s6233_s17   ;;  %s6233_s17 = sphi %s6265_s17, %s7657_s17   ;;  %s6229_s16 = sphi %s6263_s16, %s7656_s16   ;;  %s6225_s15 = sphi %s6261_s15, %s7655_s15  }
   0x3   : > { %s39_s20 = ssub.s32 %s6233_s17, %s6280_s19  ;;  %s42_s21 = sadd.s32 1, %s6229_s16 }
   0x4   : > { %p40_p0 = scmp.eq.s32.totalorder %s39_s20, 0  ;;  %p49_p1 = scmp.ne.s32.totalorder %s6229_s16, %s6225_s15 }
   0x5   : > { %p50_p2 = scmp.eq.s32.totalorder %s6233_s17, 0  ;;  %p5027_p4 = scmp.ge.s32.totalorder %s6233_s17, 2 }
   0x6   : > { %s6289_s22 = scalar_select %p40_p0, %s6229_s16, %s42_s21  }
   0x7   : > { %p51_p3 = por %p50_p2, %p49_p1  ;;  %156 = sbr.rel (%p5027_p4) target bundleno = 214 (0xd6), region = 20 }
   0xe   : > { %159 = sbr.rel (!%p51_p3) target bundleno = 214 (0xd6), region = 24  ;;  %s161_s23 = sand.u32 (%p51_p3), 1, %s6229_s16  }
   0xf   : > { %s5455_s24 = sshll.u32 (%p51_p3), %s6233_s17, 3  ;;  %s5571_s25 = smul.u32 (%p51_p3), 3136, %s161_s23 }
  0x10   : > { %s6297_s28 = scalar_lea.vmem (%p51_p3), %s7651_s1, %s5455_s24 }
  0x11   : > { %v976_v0 = vld [vmem:[%s6297_s28] sm:$0xff] (%p51_p3)  ;;  %v978_v1 = vld [vmem:[%s6297_s28 + $0x10] sm:$0xff] (%p51_p3)  ;;  %s6305_s29 = scalar_lea.vmem (%p51_p3), [#allocation2], %s5571_s25 }
  0x12   : > { %v980_v2 = vld [vmem:[%s6297_s28 + $0x20] sm:$0xff] (%p51_p3)  ;;  %v982_v3 = vld [vmem:[%s6297_s28 + $0x30] sm:$0xff] (%p51_p3)  ;;  %977 = vst [vmem:[%s6305_s29] sm:$0xff] (%p51_p3), %v976_v0  ;;  %979 = vst [vmem:[%s6305_s29 + $0x8] sm:$0xff] (%p51_p3), %v978_v1 }
  0x13   : > { %v984_v4 = vld [vmem:[%s6297_s28 + $0x40] sm:$0xff] (%p51_p3)  ;;  %v986_v5 = vld [vmem:[%s6297_s28 + $0x50] sm:$0xff] (%p51_p3)  ;;  %981 = vst [vmem:[%s6305_s29 + $0x10] sm:$0xff] (%p51_p3), %v980_v2  ;;  %983 = vst [vmem:[%s6305_s29 + $0x18] sm:$0xff] (%p51_p3), %v982_v3 }
  0x14   : > { %985 = vst [vmem:[%s6305_s29 + $0x20] sm:$0xff] (%p51_p3), %v984_v4  ;;  %987 = vst [vmem:[%s6305_s29 + $0x28] sm:$0xff] (%p51_p3), %v986_v5  ;;  %v988_v6 = vld [vmem:[%s6297_s28 + $0x60] sm:$0xff] (%p51_p3)  ;;  %v990_v7 = vld [vmem:[%s6297_s28 + $0x70] sm:$0xff] (%p51_p3) }
  0x15   : > { %v992_v8 = vld [vmem:[%s6297_s28 + $0x80] sm:$0xff]  ;;  %989 = vst [vmem:[%s6305_s29 + $0x30] sm:$0xff] %v988_v6  ;;  %991 = vst [vmem:[%s6305_s29 + $0x38] sm:$0xff] %v990_v7  ;;  %v994_v9 = vld [vmem:[%s6297_s28 + $0x90] sm:$0xff] }
  0x16   : > { %993 = vst [vmem:[%s6305_s29 + $0x40] sm:$0xff] %v992_v8  ;;  %v996_v10 = vld [vmem:[%s6297_s28 + $0xa0] sm:$0xff]  ;;  %v998_v11 = vld [vmem:[%s6297_s28 + $0xb0] sm:$0xff]  ;;  %995 = vst [vmem:[%s6305_s29 + $0x48] sm:$0xff] %v994_v9 }
  0x17   : > { %997 = vst [vmem:[%s6305_s29 + $0x50] sm:$0xff] %v996_v10  ;;  %999 = vst [vmem:[%s6305_s29 + $0x58] sm:$0xff] %v998_v11  ;;  %v1000_v12 = vld [vmem:[%s6297_s28 + $0xc0] sm:$0xff]  ;;  %v1002_v13 = vld [vmem:[%s6297_s28 + $0xd0] sm:$0xff] }
  0x18   : > { %v1004_v14 = vld [vmem:[%s6297_s28 + $0xe0] sm:$0xff]  ;;  %1001 = vst [vmem:[%s6305_s29 + $0x60] sm:$0xff] %v1000_v12  ;;  %1003 = vst [vmem:[%s6305_s29 + $0x68] sm:$0xff] %v1002_v13  ;;  %v1006_v15 = vld [vmem:[%s6297_s28 + $0xf0] sm:$0xff] }
  0x19   : > { %1005 = vst [vmem:[%s6305_s29 + $0x70] sm:$0xff] %v1004_v14  ;;  %v1008_v16 = vld [vmem:[%s6297_s28 + $0x100] sm:$0xff]  ;;  %v1010_v17 = vld [vmem:[%s6297_s28 + $0x110] sm:$0xff]  ;;  %1007 = vst [vmem:[%s6305_s29 + $0x78] sm:$0xff] %v1006_v15 }
  0x1a   : > { %1009 = vst [vmem:[%s6305_s29 + $0x80] sm:$0xff] %v1008_v16  ;;  %1011 = vst [vmem:[%s6305_s29 + $0x88] sm:$0xff] %v1010_v17  ;;  %v1012_v18 = vld [vmem:[%s6297_s28 + $0x120] sm:$0xff]  ;;  %v1014_v19 = vld [vmem:[%s6297_s28 + $0x130] sm:$0xff] }
  0x1b   : > { %v1016_v20 = vld [vmem:[%s6297_s28 + $0x140] sm:$0xff]  ;;  %1013 = vst [vmem:[%s6305_s29 + $0x90] sm:$0xff] %v1012_v18  ;;  %1015 = vst [vmem:[%s6305_s29 + $0x98] sm:$0xff] %v1014_v19  ;;  %v1018_v21 = vld [vmem:[%s6297_s28 + $0x150] sm:$0xff] }
  0x1c   : > { %1017 = vst [vmem:[%s6305_s29 + $0xa0] sm:$0xff] %v1016_v20  ;;  %v1020_v22 = vld [vmem:[%s6297_s28 + $0x160] sm:$0xff]  ;;  %v1022_v23 = vld [vmem:[%s6297_s28 + $0x170] sm:$0xff]  ;;  %1019 = vst [vmem:[%s6305_s29 + $0xa8] sm:$0xff] %v1018_v21 }
  0x1d   : > { %1021 = vst [vmem:[%s6305_s29 + $0xb0] sm:$0xff] %v1020_v22  ;;  %1023 = vst [vmem:[%s6305_s29 + $0xb8] sm:$0xff] %v1022_v23  ;;  %v1024_v24 = vld [vmem:[%s6297_s28 + $0x180] sm:$0xff]  ;;  %v1026_v25 = vld [vmem:[%s6297_s28 + $0x190] sm:$0xff] }
  0x1e   : > { %v1028_v26 = vld [vmem:[%s6297_s28 + $0x1a0] sm:$0xff]  ;;  %1025 = vst [vmem:[%s6305_s29 + $0xc0] sm:$0xff] %v1024_v24  ;;  %1027 = vst [vmem:[%s6305_s29 + $0xc8] sm:$0xff] %v1026_v25  ;;  %v1030_v27 = vld [vmem:[%s6297_s28 + $0x1b0] sm:$0xff] }
  0x1f   : > { %1029 = vst [vmem:[%s6305_s29 + $0xd0] sm:$0xff] %v1028_v26  ;;  %v1032_v28 = vld [vmem:[%s6297_s28 + $0x1c0] sm:$0xff]  ;;  %v1034_v29 = vld [vmem:[%s6297_s28 + $0x1d0] sm:$0xff]  ;;  %1031 = vst [vmem:[%s6305_s29 + $0xd8] sm:$0xff] %v1030_v27 }
  0x20   : > { %1033 = vst [vmem:[%s6305_s29 + $0xe0] sm:$0xff] %v1032_v28  ;;  %1035 = vst [vmem:[%s6305_s29 + $0xe8] sm:$0xff] %v1034_v29  ;;  %v1036_v30 = vld [vmem:[%s6297_s28 + $0x1e0] sm:$0xff]  ;;  %v1038_v31 = vld [vmem:[%s6297_s28 + $0x1f0] sm:$0xff] }
  0x21   : > { %v1040_v32 = vld [vmem:[%s6297_s28 + $0x200] sm:$0xff]  ;;  %1037 = vst [vmem:[%s6305_s29 + $0xf0] sm:$0xff] %v1036_v30  ;;  %1039 = vst [vmem:[%s6305_s29 + $0xf8] sm:$0xff] %v1038_v31  ;;  %v1042_v33 = vld [vmem:[%s6297_s28 + $0x210] sm:$0xff] }
  0x22   : > { %1041 = vst [vmem:[%s6305_s29 + $0x100] sm:$0xff] %v1040_v32  ;;  %v1044_v34 = vld [vmem:[%s6297_s28 + $0x220] sm:$0xff]  ;;  %v1046_v35 = vld [vmem:[%s6297_s28 + $0x230] sm:$0xff]  ;;  %1043 = vst [vmem:[%s6305_s29 + $0x108] sm:$0xff] %v1042_v33 }
  0x23   : > { %1045 = vst [vmem:[%s6305_s29 + $0x110] sm:$0xff] %v1044_v34  ;;  %1047 = vst [vmem:[%s6305_s29 + $0x118] sm:$0xff] %v1046_v35  ;;  %v1048_v36 = vld [vmem:[%s6297_s28 + $0x240] sm:$0xff]  ;;  %v1050_v37 = vld [vmem:[%s6297_s28 + $0x250] sm:$0xff] }
  0x24   : > { %v1052_v38 = vld [vmem:[%s6297_s28 + $0x260] sm:$0xff]  ;;  %1049 = vst [vmem:[%s6305_s29 + $0x120] sm:$0xff] %v1048_v36  ;;  %1051 = vst [vmem:[%s6305_s29 + $0x128] sm:$0xff] %v1050_v37  ;;  %v1054_v39 = vld [vmem:[%s6297_s28 + $0x270] sm:$0xff] }
  0x25   : > { %1053 = vst [vmem:[%s6305_s29 + $0x130] sm:$0xff] %v1052_v38  ;;  %v1056_v40 = vld [vmem:[%s6297_s28 + $0x280] sm:$0xff]  ;;  %v1058_v41 = vld [vmem:[%s6297_s28 + $0x290] sm:$0xff]  ;;  %1055 = vst [vmem:[%s6305_s29 + $0x138] sm:$0xff] %v1054_v39 }
  0x26   : > { %1057 = vst [vmem:[%s6305_s29 + $0x140] sm:$0xff] %v1056_v40  ;;  %1059 = vst [vmem:[%s6305_s29 + $0x148] sm:$0xff] %v1058_v41  ;;  %v1060_v42 = vld [vmem:[%s6297_s28 + $0x2a0] sm:$0xff]  ;;  %v1062_v43 = vld [vmem:[%s6297_s28 + $0x2b0] sm:$0xff] }
  0x27   : > { %v1064_v44 = vld [vmem:[%s6297_s28 + $0x2c0] sm:$0xff]  ;;  %1061 = vst [vmem:[%s6305_s29 + $0x150] sm:$0xff] %v1060_v42  ;;  %1063 = vst [vmem:[%s6305_s29 + $0x158] sm:$0xff] %v1062_v43  ;;  %v1066_v45 = vld [vmem:[%s6297_s28 + $0x2d0] sm:$0xff] }
  0x28   : > { %1065 = vst [vmem:[%s6305_s29 + $0x160] sm:$0xff] %v1064_v44  ;;  %v1068_v46 = vld [vmem:[%s6297_s28 + $0x2e0] sm:$0xff]  ;;  %v1070_v47 = vld [vmem:[%s6297_s28 + $0x2f0] sm:$0xff]  ;;  %1067 = vst [vmem:[%s6305_s29 + $0x168] sm:$0xff] %v1066_v45 }
  0x29   : > { %1069 = vst [vmem:[%s6305_s29 + $0x170] sm:$0xff] %v1068_v46  ;;  %1071 = vst [vmem:[%s6305_s29 + $0x178] sm:$0xff] %v1070_v47  ;;  %v1072_v48 = vld [vmem:[%s6297_s28 + $0x300] sm:$0xff]  ;;  %v1074_v49 = vld [vmem:[%s6297_s28 + $0x310] sm:$0xff] }
  0x2a   : > { %v1076_v50 = vld [vmem:[%s6297_s28 + $0x320] sm:$0xff]  ;;  %1073 = vst [vmem:[%s6305_s29 + $0x180] sm:$0xff] %v1072_v48  ;;  %1075 = vst [vmem:[%s6305_s29 + $0x188] sm:$0xff] %v1074_v49  ;;  %v1078_v51 = vld [vmem:[%s6297_s28 + $0x330] sm:$0xff] }
  0x2b   : > { %1077 = vst [vmem:[%s6305_s29 + $0x190] sm:$0xff] %v1076_v50  ;;  %v1080_v52 = vld [vmem:[%s6297_s28 + $0x340] sm:$0xff]  ;;  %v1082_v53 = vld [vmem:[%s6297_s28 + $0x350] sm:$0xff]  ;;  %1079 = vst [vmem:[%s6305_s29 + $0x198] sm:$0xff] %v1078_v51 }
  0x2c   : > { %1081 = vst [vmem:[%s6305_s29 + $0x1a0] sm:$0xff] %v1080_v52  ;;  %1083 = vst [vmem:[%s6305_s29 + $0x1a8] sm:$0xff] %v1082_v53  ;;  %v1084_v54 = vld [vmem:[%s6297_s28 + $0x360] sm:$0xff]  ;;  %v1086_v55 = vld [vmem:[%s6297_s28 + $0x370] sm:$0xff] }
  0x2d   : > { %v1088_v56 = vld [vmem:[%s6297_s28 + $0x380] sm:$0xff]  ;;  %1085 = vst [vmem:[%s6305_s29 + $0x1b0] sm:$0xff] %v1084_v54  ;;  %1087 = vst [vmem:[%s6305_s29 + $0x1b8] sm:$0xff] %v1086_v55  ;;  %v1090_v57 = vld [vmem:[%s6297_s28 + $0x390] sm:$0xff] }
  0x2e   : > { %1089 = vst [vmem:[%s6305_s29 + $0x1c0] sm:$0xff] %v1088_v56  ;;  %v1092_v58 = vld [vmem:[%s6297_s28 + $0x3a0] sm:$0xff]  ;;  %v1094_v59 = vld [vmem:[%s6297_s28 + $0x3b0] sm:$0xff]  ;;  %1091 = vst [vmem:[%s6305_s29 + $0x1c8] sm:$0xff] %v1090_v57 }
  0x2f   : > { %1093 = vst [vmem:[%s6305_s29 + $0x1d0] sm:$0xff] %v1092_v58  ;;  %1095 = vst [vmem:[%s6305_s29 + $0x1d8] sm:$0xff] %v1094_v59  ;;  %v1096_v60 = vld [vmem:[%s6297_s28 + $0x3c0] sm:$0xff]  ;;  %v1098_v61 = vld [vmem:[%s6297_s28 + $0x3d0] sm:$0xff] }
  0x30   : > { %v1100_v62 = vld [vmem:[%s6297_s28 + $0x3e0] sm:$0xff]  ;;  %1097 = vst [vmem:[%s6305_s29 + $0x1e0] sm:$0xff] %v1096_v60  ;;  %1099 = vst [vmem:[%s6305_s29 + $0x1e8] sm:$0xff] %v1098_v61  ;;  %v1102_v63 = vld [vmem:[%s6297_s28 + $0x3f0] sm:$0xff] }
  0x31   : > { %1101 = vst [vmem:[%s6305_s29 + $0x1f0] sm:$0xff] %v1100_v62  ;;  %v1104_v0 = vld [vmem:[%s6297_s28 + $0x400] sm:$0xff]  ;;  %v1106_v1 = vld [vmem:[%s6297_s28 + $0x410] sm:$0xff]  ;;  %1103 = vst [vmem:[%s6305_s29 + $0x1f8] sm:$0xff] %v1102_v63 }
  0x32   : > { %1105 = vst [vmem:[%s6305_s29 + $0x200] sm:$0xff] %v1104_v0  ;;  %1107 = vst [vmem:[%s6305_s29 + $0x208] sm:$0xff] %v1106_v1  ;;  %v1108_v2 = vld [vmem:[%s6297_s28 + $0x420] sm:$0xff]  ;;  %v1110_v3 = vld [vmem:[%s6297_s28 + $0x430] sm:$0xff] }
  0x33   : > { %v1112_v4 = vld [vmem:[%s6297_s28 + $0x440] sm:$0xff]  ;;  %1109 = vst [vmem:[%s6305_s29 + $0x210] sm:$0xff] %v1108_v2  ;;  %1111 = vst [vmem:[%s6305_s29 + $0x218] sm:$0xff] %v1110_v3  ;;  %v1114_v5 = vld [vmem:[%s6297_s28 + $0x450] sm:$0xff] }
  0x34   : > { %1113 = vst [vmem:[%s6305_s29 + $0x220] sm:$0xff] %v1112_v4  ;;  %v1116_v6 = vld [vmem:[%s6297_s28 + $0x460] sm:$0xff]  ;;  %v1118_v7 = vld [vmem:[%s6297_s28 + $0x470] sm:$0xff]  ;;  %1115 = vst [vmem:[%s6305_s29 + $0x228] sm:$0xff] %v1114_v5 }
  0x35   : > { %1117 = vst [vmem:[%s6305_s29 + $0x230] sm:$0xff] %v1116_v6  ;;  %1119 = vst [vmem:[%s6305_s29 + $0x238] sm:$0xff] %v1118_v7  ;;  %v1120_v8 = vld [vmem:[%s6297_s28 + $0x480] sm:$0xff]  ;;  %v1122_v9 = vld [vmem:[%s6297_s28 + $0x490] sm:$0xff] }
  0x36   : > { %v1124_v10 = vld [vmem:[%s6297_s28 + $0x4a0] sm:$0xff]  ;;  %1121 = vst [vmem:[%s6305_s29 + $0x240] sm:$0xff] %v1120_v8  ;;  %1123 = vst [vmem:[%s6305_s29 + $0x248] sm:$0xff] %v1122_v9  ;;  %v1126_v11 = vld [vmem:[%s6297_s28 + $0x4b0] sm:$0xff] }
  0x37   : > { %1125 = vst [vmem:[%s6305_s29 + $0x250] sm:$0xff] %v1124_v10  ;;  %v1128_v12 = vld [vmem:[%s6297_s28 + $0x4c0] sm:$0xff]  ;;  %v1130_v13 = vld [vmem:[%s6297_s28 + $0x4d0] sm:$0xff]  ;;  %1127 = vst [vmem:[%s6305_s29 + $0x258] sm:$0xff] %v1126_v11 }
  0x38   : > { %1129 = vst [vmem:[%s6305_s29 + $0x260] sm:$0xff] %v1128_v12  ;;  %1131 = vst [vmem:[%s6305_s29 + $0x268] sm:$0xff] %v1130_v13  ;;  %v1132_v14 = vld [vmem:[%s6297_s28 + $0x4e0] sm:$0xff]  ;;  %v1134_v15 = vld [vmem:[%s6297_s28 + $0x4f0] sm:$0xff] }
  0x39   : > { %v1136_v16 = vld [vmem:[%s6297_s28 + $0x500] sm:$0xff]  ;;  %1133 = vst [vmem:[%s6305_s29 + $0x270] sm:$0xff] %v1132_v14  ;;  %1135 = vst [vmem:[%s6305_s29 + $0x278] sm:$0xff] %v1134_v15  ;;  %v1138_v17 = vld [vmem:[%s6297_s28 + $0x510] sm:$0xff] }
  0x3a   : > { %1137 = vst [vmem:[%s6305_s29 + $0x280] sm:$0xff] %v1136_v16  ;;  %v1140_v18 = vld [vmem:[%s6297_s28 + $0x520] sm:$0xff]  ;;  %v1142_v19 = vld [vmem:[%s6297_s28 + $0x530] sm:$0xff]  ;;  %1139 = vst [vmem:[%s6305_s29 + $0x288] sm:$0xff] %v1138_v17 }
  0x3b   : > { %1141 = vst [vmem:[%s6305_s29 + $0x290] sm:$0xff] %v1140_v18  ;;  %1143 = vst [vmem:[%s6305_s29 + $0x298] sm:$0xff] %v1142_v19  ;;  %v1144_v20 = vld [vmem:[%s6297_s28 + $0x540] sm:$0xff]  ;;  %v1146_v21 = vld [vmem:[%s6297_s28 + $0x550] sm:$0xff] }
  0x3c   : > { %v1148_v22 = vld [vmem:[%s6297_s28 + $0x560] sm:$0xff]  ;;  %1145 = vst [vmem:[%s6305_s29 + $0x2a0] sm:$0xff] %v1144_v20  ;;  %1147 = vst [vmem:[%s6305_s29 + $0x2a8] sm:$0xff] %v1146_v21  ;;  %v1150_v23 = vld [vmem:[%s6297_s28 + $0x570] sm:$0xff] }
  0x3d   : > { %1149 = vst [vmem:[%s6305_s29 + $0x2b0] sm:$0xff] %v1148_v22  ;;  %v1152_v24 = vld [vmem:[%s6297_s28 + $0x580] sm:$0xff]  ;;  %v1154_v25 = vld [vmem:[%s6297_s28 + $0x590] sm:$0xff]  ;;  %1151 = vst [vmem:[%s6305_s29 + $0x2b8] sm:$0xff] %v1150_v23 }
  0x3e   : > { %1153 = vst [vmem:[%s6305_s29 + $0x2c0] sm:$0xff] %v1152_v24  ;;  %1155 = vst [vmem:[%s6305_s29 + $0x2c8] sm:$0xff] %v1154_v25  ;;  %v1156_v26 = vld [vmem:[%s6297_s28 + $0x5a0] sm:$0xff]  ;;  %v1158_v27 = vld [vmem:[%s6297_s28 + $0x5b0] sm:$0xff] }
  0x3f   : > { %v1160_v28 = vld [vmem:[%s6297_s28 + $0x5c0] sm:$0xff]  ;;  %1157 = vst [vmem:[%s6305_s29 + $0x2d0] sm:$0xff] %v1156_v26  ;;  %1159 = vst [vmem:[%s6305_s29 + $0x2d8] sm:$0xff] %v1158_v27  ;;  %v1162_v29 = vld [vmem:[%s6297_s28 + $0x5d0] sm:$0xff] }
  0x40   : > { %1161 = vst [vmem:[%s6305_s29 + $0x2e0] sm:$0xff] %v1160_v28  ;;  %v1164_v30 = vld [vmem:[%s6297_s28 + $0x5e0] sm:$0xff]  ;;  %v1166_v31 = vld [vmem:[%s6297_s28 + $0x5f0] sm:$0xff]  ;;  %1163 = vst [vmem:[%s6305_s29 + $0x2e8] sm:$0xff] %v1162_v29 }
  0x41   : > { %1165 = vst [vmem:[%s6305_s29 + $0x2f0] sm:$0xff] %v1164_v30  ;;  %1167 = vst [vmem:[%s6305_s29 + $0x2f8] sm:$0xff] %v1166_v31  ;;  %v1168_v32 = vld [vmem:[%s6297_s28 + $0x600] sm:$0xff]  ;;  %v1170_v33 = vld [vmem:[%s6297_s28 + $0x610] sm:$0xff] }
  0x42   : > { %v1172_v34 = vld [vmem:[%s6297_s28 + $0x620] sm:$0xff]  ;;  %1169 = vst [vmem:[%s6305_s29 + $0x300] sm:$0xff] %v1168_v32  ;;  %1171 = vst [vmem:[%s6305_s29 + $0x308] sm:$0xff] %v1170_v33  ;;  %v1174_v35 = vld [vmem:[%s6297_s28 + $0x630] sm:$0xff] }
  0x43   : > { %1173 = vst [vmem:[%s6305_s29 + $0x310] sm:$0xff] %v1172_v34  ;;  %v1176_v36 = vld [vmem:[%s6297_s28 + $0x640] sm:$0xff]  ;;  %v1178_v37 = vld [vmem:[%s6297_s28 + $0x650] sm:$0xff]  ;;  %1175 = vst [vmem:[%s6305_s29 + $0x318] sm:$0xff] %v1174_v35 }
  0x44   : > { %1177 = vst [vmem:[%s6305_s29 + $0x320] sm:$0xff] %v1176_v36  ;;  %1179 = vst [vmem:[%s6305_s29 + $0x328] sm:$0xff] %v1178_v37  ;;  %v1180_v38 = vld [vmem:[%s6297_s28 + $0x660] sm:$0xff]  ;;  %v1182_v39 = vld [vmem:[%s6297_s28 + $0x670] sm:$0xff] }
  0x45   : > { %v1184_v40 = vld [vmem:[%s6297_s28 + $0x680] sm:$0xff]  ;;  %1181 = vst [vmem:[%s6305_s29 + $0x330] sm:$0xff] %v1180_v38  ;;  %1183 = vst [vmem:[%s6305_s29 + $0x338] sm:$0xff] %v1182_v39  ;;  %v1186_v41 = vld [vmem:[%s6297_s28 + $0x690] sm:$0xff] }
  0x46   : > { %1185 = vst [vmem:[%s6305_s29 + $0x340] sm:$0xff] %v1184_v40  ;;  %v1188_v42 = vld [vmem:[%s6297_s28 + $0x6a0] sm:$0xff]  ;;  %v1190_v43 = vld [vmem:[%s6297_s28 + $0x6b0] sm:$0xff]  ;;  %1187 = vst [vmem:[%s6305_s29 + $0x348] sm:$0xff] %v1186_v41 }
  0x47   : > { %1189 = vst [vmem:[%s6305_s29 + $0x350] sm:$0xff] %v1188_v42  ;;  %1191 = vst [vmem:[%s6305_s29 + $0x358] sm:$0xff] %v1190_v43  ;;  %v1192_v44 = vld [vmem:[%s6297_s28 + $0x6c0] sm:$0xff]  ;;  %v1194_v45 = vld [vmem:[%s6297_s28 + $0x6d0] sm:$0xff] }
  0x48   : > { %v1196_v46 = vld [vmem:[%s6297_s28 + $0x6e0] sm:$0xff]  ;;  %1193 = vst [vmem:[%s6305_s29 + $0x360] sm:$0xff] %v1192_v44  ;;  %1195 = vst [vmem:[%s6305_s29 + $0x368] sm:$0xff] %v1194_v45  ;;  %v1198_v47 = vld [vmem:[%s6297_s28 + $0x6f0] sm:$0xff] }
  0x49   : > { %1197 = vst [vmem:[%s6305_s29 + $0x370] sm:$0xff] %v1196_v46  ;;  %v1200_v48 = vld [vmem:[%s6297_s28 + $0x700] sm:$0xff]  ;;  %v1202_v49 = vld [vmem:[%s6297_s28 + $0x710] sm:$0xff]  ;;  %1199 = vst [vmem:[%s6305_s29 + $0x378] sm:$0xff] %v1198_v47 }
  0x4a   : > { %1201 = vst [vmem:[%s6305_s29 + $0x380] sm:$0xff] %v1200_v48  ;;  %1203 = vst [vmem:[%s6305_s29 + $0x388] sm:$0xff] %v1202_v49  ;;  %v1204_v50 = vld [vmem:[%s6297_s28 + $0x720] sm:$0xff]  ;;  %v1206_v51 = vld [vmem:[%s6297_s28 + $0x730] sm:$0xff] }
  0x4b   : > { %v1208_v52 = vld [vmem:[%s6297_s28 + $0x740] sm:$0xff]  ;;  %1205 = vst [vmem:[%s6305_s29 + $0x390] sm:$0xff] %v1204_v50  ;;  %1207 = vst [vmem:[%s6305_s29 + $0x398] sm:$0xff] %v1206_v51  ;;  %v1210_v53 = vld [vmem:[%s6297_s28 + $0x750] sm:$0xff] }
  0x4c   : > { %1209 = vst [vmem:[%s6305_s29 + $0x3a0] sm:$0xff] %v1208_v52  ;;  %v1212_v54 = vld [vmem:[%s6297_s28 + $0x760] sm:$0xff]  ;;  %v1214_v55 = vld [vmem:[%s6297_s28 + $0x770] sm:$0xff]  ;;  %1211 = vst [vmem:[%s6305_s29 + $0x3a8] sm:$0xff] %v1210_v53 }
  0x4d   : > { %1213 = vst [vmem:[%s6305_s29 + $0x3b0] sm:$0xff] %v1212_v54  ;;  %1215 = vst [vmem:[%s6305_s29 + $0x3b8] sm:$0xff] %v1214_v55  ;;  %v1216_v56 = vld [vmem:[%s6297_s28 + $0x780] sm:$0xff]  ;;  %v1218_v57 = vld [vmem:[%s6297_s28 + $0x790] sm:$0xff] }
  0x4e   : > { %v1220_v58 = vld [vmem:[%s6297_s28 + $0x7a0] sm:$0xff]  ;;  %1217 = vst [vmem:[%s6305_s29 + $0x3c0] sm:$0xff] %v1216_v56  ;;  %1219 = vst [vmem:[%s6305_s29 + $0x3c8] sm:$0xff] %v1218_v57  ;;  %v1222_v59 = vld [vmem:[%s6297_s28 + $0x7b0] sm:$0xff] }
  0x4f   : > { %1221 = vst [vmem:[%s6305_s29 + $0x3d0] sm:$0xff] %v1220_v58  ;;  %v1224_v60 = vld [vmem:[%s6297_s28 + $0x7c0] sm:$0xff]  ;;  %v1226_v61 = vld [vmem:[%s6297_s28 + $0x7d0] sm:$0xff]  ;;  %1223 = vst [vmem:[%s6305_s29 + $0x3d8] sm:$0xff] %v1222_v59 }
  0x50   : > { %1225 = vst [vmem:[%s6305_s29 + $0x3e0] sm:$0xff] %v1224_v60  ;;  %1227 = vst [vmem:[%s6305_s29 + $0x3e8] sm:$0xff] %v1226_v61  ;;  %v1228_v62 = vld [vmem:[%s6297_s28 + $0x7e0] sm:$0xff]  ;;  %v1230_v63 = vld [vmem:[%s6297_s28 + $0x7f0] sm:$0xff] }
  0x51   : > { %v1232_v0 = vld [vmem:[%s6297_s28 + $0x800] sm:$0xff]  ;;  %1229 = vst [vmem:[%s6305_s29 + $0x3f0] sm:$0xff] %v1228_v62  ;;  %1231 = vst [vmem:[%s6305_s29 + $0x3f8] sm:$0xff] %v1230_v63  ;;  %v1234_v1 = vld [vmem:[%s6297_s28 + $0x810] sm:$0xff] }
  0x52   : > { %1233 = vst [vmem:[%s6305_s29 + $0x400] sm:$0xff] %v1232_v0  ;;  %v1236_v2 = vld [vmem:[%s6297_s28 + $0x820] sm:$0xff]  ;;  %v1238_v3 = vld [vmem:[%s6297_s28 + $0x830] sm:$0xff]  ;;  %1235 = vst [vmem:[%s6305_s29 + $0x408] sm:$0xff] %v1234_v1 }
  0x53   : > { %1237 = vst [vmem:[%s6305_s29 + $0x410] sm:$0xff] %v1236_v2  ;;  %1239 = vst [vmem:[%s6305_s29 + $0x418] sm:$0xff] %v1238_v3  ;;  %v1240_v4 = vld [vmem:[%s6297_s28 + $0x840] sm:$0xff]  ;;  %v1242_v5 = vld [vmem:[%s6297_s28 + $0x850] sm:$0xff] }
  0x54   : > { %v1244_v6 = vld [vmem:[%s6297_s28 + $0x860] sm:$0xff]  ;;  %1241 = vst [vmem:[%s6305_s29 + $0x420] sm:$0xff] %v1240_v4  ;;  %1243 = vst [vmem:[%s6305_s29 + $0x428] sm:$0xff] %v1242_v5  ;;  %v1246_v7 = vld [vmem:[%s6297_s28 + $0x870] sm:$0xff] }
  0x55   : > { %1245 = vst [vmem:[%s6305_s29 + $0x430] sm:$0xff] %v1244_v6  ;;  %v1248_v8 = vld [vmem:[%s6297_s28 + $0x880] sm:$0xff]  ;;  %v1250_v9 = vld [vmem:[%s6297_s28 + $0x890] sm:$0xff]  ;;  %1247 = vst [vmem:[%s6305_s29 + $0x438] sm:$0xff] %v1246_v7 }
  0x56   : > { %1249 = vst [vmem:[%s6305_s29 + $0x440] sm:$0xff] %v1248_v8  ;;  %1251 = vst [vmem:[%s6305_s29 + $0x448] sm:$0xff] %v1250_v9  ;;  %v1252_v10 = vld [vmem:[%s6297_s28 + $0x8a0] sm:$0xff]  ;;  %v1254_v11 = vld [vmem:[%s6297_s28 + $0x8b0] sm:$0xff] }
  0x57   : > { %v1256_v12 = vld [vmem:[%s6297_s28 + $0x8c0] sm:$0xff]  ;;  %1253 = vst [vmem:[%s6305_s29 + $0x450] sm:$0xff] %v1252_v10  ;;  %1255 = vst [vmem:[%s6305_s29 + $0x458] sm:$0xff] %v1254_v11  ;;  %v1258_v13 = vld [vmem:[%s6297_s28 + $0x8d0] sm:$0xff] }
  0x58   : > { %1257 = vst [vmem:[%s6305_s29 + $0x460] sm:$0xff] %v1256_v12  ;;  %v1260_v14 = vld [vmem:[%s6297_s28 + $0x8e0] sm:$0xff]  ;;  %v1262_v15 = vld [vmem:[%s6297_s28 + $0x8f0] sm:$0xff]  ;;  %1259 = vst [vmem:[%s6305_s29 + $0x468] sm:$0xff] %v1258_v13 }
  0x59   : > { %1261 = vst [vmem:[%s6305_s29 + $0x470] sm:$0xff] %v1260_v14  ;;  %1263 = vst [vmem:[%s6305_s29 + $0x478] sm:$0xff] %v1262_v15  ;;  %v1264_v16 = vld [vmem:[%s6297_s28 + $0x900] sm:$0xff]  ;;  %v1266_v17 = vld [vmem:[%s6297_s28 + $0x910] sm:$0xff] }
  0x5a   : > { %v1268_v18 = vld [vmem:[%s6297_s28 + $0x920] sm:$0xff]  ;;  %1265 = vst [vmem:[%s6305_s29 + $0x480] sm:$0xff] %v1264_v16  ;;  %1267 = vst [vmem:[%s6305_s29 + $0x488] sm:$0xff] %v1266_v17  ;;  %v1270_v19 = vld [vmem:[%s6297_s28 + $0x930] sm:$0xff] }
  0x5b   : > { %1269 = vst [vmem:[%s6305_s29 + $0x490] sm:$0xff] %v1268_v18  ;;  %v1272_v20 = vld [vmem:[%s6297_s28 + $0x940] sm:$0xff]  ;;  %v1274_v21 = vld [vmem:[%s6297_s28 + $0x950] sm:$0xff]  ;;  %1271 = vst [vmem:[%s6305_s29 + $0x498] sm:$0xff] %v1270_v19 }
  0x5c   : > { %1273 = vst [vmem:[%s6305_s29 + $0x4a0] sm:$0xff] %v1272_v20  ;;  %1275 = vst [vmem:[%s6305_s29 + $0x4a8] sm:$0xff] %v1274_v21  ;;  %v1276_v22 = vld [vmem:[%s6297_s28 + $0x960] sm:$0xff]  ;;  %v1278_v23 = vld [vmem:[%s6297_s28 + $0x970] sm:$0xff] }
  0x5d   : > { %v1280_v24 = vld [vmem:[%s6297_s28 + $0x980] sm:$0xff]  ;;  %1277 = vst [vmem:[%s6305_s29 + $0x4b0] sm:$0xff] %v1276_v22  ;;  %1279 = vst [vmem:[%s6305_s29 + $0x4b8] sm:$0xff] %v1278_v23  ;;  %v1282_v25 = vld [vmem:[%s6297_s28 + $0x990] sm:$0xff] }
  0x5e   : > { %1281 = vst [vmem:[%s6305_s29 + $0x4c0] sm:$0xff] %v1280_v24  ;;  %v1284_v26 = vld [vmem:[%s6297_s28 + $0x9a0] sm:$0xff]  ;;  %v1286_v27 = vld [vmem:[%s6297_s28 + $0x9b0] sm:$0xff]  ;;  %1283 = vst [vmem:[%s6305_s29 + $0x4c8] sm:$0xff] %v1282_v25 }
  0x5f   : > { %1285 = vst [vmem:[%s6305_s29 + $0x4d0] sm:$0xff] %v1284_v26  ;;  %1287 = vst [vmem:[%s6305_s29 + $0x4d8] sm:$0xff] %v1286_v27  ;;  %v1288_v28 = vld [vmem:[%s6297_s28 + $0x9c0] sm:$0xff]  ;;  %v1290_v29 = vld [vmem:[%s6297_s28 + $0x9d0] sm:$0xff] }
  0x60   : > { %v1292_v30 = vld [vmem:[%s6297_s28 + $0x9e0] sm:$0xff]  ;;  %1289 = vst [vmem:[%s6305_s29 + $0x4e0] sm:$0xff] %v1288_v28  ;;  %1291 = vst [vmem:[%s6305_s29 + $0x4e8] sm:$0xff] %v1290_v29  ;;  %v1294_v31 = vld [vmem:[%s6297_s28 + $0x9f0] sm:$0xff] }
  0x61   : > { %1293 = vst [vmem:[%s6305_s29 + $0x4f0] sm:$0xff] %v1292_v30  ;;  %v1296_v32 = vld [vmem:[%s6297_s28 + $0xa00] sm:$0xff]  ;;  %v1298_v33 = vld [vmem:[%s6297_s28 + $0xa10] sm:$0xff]  ;;  %1295 = vst [vmem:[%s6305_s29 + $0x4f8] sm:$0xff] %v1294_v31 }
  0x62   : > { %1297 = vst [vmem:[%s6305_s29 + $0x500] sm:$0xff] %v1296_v32  ;;  %1299 = vst [vmem:[%s6305_s29 + $0x508] sm:$0xff] %v1298_v33  ;;  %v1300_v34 = vld [vmem:[%s6297_s28 + $0xa20] sm:$0xff]  ;;  %v1302_v35 = vld [vmem:[%s6297_s28 + $0xa30] sm:$0xff] }
  0x63   : > { %v1304_v36 = vld [vmem:[%s6297_s28 + $0xa40] sm:$0xff]  ;;  %1301 = vst [vmem:[%s6305_s29 + $0x510] sm:$0xff] %v1300_v34  ;;  %1303 = vst [vmem:[%s6305_s29 + $0x518] sm:$0xff] %v1302_v35  ;;  %v1306_v37 = vld [vmem:[%s6297_s28 + $0xa50] sm:$0xff] }
  0x64   : > { %1305 = vst [vmem:[%s6305_s29 + $0x520] sm:$0xff] %v1304_v36  ;;  %v1308_v38 = vld [vmem:[%s6297_s28 + $0xa60] sm:$0xff]  ;;  %v1310_v39 = vld [vmem:[%s6297_s28 + $0xa70] sm:$0xff]  ;;  %1307 = vst [vmem:[%s6305_s29 + $0x528] sm:$0xff] %v1306_v37 }
  0x65   : > { %1309 = vst [vmem:[%s6305_s29 + $0x530] sm:$0xff] %v1308_v38  ;;  %1311 = vst [vmem:[%s6305_s29 + $0x538] sm:$0xff] %v1310_v39  ;;  %v1312_v40 = vld [vmem:[%s6297_s28 + $0xa80] sm:$0xff]  ;;  %v1314_v41 = vld [vmem:[%s6297_s28 + $0xa90] sm:$0xff] }
  0x66   : > { %v1316_v42 = vld [vmem:[%s6297_s28 + $0xaa0] sm:$0xff]  ;;  %1313 = vst [vmem:[%s6305_s29 + $0x540] sm:$0xff] %v1312_v40  ;;  %1315 = vst [vmem:[%s6305_s29 + $0x548] sm:$0xff] %v1314_v41  ;;  %v1318_v43 = vld [vmem:[%s6297_s28 + $0xab0] sm:$0xff] }
  0x67   : > { %1317 = vst [vmem:[%s6305_s29 + $0x550] sm:$0xff] %v1316_v42  ;;  %v1320_v44 = vld [vmem:[%s6297_s28 + $0xac0] sm:$0xff]  ;;  %v1322_v45 = vld [vmem:[%s6297_s28 + $0xad0] sm:$0xff]  ;;  %1319 = vst [vmem:[%s6305_s29 + $0x558] sm:$0xff] %v1318_v43 }
  0x68   : > { %1321 = vst [vmem:[%s6305_s29 + $0x560] sm:$0xff] %v1320_v44  ;;  %1323 = vst [vmem:[%s6305_s29 + $0x568] sm:$0xff] %v1322_v45  ;;  %v1324_v46 = vld [vmem:[%s6297_s28 + $0xae0] sm:$0xff]  ;;  %v1326_v47 = vld [vmem:[%s6297_s28 + $0xaf0] sm:$0xff] }
  0x69   : > { %v1328_v48 = vld [vmem:[%s6297_s28 + $0xb00] sm:$0xff]  ;;  %1325 = vst [vmem:[%s6305_s29 + $0x570] sm:$0xff] %v1324_v46  ;;  %1327 = vst [vmem:[%s6305_s29 + $0x578] sm:$0xff] %v1326_v47  ;;  %v1330_v49 = vld [vmem:[%s6297_s28 + $0xb10] sm:$0xff] }
  0x6a   : > { %1329 = vst [vmem:[%s6305_s29 + $0x580] sm:$0xff] %v1328_v48  ;;  %v1332_v50 = vld [vmem:[%s6297_s28 + $0xb20] sm:$0xff]  ;;  %v1334_v51 = vld [vmem:[%s6297_s28 + $0xb30] sm:$0xff]  ;;  %1331 = vst [vmem:[%s6305_s29 + $0x588] sm:$0xff] %v1330_v49 }
  0x6b   : > { %1333 = vst [vmem:[%s6305_s29 + $0x590] sm:$0xff] %v1332_v50  ;;  %1335 = vst [vmem:[%s6305_s29 + $0x598] sm:$0xff] %v1334_v51  ;;  %v1336_v52 = vld [vmem:[%s6297_s28 + $0xb40] sm:$0xff]  ;;  %v1338_v53 = vld [vmem:[%s6297_s28 + $0xb50] sm:$0xff] }
  0x6c   : > { %v1340_v54 = vld [vmem:[%s6297_s28 + $0xb60] sm:$0xff]  ;;  %1337 = vst [vmem:[%s6305_s29 + $0x5a0] sm:$0xff] %v1336_v52  ;;  %1339 = vst [vmem:[%s6305_s29 + $0x5a8] sm:$0xff] %v1338_v53  ;;  %v1342_v55 = vld [vmem:[%s6297_s28 + $0xb70] sm:$0xff] }
  0x6d   : > { %1341 = vst [vmem:[%s6305_s29 + $0x5b0] sm:$0xff] %v1340_v54  ;;  %v1344_v56 = vld [vmem:[%s6297_s28 + $0xb80] sm:$0xff]  ;;  %v1346_v57 = vld [vmem:[%s6297_s28 + $0xb90] sm:$0xff]  ;;  %1343 = vst [vmem:[%s6305_s29 + $0x5b8] sm:$0xff] %v1342_v55 }
  0x6e   : > { %1345 = vst [vmem:[%s6305_s29 + $0x5c0] sm:$0xff] %v1344_v56  ;;  %1347 = vst [vmem:[%s6305_s29 + $0x5c8] sm:$0xff] %v1346_v57  ;;  %v1348_v58 = vld [vmem:[%s6297_s28 + $0xba0] sm:$0xff]  ;;  %v1350_v59 = vld [vmem:[%s6297_s28 + $0xbb0] sm:$0xff] }
  0x6f   : > { %v1352_v60 = vld [vmem:[%s6297_s28 + $0xbc0] sm:$0xff]  ;;  %1349 = vst [vmem:[%s6305_s29 + $0x5d0] sm:$0xff] %v1348_v58  ;;  %1351 = vst [vmem:[%s6305_s29 + $0x5d8] sm:$0xff] %v1350_v59  ;;  %v1354_v61 = vld [vmem:[%s6297_s28 + $0xbd0] sm:$0xff] }
  0x70   : > { %1353 = vst [vmem:[%s6305_s29 + $0x5e0] sm:$0xff] %v1352_v60  ;;  %v1356_v62 = vld [vmem:[%s6297_s28 + $0xbe0] sm:$0xff]  ;;  %v1358_v63 = vld [vmem:[%s6297_s28 + $0xbf0] sm:$0xff]  ;;  %1355 = vst [vmem:[%s6305_s29 + $0x5e8] sm:$0xff] %v1354_v61 }
  0x71   : > { %1357 = vst [vmem:[%s6305_s29 + $0x5f0] sm:$0xff] %v1356_v62  ;;  %1359 = vst [vmem:[%s6305_s29 + $0x5f8] sm:$0xff] %v1358_v63  ;;  %v1360_v0 = vld [vmem:[%s6297_s28 + $0xc00] sm:$0xff]  ;;  %v1362_v1 = vld [vmem:[%s6297_s28 + $0xc10] sm:$0xff] }
  0x72   : > { %v1364_v2 = vld [vmem:[%s6297_s28 + $0xc20] sm:$0xff]  ;;  %1361 = vst [vmem:[%s6305_s29 + $0x600] sm:$0xff] %v1360_v0  ;;  %1363 = vst [vmem:[%s6305_s29 + $0x608] sm:$0xff] %v1362_v1  ;;  %v1366_v3 = vld [vmem:[%s6297_s28 + $0xc30] sm:$0xff] }
  0x73   : > { %1365 = vst [vmem:[%s6305_s29 + $0x610] sm:$0xff] %v1364_v2  ;;  %v1368_v4 = vld [vmem:[%s6297_s28 + $0xc40] sm:$0xff]  ;;  %v1370_v5 = vld [vmem:[%s6297_s28 + $0xc50] sm:$0xff]  ;;  %1367 = vst [vmem:[%s6305_s29 + $0x618] sm:$0xff] %v1366_v3 }
  0x74   : > { %1369 = vst [vmem:[%s6305_s29 + $0x620] sm:$0xff] %v1368_v4  ;;  %1371 = vst [vmem:[%s6305_s29 + $0x628] sm:$0xff] %v1370_v5  ;;  %v1372_v6 = vld [vmem:[%s6297_s28 + $0xc60] sm:$0xff]  ;;  %v1374_v7 = vld [vmem:[%s6297_s28 + $0xc70] sm:$0xff] }
  0x75   : > { %v1376_v8 = vld [vmem:[%s6297_s28 + $0xc80] sm:$0xff]  ;;  %1373 = vst [vmem:[%s6305_s29 + $0x630] sm:$0xff] %v1372_v6  ;;  %1375 = vst [vmem:[%s6305_s29 + $0x638] sm:$0xff] %v1374_v7  ;;  %v1378_v9 = vld [vmem:[%s6297_s28 + $0xc90] sm:$0xff] }
  0x76   : > { %1377 = vst [vmem:[%s6305_s29 + $0x640] sm:$0xff] %v1376_v8  ;;  %v1380_v10 = vld [vmem:[%s6297_s28 + $0xca0] sm:$0xff]  ;;  %v1382_v11 = vld [vmem:[%s6297_s28 + $0xcb0] sm:$0xff]  ;;  %1379 = vst [vmem:[%s6305_s29 + $0x648] sm:$0xff] %v1378_v9 }
  0x77   : > { %1381 = vst [vmem:[%s6305_s29 + $0x650] sm:$0xff] %v1380_v10  ;;  %1383 = vst [vmem:[%s6305_s29 + $0x658] sm:$0xff] %v1382_v11  ;;  %v1384_v12 = vld [vmem:[%s6297_s28 + $0xcc0] sm:$0xff]  ;;  %v1386_v13 = vld [vmem:[%s6297_s28 + $0xcd0] sm:$0xff] }
  0x78   : > { %v1388_v14 = vld [vmem:[%s6297_s28 + $0xce0] sm:$0xff]  ;;  %1385 = vst [vmem:[%s6305_s29 + $0x660] sm:$0xff] %v1384_v12  ;;  %1387 = vst [vmem:[%s6305_s29 + $0x668] sm:$0xff] %v1386_v13  ;;  %v1390_v15 = vld [vmem:[%s6297_s28 + $0xcf0] sm:$0xff] }
  0x79   : > { %1389 = vst [vmem:[%s6305_s29 + $0x670] sm:$0xff] %v1388_v14  ;;  %v1392_v16 = vld [vmem:[%s6297_s28 + $0xd00] sm:$0xff]  ;;  %v1394_v17 = vld [vmem:[%s6297_s28 + $0xd10] sm:$0xff]  ;;  %1391 = vst [vmem:[%s6305_s29 + $0x678] sm:$0xff] %v1390_v15 }
  0x7a   : > { %1393 = vst [vmem:[%s6305_s29 + $0x680] sm:$0xff] %v1392_v16  ;;  %1395 = vst [vmem:[%s6305_s29 + $0x688] sm:$0xff] %v1394_v17  ;;  %v1396_v18 = vld [vmem:[%s6297_s28 + $0xd20] sm:$0xff]  ;;  %v1398_v19 = vld [vmem:[%s6297_s28 + $0xd30] sm:$0xff] }
  0x7b   : > { %v1400_v20 = vld [vmem:[%s6297_s28 + $0xd40] sm:$0xff]  ;;  %1397 = vst [vmem:[%s6305_s29 + $0x690] sm:$0xff] %v1396_v18  ;;  %1399 = vst [vmem:[%s6305_s29 + $0x698] sm:$0xff] %v1398_v19  ;;  %v1402_v21 = vld [vmem:[%s6297_s28 + $0xd50] sm:$0xff] }
  0x7c   : > { %1401 = vst [vmem:[%s6305_s29 + $0x6a0] sm:$0xff] %v1400_v20  ;;  %v1404_v22 = vld [vmem:[%s6297_s28 + $0xd60] sm:$0xff]  ;;  %v1406_v23 = vld [vmem:[%s6297_s28 + $0xd70] sm:$0xff]  ;;  %1403 = vst [vmem:[%s6305_s29 + $0x6a8] sm:$0xff] %v1402_v21 }
  0x7d   : > { %1405 = vst [vmem:[%s6305_s29 + $0x6b0] sm:$0xff] %v1404_v22  ;;  %1407 = vst [vmem:[%s6305_s29 + $0x6b8] sm:$0xff] %v1406_v23  ;;  %v1408_v24 = vld [vmem:[%s6297_s28 + $0xd80] sm:$0xff]  ;;  %v1410_v25 = vld [vmem:[%s6297_s28 + $0xd90] sm:$0xff] }
  0x7e   : > { %v1412_v26 = vld [vmem:[%s6297_s28 + $0xda0] sm:$0xff]  ;;  %1409 = vst [vmem:[%s6305_s29 + $0x6c0] sm:$0xff] %v1408_v24  ;;  %1411 = vst [vmem:[%s6305_s29 + $0x6c8] sm:$0xff] %v1410_v25  ;;  %v1414_v27 = vld [vmem:[%s6297_s28 + $0xdb0] sm:$0xff] }
  0x7f   : > { %1413 = vst [vmem:[%s6305_s29 + $0x6d0] sm:$0xff] %v1412_v26  ;;  %v1416_v28 = vld [vmem:[%s6297_s28 + $0xdc0] sm:$0xff]  ;;  %v1418_v29 = vld [vmem:[%s6297_s28 + $0xdd0] sm:$0xff]  ;;  %1415 = vst [vmem:[%s6305_s29 + $0x6d8] sm:$0xff] %v1414_v27 }
  0x80   : > { %1417 = vst [vmem:[%s6305_s29 + $0x6e0] sm:$0xff] %v1416_v28  ;;  %1419 = vst [vmem:[%s6305_s29 + $0x6e8] sm:$0xff] %v1418_v29  ;;  %v1420_v30 = vld [vmem:[%s6297_s28 + $0xde0] sm:$0xff]  ;;  %v1422_v31 = vld [vmem:[%s6297_s28 + $0xdf0] sm:$0xff] }
  0x81   : > { %v1424_v32 = vld [vmem:[%s6297_s28 + $0xe00] sm:$0xff]  ;;  %1421 = vst [vmem:[%s6305_s29 + $0x6f0] sm:$0xff] %v1420_v30  ;;  %1423 = vst [vmem:[%s6305_s29 + $0x6f8] sm:$0xff] %v1422_v31  ;;  %v1426_v33 = vld [vmem:[%s6297_s28 + $0xe10] sm:$0xff] }
  0x82   : > { %1425 = vst [vmem:[%s6305_s29 + $0x700] sm:$0xff] %v1424_v32  ;;  %v1428_v34 = vld [vmem:[%s6297_s28 + $0xe20] sm:$0xff]  ;;  %v1430_v35 = vld [vmem:[%s6297_s28 + $0xe30] sm:$0xff]  ;;  %1427 = vst [vmem:[%s6305_s29 + $0x708] sm:$0xff] %v1426_v33 }
  0x83   : > { %1429 = vst [vmem:[%s6305_s29 + $0x710] sm:$0xff] %v1428_v34  ;;  %1431 = vst [vmem:[%s6305_s29 + $0x718] sm:$0xff] %v1430_v35  ;;  %v1432_v36 = vld [vmem:[%s6297_s28 + $0xe40] sm:$0xff]  ;;  %v1434_v37 = vld [vmem:[%s6297_s28 + $0xe50] sm:$0xff] }
  0x84   : > { %v1436_v38 = vld [vmem:[%s6297_s28 + $0xe60] sm:$0xff]  ;;  %1433 = vst [vmem:[%s6305_s29 + $0x720] sm:$0xff] %v1432_v36  ;;  %1435 = vst [vmem:[%s6305_s29 + $0x728] sm:$0xff] %v1434_v37  ;;  %v1438_v39 = vld [vmem:[%s6297_s28 + $0xe70] sm:$0xff] }
  0x85   : > { %1437 = vst [vmem:[%s6305_s29 + $0x730] sm:$0xff] %v1436_v38  ;;  %v1440_v40 = vld [vmem:[%s6297_s28 + $0xe80] sm:$0xff]  ;;  %v1442_v41 = vld [vmem:[%s6297_s28 + $0xe90] sm:$0xff]  ;;  %1439 = vst [vmem:[%s6305_s29 + $0x738] sm:$0xff] %v1438_v39 }
  0x86   : > { %1441 = vst [vmem:[%s6305_s29 + $0x740] sm:$0xff] %v1440_v40  ;;  %1443 = vst [vmem:[%s6305_s29 + $0x748] sm:$0xff] %v1442_v41  ;;  %v1444_v42 = vld [vmem:[%s6297_s28 + $0xea0] sm:$0xff]  ;;  %v1446_v43 = vld [vmem:[%s6297_s28 + $0xeb0] sm:$0xff] }
  0x87   : > { %v1448_v44 = vld [vmem:[%s6297_s28 + $0xec0] sm:$0xff]  ;;  %1445 = vst [vmem:[%s6305_s29 + $0x750] sm:$0xff] %v1444_v42  ;;  %1447 = vst [vmem:[%s6305_s29 + $0x758] sm:$0xff] %v1446_v43  ;;  %v1450_v45 = vld [vmem:[%s6297_s28 + $0xed0] sm:$0xff] }
  0x88   : > { %1449 = vst [vmem:[%s6305_s29 + $0x760] sm:$0xff] %v1448_v44  ;;  %v1452_v46 = vld [vmem:[%s6297_s28 + $0xee0] sm:$0xff]  ;;  %v1454_v47 = vld [vmem:[%s6297_s28 + $0xef0] sm:$0xff]  ;;  %1451 = vst [vmem:[%s6305_s29 + $0x768] sm:$0xff] %v1450_v45 }
  0x89   : > { %1453 = vst [vmem:[%s6305_s29 + $0x770] sm:$0xff] %v1452_v46  ;;  %1455 = vst [vmem:[%s6305_s29 + $0x778] sm:$0xff] %v1454_v47  ;;  %v1456_v48 = vld [vmem:[%s6297_s28 + $0xf00] sm:$0xff]  ;;  %v1458_v49 = vld [vmem:[%s6297_s28 + $0xf10] sm:$0xff] }
  0x8a   : > { %v1460_v50 = vld [vmem:[%s6297_s28 + $0xf20] sm:$0xff]  ;;  %1457 = vst [vmem:[%s6305_s29 + $0x780] sm:$0xff] %v1456_v48  ;;  %1459 = vst [vmem:[%s6305_s29 + $0x788] sm:$0xff] %v1458_v49  ;;  %v1462_v51 = vld [vmem:[%s6297_s28 + $0xf30] sm:$0xff] }
  0x8b   : > { %1461 = vst [vmem:[%s6305_s29 + $0x790] sm:$0xff] %v1460_v50  ;;  %v1464_v52 = vld [vmem:[%s6297_s28 + $0xf40] sm:$0xff]  ;;  %v1466_v53 = vld [vmem:[%s6297_s28 + $0xf50] sm:$0xff]  ;;  %1463 = vst [vmem:[%s6305_s29 + $0x798] sm:$0xff] %v1462_v51 }
  0x8c   : > { %1465 = vst [vmem:[%s6305_s29 + $0x7a0] sm:$0xff] %v1464_v52  ;;  %1467 = vst [vmem:[%s6305_s29 + $0x7a8] sm:$0xff] %v1466_v53  ;;  %v1468_v54 = vld [vmem:[%s6297_s28 + $0xf60] sm:$0xff]  ;;  %v1470_v55 = vld [vmem:[%s6297_s28 + $0xf70] sm:$0xff] }
  0x8d   : > { %v1472_v56 = vld [vmem:[%s6297_s28 + $0xf80] sm:$0xff]  ;;  %1469 = vst [vmem:[%s6305_s29 + $0x7b0] sm:$0xff] %v1468_v54  ;;  %1471 = vst [vmem:[%s6305_s29 + $0x7b8] sm:$0xff] %v1470_v55  ;;  %v1474_v57 = vld [vmem:[%s6297_s28 + $0xf90] sm:$0xff] }
  0x8e   : > { %1473 = vst [vmem:[%s6305_s29 + $0x7c0] sm:$0xff] %v1472_v56  ;;  %v1476_v58 = vld [vmem:[%s6297_s28 + $0xfa0] sm:$0xff]  ;;  %v1478_v59 = vld [vmem:[%s6297_s28 + $0xfb0] sm:$0xff]  ;;  %1475 = vst [vmem:[%s6305_s29 + $0x7c8] sm:$0xff] %v1474_v57 }
  0x8f   : > { %1477 = vst [vmem:[%s6305_s29 + $0x7d0] sm:$0xff] %v1476_v58  ;;  %1479 = vst [vmem:[%s6305_s29 + $0x7d8] sm:$0xff] %v1478_v59  ;;  %v1480_v60 = vld [vmem:[%s6297_s28 + $0xfc0] sm:$0xff]  ;;  %v1482_v61 = vld [vmem:[%s6297_s28 + $0xfd0] sm:$0xff] }
  0x90   : > { %v1484_v62 = vld [vmem:[%s6297_s28 + $0xfe0] sm:$0xff]  ;;  %1481 = vst [vmem:[%s6305_s29 + $0x7e0] sm:$0xff] %v1480_v60  ;;  %1483 = vst [vmem:[%s6305_s29 + $0x7e8] sm:$0xff] %v1482_v61  ;;  %v1486_v63 = vld [vmem:[%s6297_s28 + $0xff0] sm:$0xff] }
  0x91   : > { %1485 = vst [vmem:[%s6305_s29 + $0x7f0] sm:$0xff] %v1484_v62  ;;  %v1488_v0 = vld [vmem:[%s6297_s28 + $0x1000] sm:$0xff]  ;;  %v1490_v1 = vld [vmem:[%s6297_s28 + $0x1010] sm:$0xff]  ;;  %1487 = vst [vmem:[%s6305_s29 + $0x7f8] sm:$0xff] %v1486_v63 }
  0x92   : > { %1489 = vst [vmem:[%s6305_s29 + $0x800] sm:$0xff] %v1488_v0  ;;  %1491 = vst [vmem:[%s6305_s29 + $0x808] sm:$0xff] %v1490_v1  ;;  %v1492_v2 = vld [vmem:[%s6297_s28 + $0x1020] sm:$0xff]  ;;  %v1494_v3 = vld [vmem:[%s6297_s28 + $0x1030] sm:$0xff] }
  0x93   : > { %v1496_v4 = vld [vmem:[%s6297_s28 + $0x1040] sm:$0xff]  ;;  %1493 = vst [vmem:[%s6305_s29 + $0x810] sm:$0xff] %v1492_v2  ;;  %1495 = vst [vmem:[%s6305_s29 + $0x818] sm:$0xff] %v1494_v3  ;;  %v1498_v5 = vld [vmem:[%s6297_s28 + $0x1050] sm:$0xff] }
  0x94   : > { %1497 = vst [vmem:[%s6305_s29 + $0x820] sm:$0xff] %v1496_v4  ;;  %v1500_v6 = vld [vmem:[%s6297_s28 + $0x1060] sm:$0xff]  ;;  %v1502_v7 = vld [vmem:[%s6297_s28 + $0x1070] sm:$0xff]  ;;  %1499 = vst [vmem:[%s6305_s29 + $0x828] sm:$0xff] %v1498_v5 }
  0x95   : > { %1501 = vst [vmem:[%s6305_s29 + $0x830] sm:$0xff] %v1500_v6  ;;  %1503 = vst [vmem:[%s6305_s29 + $0x838] sm:$0xff] %v1502_v7  ;;  %v1504_v8 = vld [vmem:[%s6297_s28 + $0x1080] sm:$0xff]  ;;  %v1506_v9 = vld [vmem:[%s6297_s28 + $0x1090] sm:$0xff] }
  0x96   : > { %v1508_v10 = vld [vmem:[%s6297_s28 + $0x10a0] sm:$0xff]  ;;  %1505 = vst [vmem:[%s6305_s29 + $0x840] sm:$0xff] %v1504_v8  ;;  %1507 = vst [vmem:[%s6305_s29 + $0x848] sm:$0xff] %v1506_v9  ;;  %v1510_v11 = vld [vmem:[%s6297_s28 + $0x10b0] sm:$0xff] }
  0x97   : > { %1509 = vst [vmem:[%s6305_s29 + $0x850] sm:$0xff] %v1508_v10  ;;  %v1512_v12 = vld [vmem:[%s6297_s28 + $0x10c0] sm:$0xff]  ;;  %v1514_v13 = vld [vmem:[%s6297_s28 + $0x10d0] sm:$0xff]  ;;  %1511 = vst [vmem:[%s6305_s29 + $0x858] sm:$0xff] %v1510_v11 }
  0x98   : > { %1513 = vst [vmem:[%s6305_s29 + $0x860] sm:$0xff] %v1512_v12  ;;  %1515 = vst [vmem:[%s6305_s29 + $0x868] sm:$0xff] %v1514_v13  ;;  %v1516_v14 = vld [vmem:[%s6297_s28 + $0x10e0] sm:$0xff]  ;;  %v1518_v15 = vld [vmem:[%s6297_s28 + $0x10f0] sm:$0xff] }
  0x99   : > { %v1520_v16 = vld [vmem:[%s6297_s28 + $0x1100] sm:$0xff]  ;;  %1517 = vst [vmem:[%s6305_s29 + $0x870] sm:$0xff] %v1516_v14  ;;  %1519 = vst [vmem:[%s6305_s29 + $0x878] sm:$0xff] %v1518_v15  ;;  %v1522_v17 = vld [vmem:[%s6297_s28 + $0x1110] sm:$0xff] }
  0x9a   : > { %1521 = vst [vmem:[%s6305_s29 + $0x880] sm:$0xff] %v1520_v16  ;;  %v1524_v18 = vld [vmem:[%s6297_s28 + $0x1120] sm:$0xff]  ;;  %v1526_v19 = vld [vmem:[%s6297_s28 + $0x1130] sm:$0xff]  ;;  %1523 = vst [vmem:[%s6305_s29 + $0x888] sm:$0xff] %v1522_v17 }
  0x9b   : > { %1525 = vst [vmem:[%s6305_s29 + $0x890] sm:$0xff] %v1524_v18  ;;  %1527 = vst [vmem:[%s6305_s29 + $0x898] sm:$0xff] %v1526_v19  ;;  %v1528_v20 = vld [vmem:[%s6297_s28 + $0x1140] sm:$0xff]  ;;  %v1530_v21 = vld [vmem:[%s6297_s28 + $0x1150] sm:$0xff] }
  0x9c   : > { %v1532_v22 = vld [vmem:[%s6297_s28 + $0x1160] sm:$0xff]  ;;  %1529 = vst [vmem:[%s6305_s29 + $0x8a0] sm:$0xff] %v1528_v20  ;;  %1531 = vst [vmem:[%s6305_s29 + $0x8a8] sm:$0xff] %v1530_v21  ;;  %v1534_v23 = vld [vmem:[%s6297_s28 + $0x1170] sm:$0xff] }
  0x9d   : > { %1533 = vst [vmem:[%s6305_s29 + $0x8b0] sm:$0xff] %v1532_v22  ;;  %v1536_v24 = vld [vmem:[%s6297_s28 + $0x1180] sm:$0xff]  ;;  %v1538_v25 = vld [vmem:[%s6297_s28 + $0x1190] sm:$0xff]  ;;  %1535 = vst [vmem:[%s6305_s29 + $0x8b8] sm:$0xff] %v1534_v23 }
  0x9e   : > { %1537 = vst [vmem:[%s6305_s29 + $0x8c0] sm:$0xff] %v1536_v24  ;;  %1539 = vst [vmem:[%s6305_s29 + $0x8c8] sm:$0xff] %v1538_v25  ;;  %v1540_v26 = vld [vmem:[%s6297_s28 + $0x11a0] sm:$0xff]  ;;  %v1542_v27 = vld [vmem:[%s6297_s28 + $0x11b0] sm:$0xff] }
  0x9f   : > { %v1544_v28 = vld [vmem:[%s6297_s28 + $0x11c0] sm:$0xff]  ;;  %1541 = vst [vmem:[%s6305_s29 + $0x8d0] sm:$0xff] %v1540_v26  ;;  %1543 = vst [vmem:[%s6305_s29 + $0x8d8] sm:$0xff] %v1542_v27  ;;  %v1546_v29 = vld [vmem:[%s6297_s28 + $0x11d0] sm:$0xff] }
  0xa0   : > { %1545 = vst [vmem:[%s6305_s29 + $0x8e0] sm:$0xff] %v1544_v28  ;;  %v1548_v30 = vld [vmem:[%s6297_s28 + $0x11e0] sm:$0xff]  ;;  %v1550_v31 = vld [vmem:[%s6297_s28 + $0x11f0] sm:$0xff]  ;;  %1547 = vst [vmem:[%s6305_s29 + $0x8e8] sm:$0xff] %v1546_v29 }
  0xa1   : > { %1549 = vst [vmem:[%s6305_s29 + $0x8f0] sm:$0xff] %v1548_v30  ;;  %1551 = vst [vmem:[%s6305_s29 + $0x8f8] sm:$0xff] %v1550_v31  ;;  %v1552_v32 = vld [vmem:[%s6297_s28 + $0x1200] sm:$0xff]  ;;  %v1554_v33 = vld [vmem:[%s6297_s28 + $0x1210] sm:$0xff] }
  0xa2   : > { %v1556_v34 = vld [vmem:[%s6297_s28 + $0x1220] sm:$0xff]  ;;  %1553 = vst [vmem:[%s6305_s29 + $0x900] sm:$0xff] %v1552_v32  ;;  %1555 = vst [vmem:[%s6305_s29 + $0x908] sm:$0xff] %v1554_v33  ;;  %v1558_v35 = vld [vmem:[%s6297_s28 + $0x1230] sm:$0xff] }
  0xa3   : > { %1557 = vst [vmem:[%s6305_s29 + $0x910] sm:$0xff] %v1556_v34  ;;  %v1560_v36 = vld [vmem:[%s6297_s28 + $0x1240] sm:$0xff]  ;;  %v1562_v37 = vld [vmem:[%s6297_s28 + $0x1250] sm:$0xff]  ;;  %1559 = vst [vmem:[%s6305_s29 + $0x918] sm:$0xff] %v1558_v35 }
  0xa4   : > { %1561 = vst [vmem:[%s6305_s29 + $0x920] sm:$0xff] %v1560_v36  ;;  %1563 = vst [vmem:[%s6305_s29 + $0x928] sm:$0xff] %v1562_v37  ;;  %v1564_v38 = vld [vmem:[%s6297_s28 + $0x1260] sm:$0xff]  ;;  %v1566_v39 = vld [vmem:[%s6297_s28 + $0x1270] sm:$0xff] }
  0xa5   : > { %v1568_v40 = vld [vmem:[%s6297_s28 + $0x1280] sm:$0xff]  ;;  %1565 = vst [vmem:[%s6305_s29 + $0x930] sm:$0xff] %v1564_v38  ;;  %1567 = vst [vmem:[%s6305_s29 + $0x938] sm:$0xff] %v1566_v39  ;;  %v1570_v41 = vld [vmem:[%s6297_s28 + $0x1290] sm:$0xff] }
  0xa6   : > { %1569 = vst [vmem:[%s6305_s29 + $0x940] sm:$0xff] %v1568_v40  ;;  %v1572_v42 = vld [vmem:[%s6297_s28 + $0x12a0] sm:$0xff]  ;;  %v1574_v43 = vld [vmem:[%s6297_s28 + $0x12b0] sm:$0xff]  ;;  %1571 = vst [vmem:[%s6305_s29 + $0x948] sm:$0xff] %v1570_v41 }
  0xa7   : > { %1573 = vst [vmem:[%s6305_s29 + $0x950] sm:$0xff] %v1572_v42  ;;  %1575 = vst [vmem:[%s6305_s29 + $0x958] sm:$0xff] %v1574_v43  ;;  %v1576_v44 = vld [vmem:[%s6297_s28 + $0x12c0] sm:$0xff]  ;;  %v1578_v45 = vld [vmem:[%s6297_s28 + $0x12d0] sm:$0xff] }
  0xa8   : > { %v1580_v46 = vld [vmem:[%s6297_s28 + $0x12e0] sm:$0xff]  ;;  %1577 = vst [vmem:[%s6305_s29 + $0x960] sm:$0xff] %v1576_v44  ;;  %1579 = vst [vmem:[%s6305_s29 + $0x968] sm:$0xff] %v1578_v45  ;;  %v1582_v47 = vld [vmem:[%s6297_s28 + $0x12f0] sm:$0xff] }
  0xa9   : > { %1581 = vst [vmem:[%s6305_s29 + $0x970] sm:$0xff] %v1580_v46  ;;  %v1584_v48 = vld [vmem:[%s6297_s28 + $0x1300] sm:$0xff]  ;;  %v1586_v49 = vld [vmem:[%s6297_s28 + $0x1310] sm:$0xff]  ;;  %1583 = vst [vmem:[%s6305_s29 + $0x978] sm:$0xff] %v1582_v47 }
  0xaa   : > { %1585 = vst [vmem:[%s6305_s29 + $0x980] sm:$0xff] %v1584_v48  ;;  %1587 = vst [vmem:[%s6305_s29 + $0x988] sm:$0xff] %v1586_v49  ;;  %v1588_v50 = vld [vmem:[%s6297_s28 + $0x1320] sm:$0xff]  ;;  %v1590_v51 = vld [vmem:[%s6297_s28 + $0x1330] sm:$0xff] }
  0xab   : > { %v1592_v52 = vld [vmem:[%s6297_s28 + $0x1340] sm:$0xff]  ;;  %1589 = vst [vmem:[%s6305_s29 + $0x990] sm:$0xff] %v1588_v50  ;;  %1591 = vst [vmem:[%s6305_s29 + $0x998] sm:$0xff] %v1590_v51  ;;  %v1594_v53 = vld [vmem:[%s6297_s28 + $0x1350] sm:$0xff] }
  0xac   : > { %1593 = vst [vmem:[%s6305_s29 + $0x9a0] sm:$0xff] %v1592_v52  ;;  %v1596_v54 = vld [vmem:[%s6297_s28 + $0x1360] sm:$0xff]  ;;  %v1598_v55 = vld [vmem:[%s6297_s28 + $0x1370] sm:$0xff]  ;;  %1595 = vst [vmem:[%s6305_s29 + $0x9a8] sm:$0xff] %v1594_v53 }
  0xad   : > { %1597 = vst [vmem:[%s6305_s29 + $0x9b0] sm:$0xff] %v1596_v54  ;;  %1599 = vst [vmem:[%s6305_s29 + $0x9b8] sm:$0xff] %v1598_v55  ;;  %v1600_v56 = vld [vmem:[%s6297_s28 + $0x1380] sm:$0xff]  ;;  %v1602_v57 = vld [vmem:[%s6297_s28 + $0x1390] sm:$0xff] }
  0xae   : > { %v1604_v58 = vld [vmem:[%s6297_s28 + $0x13a0] sm:$0xff]  ;;  %1601 = vst [vmem:[%s6305_s29 + $0x9c0] sm:$0xff] %v1600_v56  ;;  %1603 = vst [vmem:[%s6305_s29 + $0x9c8] sm:$0xff] %v1602_v57  ;;  %v1606_v59 = vld [vmem:[%s6297_s28 + $0x13b0] sm:$0xff] }
  0xaf   : > { %1605 = vst [vmem:[%s6305_s29 + $0x9d0] sm:$0xff] %v1604_v58  ;;  %v1608_v60 = vld [vmem:[%s6297_s28 + $0x13c0] sm:$0xff]  ;;  %v1610_v61 = vld [vmem:[%s6297_s28 + $0x13d0] sm:$0xff]  ;;  %1607 = vst [vmem:[%s6305_s29 + $0x9d8] sm:$0xff] %v1606_v59 }
  0xb0   : > { %1609 = vst [vmem:[%s6305_s29 + $0x9e0] sm:$0xff] %v1608_v60  ;;  %1611 = vst [vmem:[%s6305_s29 + $0x9e8] sm:$0xff] %v1610_v61  ;;  %v1612_v62 = vld [vmem:[%s6297_s28 + $0x13e0] sm:$0xff]  ;;  %v1614_v63 = vld [vmem:[%s6297_s28 + $0x13f0] sm:$0xff] }
  0xb1   : > { %v1616_v0 = vld [vmem:[%s6297_s28 + $0x1400] sm:$0xff]  ;;  %1613 = vst [vmem:[%s6305_s29 + $0x9f0] sm:$0xff] %v1612_v62  ;;  %1615 = vst [vmem:[%s6305_s29 + $0x9f8] sm:$0xff] %v1614_v63  ;;  %v1618_v1 = vld [vmem:[%s6297_s28 + $0x1410] sm:$0xff] }
  0xb2   : > { %1617 = vst [vmem:[%s6305_s29 + $0xa00] sm:$0xff] %v1616_v0  ;;  %v1620_v2 = vld [vmem:[%s6297_s28 + $0x1420] sm:$0xff]  ;;  %v1622_v3 = vld [vmem:[%s6297_s28 + $0x1430] sm:$0xff]  ;;  %1619 = vst [vmem:[%s6305_s29 + $0xa08] sm:$0xff] %v1618_v1 }
  0xb3   : > { %1621 = vst [vmem:[%s6305_s29 + $0xa10] sm:$0xff] %v1620_v2  ;;  %1623 = vst [vmem:[%s6305_s29 + $0xa18] sm:$0xff] %v1622_v3  ;;  %v1624_v4 = vld [vmem:[%s6297_s28 + $0x1440] sm:$0xff]  ;;  %v1626_v5 = vld [vmem:[%s6297_s28 + $0x1450] sm:$0xff] }
  0xb4   : > { %v1628_v6 = vld [vmem:[%s6297_s28 + $0x1460] sm:$0xff]  ;;  %1625 = vst [vmem:[%s6305_s29 + $0xa20] sm:$0xff] %v1624_v4  ;;  %1627 = vst [vmem:[%s6305_s29 + $0xa28] sm:$0xff] %v1626_v5  ;;  %v1630_v7 = vld [vmem:[%s6297_s28 + $0x1470] sm:$0xff] }
  0xb5   : > { %1629 = vst [vmem:[%s6305_s29 + $0xa30] sm:$0xff] %v1628_v6  ;;  %v1632_v8 = vld [vmem:[%s6297_s28 + $0x1480] sm:$0xff]  ;;  %v1634_v9 = vld [vmem:[%s6297_s28 + $0x1490] sm:$0xff]  ;;  %1631 = vst [vmem:[%s6305_s29 + $0xa38] sm:$0xff] %v1630_v7 }
  0xb6   : > { %1633 = vst [vmem:[%s6305_s29 + $0xa40] sm:$0xff] %v1632_v8  ;;  %1635 = vst [vmem:[%s6305_s29 + $0xa48] sm:$0xff] %v1634_v9  ;;  %v1636_v10 = vld [vmem:[%s6297_s28 + $0x14a0] sm:$0xff]  ;;  %v1638_v11 = vld [vmem:[%s6297_s28 + $0x14b0] sm:$0xff] }
  0xb7   : > { %v1640_v12 = vld [vmem:[%s6297_s28 + $0x14c0] sm:$0xff]  ;;  %1637 = vst [vmem:[%s6305_s29 + $0xa50] sm:$0xff] %v1636_v10  ;;  %1639 = vst [vmem:[%s6305_s29 + $0xa58] sm:$0xff] %v1638_v11  ;;  %v1642_v13 = vld [vmem:[%s6297_s28 + $0x14d0] sm:$0xff] }
  0xb8   : > { %1641 = vst [vmem:[%s6305_s29 + $0xa60] sm:$0xff] %v1640_v12  ;;  %v1644_v14 = vld [vmem:[%s6297_s28 + $0x14e0] sm:$0xff]  ;;  %v1646_v15 = vld [vmem:[%s6297_s28 + $0x14f0] sm:$0xff]  ;;  %1643 = vst [vmem:[%s6305_s29 + $0xa68] sm:$0xff] %v1642_v13 }
  0xb9   : > { %1645 = vst [vmem:[%s6305_s29 + $0xa70] sm:$0xff] %v1644_v14  ;;  %1647 = vst [vmem:[%s6305_s29 + $0xa78] sm:$0xff] %v1646_v15  ;;  %v1648_v16 = vld [vmem:[%s6297_s28 + $0x1500] sm:$0xff]  ;;  %v1650_v17 = vld [vmem:[%s6297_s28 + $0x1510] sm:$0xff] }
  0xba   : > { %v1652_v18 = vld [vmem:[%s6297_s28 + $0x1520] sm:$0xff]  ;;  %1649 = vst [vmem:[%s6305_s29 + $0xa80] sm:$0xff] %v1648_v16  ;;  %1651 = vst [vmem:[%s6305_s29 + $0xa88] sm:$0xff] %v1650_v17  ;;  %v1654_v19 = vld [vmem:[%s6297_s28 + $0x1530] sm:$0xff] }
  0xbb   : > { %1653 = vst [vmem:[%s6305_s29 + $0xa90] sm:$0xff] %v1652_v18  ;;  %v1656_v20 = vld [vmem:[%s6297_s28 + $0x1540] sm:$0xff]  ;;  %v1658_v21 = vld [vmem:[%s6297_s28 + $0x1550] sm:$0xff]  ;;  %1655 = vst [vmem:[%s6305_s29 + $0xa98] sm:$0xff] %v1654_v19 }
  0xbc   : > { %1657 = vst [vmem:[%s6305_s29 + $0xaa0] sm:$0xff] %v1656_v20  ;;  %1659 = vst [vmem:[%s6305_s29 + $0xaa8] sm:$0xff] %v1658_v21  ;;  %v1660_v22 = vld [vmem:[%s6297_s28 + $0x1560] sm:$0xff]  ;;  %v1662_v23 = vld [vmem:[%s6297_s28 + $0x1570] sm:$0xff] }
  0xbd   : > { %v1664_v24 = vld [vmem:[%s6297_s28 + $0x1580] sm:$0xff]  ;;  %1661 = vst [vmem:[%s6305_s29 + $0xab0] sm:$0xff] %v1660_v22  ;;  %1663 = vst [vmem:[%s6305_s29 + $0xab8] sm:$0xff] %v1662_v23  ;;  %v1666_v25 = vld [vmem:[%s6297_s28 + $0x1590] sm:$0xff] }
  0xbe   : > { %1665 = vst [vmem:[%s6305_s29 + $0xac0] sm:$0xff] %v1664_v24  ;;  %v1668_v26 = vld [vmem:[%s6297_s28 + $0x15a0] sm:$0xff]  ;;  %v1670_v27 = vld [vmem:[%s6297_s28 + $0x15b0] sm:$0xff]  ;;  %1667 = vst [vmem:[%s6305_s29 + $0xac8] sm:$0xff] %v1666_v25 }
  0xbf   : > { %1669 = vst [vmem:[%s6305_s29 + $0xad0] sm:$0xff] %v1668_v26  ;;  %1671 = vst [vmem:[%s6305_s29 + $0xad8] sm:$0xff] %v1670_v27  ;;  %v1672_v28 = vld [vmem:[%s6297_s28 + $0x15c0] sm:$0xff]  ;;  %v1674_v29 = vld [vmem:[%s6297_s28 + $0x15d0] sm:$0xff] }
  0xc0   : > { %v1676_v30 = vld [vmem:[%s6297_s28 + $0x15e0] sm:$0xff]  ;;  %1673 = vst [vmem:[%s6305_s29 + $0xae0] sm:$0xff] %v1672_v28  ;;  %1675 = vst [vmem:[%s6305_s29 + $0xae8] sm:$0xff] %v1674_v29  ;;  %v1678_v31 = vld [vmem:[%s6297_s28 + $0x15f0] sm:$0xff] }
  0xc1   : > { %1677 = vst [vmem:[%s6305_s29 + $0xaf0] sm:$0xff] %v1676_v30  ;;  %v1680_v32 = vld [vmem:[%s6297_s28 + $0x1600] sm:$0xff]  ;;  %v1682_v33 = vld [vmem:[%s6297_s28 + $0x1610] sm:$0xff]  ;;  %1679 = vst [vmem:[%s6305_s29 + $0xaf8] sm:$0xff] %v1678_v31 }
  0xc2   : > { %1681 = vst [vmem:[%s6305_s29 + $0xb00] sm:$0xff] %v1680_v32  ;;  %1683 = vst [vmem:[%s6305_s29 + $0xb08] sm:$0xff] %v1682_v33  ;;  %v1684_v34 = vld [vmem:[%s6297_s28 + $0x1620] sm:$0xff]  ;;  %v1686_v35 = vld [vmem:[%s6297_s28 + $0x1630] sm:$0xff] }
  0xc3   : > { %v1688_v36 = vld [vmem:[%s6297_s28 + $0x1640] sm:$0xff]  ;;  %1685 = vst [vmem:[%s6305_s29 + $0xb10] sm:$0xff] %v1684_v34  ;;  %1687 = vst [vmem:[%s6305_s29 + $0xb18] sm:$0xff] %v1686_v35  ;;  %v1690_v37 = vld [vmem:[%s6297_s28 + $0x1650] sm:$0xff] }
  0xc4   : > { %1689 = vst [vmem:[%s6305_s29 + $0xb20] sm:$0xff] %v1688_v36  ;;  %v1692_v38 = vld [vmem:[%s6297_s28 + $0x1660] sm:$0xff]  ;;  %v1694_v39 = vld [vmem:[%s6297_s28 + $0x1670] sm:$0xff]  ;;  %1691 = vst [vmem:[%s6305_s29 + $0xb28] sm:$0xff] %v1690_v37 }
  0xc5   : > { %1693 = vst [vmem:[%s6305_s29 + $0xb30] sm:$0xff] %v1692_v38  ;;  %1695 = vst [vmem:[%s6305_s29 + $0xb38] sm:$0xff] %v1694_v39  ;;  %v1696_v40 = vld [vmem:[%s6297_s28 + $0x1680] sm:$0xff]  ;;  %v1698_v41 = vld [vmem:[%s6297_s28 + $0x1690] sm:$0xff] }
  0xc6   : > { %v1700_v42 = vld [vmem:[%s6297_s28 + $0x16a0] sm:$0xff]  ;;  %1697 = vst [vmem:[%s6305_s29 + $0xb40] sm:$0xff] %v1696_v40  ;;  %1699 = vst [vmem:[%s6305_s29 + $0xb48] sm:$0xff] %v1698_v41  ;;  %v1702_v43 = vld [vmem:[%s6297_s28 + $0x16b0] sm:$0xff] }
  0xc7   : > { %1701 = vst [vmem:[%s6305_s29 + $0xb50] sm:$0xff] %v1700_v42  ;;  %v1704_v44 = vld [vmem:[%s6297_s28 + $0x16c0] sm:$0xff]  ;;  %v1706_v45 = vld [vmem:[%s6297_s28 + $0x16d0] sm:$0xff]  ;;  %1703 = vst [vmem:[%s6305_s29 + $0xb58] sm:$0xff] %v1702_v43 }
  0xc8   : > { %1705 = vst [vmem:[%s6305_s29 + $0xb60] sm:$0xff] %v1704_v44  ;;  %1707 = vst [vmem:[%s6305_s29 + $0xb68] sm:$0xff] %v1706_v45  ;;  %v1708_v46 = vld [vmem:[%s6297_s28 + $0x16e0] sm:$0xff]  ;;  %v1710_v47 = vld [vmem:[%s6297_s28 + $0x16f0] sm:$0xff] }
  0xc9   : > { %v1712_v48 = vld [vmem:[%s6297_s28 + $0x1700] sm:$0xff]  ;;  %1709 = vst [vmem:[%s6305_s29 + $0xb70] sm:$0xff] %v1708_v46  ;;  %1711 = vst [vmem:[%s6305_s29 + $0xb78] sm:$0xff] %v1710_v47  ;;  %v1714_v49 = vld [vmem:[%s6297_s28 + $0x1710] sm:$0xff] }
  0xca   : > { %1713 = vst [vmem:[%s6305_s29 + $0xb80] sm:$0xff] %v1712_v48  ;;  %v1716_v50 = vld [vmem:[%s6297_s28 + $0x1720] sm:$0xff]  ;;  %v1718_v51 = vld [vmem:[%s6297_s28 + $0x1730] sm:$0xff]  ;;  %1715 = vst [vmem:[%s6305_s29 + $0xb88] sm:$0xff] %v1714_v49 }
  0xcb   : > { %1717 = vst [vmem:[%s6305_s29 + $0xb90] sm:$0xff] %v1716_v50  ;;  %1719 = vst [vmem:[%s6305_s29 + $0xb98] sm:$0xff] %v1718_v51  ;;  %v1720_v52 = vld [vmem:[%s6297_s28 + $0x1740] sm:$0xff]  ;;  %v1722_v53 = vld [vmem:[%s6297_s28 + $0x1750] sm:$0xff] }
  0xcc   : > { %v1724_v54 = vld [vmem:[%s6297_s28 + $0x1760] sm:$0xff]  ;;  %1721 = vst [vmem:[%s6305_s29 + $0xba0] sm:$0xff] %v1720_v52  ;;  %1723 = vst [vmem:[%s6305_s29 + $0xba8] sm:$0xff] %v1722_v53  ;;  %v1726_v55 = vld [vmem:[%s6297_s28 + $0x1770] sm:$0xff] }
  0xcd   : > { %1725 = vst [vmem:[%s6305_s29 + $0xbb0] sm:$0xff] %v1724_v54  ;;  %v1728_v56 = vld [vmem:[%s6297_s28 + $0x1780] sm:$0xff]  ;;  %v1730_v57 = vld [vmem:[%s6297_s28 + $0x1790] sm:$0xff]  ;;  %1727 = vst [vmem:[%s6305_s29 + $0xbb8] sm:$0xff] %v1726_v55 }
  0xce   : > { %1729 = vst [vmem:[%s6305_s29 + $0xbc0] sm:$0xff] %v1728_v56  ;;  %1731 = vst [vmem:[%s6305_s29 + $0xbc8] sm:$0xff] %v1730_v57  ;;  %v1732_v58 = vld [vmem:[%s6297_s28 + $0x17a0] sm:$0xff]  ;;  %v1734_v59 = vld [vmem:[%s6297_s28 + $0x17b0] sm:$0xff] }
  0xcf   : > { %v1736_v60 = vld [vmem:[%s6297_s28 + $0x17c0] sm:$0xff]  ;;  %1733 = vst [vmem:[%s6305_s29 + $0xbd0] sm:$0xff] %v1732_v58  ;;  %1735 = vst [vmem:[%s6305_s29 + $0xbd8] sm:$0xff] %v1734_v59  ;;  %v1738_v61 = vld [vmem:[%s6297_s28 + $0x17d0] sm:$0xff] }
  0xd0   : > { %1737 = vst [vmem:[%s6305_s29 + $0xbe0] sm:$0xff] %v1736_v60  ;;  %v1740_v62 = vld [vmem:[%s6297_s28 + $0x17e0] sm:$0xff]  ;;  %v1742_v63 = vld [vmem:[%s6297_s28 + $0x17f0] sm:$0xff]  ;;  %1739 = vst [vmem:[%s6305_s29 + $0xbe8] sm:$0xff] %v1738_v61 }
  0xd1   : > { %1741 = vst [vmem:[%s6305_s29 + $0xbf0] sm:$0xff] %v1740_v62  ;;  %1743 = vst [vmem:[%s6305_s29 + $0xbf8] sm:$0xff] %v1742_v63  ;;  %v1744_v0 = vld [vmem:[%s6297_s28 + $0x1800] sm:$0xff]  ;;  %v1746_v1 = vld [vmem:[%s6297_s28 + $0x1810] sm:$0xff] }
  0xd2   : > { %v1748_v2 = vld [vmem:[%s6297_s28 + $0x1820] sm:$0xff]  ;;  %1745 = vst [vmem:[%s6305_s29 + $0xc00] sm:$0xff] %v1744_v0  ;;  %1747 = vst [vmem:[%s6305_s29 + $0xc08] sm:$0xff] %v1746_v1  ;;  %v1750_v3 = vld [vmem:[%s6297_s28 + $0x1830] sm:$0xff] }
  0xd3   : > { %1749 = vst [vmem:[%s6305_s29 + $0xc10] sm:$0xff] %v1748_v2  ;;  %v1752_v4 = vld [vmem:[%s6297_s28 + $0x1840] sm:$0xff]  ;;  %v1754_v5 = vld [vmem:[%s6297_s28 + $0x1850] sm:$0xff]  ;;  %1751 = vst [vmem:[%s6305_s29 + $0xc18] sm:$0xff] %v1750_v3 }
  0xd4   : > { %1753 = vst [vmem:[%s6305_s29 + $0xc20] sm:$0xff] %v1752_v4  ;;  %1755 = vst [vmem:[%s6305_s29 + $0xc28] sm:$0xff] %v1754_v5  ;;  %v1756_v6 = vld [vmem:[%s6297_s28 + $0x1860] sm:$0xff]  ;;  %v1758_v7 = vld [vmem:[%s6297_s28 + $0x1870] sm:$0xff] }
  0xd5   : > { %1757 = vst [vmem:[%s6305_s29 + $0xc30] sm:$0xff] %v1756_v6  ;;  %1759 = vst [vmem:[%s6305_s29 + $0xc38] sm:$0xff] %v1758_v7 }
  0xd6 PF: > { %p5030_p5 = scmp.ge.s32.totalorder %s6233_s17, 1  ;;  %p1781_p6 = scmp.lt.s32.totalorder %s6233_s17, 3 }
  0xd8   : > { %p1782_p7 = pnand %p5030_p5, %p1781_p6 }
  0xd9   : > { %s1788_s30 = sand.u32 (!%p1782_p7), 1, %s6225_s15   ;;  %v7091_v8 = vld [vmem:[%s7650_s0] sm:$0xff] (!%p1782_p7)  ;;  %v7096_v9 = vld [vmem:[%s7650_s0 + $0x30] sm:$0xff] (!%p1782_p7)  ;;  %vm4302_vm0 = vcmask (!%p1782_p7), 523264   ;;  %p1833_p10 = scmp.lt.s32.totalorder (!%p1782_p7), %s6277_s18, 1 }
  0xda   : > { %1785 = sbr.rel (%p1782_p7) target bundleno = 1058 (0x422), region = 70  ;;  %v5036_v10 = vcombine.high (!%p1782_p7), %v7091_v8, %v7091_v8  ;;  %v5048_v11 = vcombine.high (!%p1782_p7), %v7096_v9, %v7096_v9 }
  0xdb   : > { %s5572_s9 = smul.u32 (!%p1782_p7), 3136, %s1788_s30 }
  0xdc   : > { %4338 = vmatprep.mubr.bf16.mxu1 (!%p1782_p7), %v5036_v10  ;;  %4584 = vmatprep.mubr.bf16.mxu0 (!%p1782_p7), %v5048_v11 }
  0xdd   : > { %s7102_s10 = scalar_lea.vmem (!%p1782_p7), [#allocation2], %s5572_s9  ;;  %s5032_s9 = sshll.u32 (!%p1782_p7), %s6277_s18, 5 }
  0xde   : > { %v5598_v12 = vld [vmem:[%s7102_s10 + $0x4] ss:$8 sps:$4 sm:$0xff] (!%p1782_p7)   ;;  %v5602_v14 = vld [vmem:[%s7102_s10] ss:$8 sps:$4 sm:$0xff] (!%p1782_p7)   ;;  %v5604_v16 = vld [vmem:[%s7102_s10 + $0x14] ss:$8 sps:$4 sm:$0xff] (!%p1782_p7)  }
  0xdf   : > { %v5600_v13 = vld [vmem:[%s7102_s10 + $0x604] ss:$8 sps:$4 sm:$0xff] (!%p1782_p7)   ;;  %4306 = vmatprep.subr.bf16.mxu1 (!%p1782_p7), %v5598_v12  ;;  %v5603_v15 = vld [vmem:[%s7102_s10 + $0x600] ss:$8 sps:$4 sm:$0xff] (!%p1782_p7)   ;;  %v5606_v17 = vld [vmem:[%s7102_s10 + $0x614] ss:$8 sps:$4 sm:$0xff] (!%p1782_p7)  }
  0xe0   : > { %4552 = vmatprep.subr.bf16.mxu0 (!%p1782_p7), %v5600_v13  ;;  %4307 = vmatpush1.bf16.msra.mxu1 (!%p1782_p7), %v5602_v14  ;;  %v5608_v18 = vld [vmem:[%s7102_s10 + $0x10] ss:$8 sps:$4 sm:$0xff] (!%p1782_p7)   ;;  %v5610_v20 = vld [vmem:[%s7102_s10 + $0x24] ss:$8 sps:$4 sm:$0xff] (!%p1782_p7)   ;;  %v5614_v22 = vld [vmem:[%s7102_s10 + $0x20] ss:$8 sps:$4 sm:$0xff] (!%p1782_p7)  }
  0xe1   : > { %4553 = vmatpush1.bf16.msra.mxu0 %v5603_v15  ;;  %4308 = vmatprep.subr.bf16.mxu1 %v5604_v16  ;;  %v5609_v19 = vld [vmem:[%s7102_s10 + $0x610] ss:$8 sps:$4 sm:$0xff]   ;;  %v5612_v21 = vld [vmem:[%s7102_s10 + $0x624] ss:$8 sps:$4 sm:$0xff]   ;;  %v5615_v23 = vld [vmem:[%s7102_s10 + $0x620] ss:$8 sps:$4 sm:$0xff]   ;;  %v5035_v16 = vcombine.low %v7091_v8, %v7091_v8 }
  0xe2   : > { %4554 = vmatprep.subr.bf16.mxu0 %v5606_v17  ;;  %v5616_v24 = vld [vmem:[%s7102_s10 + $0x34] ss:$8 sps:$4 sm:$0xff]   ;;  %v5620_v26 = vld [vmem:[%s7102_s10 + $0x30] ss:$8 sps:$4 sm:$0xff]   ;;  %v5622_v28 = vld [vmem:[%s7102_s10 + $0x44] ss:$8 sps:$4 sm:$0xff]  }
  0xe3   : > { %v5618_v25 = vld [vmem:[%s7102_s10 + $0x634] ss:$8 sps:$4 sm:$0xff]   ;;  %v5621_v27 = vld [vmem:[%s7102_s10 + $0x630] ss:$8 sps:$4 sm:$0xff]   ;;  %v5624_v29 = vld [vmem:[%s7102_s10 + $0x644] ss:$8 sps:$4 sm:$0xff]  }
  0xe4   : > { %4309 = vmatpush1.bf16.msra.mxu1 %v5608_v18  ;;  %v5626_v30 = vld [vmem:[%s7102_s10 + $0x40] ss:$8 sps:$4 sm:$0xff]   ;;  %v5628_v32 = vld [vmem:[%s7102_s10 + $0x54] ss:$8 sps:$4 sm:$0xff]   ;;  %v5632_v34 = vld [vmem:[%s7102_s10 + $0x50] ss:$8 sps:$4 sm:$0xff]   ;;  %v5047_v18 = vcombine.low %v7096_v9, %v7096_v9 }
  0xe5   : > { %4555 = vmatpush1.bf16.msra.mxu0 %v5609_v19  ;;  %4310 = vmatprep.subr.bf16.mxu1 %v5610_v20  ;;  %v5627_v31 = vld [vmem:[%s7102_s10 + $0x640] ss:$8 sps:$4 sm:$0xff]   ;;  %v5630_v33 = vld [vmem:[%s7102_s10 + $0x654] ss:$8 sps:$4 sm:$0xff]   ;;  %v5633_v35 = vld [vmem:[%s7102_s10 + $0x650] ss:$8 sps:$4 sm:$0xff]  }
  0xe6   : > { %4556 = vmatprep.subr.bf16.mxu0 %v5612_v21  ;;  %v5634_v36 = vld [vmem:[%s7102_s10 + $0x64] ss:$8 sps:$4 sm:$0xff]   ;;  %v5638_v38 = vld [vmem:[%s7102_s10 + $0x60] ss:$8 sps:$4 sm:$0xff]   ;;  %v5640_v40 = vld [vmem:[%s7102_s10 + $0x74] ss:$8 sps:$4 sm:$0xff]  }
  0xe7   : > { %v5636_v37 = vld [vmem:[%s7102_s10 + $0x664] ss:$8 sps:$4 sm:$0xff]   ;;  %v5639_v39 = vld [vmem:[%s7102_s10 + $0x660] ss:$8 sps:$4 sm:$0xff]   ;;  %v5642_v41 = vld [vmem:[%s7102_s10 + $0x674] ss:$8 sps:$4 sm:$0xff]  }
  0xe8   : > { %4311 = vmatpush1.bf16.msra.mxu1 %v5614_v22  ;;  %v5644_v42 = vld [vmem:[%s7102_s10 + $0x70] ss:$8 sps:$4 sm:$0xff]   ;;  %v5646_v44 = vld [vmem:[%s7102_s10 + $0x84] ss:$8 sps:$4 sm:$0xff]   ;;  %v5650_v46 = vld [vmem:[%s7102_s10 + $0x80] ss:$8 sps:$4 sm:$0xff]  }
  0xe9   : > { %4557 = vmatpush1.bf16.msra.mxu0 %v5615_v23  ;;  %4312 = vmatprep.subr.bf16.mxu1 %v5616_v24  ;;  %v5645_v43 = vld [vmem:[%s7102_s10 + $0x670] ss:$8 sps:$4 sm:$0xff]   ;;  %v5648_v45 = vld [vmem:[%s7102_s10 + $0x684] ss:$8 sps:$4 sm:$0xff]   ;;  %v5651_v47 = vld [vmem:[%s7102_s10 + $0x680] ss:$8 sps:$4 sm:$0xff]  }
  0xea   : > { %4558 = vmatprep.subr.bf16.mxu0 %v5618_v25  ;;  %v5652_v48 = vld [vmem:[%s7102_s10 + $0x94] ss:$8 sps:$4 sm:$0xff]   ;;  %v5656_v50 = vld [vmem:[%s7102_s10 + $0x90] ss:$8 sps:$4 sm:$0xff]   ;;  %v5658_v52 = vld [vmem:[%s7102_s10 + $0xa4] ss:$8 sps:$4 sm:$0xff]  }
  0xeb   : > { %v5654_v49 = vld [vmem:[%s7102_s10 + $0x694] ss:$8 sps:$4 sm:$0xff]   ;;  %v5657_v51 = vld [vmem:[%s7102_s10 + $0x690] ss:$8 sps:$4 sm:$0xff]   ;;  %v5660_v53 = vld [vmem:[%s7102_s10 + $0x6a4] ss:$8 sps:$4 sm:$0xff]  }
  0xec   : > { %4313 = vmatpush1.bf16.msra.mxu1 %v5620_v26  ;;  %v5662_v54 = vld [vmem:[%s7102_s10 + $0xa0] ss:$8 sps:$4 sm:$0xff]   ;;  %v5664_v56 = vld [vmem:[%s7102_s10 + $0xb4] ss:$8 sps:$4 sm:$0xff]   ;;  %v5668_v58 = vld [vmem:[%s7102_s10 + $0xb0] ss:$8 sps:$4 sm:$0xff]  }
  0xed   : > { %4559 = vmatpush1.bf16.msra.mxu0 %v5621_v27  ;;  %4314 = vmatprep.subr.bf16.mxu1 %v5622_v28  ;;  %v5663_v55 = vld [vmem:[%s7102_s10 + $0x6a0] ss:$8 sps:$4 sm:$0xff]   ;;  %v5666_v57 = vld [vmem:[%s7102_s10 + $0x6b4] ss:$8 sps:$4 sm:$0xff]   ;;  %v5669_v59 = vld [vmem:[%s7102_s10 + $0x6b0] ss:$8 sps:$4 sm:$0xff]  }
  0xee   : > { %4560 = vmatprep.subr.bf16.mxu0 %v5624_v29  ;;  %v5670_v60 = vld [vmem:[%s7102_s10 + $0xc4] ss:$8 sps:$4 sm:$0xff]   ;;  %v5674_v62 = vld [vmem:[%s7102_s10 + $0xc0] ss:$8 sps:$4 sm:$0xff]   ;;  %v5676_v0 = vld [vmem:[%s7102_s10 + $0xd4] ss:$8 sps:$4 sm:$0xff]  }
  0xef   : > { %v5672_v61 = vld [vmem:[%s7102_s10 + $0x6c4] ss:$8 sps:$4 sm:$0xff]   ;;  %v5675_v63 = vld [vmem:[%s7102_s10 + $0x6c0] ss:$8 sps:$4 sm:$0xff]   ;;  %v5678_v1 = vld [vmem:[%s7102_s10 + $0x6d4] ss:$8 sps:$4 sm:$0xff]  }
  0xf0   : > { %4315 = vmatpush1.bf16.msra.mxu1 %v5626_v30  ;;  %v5680_v2 = vld [vmem:[%s7102_s10 + $0xd0] ss:$8 sps:$4 sm:$0xff]   ;;  %v5682_v4 = vld [vmem:[%s7102_s10 + $0xe4] ss:$8 sps:$4 sm:$0xff]   ;;  %v5686_v6 = vld [vmem:[%s7102_s10 + $0xe0] ss:$8 sps:$4 sm:$0xff]  }
  0xf1   : > { %4561 = vmatpush1.bf16.msra.mxu0 %v5627_v31  ;;  %4316 = vmatprep.subr.bf16.mxu1 %v5628_v32  ;;  %v5681_v3 = vld [vmem:[%s7102_s10 + $0x6d0] ss:$8 sps:$4 sm:$0xff]   ;;  %v5684_v5 = vld [vmem:[%s7102_s10 + $0x6e4] ss:$8 sps:$4 sm:$0xff]   ;;  %v5687_v7 = vld [vmem:[%s7102_s10 + $0x6e0] ss:$8 sps:$4 sm:$0xff]  }
  0xf2   : > { %4562 = vmatprep.subr.bf16.mxu0 %v5630_v33  ;;  %v5688_v10 = vld [vmem:[%s7102_s10 + $0xf4] ss:$8 sps:$4 sm:$0xff]   ;;  %v5692_v12 = vld [vmem:[%s7102_s10 + $0xf0] ss:$8 sps:$4 sm:$0xff]   ;;  %v5698_v14 = vld [vmem:[%s7102_s10 + $0x104] ss:$8 sps:$4 sm:$0xff]  }
  0xf3   : > { %v5690_v11 = vld [vmem:[%s7102_s10 + $0x6f4] ss:$8 sps:$4 sm:$0xff]   ;;  %v5693_v13 = vld [vmem:[%s7102_s10 + $0x6f0] ss:$8 sps:$4 sm:$0xff]   ;;  %v5703_v15 = vld [vmem:[%s7102_s10 + $0x704] ss:$8 sps:$4 sm:$0xff]  }
  0xf4   : > { %4317 = vmatpush1.bf16.msra.mxu1 %v5632_v34  ;;  %v5696_v17 = vld [vmem:[%s7102_s10 + $0x100] ss:$8 sps:$4 sm:$0xff]   ;;  %v5706_v20 = vld [vmem:[%s7102_s10 + $0x114] ss:$8 sps:$4 sm:$0xff]   ;;  %v5704_v8 = vld [vmem:[%s7102_s10 + $0x110] ss:$8 sps:$4 sm:$0xff]  }
  0xf5   : > { %4563 = vmatpush1.bf16.msra.mxu0 %v5633_v35  ;;  %4318 = vmatprep.subr.bf16.mxu1 %v5634_v36  ;;  %v5701_v19 = vld [vmem:[%s7102_s10 + $0x700] ss:$8 sps:$4 sm:$0xff]   ;;  %v5709_v21 = vld [vmem:[%s7102_s10 + $0x714] ss:$8 sps:$4 sm:$0xff]   ;;  %v5707_v22 = vld [vmem:[%s7102_s10 + $0x710] ss:$8 sps:$4 sm:$0xff]  }
  0xf6   : > { %4564 = vmatprep.subr.bf16.mxu0 %v5636_v37  ;;  %v5712_v9 = vld [vmem:[%s7102_s10 + $0x124] ss:$8 sps:$4 sm:$0xff]   ;;  %v5710_v24 = vld [vmem:[%s7102_s10 + $0x120] ss:$8 sps:$4 sm:$0xff]   ;;  %v5718_v26 = vld [vmem:[%s7102_s10 + $0x134] ss:$8 sps:$4 sm:$0xff]  }
  0xf7   : > { %v5715_v23 = vld [vmem:[%s7102_s10 + $0x724] ss:$8 sps:$4 sm:$0xff]   ;;  %v5713_v25 = vld [vmem:[%s7102_s10 + $0x720] ss:$8 sps:$4 sm:$0xff]   ;;  %v5721_v27 = vld [vmem:[%s7102_s10 + $0x734] ss:$8 sps:$4 sm:$0xff]  }
  0xf8   : > { %4319 = vmatpush1.bf16.msra.mxu1 %v5638_v38  ;;  %v5716_v28 = vld [vmem:[%s7102_s10 + $0x130] ss:$8 sps:$4 sm:$0xff]   ;;  %v5724_v30 = vld [vmem:[%s7102_s10 + $0x144] ss:$8 sps:$4 sm:$0xff]   ;;  %v5722_v32 = vld [vmem:[%s7102_s10 + $0x140] ss:$8 sps:$4 sm:$0xff]  }
  0xf9   : > { %4565 = vmatpush1.bf16.msra.mxu0 %v5639_v39  ;;  %4320 = vmatprep.subr.bf16.mxu1 %v5640_v40  ;;  %v5719_v29 = vld [vmem:[%s7102_s10 + $0x730] ss:$8 sps:$4 sm:$0xff]   ;;  %v5727_v31 = vld [vmem:[%s7102_s10 + $0x744] ss:$8 sps:$4 sm:$0xff]   ;;  %v5725_v33 = vld [vmem:[%s7102_s10 + $0x740] ss:$8 sps:$4 sm:$0xff]  }
  0xfa   : > { %4566 = vmatprep.subr.bf16.mxu0 %v5642_v41  ;;  %v5730_v34 = vld [vmem:[%s7102_s10 + $0x154] ss:$8 sps:$4 sm:$0xff]   ;;  %v5728_v36 = vld [vmem:[%s7102_s10 + $0x150] ss:$8 sps:$4 sm:$0xff]   ;;  %v5736_v38 = vld [vmem:[%s7102_s10 + $0x164] ss:$8 sps:$4 sm:$0xff]  }
  0xfb   : > { %v5733_v35 = vld [vmem:[%s7102_s10 + $0x754] ss:$8 sps:$4 sm:$0xff]   ;;  %v5731_v37 = vld [vmem:[%s7102_s10 + $0x750] ss:$8 sps:$4 sm:$0xff]   ;;  %v5739_v39 = vld [vmem:[%s7102_s10 + $0x764] ss:$8 sps:$4 sm:$0xff]  }
  0xfc   : > { %4321 = vmatpush1.bf16.msra.mxu1 %v5644_v42  ;;  %v7201_v40 = vld [vmem:[%s7650_s0 + $0x8] sm:$0xff]  ;;  %v7208_v42 = vld [vmem:[%s7650_s0 + $0x38] sm:$0xff]  ;;  %p1828_p8 = scmp.lt.s32.totalorder %s5032_s9, 63 }
  0xfd   : > { %4567 = vmatpush1.bf16.msra.mxu0 %v5645_v43  ;;  %4322 = vmatprep.subr.bf16.mxu1 %v5646_v44  ;;  %v5038_v41 = vcombine.high %v7201_v40, %v7201_v40  ;;  %v5734_v43 = vld [vmem:[%s7102_s10 + $0x160] ss:$8 sps:$4 sm:$0xff]  }
  0xfe   : > { %4568 = vmatprep.subr.bf16.mxu0 %v5648_v45  ;;  %v5737_v44 = vld [vmem:[%s7102_s10 + $0x760] ss:$8 sps:$4 sm:$0xff]   ;;  %v5050_v45 = vcombine.high %v7208_v42, %v7208_v42  ;;  %s7659_s9 = smov (!%p1828_p8, %s5032_s9), 63 }
  0xff   : > { %s5033_s11 = sshll.u32 %s7659_s9, 3 }
 0x100   : > { %4323 = vmatpush1.bf16.msra.mxu1 %v5650_v46  ;;  %v5742_v46 = vld [vmem:[%s7102_s10 + $0x174] ss:$8 sps:$4 sm:$0xff]   ;;  %s7576_s14 = scalar_lea.vmem %s7653_s3, %s5033_s11 }
 0x101   : > { %4569 = vmatpush1.bf16.msra.mxu0 %v5651_v47  ;;  %4324 = vmatprep.subr.bf16.mxu1 %v5652_v48  ;;  %v5745_v47 = vld [vmem:[%s7102_s10 + $0x774] ss:$8 sps:$4 sm:$0xff]   ;;  %v5740_v48 = vld [vmem:[%s7102_s10 + $0x170] ss:$8 sps:$4 sm:$0xff]  }
 0x102   : > { %4570 = vmatprep.subr.bf16.mxu0 %v5654_v49  ;;  %v5743_v49 = vld [vmem:[%s7102_s10 + $0x770] ss:$8 sps:$4 sm:$0xff]  }
 0x104   : > { %4325 = vmatpush1.bf16.msra.mxu1 %v5656_v50  ;;  %v5748_v50 = vld [vmem:[%s7102_s10 + $0x184] ss:$8 sps:$4 sm:$0xff]  }
 0x105   : > { %4571 = vmatpush1.bf16.msra.mxu0 %v5657_v51  ;;  %4326 = vmatprep.subr.bf16.mxu1 %v5658_v52  ;;  %v5751_v51 = vld [vmem:[%s7102_s10 + $0x784] ss:$8 sps:$4 sm:$0xff]   ;;  %v5746_v52 = vld [vmem:[%s7102_s10 + $0x180] ss:$8 sps:$4 sm:$0xff]  }
 0x106   : > { %4572 = vmatprep.subr.bf16.mxu0 %v5660_v53  ;;  %v5749_v53 = vld [vmem:[%s7102_s10 + $0x780] ss:$8 sps:$4 sm:$0xff]  }
 0x108   : > { %4327 = vmatpush1.bf16.msra.mxu1 %v5662_v54  ;;  %v5754_v54 = vld [vmem:[%s7102_s10 + $0x194] ss:$8 sps:$4 sm:$0xff]  }
 0x109   : > { %4573 = vmatpush1.bf16.msra.mxu0 %v5663_v55  ;;  %4328 = vmatprep.subr.bf16.mxu1 %v5664_v56  ;;  %v5757_v55 = vld [vmem:[%s7102_s10 + $0x794] ss:$8 sps:$4 sm:$0xff]   ;;  %v5752_v56 = vld [vmem:[%s7102_s10 + $0x190] ss:$8 sps:$4 sm:$0xff]  }
 0x10a   : > { %4574 = vmatprep.subr.bf16.mxu0 %v5666_v57  ;;  %v5755_v57 = vld [vmem:[%s7102_s10 + $0x790] ss:$8 sps:$4 sm:$0xff]  }
 0x10c   : > { %4329 = vmatpush1.bf16.msra.mxu1 %v5668_v58  ;;  %v5760_v58 = vld [vmem:[%s7102_s10 + $0x1a4] ss:$8 sps:$4 sm:$0xff]  }
 0x10d   : > { %4575 = vmatpush1.bf16.msra.mxu0 %v5669_v59  ;;  %4330 = vmatprep.subr.bf16.mxu1 %v5670_v60  ;;  %v5763_v59 = vld [vmem:[%s7102_s10 + $0x7a4] ss:$8 sps:$4 sm:$0xff]   ;;  %v5758_v60 = vld [vmem:[%s7102_s10 + $0x1a0] ss:$8 sps:$4 sm:$0xff]  }
 0x10e   : > { %4576 = vmatprep.subr.bf16.mxu0 %v5672_v61  ;;  %v5761_v61 = vld [vmem:[%s7102_s10 + $0x7a0] ss:$8 sps:$4 sm:$0xff]  }
 0x110   : > { %4331 = vmatpush1.bf16.msra.mxu1 %v5674_v62  ;;  %v5766_v62 = vld [vmem:[%s7102_s10 + $0x1b4] ss:$8 sps:$4 sm:$0xff]  }
 0x111   : > { %4577 = vmatpush1.bf16.msra.mxu0 %v5675_v63  ;;  %4332 = vmatprep.subr.bf16.mxu1 %v5676_v0  ;;  %v5769_v63 = vld [vmem:[%s7102_s10 + $0x7b4] ss:$8 sps:$4 sm:$0xff]   ;;  %v5764_v0 = vld [vmem:[%s7102_s10 + $0x1b0] ss:$8 sps:$4 sm:$0xff]  }
 0x112   : > { %4578 = vmatprep.subr.bf16.mxu0 %v5678_v1  ;;  %v5767_v1 = vld [vmem:[%s7102_s10 + $0x7b0] ss:$8 sps:$4 sm:$0xff]  }
 0x114   : > { %4333 = vmatpush1.bf16.msra.mxu1 %v5680_v2  ;;  %v5772_v2 = vld [vmem:[%s7102_s10 + $0x1c4] ss:$8 sps:$4 sm:$0xff]  }
 0x115   : > { %4579 = vmatpush1.bf16.msra.mxu0 %v5681_v3  ;;  %4334 = vmatprep.subr.bf16.mxu1 %v5682_v4  ;;  %v5775_v3 = vld [vmem:[%s7102_s10 + $0x7c4] ss:$8 sps:$4 sm:$0xff]   ;;  %v5770_v4 = vld [vmem:[%s7102_s10 + $0x1c0] ss:$8 sps:$4 sm:$0xff]  }
 0x116   : > { %4580 = vmatprep.subr.bf16.mxu0 %v5684_v5  ;;  %v5773_v5 = vld [vmem:[%s7102_s10 + $0x7c0] ss:$8 sps:$4 sm:$0xff]  }
 0x118   : > { %4335 = vmatpush1.bf16.msra.mxu1 %v5686_v6  ;;  %v5778_v6 = vld [vmem:[%s7102_s10 + $0x1d4] ss:$8 sps:$4 sm:$0xff]  }
 0x119   : > { %4581 = vmatpush1.bf16.msra.mxu0 %v5687_v7  ;;  %4336 = vmatprep.subr.bf16.mxu1 %v5688_v10  ;;  %v5781_v7 = vld [vmem:[%s7102_s10 + $0x7d4] ss:$8 sps:$4 sm:$0xff]   ;;  %v5776_v10 = vld [vmem:[%s7102_s10 + $0x1d0] ss:$8 sps:$4 sm:$0xff]  }
 0x11a   : > { %4582 = vmatprep.subr.bf16.mxu0 %v5690_v11  ;;  %v5779_v11 = vld [vmem:[%s7102_s10 + $0x7d0] ss:$8 sps:$4 sm:$0xff]  }
 0x11c   : > { %4337 = vmatpush1.bf16.msra.mxu1 %v5692_v12  ;;  %v5784_v12 = vld [vmem:[%s7102_s10 + $0x1e4] ss:$8 sps:$4 sm:$0xff]  }
 0x11d   : > { %4583 = vmatpush1.bf16.msra.mxu0 %v5693_v13  ;;  %4347 = vmatprep.subr.bf16.mxu1 %v5698_v14  ;;  %v5787_v13 = vld [vmem:[%s7102_s10 + $0x7e4] ss:$8 sps:$4 sm:$0xff]   ;;  %v5782_v14 = vld [vmem:[%s7102_s10 + $0x1e0] ss:$8 sps:$4 sm:$0xff]  }
 0x11e   : > { %4593 = vmatprep.subr.bf16.mxu0 %v5703_v15  ;;  %v5785_v15 = vld [vmem:[%s7102_s10 + $0x7e0] ss:$8 sps:$4 sm:$0xff]  }
 0x11f   : > { %4339 = vmatmul.mubr.bf16.vlgmr.msra.gmra.mrb[0].mxu1 %v5035_v16  ;;  %v5790_v16 = vld [vmem:[%s7102_s10 + $0x1f4] ss:$8 sps:$4 sm:$0xff]  }
 0x120   : > { %4585 = vmatmul.mubr.bf16.vlgmr.msra.gmra.mrb[0].mxu0 %v5047_v18  ;;  %4348 = vmatpush1.bf16.msra.mxu1 %v5696_v17  ;;  %v5793_v17 = vld [vmem:[%s7102_s10 + $0x7f4] ss:$8 sps:$4 sm:$0xff]   ;;  %v5788_v18 = vld [vmem:[%s7102_s10 + $0x1f0] ss:$8 sps:$4 sm:$0xff]  }
 0x121   : > { %4594 = vmatpush1.bf16.msra.mxu0 %v5701_v19  ;;  %4349 = vmatprep.subr.bf16.mxu1 %v5706_v20  ;;  %v5791_v19 = vld [vmem:[%s7102_s10 + $0x7f0] ss:$8 sps:$4 sm:$0xff]   ;;  %v5798_v20 = vld [vmem:[%s7102_s10 + $0x204] ss:$8 sps:$4 sm:$0xff]  }
 0x122   : > { %4595 = vmatprep.subr.bf16.mxu0 %v5709_v21  ;;  %4379 = vmatprep.mubr.bf16.mxu1 %v5038_v41  ;;  %v5803_v21 = vld [vmem:[%s7102_s10 + $0x804] ss:$8 sps:$4 sm:$0xff]  }
 0x123   : > { %4625 = vmatprep.mubr.bf16.mxu0 %v5050_v45  ;;  %v5827_v41 = vld [vmem:[%s7102_s10 + $0x844] ss:$8 sps:$4 sm:$0xff]   ;;  %v5833_v45 = vld [vmem:[%s7102_s10 + $0x854] ss:$8 sps:$4 sm:$0xff]  }
 0x124   : > { %4350 = vmatpush1.bf16.msra.mxu1 %v5704_v8  ;;  %v5037_v8 = vcombine.low %v7201_v40, %v7201_v40  ;;  %v5824_v40 = vld [vmem:[%s7102_s10 + $0x244] ss:$8 sps:$4 sm:$0xff]  }
 0x125   : > { %4596 = vmatpush1.bf16.msra.mxu0 %v5707_v22  ;;  %4351 = vmatprep.subr.bf16.mxu1 %v5712_v9  ;;  %v5796_v22 = vld [vmem:[%s7102_s10 + $0x200] ss:$8 sps:$4 sm:$0xff]   ;;  %v5049_v9 = vcombine.low %v7208_v42, %v7208_v42 }
 0x126   : > { %4597 = vmatprep.subr.bf16.mxu0 %v5715_v23  ;;  %v5801_v23 = vld [vmem:[%s7102_s10 + $0x800] ss:$8 sps:$4 sm:$0xff]  }
 0x127   : > { %v5822_v42 = vld [vmem:[%s7102_s10 + $0x240] ss:$8 sps:$4 sm:$0xff]  }
 0x128   : > { %4352 = vmatpush1.bf16.msra.mxu1 %v5710_v24  ;;  %v5806_v24 = vld [vmem:[%s7102_s10 + $0x214] ss:$8 sps:$4 sm:$0xff]  }
 0x129   : > { %4598 = vmatpush1.bf16.msra.mxu0 %v5713_v25  ;;  %4353 = vmatprep.subr.bf16.mxu1 %v5718_v26  ;;  %v7262_v25 = vld [vmem:[%s7650_s0 + $0x10] sm:$0xff] }
 0x12a   : > { %4599 = vmatprep.subr.bf16.mxu0 %v5721_v27  ;;  %v5809_v26 = vld [vmem:[%s7102_s10 + $0x814] ss:$8 sps:$4 sm:$0xff]   ;;  %v5040_v27 = vcombine.high %v7262_v25, %v7262_v25 }
 0x12c   : > { %4354 = vmatpush1.bf16.msra.mxu1 %v5716_v28  ;;  %v7270_v28 = vld [vmem:[%s7650_s0 + $0x40] sm:$0xff] }
 0x12d   : > { %4600 = vmatpush1.bf16.msra.mxu0 %v5719_v29  ;;  %4355 = vmatprep.subr.bf16.mxu1 %v5724_v30  ;;  %v5804_v29 = vld [vmem:[%s7102_s10 + $0x210] ss:$8 sps:$4 sm:$0xff]  }
 0x12e   : > { %4601 = vmatprep.subr.bf16.mxu0 %v5727_v31  ;;  %v5807_v30 = vld [vmem:[%s7102_s10 + $0x810] ss:$8 sps:$4 sm:$0xff]   ;;  %v5052_v31 = vcombine.high %v7270_v28, %v7270_v28 }
 0x130   : > { %4356 = vmatpush1.bf16.msra.mxu1 %v5722_v32  ;;  %v5812_v32 = vld [vmem:[%s7102_s10 + $0x224] ss:$8 sps:$4 sm:$0xff]  }
 0x131   : > { %4602 = vmatpush1.bf16.msra.mxu0 %v5725_v33  ;;  %4357 = vmatprep.subr.bf16.mxu1 %v5730_v34  ;;  %v5815_v33 = vld [vmem:[%s7102_s10 + $0x824] ss:$8 sps:$4 sm:$0xff]   ;;  %v5810_v34 = vld [vmem:[%s7102_s10 + $0x220] ss:$8 sps:$4 sm:$0xff]  }
 0x132   : > { %4603 = vmatprep.subr.bf16.mxu0 %v5733_v35  ;;  %v5813_v35 = vld [vmem:[%s7102_s10 + $0x820] ss:$8 sps:$4 sm:$0xff]  }
 0x134   : > { %4358 = vmatpush1.bf16.msra.mxu1 %v5728_v36  ;;  %v5818_v36 = vld [vmem:[%s7102_s10 + $0x234] ss:$8 sps:$4 sm:$0xff]  }
 0x135   : > { %4604 = vmatpush1.bf16.msra.mxu0 %v5731_v37  ;;  %4359 = vmatprep.subr.bf16.mxu1 %v5736_v38  ;;  %v5821_v37 = vld [vmem:[%s7102_s10 + $0x834] ss:$8 sps:$4 sm:$0xff]   ;;  %v5816_v38 = vld [vmem:[%s7102_s10 + $0x230] ss:$8 sps:$4 sm:$0xff]  }
 0x136   : > { %4605 = vmatprep.subr.bf16.mxu0 %v5739_v39  ;;  %v5819_v39 = vld [vmem:[%s7102_s10 + $0x830] ss:$8 sps:$4 sm:$0xff]  }
 0x138   : > { %4360 = vmatpush1.bf16.msra.mxu1 %v5734_v43  ;;  %v5825_v43 = vld [vmem:[%s7102_s10 + $0x840] ss:$8 sps:$4 sm:$0xff]  }
 0x139   : > { %4606 = vmatpush1.bf16.msra.mxu0 %v5737_v44  ;;  %4361 = vmatprep.subr.bf16.mxu1 %v5742_v46  ;;  %v5830_v44 = vld [vmem:[%s7102_s10 + $0x254] ss:$8 sps:$4 sm:$0xff]   ;;  %v5828_v46 = vld [vmem:[%s7102_s10 + $0x250] ss:$8 sps:$4 sm:$0xff]  }
 0x13a   : > { %4607 = vmatprep.subr.bf16.mxu0 %v5745_v47  ;;  %v5831_v47 = vld [vmem:[%s7102_s10 + $0x850] ss:$8 sps:$4 sm:$0xff]  }
 0x13c   : > { %4362 = vmatpush1.bf16.msra.mxu1 %v5740_v48  ;;  %v5836_v48 = vld [vmem:[%s7102_s10 + $0x264] ss:$8 sps:$4 sm:$0xff]  }
 0x13d   : > { %4608 = vmatpush1.bf16.msra.mxu0 %v5743_v49  ;;  %4363 = vmatprep.subr.bf16.mxu1 %v5748_v50  ;;  %v5839_v49 = vld [vmem:[%s7102_s10 + $0x864] ss:$8 sps:$4 sm:$0xff]   ;;  %v5834_v50 = vld [vmem:[%s7102_s10 + $0x260] ss:$8 sps:$4 sm:$0xff]  }
 0x13e   : > { %4609 = vmatprep.subr.bf16.mxu0 %v5751_v51  ;;  %v5837_v51 = vld [vmem:[%s7102_s10 + $0x860] ss:$8 sps:$4 sm:$0xff]  }
 0x140   : > { %4364 = vmatpush1.bf16.msra.mxu1 %v5746_v52  ;;  %v5842_v52 = vld [vmem:[%s7102_s10 + $0x274] ss:$8 sps:$4 sm:$0xff]  }
 0x141   : > { %4610 = vmatpush1.bf16.msra.mxu0 %v5749_v53  ;;  %4365 = vmatprep.subr.bf16.mxu1 %v5754_v54  ;;  %v5845_v53 = vld [vmem:[%s7102_s10 + $0x874] ss:$8 sps:$4 sm:$0xff]   ;;  %v5840_v54 = vld [vmem:[%s7102_s10 + $0x270] ss:$8 sps:$4 sm:$0xff]  }
 0x142   : > { %4611 = vmatprep.subr.bf16.mxu0 %v5757_v55  ;;  %v5843_v55 = vld [vmem:[%s7102_s10 + $0x870] ss:$8 sps:$4 sm:$0xff]  }
 0x144   : > { %4366 = vmatpush1.bf16.msra.mxu1 %v5752_v56  ;;  %v5848_v56 = vld [vmem:[%s7102_s10 + $0x284] ss:$8 sps:$4 sm:$0xff]  }
 0x145   : > { %4612 = vmatpush1.bf16.msra.mxu0 %v5755_v57  ;;  %4367 = vmatprep.subr.bf16.mxu1 %v5760_v58  ;;  %v5851_v57 = vld [vmem:[%s7102_s10 + $0x884] ss:$8 sps:$4 sm:$0xff]   ;;  %v5846_v58 = vld [vmem:[%s7102_s10 + $0x280] ss:$8 sps:$4 sm:$0xff]  }
 0x146   : > { %4613 = vmatprep.subr.bf16.mxu0 %v5763_v59  ;;  %v5849_v59 = vld [vmem:[%s7102_s10 + $0x880] ss:$8 sps:$4 sm:$0xff]  }
 0x148   : > { %4368 = vmatpush1.bf16.msra.mxu1 %v5758_v60  ;;  %v5854_v60 = vld [vmem:[%s7102_s10 + $0x294] ss:$8 sps:$4 sm:$0xff]  }
 0x149   : > { %4614 = vmatpush1.bf16.msra.mxu0 %v5761_v61  ;;  %4369 = vmatprep.subr.bf16.mxu1 %v5766_v62  ;;  %v5857_v61 = vld [vmem:[%s7102_s10 + $0x894] ss:$8 sps:$4 sm:$0xff]   ;;  %v5852_v62 = vld [vmem:[%s7102_s10 + $0x290] ss:$8 sps:$4 sm:$0xff]  }
 0x14a   : > { %4615 = vmatprep.subr.bf16.mxu0 %v5769_v63  ;;  %v5855_v63 = vld [vmem:[%s7102_s10 + $0x890] ss:$8 sps:$4 sm:$0xff]  }
 0x14c   : > { %4370 = vmatpush1.bf16.msra.mxu1 %v5764_v0  ;;  %v5860_v0 = vld [vmem:[%s7102_s10 + $0x2a4] ss:$8 sps:$4 sm:$0xff]  }
 0x14d   : > { %4616 = vmatpush1.bf16.msra.mxu0 %v5767_v1  ;;  %4371 = vmatprep.subr.bf16.mxu1 %v5772_v2  ;;  %v5863_v1 = vld [vmem:[%s7102_s10 + $0x8a4] ss:$8 sps:$4 sm:$0xff]   ;;  %v5858_v2 = vld [vmem:[%s7102_s10 + $0x2a0] ss:$8 sps:$4 sm:$0xff]  }
 0x14e   : > { %4617 = vmatprep.subr.bf16.mxu0 %v5775_v3  ;;  %v5861_v3 = vld [vmem:[%s7102_s10 + $0x8a0] ss:$8 sps:$4 sm:$0xff]  }
 0x150   : > { %4372 = vmatpush1.bf16.msra.mxu1 %v5770_v4  ;;  %v5866_v4 = vld [vmem:[%s7102_s10 + $0x2b4] ss:$8 sps:$4 sm:$0xff]  }
 0x151   : > { %4618 = vmatpush1.bf16.msra.mxu0 %v5773_v5  ;;  %4373 = vmatprep.subr.bf16.mxu1 %v5778_v6  ;;  %v5869_v5 = vld [vmem:[%s7102_s10 + $0x8b4] ss:$8 sps:$4 sm:$0xff]   ;;  %v5864_v6 = vld [vmem:[%s7102_s10 + $0x2b0] ss:$8 sps:$4 sm:$0xff]  }
 0x152   : > { %4619 = vmatprep.subr.bf16.mxu0 %v5781_v7  ;;  %v5867_v7 = vld [vmem:[%s7102_s10 + $0x8b0] ss:$8 sps:$4 sm:$0xff]  }
 0x154   : > { %4374 = vmatpush1.bf16.msra.mxu1 %v5776_v10  ;;  %v5872_v10 = vld [vmem:[%s7102_s10 + $0x2c4] ss:$8 sps:$4 sm:$0xff]  }
 0x155   : > { %4620 = vmatpush1.bf16.msra.mxu0 %v5779_v11  ;;  %4375 = vmatprep.subr.bf16.mxu1 %v5784_v12  ;;  %v5875_v11 = vld [vmem:[%s7102_s10 + $0x8c4] ss:$8 sps:$4 sm:$0xff]   ;;  %v5870_v12 = vld [vmem:[%s7102_s10 + $0x2c0] ss:$8 sps:$4 sm:$0xff]  }
 0x156   : > { %4621 = vmatprep.subr.bf16.mxu0 %v5787_v13  ;;  %v5873_v13 = vld [vmem:[%s7102_s10 + $0x8c0] ss:$8 sps:$4 sm:$0xff]  }
 0x158   : > { %4376 = vmatpush1.bf16.msra.mxu1 %v5782_v14  ;;  %v5878_v14 = vld [vmem:[%s7102_s10 + $0x2d4] ss:$8 sps:$4 sm:$0xff]  }
 0x159   : > { %4622 = vmatpush1.bf16.msra.mxu0 %v5785_v15  ;;  %4377 = vmatprep.subr.bf16.mxu1 %v5790_v16  ;;  %v5881_v15 = vld [vmem:[%s7102_s10 + $0x8d4] ss:$8 sps:$4 sm:$0xff]   ;;  %v5876_v16 = vld [vmem:[%s7102_s10 + $0x2d0] ss:$8 sps:$4 sm:$0xff]  }
 0x15a   : > { %4623 = vmatprep.subr.bf16.mxu0 %v5793_v17  ;;  %v5879_v17 = vld [vmem:[%s7102_s10 + $0x8d0] ss:$8 sps:$4 sm:$0xff]  }
 0x15c   : > { %4378 = vmatpush1.bf16.msra.mxu1 %v5788_v18  ;;  %v5884_v18 = vld [vmem:[%s7102_s10 + $0x2e4] ss:$8 sps:$4 sm:$0xff]  }
 0x15d   : > { %4624 = vmatpush1.bf16.msra.mxu0 %v5791_v19  ;;  %4388 = vmatprep.subr.bf16.mxu1 %v5798_v20  ;;  %v5887_v19 = vld [vmem:[%s7102_s10 + $0x8e4] ss:$8 sps:$4 sm:$0xff]   ;;  %v5882_v20 = vld [vmem:[%s7102_s10 + $0x2e0] ss:$8 sps:$4 sm:$0xff]  }
 0x15e   : > { %4634 = vmatprep.subr.bf16.mxu0 %v5803_v21  ;;  %v5885_v21 = vld [vmem:[%s7102_s10 + $0x8e0] ss:$8 sps:$4 sm:$0xff]  }
 0x15f   : > { %4380 = vmatmul.mubr.bf16.vlgmr.msra.gmra.mrb[0].mxu1 %v5037_v8  ;;  %v5890_v8 = vld [vmem:[%s7102_s10 + $0x2f4] ss:$8 sps:$4 sm:$0xff]  }
 0x160   : > { %4626 = vmatmul.mubr.bf16.vlgmr.msra.gmra.mrb[0].mxu0 %v5049_v9  ;;  %4389 = vmatpush1.bf16.msra.mxu1 %v5796_v22  ;;  %v5893_v22 = vld [vmem:[%s7102_s10 + $0x8f4] ss:$8 sps:$4 sm:$0xff]   ;;  %v5888_v9 = vld [vmem:[%s7102_s10 + $0x2f0] ss:$8 sps:$4 sm:$0xff]  }
 0x161   : > { %4635 = vmatpush1.bf16.msra.mxu0 %v5801_v23  ;;  %4390 = vmatprep.subr.bf16.mxu1 %v5806_v24  ;;  %v5891_v23 = vld [vmem:[%s7102_s10 + $0x8f0] ss:$8 sps:$4 sm:$0xff]   ;;  %v5898_v24 = vld [vmem:[%s7102_s10 + $0x304] ss:$8 sps:$4 sm:$0xff]  }
 0x162   : > { %4636 = vmatprep.subr.bf16.mxu0 %v5809_v26  ;;  %4420 = vmatprep.mubr.bf16.mxu1 %v5040_v27  ;;  %v5903_v26 = vld [vmem:[%s7102_s10 + $0x904] ss:$8 sps:$4 sm:$0xff]   ;;  %v7337_v27 = vld [vmem:[%s7650_s0 + $0x18] sm:$0xff] }
 0x163   : > { %4666 = vmatprep.mubr.bf16.mxu0 %v5052_v31  ;;  %v7346_v31 = vld [vmem:[%s7650_s0 + $0x48] sm:$0xff] }
 0x164   : > { %4391 = vmatpush1.bf16.msra.mxu1 %v5804_v29  ;;  %v5039_v29 = vcombine.low %v7262_v25, %v7262_v25  ;;  %v5909_v25 = vld [vmem:[%s7102_s10 + $0x914] ss:$8 sps:$4 sm:$0xff]  }
 0x165   : > { %4637 = vmatpush1.bf16.msra.mxu0 %v5807_v30  ;;  %4392 = vmatprep.subr.bf16.mxu1 %v5812_v32  ;;  %v5051_v30 = vcombine.low %v7270_v28, %v7270_v28  ;;  %v5896_v32 = vld [vmem:[%s7102_s10 + $0x300] ss:$8 sps:$4 sm:$0xff]   ;;  %v5042_v28 = vcombine.high %v7337_v27, %v7337_v27 }
 0x166   : > { %4638 = vmatprep.subr.bf16.mxu0 %v5815_v33  ;;  %v5901_v33 = vld [vmem:[%s7102_s10 + $0x900] ss:$8 sps:$4 sm:$0xff]  }
 0x168   : > { %4393 = vmatpush1.bf16.msra.mxu1 %v5810_v34  ;;  %v5906_v34 = vld [vmem:[%s7102_s10 + $0x314] ss:$8 sps:$4 sm:$0xff]  }
 0x169   : > { %4639 = vmatpush1.bf16.msra.mxu0 %v5813_v35  ;;  %4394 = vmatprep.subr.bf16.mxu1 %v5818_v36  ;;  %v5054_v35 = vcombine.high %v7346_v31, %v7346_v31  ;;  %v5904_v36 = vld [vmem:[%s7102_s10 + $0x310] ss:$8 sps:$4 sm:$0xff]  }
 0x16a   : > { %4640 = vmatprep.subr.bf16.mxu0 %v5821_v37  ;;  %v5907_v37 = vld [vmem:[%s7102_s10 + $0x910] ss:$8 sps:$4 sm:$0xff]  }
 0x16c   : > { %4395 = vmatpush1.bf16.msra.mxu1 %v5816_v38  ;;  %v5912_v38 = vld [vmem:[%s7102_s10 + $0x324] ss:$8 sps:$4 sm:$0xff]  }
 0x16d   : > { %4641 = vmatpush1.bf16.msra.mxu0 %v5819_v39  ;;  %4396 = vmatprep.subr.bf16.mxu1 %v5824_v40  ;;  %v5915_v39 = vld [vmem:[%s7102_s10 + $0x924] ss:$8 sps:$4 sm:$0xff]   ;;  %v5910_v40 = vld [vmem:[%s7102_s10 + $0x320] ss:$8 sps:$4 sm:$0xff]  }
 0x16e   : > { %4642 = vmatprep.subr.bf16.mxu0 %v5827_v41  ;;  %v5913_v41 = vld [vmem:[%s7102_s10 + $0x920] ss:$8 sps:$4 sm:$0xff]  }
 0x170   : > { %4397 = vmatpush1.bf16.msra.mxu1 %v5822_v42  ;;  %v5918_v42 = vld [vmem:[%s7102_s10 + $0x334] ss:$8 sps:$4 sm:$0xff]  }
 0x171   : > { %4643 = vmatpush1.bf16.msra.mxu0 %v5825_v43  ;;  %4398 = vmatprep.subr.bf16.mxu1 %v5830_v44  ;;  %v5921_v43 = vld [vmem:[%s7102_s10 + $0x934] ss:$8 sps:$4 sm:$0xff]   ;;  %v5916_v44 = vld [vmem:[%s7102_s10 + $0x330] ss:$8 sps:$4 sm:$0xff]  }
 0x172   : > { %4644 = vmatprep.subr.bf16.mxu0 %v5833_v45  ;;  %v5919_v45 = vld [vmem:[%s7102_s10 + $0x930] ss:$8 sps:$4 sm:$0xff]  }
 0x174   : > { %4399 = vmatpush1.bf16.msra.mxu1 %v5828_v46  ;;  %v5924_v46 = vld [vmem:[%s7102_s10 + $0x344] ss:$8 sps:$4 sm:$0xff]  }
 0x175   : > { %4645 = vmatpush1.bf16.msra.mxu0 %v5831_v47  ;;  %4400 = vmatprep.subr.bf16.mxu1 %v5836_v48  ;;  %v5927_v47 = vld [vmem:[%s7102_s10 + $0x944] ss:$8 sps:$4 sm:$0xff]   ;;  %v5922_v48 = vld [vmem:[%s7102_s10 + $0x340] ss:$8 sps:$4 sm:$0xff]  }
 0x176   : > { %4646 = vmatprep.subr.bf16.mxu0 %v5839_v49  ;;  %v5925_v49 = vld [vmem:[%s7102_s10 + $0x940] ss:$8 sps:$4 sm:$0xff]  }
 0x178   : > { %4401 = vmatpush1.bf16.msra.mxu1 %v5834_v50  ;;  %v5930_v50 = vld [vmem:[%s7102_s10 + $0x354] ss:$8 sps:$4 sm:$0xff]  }
 0x179   : > { %4647 = vmatpush1.bf16.msra.mxu0 %v5837_v51  ;;  %4402 = vmatprep.subr.bf16.mxu1 %v5842_v52  ;;  %v5933_v51 = vld [vmem:[%s7102_s10 + $0x954] ss:$8 sps:$4 sm:$0xff]   ;;  %v5928_v52 = vld [vmem:[%s7102_s10 + $0x350] ss:$8 sps:$4 sm:$0xff]  }
 0x17a   : > { %4648 = vmatprep.subr.bf16.mxu0 %v5845_v53  ;;  %v5931_v53 = vld [vmem:[%s7102_s10 + $0x950] ss:$8 sps:$4 sm:$0xff]  }
 0x17c   : > { %4403 = vmatpush1.bf16.msra.mxu1 %v5840_v54  ;;  %v5936_v54 = vld [vmem:[%s7102_s10 + $0x364] ss:$8 sps:$4 sm:$0xff]  }
 0x17d   : > { %4649 = vmatpush1.bf16.msra.mxu0 %v5843_v55  ;;  %4404 = vmatprep.subr.bf16.mxu1 %v5848_v56  ;;  %v5939_v55 = vld [vmem:[%s7102_s10 + $0x964] ss:$8 sps:$4 sm:$0xff]   ;;  %v5934_v56 = vld [vmem:[%s7102_s10 + $0x360] ss:$8 sps:$4 sm:$0xff]  }
 0x17e   : > { %4650 = vmatprep.subr.bf16.mxu0 %v5851_v57  ;;  %v5937_v57 = vld [vmem:[%s7102_s10 + $0x960] ss:$8 sps:$4 sm:$0xff]  }
 0x180   : > { %4405 = vmatpush1.bf16.msra.mxu1 %v5846_v58  ;;  %v5942_v58 = vld [vmem:[%s7102_s10 + $0x374] ss:$8 sps:$4 sm:$0xff]  }
 0x181   : > { %4651 = vmatpush1.bf16.msra.mxu0 %v5849_v59  ;;  %4406 = vmatprep.subr.bf16.mxu1 %v5854_v60  ;;  %v5945_v59 = vld [vmem:[%s7102_s10 + $0x974] ss:$8 sps:$4 sm:$0xff]   ;;  %v5940_v60 = vld [vmem:[%s7102_s10 + $0x370] ss:$8 sps:$4 sm:$0xff]  }
 0x182   : > { %4652 = vmatprep.subr.bf16.mxu0 %v5857_v61  ;;  %v5943_v61 = vld [vmem:[%s7102_s10 + $0x970] ss:$8 sps:$4 sm:$0xff]  }
 0x184   : > { %4407 = vmatpush1.bf16.msra.mxu1 %v5852_v62  ;;  %v5948_v62 = vld [vmem:[%s7102_s10 + $0x384] ss:$8 sps:$4 sm:$0xff]  }
 0x185   : > { %4653 = vmatpush1.bf16.msra.mxu0 %v5855_v63  ;;  %4408 = vmatprep.subr.bf16.mxu1 %v5860_v0  ;;  %v5951_v63 = vld [vmem:[%s7102_s10 + $0x984] ss:$8 sps:$4 sm:$0xff]   ;;  %v5946_v0 = vld [vmem:[%s7102_s10 + $0x380] ss:$8 sps:$4 sm:$0xff]  }
 0x186   : > { %4654 = vmatprep.subr.bf16.mxu0 %v5863_v1  ;;  %v5949_v1 = vld [vmem:[%s7102_s10 + $0x980] ss:$8 sps:$4 sm:$0xff]  }
 0x188   : > { %4409 = vmatpush1.bf16.msra.mxu1 %v5858_v2  ;;  %v5954_v2 = vld [vmem:[%s7102_s10 + $0x394] ss:$8 sps:$4 sm:$0xff]  }
 0x189   : > { %4655 = vmatpush1.bf16.msra.mxu0 %v5861_v3  ;;  %4410 = vmatprep.subr.bf16.mxu1 %v5866_v4  ;;  %v5957_v3 = vld [vmem:[%s7102_s10 + $0x994] ss:$8 sps:$4 sm:$0xff]   ;;  %v5952_v4 = vld [vmem:[%s7102_s10 + $0x390] ss:$8 sps:$4 sm:$0xff]  }
 0x18a   : > { %4656 = vmatprep.subr.bf16.mxu0 %v5869_v5  ;;  %v5955_v5 = vld [vmem:[%s7102_s10 + $0x990] ss:$8 sps:$4 sm:$0xff]  }
 0x18c   : > { %4411 = vmatpush1.bf16.msra.mxu1 %v5864_v6  ;;  %v5960_v6 = vld [vmem:[%s7102_s10 + $0x3a4] ss:$8 sps:$4 sm:$0xff]  }
 0x18d   : > { %4657 = vmatpush1.bf16.msra.mxu0 %v5867_v7  ;;  %4412 = vmatprep.subr.bf16.mxu1 %v5872_v10  ;;  %v5963_v7 = vld [vmem:[%s7102_s10 + $0x9a4] ss:$8 sps:$4 sm:$0xff]   ;;  %v5958_v10 = vld [vmem:[%s7102_s10 + $0x3a0] ss:$8 sps:$4 sm:$0xff]  }
 0x18e   : > { %4658 = vmatprep.subr.bf16.mxu0 %v5875_v11  ;;  %v5961_v11 = vld [vmem:[%s7102_s10 + $0x9a0] ss:$8 sps:$4 sm:$0xff]  }
 0x190   : > { %4413 = vmatpush1.bf16.msra.mxu1 %v5870_v12  ;;  %v5966_v12 = vld [vmem:[%s7102_s10 + $0x3b4] ss:$8 sps:$4 sm:$0xff]  }
 0x191   : > { %4659 = vmatpush1.bf16.msra.mxu0 %v5873_v13  ;;  %4414 = vmatprep.subr.bf16.mxu1 %v5878_v14  ;;  %v5969_v13 = vld [vmem:[%s7102_s10 + $0x9b4] ss:$8 sps:$4 sm:$0xff]   ;;  %v5964_v14 = vld [vmem:[%s7102_s10 + $0x3b0] ss:$8 sps:$4 sm:$0xff]  }
 0x192   : > { %4660 = vmatprep.subr.bf16.mxu0 %v5881_v15  ;;  %v5967_v15 = vld [vmem:[%s7102_s10 + $0x9b0] ss:$8 sps:$4 sm:$0xff]  }
 0x194   : > { %4415 = vmatpush1.bf16.msra.mxu1 %v5876_v16  ;;  %v5972_v16 = vld [vmem:[%s7102_s10 + $0x3c4] ss:$8 sps:$4 sm:$0xff]  }
 0x195   : > { %4661 = vmatpush1.bf16.msra.mxu0 %v5879_v17  ;;  %4416 = vmatprep.subr.bf16.mxu1 %v5884_v18  ;;  %v5975_v17 = vld [vmem:[%s7102_s10 + $0x9c4] ss:$8 sps:$4 sm:$0xff]   ;;  %v5970_v18 = vld [vmem:[%s7102_s10 + $0x3c0] ss:$8 sps:$4 sm:$0xff]  }
 0x196   : > { %4662 = vmatprep.subr.bf16.mxu0 %v5887_v19  ;;  %v5973_v19 = vld [vmem:[%s7102_s10 + $0x9c0] ss:$8 sps:$4 sm:$0xff]  }
 0x198   : > { %4417 = vmatpush1.bf16.msra.mxu1 %v5882_v20  ;;  %v5978_v20 = vld [vmem:[%s7102_s10 + $0x3d4] ss:$8 sps:$4 sm:$0xff]  }
 0x199   : > { %4663 = vmatpush1.bf16.msra.mxu0 %v5885_v21  ;;  %4418 = vmatprep.subr.bf16.mxu1 %v5890_v8  ;;  %v5981_v21 = vld [vmem:[%s7102_s10 + $0x9d4] ss:$8 sps:$4 sm:$0xff]   ;;  %v5976_v8 = vld [vmem:[%s7102_s10 + $0x3d0] ss:$8 sps:$4 sm:$0xff]  }
 0x19a   : > { %4664 = vmatprep.subr.bf16.mxu0 %v5893_v22  ;;  %v5979_v22 = vld [vmem:[%s7102_s10 + $0x9d0] ss:$8 sps:$4 sm:$0xff]  }
 0x19c   : > { %4419 = vmatpush1.bf16.msra.mxu1 %v5888_v9  ;;  %v5984_v9 = vld [vmem:[%s7102_s10 + $0x3e4] ss:$8 sps:$4 sm:$0xff]  }
 0x19d   : > { %4665 = vmatpush1.bf16.msra.mxu0 %v5891_v23  ;;  %4429 = vmatprep.subr.bf16.mxu1 %v5898_v24  ;;  %v5987_v23 = vld [vmem:[%s7102_s10 + $0x9e4] ss:$8 sps:$4 sm:$0xff]   ;;  %v5982_v24 = vld [vmem:[%s7102_s10 + $0x3e0] ss:$8 sps:$4 sm:$0xff]  }
 0x19e   : > { %4675 = vmatprep.subr.bf16.mxu0 %v5903_v26  ;;  %v5985_v26 = vld [vmem:[%s7102_s10 + $0x9e0] ss:$8 sps:$4 sm:$0xff]  }
 0x19f   : > { %4421 = vmatmul.mubr.bf16.vlgmr.msra.gmra.mrb[0].mxu1 %v5039_v29  ;;  %v5990_v29 = vld [vmem:[%s7102_s10 + $0x3f4] ss:$8 sps:$4 sm:$0xff]  }
 0x1a0   : > { %4667 = vmatmul.mubr.bf16.vlgmr.msra.gmra.mrb[0].mxu0 %v5051_v30  ;;  %4430 = vmatpush1.bf16.msra.mxu1 %v5896_v32  ;;  %v5993_v30 = vld [vmem:[%s7102_s10 + $0x9f4] ss:$8 sps:$4 sm:$0xff]   ;;  %v5988_v32 = vld [vmem:[%s7102_s10 + $0x3f0] ss:$8 sps:$4 sm:$0xff]  }
 0x1a1   : > { %4676 = vmatpush1.bf16.msra.mxu0 %v5901_v33  ;;  %4431 = vmatprep.subr.bf16.mxu1 %v5906_v34  ;;  %v5991_v33 = vld [vmem:[%s7102_s10 + $0x9f0] ss:$8 sps:$4 sm:$0xff]   ;;  %v5998_v34 = vld [vmem:[%s7102_s10 + $0x404] ss:$8 sps:$4 sm:$0xff]  }
 0x1a2   : > { %4677 = vmatprep.subr.bf16.mxu0 %v5909_v25  ;;  %4461 = vmatprep.mubr.bf16.mxu1 %v5042_v28  ;;  %v6003_v25 = vld [vmem:[%s7102_s10 + $0xa04] ss:$8 sps:$4 sm:$0xff]   ;;  %v5996_v28 = vld [vmem:[%s7102_s10 + $0x400] ss:$8 sps:$4 sm:$0xff]  }
 0x1a3   : > { %4707 = vmatprep.mubr.bf16.mxu0 %v5054_v35  ;;  %v6001_v35 = vld [vmem:[%s7102_s10 + $0xa00] ss:$8 sps:$4 sm:$0xff]  }
 0x1a4   : > { %4432 = vmatpush1.bf16.msra.mxu1 %v5904_v36  ;;  %v5041_v36 = vcombine.low %v7337_v27, %v7337_v27  ;;  %v6006_v27 = vld [vmem:[%s7102_s10 + $0x414] ss:$8 sps:$4 sm:$0xff]  }
 0x1a5   : > { %4678 = vmatpush1.bf16.msra.mxu0 %v5907_v37  ;;  %4433 = vmatprep.subr.bf16.mxu1 %v5912_v38  ;;  %v5053_v37 = vcombine.low %v7346_v31, %v7346_v31  ;;  %v7425_v38 = vld [vmem:[%s7650_s0 + $0x20] sm:$0xff] }
 0x1a6   : > { %4679 = vmatprep.subr.bf16.mxu0 %v5915_v39  ;;  %v7430_v39 = vld [vmem:[%s7650_s0 + $0x50] sm:$0xff]  ;;  %v5044_v31 = vcombine.high %v7425_v38, %v7425_v38 }
 0x1a8   : > { %4434 = vmatpush1.bf16.msra.mxu1 %v5910_v40  ;;  %v6009_v40 = vld [vmem:[%s7102_s10 + $0xa14] ss:$8 sps:$4 sm:$0xff]  }
 0x1a9   : > { %4680 = vmatpush1.bf16.msra.mxu0 %v5913_v41  ;;  %4435 = vmatprep.subr.bf16.mxu1 %v5918_v42  ;;  %v5056_v41 = vcombine.high %v7430_v39, %v7430_v39  ;;  %v6004_v42 = vld [vmem:[%s7102_s10 + $0x410] ss:$8 sps:$4 sm:$0xff]  }
 0x1aa   : > { %4681 = vmatprep.subr.bf16.mxu0 %v5921_v43  ;;  %v6007_v43 = vld [vmem:[%s7102_s10 + $0xa10] ss:$8 sps:$4 sm:$0xff]  }
 0x1ac   : > { %4436 = vmatpush1.bf16.msra.mxu1 %v5916_v44  ;;  %v6012_v44 = vld [vmem:[%s7102_s10 + $0x424] ss:$8 sps:$4 sm:$0xff]  }
 0x1ad   : > { %4682 = vmatpush1.bf16.msra.mxu0 %v5919_v45  ;;  %4437 = vmatprep.subr.bf16.mxu1 %v5924_v46  ;;  %v6015_v45 = vld [vmem:[%s7102_s10 + $0xa24] ss:$8 sps:$4 sm:$0xff]   ;;  %v6010_v46 = vld [vmem:[%s7102_s10 + $0x420] ss:$8 sps:$4 sm:$0xff]  }
 0x1ae   : > { %4683 = vmatprep.subr.bf16.mxu0 %v5927_v47  ;;  %v6013_v47 = vld [vmem:[%s7102_s10 + $0xa20] ss:$8 sps:$4 sm:$0xff]  }
 0x1b0   : > { %4438 = vmatpush1.bf16.msra.mxu1 %v5922_v48  ;;  %v6018_v48 = vld [vmem:[%s7102_s10 + $0x434] ss:$8 sps:$4 sm:$0xff]  }
 0x1b1   : > { %4684 = vmatpush1.bf16.msra.mxu0 %v5925_v49  ;;  %4439 = vmatprep.subr.bf16.mxu1 %v5930_v50  ;;  %v6021_v49 = vld [vmem:[%s7102_s10 + $0xa34] ss:$8 sps:$4 sm:$0xff]   ;;  %v6016_v50 = vld [vmem:[%s7102_s10 + $0x430] ss:$8 sps:$4 sm:$0xff]  }
 0x1b2   : > { %4685 = vmatprep.subr.bf16.mxu0 %v5933_v51  ;;  %v6019_v51 = vld [vmem:[%s7102_s10 + $0xa30] ss:$8 sps:$4 sm:$0xff]  }
 0x1b4   : > { %4440 = vmatpush1.bf16.msra.mxu1 %v5928_v52  ;;  %v6024_v52 = vld [vmem:[%s7102_s10 + $0x444] ss:$8 sps:$4 sm:$0xff]  }
 0x1b5   : > { %4686 = vmatpush1.bf16.msra.mxu0 %v5931_v53  ;;  %4441 = vmatprep.subr.bf16.mxu1 %v5936_v54  ;;  %v6027_v53 = vld [vmem:[%s7102_s10 + $0xa44] ss:$8 sps:$4 sm:$0xff]   ;;  %v6022_v54 = vld [vmem:[%s7102_s10 + $0x440] ss:$8 sps:$4 sm:$0xff]  }
 0x1b6   : > { %4687 = vmatprep.subr.bf16.mxu0 %v5939_v55  ;;  %v6025_v55 = vld [vmem:[%s7102_s10 + $0xa40] ss:$8 sps:$4 sm:$0xff]  }
 0x1b8   : > { %4442 = vmatpush1.bf16.msra.mxu1 %v5934_v56  ;;  %v6030_v56 = vld [vmem:[%s7102_s10 + $0x454] ss:$8 sps:$4 sm:$0xff]  }
 0x1b9   : > { %4688 = vmatpush1.bf16.msra.mxu0 %v5937_v57  ;;  %4443 = vmatprep.subr.bf16.mxu1 %v5942_v58  ;;  %v6033_v57 = vld [vmem:[%s7102_s10 + $0xa54] ss:$8 sps:$4 sm:$0xff]   ;;  %v6028_v58 = vld [vmem:[%s7102_s10 + $0x450] ss:$8 sps:$4 sm:$0xff]  }
 0x1ba   : > { %4689 = vmatprep.subr.bf16.mxu0 %v5945_v59  ;;  %v6031_v59 = vld [vmem:[%s7102_s10 + $0xa50] ss:$8 sps:$4 sm:$0xff]  }
 0x1bc   : > { %4444 = vmatpush1.bf16.msra.mxu1 %v5940_v60  ;;  %v6036_v60 = vld [vmem:[%s7102_s10 + $0x464] ss:$8 sps:$4 sm:$0xff]  }
 0x1bd   : > { %4690 = vmatpush1.bf16.msra.mxu0 %v5943_v61  ;;  %4445 = vmatprep.subr.bf16.mxu1 %v5948_v62  ;;  %v6039_v61 = vld [vmem:[%s7102_s10 + $0xa64] ss:$8 sps:$4 sm:$0xff]   ;;  %v6034_v62 = vld [vmem:[%s7102_s10 + $0x460] ss:$8 sps:$4 sm:$0xff]  }
 0x1be   : > { %4691 = vmatprep.subr.bf16.mxu0 %v5951_v63  ;;  %v6037_v63 = vld [vmem:[%s7102_s10 + $0xa60] ss:$8 sps:$4 sm:$0xff]  }
 0x1c0   : > { %4446 = vmatpush1.bf16.msra.mxu1 %v5946_v0  ;;  %v6042_v0 = vld [vmem:[%s7102_s10 + $0x474] ss:$8 sps:$4 sm:$0xff]  }
 0x1c1   : > { %4692 = vmatpush1.bf16.msra.mxu0 %v5949_v1  ;;  %4447 = vmatprep.subr.bf16.mxu1 %v5954_v2  ;;  %v6045_v1 = vld [vmem:[%s7102_s10 + $0xa74] ss:$8 sps:$4 sm:$0xff]   ;;  %v6040_v2 = vld [vmem:[%s7102_s10 + $0x470] ss:$8 sps:$4 sm:$0xff]  }
 0x1c2   : > { %4693 = vmatprep.subr.bf16.mxu0 %v5957_v3  ;;  %v6043_v3 = vld [vmem:[%s7102_s10 + $0xa70] ss:$8 sps:$4 sm:$0xff]  }
 0x1c4   : > { %4448 = vmatpush1.bf16.msra.mxu1 %v5952_v4  ;;  %v6048_v4 = vld [vmem:[%s7102_s10 + $0x484] ss:$8 sps:$4 sm:$0xff]  }
 0x1c5   : > { %4694 = vmatpush1.bf16.msra.mxu0 %v5955_v5  ;;  %4449 = vmatprep.subr.bf16.mxu1 %v5960_v6  ;;  %v6051_v5 = vld [vmem:[%s7102_s10 + $0xa84] ss:$8 sps:$4 sm:$0xff]   ;;  %v6046_v6 = vld [vmem:[%s7102_s10 + $0x480] ss:$8 sps:$4 sm:$0xff]  }
 0x1c6   : > { %4695 = vmatprep.subr.bf16.mxu0 %v5963_v7  ;;  %v6049_v7 = vld [vmem:[%s7102_s10 + $0xa80] ss:$8 sps:$4 sm:$0xff]  }
 0x1c8   : > { %4450 = vmatpush1.bf16.msra.mxu1 %v5958_v10  ;;  %v6054_v10 = vld [vmem:[%s7102_s10 + $0x494] ss:$8 sps:$4 sm:$0xff]  }
 0x1c9   : > { %4696 = vmatpush1.bf16.msra.mxu0 %v5961_v11  ;;  %4451 = vmatprep.subr.bf16.mxu1 %v5966_v12  ;;  %v6057_v11 = vld [vmem:[%s7102_s10 + $0xa94] ss:$8 sps:$4 sm:$0xff]   ;;  %v6052_v12 = vld [vmem:[%s7102_s10 + $0x490] ss:$8 sps:$4 sm:$0xff]  }
 0x1ca   : > { %4697 = vmatprep.subr.bf16.mxu0 %v5969_v13  ;;  %v6055_v13 = vld [vmem:[%s7102_s10 + $0xa90] ss:$8 sps:$4 sm:$0xff]  }
 0x1cc   : > { %4452 = vmatpush1.bf16.msra.mxu1 %v5964_v14  ;;  %v6060_v14 = vld [vmem:[%s7102_s10 + $0x4a4] ss:$8 sps:$4 sm:$0xff]  }
 0x1cd   : > { %4698 = vmatpush1.bf16.msra.mxu0 %v5967_v15  ;;  %4453 = vmatprep.subr.bf16.mxu1 %v5972_v16  ;;  %v6063_v15 = vld [vmem:[%s7102_s10 + $0xaa4] ss:$8 sps:$4 sm:$0xff]   ;;  %v6058_v16 = vld [vmem:[%s7102_s10 + $0x4a0] ss:$8 sps:$4 sm:$0xff]  }
 0x1ce   : > { %4699 = vmatprep.subr.bf16.mxu0 %v5975_v17  ;;  %v6061_v17 = vld [vmem:[%s7102_s10 + $0xaa0] ss:$8 sps:$4 sm:$0xff]  }
 0x1d0   : > { %4454 = vmatpush1.bf16.msra.mxu1 %v5970_v18  ;;  %v6066_v18 = vld [vmem:[%s7102_s10 + $0x4b4] ss:$8 sps:$4 sm:$0xff]  }
 0x1d1   : > { %4700 = vmatpush1.bf16.msra.mxu0 %v5973_v19  ;;  %4455 = vmatprep.subr.bf16.mxu1 %v5978_v20  ;;  %v6069_v19 = vld [vmem:[%s7102_s10 + $0xab4] ss:$8 sps:$4 sm:$0xff]   ;;  %v6064_v20 = vld [vmem:[%s7102_s10 + $0x4b0] ss:$8 sps:$4 sm:$0xff]  }
 0x1d2   : > { %4701 = vmatprep.subr.bf16.mxu0 %v5981_v21  ;;  %v6067_v21 = vld [vmem:[%s7102_s10 + $0xab0] ss:$8 sps:$4 sm:$0xff]  }
 0x1d4   : > { %4456 = vmatpush1.bf16.msra.mxu1 %v5976_v8  ;;  %v6072_v8 = vld [vmem:[%s7102_s10 + $0x4c4] ss:$8 sps:$4 sm:$0xff]  }
 0x1d5   : > { %4702 = vmatpush1.bf16.msra.mxu0 %v5979_v22  ;;  %4457 = vmatprep.subr.bf16.mxu1 %v5984_v9  ;;  %v6075_v22 = vld [vmem:[%s7102_s10 + $0xac4] ss:$8 sps:$4 sm:$0xff]   ;;  %v6070_v9 = vld [vmem:[%s7102_s10 + $0x4c0] ss:$8 sps:$4 sm:$0xff]  }
 0x1d6   : > { %4703 = vmatprep.subr.bf16.mxu0 %v5987_v23  ;;  %v6073_v23 = vld [vmem:[%s7102_s10 + $0xac0] ss:$8 sps:$4 sm:$0xff]  }
 0x1d8   : > { %4458 = vmatpush1.bf16.msra.mxu1 %v5982_v24  ;;  %v6078_v24 = vld [vmem:[%s7102_s10 + $0x4d4] ss:$8 sps:$4 sm:$0xff]  }
 0x1d9   : > { %4704 = vmatpush1.bf16.msra.mxu0 %v5985_v26  ;;  %4459 = vmatprep.subr.bf16.mxu1 %v5990_v29  ;;  %v6081_v26 = vld [vmem:[%s7102_s10 + $0xad4] ss:$8 sps:$4 sm:$0xff]   ;;  %v6076_v29 = vld [vmem:[%s7102_s10 + $0x4d0] ss:$8 sps:$4 sm:$0xff]  }
 0x1da   : > { %4705 = vmatprep.subr.bf16.mxu0 %v5993_v30  ;;  %v6079_v30 = vld [vmem:[%s7102_s10 + $0xad0] ss:$8 sps:$4 sm:$0xff]  }
 0x1dc   : > { %4460 = vmatpush1.bf16.msra.mxu1 %v5988_v32  ;;  %v6084_v32 = vld [vmem:[%s7102_s10 + $0x4e4] ss:$8 sps:$4 sm:$0xff]  }
 0x1dd   : > { %4706 = vmatpush1.bf16.msra.mxu0 %v5991_v33  ;;  %4470 = vmatprep.subr.bf16.mxu1 %v5998_v34  ;;  %v6087_v33 = vld [vmem:[%s7102_s10 + $0xae4] ss:$8 sps:$4 sm:$0xff]   ;;  %v6082_v34 = vld [vmem:[%s7102_s10 + $0x4e0] ss:$8 sps:$4 sm:$0xff]  }
 0x1de   : > { %4716 = vmatprep.subr.bf16.mxu0 %v6003_v25  ;;  %v6085_v25 = vld [vmem:[%s7102_s10 + $0xae0] ss:$8 sps:$4 sm:$0xff]  }
 0x1df   : > { %4462 = vmatmul.mubr.bf16.vlgmr.msra.gmra.mrb[0].mxu1 %v5041_v36  ;;  %v6088_v36 = vld [vmem:[%s7102_s10 + $0x4f0] ss:$8 sps:$4 sm:$0xff]  }
 0x1e0   : > { %4708 = vmatmul.mubr.bf16.vlgmr.msra.gmra.mrb[0].mxu0 %v5053_v37  ;;  %4471 = vmatpush1.bf16.msra.mxu1 %v5996_v28  ;;  %v6090_v28 = vld [vmem:[%s7102_s10 + $0x4f4] ss:$8 sps:$4 sm:$0xff]   ;;  %v6091_v37 = vld [vmem:[%s7102_s10 + $0xaf0] ss:$8 sps:$4 sm:$0xff]  }
 0x1e1   : > { %4717 = vmatpush1.bf16.msra.mxu0 %v6001_v35  ;;  %4472 = vmatprep.subr.bf16.mxu1 %v6006_v27  ;;  %v6093_v35 = vld [vmem:[%s7102_s10 + $0xaf4] ss:$8 sps:$4 sm:$0xff]   ;;  %v6098_v27 = vld [vmem:[%s7102_s10 + $0x504] ss:$8 sps:$4 sm:$0xff]  }
 0x1e2   : > { %4718 = vmatprep.subr.bf16.mxu0 %v6009_v40  ;;  %4502 = vmatprep.mubr.bf16.mxu1 %v5044_v31  ;;  %v6103_v40 = vld [vmem:[%s7102_s10 + $0xb04] ss:$8 sps:$4 sm:$0xff]   ;;  %v5043_v31 = vcombine.low %v7425_v38, %v7425_v38  ;;  %v6101_v38 = vld [vmem:[%s7102_s10 + $0xb00] ss:$8 sps:$4 sm:$0xff]  }
 0x1e3   : > { %4748 = vmatprep.mubr.bf16.mxu0 %v5056_v41  ;;  %v5055_v41 = vcombine.low %v7430_v39, %v7430_v39  ;;  %v6106_v39 = vld [vmem:[%s7102_s10 + $0x514] ss:$8 sps:$4 sm:$0xff]  }
 0x1e4   : > { %4473 = vmatpush1.bf16.msra.mxu1 %v6004_v42  ;;  %v7505_v42 = vld [vmem:[%s7650_s0 + $0x28] sm:$0xff] }
 0x1e5   : > { %4719 = vmatpush1.bf16.msra.mxu0 %v6007_v43  ;;  %4474 = vmatprep.subr.bf16.mxu1 %v6012_v44  ;;  %v7510_v43 = vld [vmem:[%s7650_s0 + $0x58] sm:$0xff]  ;;  %v6096_v44 = vld [vmem:[%s7102_s10 + $0x500] ss:$8 sps:$4 sm:$0xff]  }
 0x1e6   : > { %4720 = vmatprep.subr.bf16.mxu0 %v6015_v45  ;;  %v6109_v45 = vld [vmem:[%s7102_s10 + $0xb14] ss:$8 sps:$4 sm:$0xff]  }
 0x1e8   : > { %4475 = vmatpush1.bf16.msra.mxu1 %v6010_v46  ;;  %v5046_v46 = vcombine.high %v7505_v42, %v7505_v42 }
 0x1e9   : > { %4721 = vmatpush1.bf16.msra.mxu0 %v6013_v47  ;;  %4476 = vmatprep.subr.bf16.mxu1 %v6018_v48  ;;  %v5058_v47 = vcombine.high %v7510_v43, %v7510_v43  ;;  %v6104_v48 = vld [vmem:[%s7102_s10 + $0x510] ss:$8 sps:$4 sm:$0xff]  }
 0x1ea   : > { %4722 = vmatprep.subr.bf16.mxu0 %v6021_v49  ;;  %v6107_v49 = vld [vmem:[%s7102_s10 + $0xb10] ss:$8 sps:$4 sm:$0xff]  }
 0x1ec   : > { %4477 = vmatpush1.bf16.msra.mxu1 %v6016_v50  ;;  %v6112_v50 = vld [vmem:[%s7102_s10 + $0x524] ss:$8 sps:$4 sm:$0xff]  }
 0x1ed   : > { %4723 = vmatpush1.bf16.msra.mxu0 %v6019_v51  ;;  %4478 = vmatprep.subr.bf16.mxu1 %v6024_v52  ;;  %v6115_v51 = vld [vmem:[%s7102_s10 + $0xb24] ss:$8 sps:$4 sm:$0xff]   ;;  %v6110_v52 = vld [vmem:[%s7102_s10 + $0x520] ss:$8 sps:$4 sm:$0xff]  }
 0x1ee   : > { %4724 = vmatprep.subr.bf16.mxu0 %v6027_v53  ;;  %v6113_v53 = vld [vmem:[%s7102_s10 + $0xb20] ss:$8 sps:$4 sm:$0xff]  }
 0x1f0   : > { %4479 = vmatpush1.bf16.msra.mxu1 %v6022_v54  ;;  %v6118_v54 = vld [vmem:[%s7102_s10 + $0x534] ss:$8 sps:$4 sm:$0xff]  }
 0x1f1   : > { %4725 = vmatpush1.bf16.msra.mxu0 %v6025_v55  ;;  %4480 = vmatprep.subr.bf16.mxu1 %v6030_v56  ;;  %v6121_v55 = vld [vmem:[%s7102_s10 + $0xb34] ss:$8 sps:$4 sm:$0xff]   ;;  %v6116_v56 = vld [vmem:[%s7102_s10 + $0x530] ss:$8 sps:$4 sm:$0xff]  }
 0x1f2   : > { %4726 = vmatprep.subr.bf16.mxu0 %v6033_v57  ;;  %v6119_v57 = vld [vmem:[%s7102_s10 + $0xb30] ss:$8 sps:$4 sm:$0xff]  }
 0x1f4   : > { %4481 = vmatpush1.bf16.msra.mxu1 %v6028_v58  ;;  %v6124_v58 = vld [vmem:[%s7102_s10 + $0x544] ss:$8 sps:$4 sm:$0xff]  }
 0x1f5   : > { %4727 = vmatpush1.bf16.msra.mxu0 %v6031_v59  ;;  %4482 = vmatprep.subr.bf16.mxu1 %v6036_v60  ;;  %v6127_v59 = vld [vmem:[%s7102_s10 + $0xb44] ss:$8 sps:$4 sm:$0xff]   ;;  %v6122_v60 = vld [vmem:[%s7102_s10 + $0x540] ss:$8 sps:$4 sm:$0xff]  }
 0x1f6   : > { %4728 = vmatprep.subr.bf16.mxu0 %v6039_v61  ;;  %v6125_v61 = vld [vmem:[%s7102_s10 + $0xb40] ss:$8 sps:$4 sm:$0xff]  }
 0x1f8   : > { %4483 = vmatpush1.bf16.msra.mxu1 %v6034_v62  ;;  %v6130_v62 = vld [vmem:[%s7102_s10 + $0x554] ss:$8 sps:$4 sm:$0xff]  }
 0x1f9   : > { %4729 = vmatpush1.bf16.msra.mxu0 %v6037_v63  ;;  %4484 = vmatprep.subr.bf16.mxu1 %v6042_v0  ;;  %v6133_v63 = vld [vmem:[%s7102_s10 + $0xb54] ss:$8 sps:$4 sm:$0xff]   ;;  %v6128_v0 = vld [vmem:[%s7102_s10 + $0x550] ss:$8 sps:$4 sm:$0xff]  }
 0x1fa   : > { %4730 = vmatprep.subr.bf16.mxu0 %v6045_v1  ;;  %v6131_v1 = vld [vmem:[%s7102_s10 + $0xb50] ss:$8 sps:$4 sm:$0xff]  }
 0x1fc   : > { %4485 = vmatpush1.bf16.msra.mxu1 %v6040_v2  ;;  %v6136_v2 = vld [vmem:[%s7102_s10 + $0x564] ss:$8 sps:$4 sm:$0xff]  }
 0x1fd   : > { %4731 = vmatpush1.bf16.msra.mxu0 %v6043_v3  ;;  %4486 = vmatprep.subr.bf16.mxu1 %v6048_v4  ;;  %v6139_v3 = vld [vmem:[%s7102_s10 + $0xb64] ss:$8 sps:$4 sm:$0xff]   ;;  %v6134_v4 = vld [vmem:[%s7102_s10 + $0x560] ss:$8 sps:$4 sm:$0xff]  }
 0x1fe   : > { %4732 = vmatprep.subr.bf16.mxu0 %v6051_v5  ;;  %v6137_v5 = vld [vmem:[%s7102_s10 + $0xb60] ss:$8 sps:$4 sm:$0xff]  }
 0x200   : > { %4487 = vmatpush1.bf16.msra.mxu1 %v6046_v6  ;;  %v6142_v6 = vld [vmem:[%s7102_s10 + $0x574] ss:$8 sps:$4 sm:$0xff]  }
 0x201   : > { %4733 = vmatpush1.bf16.msra.mxu0 %v6049_v7  ;;  %4488 = vmatprep.subr.bf16.mxu1 %v6054_v10  ;;  %v6145_v7 = vld [vmem:[%s7102_s10 + $0xb74] ss:$8 sps:$4 sm:$0xff]   ;;  %v6140_v10 = vld [vmem:[%s7102_s10 + $0x570] ss:$8 sps:$4 sm:$0xff]  }
 0x202   : > { %4734 = vmatprep.subr.bf16.mxu0 %v6057_v11  ;;  %v6143_v11 = vld [vmem:[%s7102_s10 + $0xb70] ss:$8 sps:$4 sm:$0xff]  }
 0x204   : > { %4489 = vmatpush1.bf16.msra.mxu1 %v6052_v12  ;;  %v6148_v12 = vld [vmem:[%s7102_s10 + $0x584] ss:$8 sps:$4 sm:$0xff]  }
 0x205   : > { %4735 = vmatpush1.bf16.msra.mxu0 %v6055_v13  ;;  %4490 = vmatprep.subr.bf16.mxu1 %v6060_v14  ;;  %v6151_v13 = vld [vmem:[%s7102_s10 + $0xb84] ss:$8 sps:$4 sm:$0xff]   ;;  %v6146_v14 = vld [vmem:[%s7102_s10 + $0x580] ss:$8 sps:$4 sm:$0xff]  }
 0x206   : > { %4736 = vmatprep.subr.bf16.mxu0 %v6063_v15  ;;  %v6149_v15 = vld [vmem:[%s7102_s10 + $0xb80] ss:$8 sps:$4 sm:$0xff]  }
 0x208   : > { %4491 = vmatpush1.bf16.msra.mxu1 %v6058_v16  ;;  %v6154_v16 = vld [vmem:[%s7102_s10 + $0x594] ss:$8 sps:$4 sm:$0xff]  }
 0x209   : > { %4737 = vmatpush1.bf16.msra.mxu0 %v6061_v17  ;;  %4492 = vmatprep.subr.bf16.mxu1 %v6066_v18  ;;  %v6157_v17 = vld [vmem:[%s7102_s10 + $0xb94] ss:$8 sps:$4 sm:$0xff]   ;;  %v6152_v18 = vld [vmem:[%s7102_s10 + $0x590] ss:$8 sps:$4 sm:$0xff]  }
 0x20a   : > { %4738 = vmatprep.subr.bf16.mxu0 %v6069_v19  ;;  %v6155_v19 = vld [vmem:[%s7102_s10 + $0xb90] ss:$8 sps:$4 sm:$0xff]  }
 0x20c   : > { %4493 = vmatpush1.bf16.msra.mxu1 %v6064_v20  ;;  %v6160_v20 = vld [vmem:[%s7102_s10 + $0x5a4] ss:$8 sps:$4 sm:$0xff]  }
 0x20d   : > { %4739 = vmatpush1.bf16.msra.mxu0 %v6067_v21  ;;  %4494 = vmatprep.subr.bf16.mxu1 %v6072_v8  ;;  %v6163_v21 = vld [vmem:[%s7102_s10 + $0xba4] ss:$8 sps:$4 sm:$0xff]   ;;  %v6158_v8 = vld [vmem:[%s7102_s10 + $0x5a0] ss:$8 sps:$4 sm:$0xff]  }
 0x20e   : > { %4740 = vmatprep.subr.bf16.mxu0 %v6075_v22  ;;  %v6161_v22 = vld [vmem:[%s7102_s10 + $0xba0] ss:$8 sps:$4 sm:$0xff]  }
 0x210   : > { %4495 = vmatpush1.bf16.msra.mxu1 %v6070_v9  ;;  %v6166_v9 = vld [vmem:[%s7102_s10 + $0x5b4] ss:$8 sps:$4 sm:$0xff]  }
 0x211   : > { %4741 = vmatpush1.bf16.msra.mxu0 %v6073_v23  ;;  %4496 = vmatprep.subr.bf16.mxu1 %v6078_v24  ;;  %v6169_v23 = vld [vmem:[%s7102_s10 + $0xbb4] ss:$8 sps:$4 sm:$0xff]   ;;  %v6164_v24 = vld [vmem:[%s7102_s10 + $0x5b0] ss:$8 sps:$4 sm:$0xff]  }
 0x212   : > { %4742 = vmatprep.subr.bf16.mxu0 %v6081_v26  ;;  %v6167_v26 = vld [vmem:[%s7102_s10 + $0xbb0] ss:$8 sps:$4 sm:$0xff]  }
 0x214   : > { %4497 = vmatpush1.bf16.msra.mxu1 %v6076_v29  ;;  %v6172_v29 = vld [vmem:[%s7102_s10 + $0x5c4] ss:$8 sps:$4 sm:$0xff]  }
 0x215   : > { %4743 = vmatpush1.bf16.msra.mxu0 %v6079_v30  ;;  %4498 = vmatprep.subr.bf16.mxu1 %v6084_v32  ;;  %v6175_v30 = vld [vmem:[%s7102_s10 + $0xbc4] ss:$8 sps:$4 sm:$0xff]   ;;  %v6170_v32 = vld [vmem:[%s7102_s10 + $0x5c0] ss:$8 sps:$4 sm:$0xff]  }
 0x216   : > { %4744 = vmatprep.subr.bf16.mxu0 %v6087_v33  ;;  %v6173_v33 = vld [vmem:[%s7102_s10 + $0xbc0] ss:$8 sps:$4 sm:$0xff]  }
 0x218   : > { %4499 = vmatpush1.bf16.msra.mxu1 %v6082_v34  ;;  %v6178_v34 = vld [vmem:[%s7102_s10 + $0x5d4] ss:$8 sps:$4 sm:$0xff]  }
 0x219   : > { %4745 = vmatpush1.bf16.msra.mxu0 %v6085_v25  ;;  %4500 = vmatprep.subr.bf16.mxu1 %v6090_v28  ;;  %v6181_v25 = vld [vmem:[%s7102_s10 + $0xbd4] ss:$8 sps:$4 sm:$0xff]   ;;  %v6176_v28 = vld [vmem:[%s7102_s10 + $0x5d0] ss:$8 sps:$4 sm:$0xff]  }
 0x21a   : > { %4746 = vmatprep.subr.bf16.mxu0 %v6093_v35  ;;  %v6179_v35 = vld [vmem:[%s7102_s10 + $0xbd0] ss:$8 sps:$4 sm:$0xff]  }
 0x21c   : > { %4501 = vmatpush1.bf16.msra.mxu1 %v6088_v36  ;;  %v6184_v36 = vld [vmem:[%s7102_s10 + $0x5e4] ss:$8 sps:$4 sm:$0xff]  }
 0x21d   : > { %4747 = vmatpush1.bf16.msra.mxu0 %v6091_v37  ;;  %4511 = vmatprep.subr.bf16.mxu1 %v6098_v27  ;;  %v6187_v37 = vld [vmem:[%s7102_s10 + $0xbe4] ss:$8 sps:$4 sm:$0xff]   ;;  %v6182_v27 = vld [vmem:[%s7102_s10 + $0x5e0] ss:$8 sps:$4 sm:$0xff]  }
 0x21e   : > { %4757 = vmatprep.subr.bf16.mxu0 %v6103_v40  ;;  %v6185_v40 = vld [vmem:[%s7102_s10 + $0xbe0] ss:$8 sps:$4 sm:$0xff]  }
 0x21f   : > { %4503 = vmatmul.mubr.bf16.vlgmr.msra.gmra.mrb[0].mxu1 %v5043_v31  ;;  %v6190_v31 = vld [vmem:[%s7102_s10 + $0x5f4] ss:$8 sps:$4 sm:$0xff]  }
 0x220   : > { %4749 = vmatmul.mubr.bf16.vlgmr.msra.gmra.mrb[0].mxu0 %v5055_v41  ;;  %4512 = vmatpush1.bf16.msra.mxu1 %v6096_v44  ;;  %v6193_v41 = vld [vmem:[%s7102_s10 + $0xbf4] ss:$8 sps:$4 sm:$0xff]   ;;  %v4857_v44 = vld [vmem:[%s7576_s14 + $0x80] sm:$0xff] }
 0x221   : > { %4758 = vmatpush1.bf16.msra.mxu0 %v6101_v38  ;;  %4513 = vmatprep.subr.bf16.mxu1 %v6106_v39  ;;  %v4858_v38 = vld [vmem:[%s7576_s14 + $0x88] sm:$0xff]  ;;  %v6188_v39 = vld [vmem:[%s7102_s10 + $0x5f0] ss:$8 sps:$4 sm:$0xff]  }
 0x222   : > { %4759 = vmatprep.subr.bf16.mxu0 %v6109_v45  ;;  %4543 = vmatprep.mubr.bf16.mxu1 %v5046_v46  ;;  %v6191_v45 = vld [vmem:[%s7102_s10 + $0xbf0] ss:$8 sps:$4 sm:$0xff]   ;;  %v6200_v46 = vld [vmem:[%s7102_s10 + $0xc04] ss:$8 sps:$4 sm:$0xff]  }
 0x223   : > { %4789 = vmatprep.mubr.bf16.mxu0 %v5058_v47  ;;  %v5491_v47 = vpack.c.bf16 %v4858_v38, %v4857_v44 }
 0x224   : > { %4514 = vmatpush1.bf16.msra.mxu1 %v6104_v48  ;;  %v4841_v48 = vld [vmem:[%s7576_s14] sm:$0xff] }
 0x225   : > { %4760 = vmatpush1.bf16.msra.mxu0 %v6107_v49  ;;  %4515 = vmatprep.subr.bf16.mxu1 %v6112_v50  ;;  %v4842_v49 = vld [vmem:[%s7576_s14 + $0x8] sm:$0xff]  ;;  %v5045_v50 = vcombine.low %v7505_v42, %v7505_v42  ;;  %v4861_v42 = vld [vmem:[%s7576_s14 + $0xa0] sm:$0xff] }
 0x226   : > { %4761 = vmatprep.subr.bf16.mxu0 %v6115_v51  ;;  %v5057_v51 = vcombine.low %v7510_v43, %v7510_v43  ;;  %v4862_v43 = vld [vmem:[%s7576_s14 + $0xa8] sm:$0xff] }
 0x228   : > { %4516 = vmatpush1.bf16.msra.mxu1 %v6110_v52  ;;  %v4859_v52 = vld [vmem:[%s7576_s14 + $0x90] sm:$0xff] }
 0x229   : > { %4762 = vmatpush1.bf16.msra.mxu0 %v6113_v53  ;;  %4517 = vmatprep.subr.bf16.mxu1 %v6118_v54  ;;  %v4860_v53 = vld [vmem:[%s7576_s14 + $0x98] sm:$0xff]  ;;  %v6198_v54 = vld [vmem:[%s7102_s10 + $0xc00] ss:$8 sps:$4 sm:$0xff]  }
 0x22a   : > { %4763 = vmatprep.subr.bf16.mxu0 %v6121_v55  ;;  %v6203_v55 = vld [vmem:[%s7102_s10 + $0xc14] ss:$8 sps:$4 sm:$0xff]  }
 0x22c   : > { %4518 = vmatpush1.bf16.msra.mxu1 %v6116_v56  ;;  %v5493_v56 = vpack.c.bf16 %v4842_v49, %v4841_v48 }
 0x22d   : > { %4764 = vmatpush1.bf16.msra.mxu0 %v6119_v57  ;;  %4519 = vmatprep.subr.bf16.mxu1 %v6124_v58  ;;  %v5495_v57 = vpack.c.bf16 %v4860_v53, %v4859_v52  ;;  %v4843_v58 = vld [vmem:[%s7576_s14 + $0x10] sm:$0xff] }
 0x22e   : > { %4765 = vmatprep.subr.bf16.mxu0 %v6127_v59  ;;  %v4844_v59 = vld [vmem:[%s7576_s14 + $0x18] sm:$0xff] }
 0x230   : > { %4520 = vmatpush1.bf16.msra.mxu1 %v6122_v60  ;;  %v6201_v60 = vld [vmem:[%s7102_s10 + $0xc10] ss:$8 sps:$4 sm:$0xff]  }
 0x231   : > { %4766 = vmatpush1.bf16.msra.mxu0 %v6125_v61  ;;  %4521 = vmatprep.subr.bf16.mxu1 %v6130_v62  ;;  %v6235_v61 = vmov 0   ;;  %v6206_v62 = vld [vmem:[%s7102_s10 + $0xc24] ss:$8 sps:$4 sm:$0xff]  }
 0x232   : > { %4767 = vmatprep.subr.bf16.mxu0 %v6133_v63  ;;  %v5497_v63 = vpack.c.bf16 %v4844_v59, %v4843_v58 }
 0x234   : > { %4522 = vmatpush1.bf16.msra.mxu1 %v6128_v0  ;;  %v5499_v0 = vpack.c.bf16 %v4862_v43, %v4861_v42 }
 0x235   : > { %4768 = vmatpush1.bf16.msra.mxu0 %v6131_v1  ;;  %4523 = vmatprep.subr.bf16.mxu1 %v6136_v2  ;;  %v6204_v1 = vld [vmem:[%s7102_s10 + $0xc20] ss:$8 sps:$4 sm:$0xff]   ;;  %v6209_v2 = vld [vmem:[%s7102_s10 + $0xc34] ss:$8 sps:$4 sm:$0xff]  }
 0x236   : > { %4769 = vmatprep.subr.bf16.mxu0 %v6139_v3  ;;  %v6207_v3 = vld [vmem:[%s7102_s10 + $0xc30] ss:$8 sps:$4 sm:$0xff]   ;;  %s5031_s10 = sshll.u32 %s6277_s18, 1  ;;  %s7663_s18 = smov (!%p1833_p10, %s6277_s18), 1 }
 0x237   : > { %p1823_p9 = scmp.lt.s32.totalorder %s5031_s10, 3  ;;  %s5034_s24 = sshll.u32 %s7663_s18, 3 }
 0x238   : > { %4524 = vmatpush1.bf16.msra.mxu1 %v6134_v4  ;;  %v6210_v4 = vld [vmem:[%s7650_s0 + $0x60] ss:$0 sps:$4 sm:$0xff]   ;;  %s1836_s27 = scalar_lea.vmem %s7654_s4, %s5034_s24 }
 0x239   : > { %4770 = vmatpush1.bf16.msra.mxu0 %v6137_v5  ;;  %4525 = vmatprep.subr.bf16.mxu1 %v6142_v6  ;;  %v4845_v5 = vld [vmem:[%s7576_s14 + $0x20] sm:$0xff]  ;;  %v4846_v6 = vld [vmem:[%s7576_s14 + $0x28] sm:$0xff]  ;;  %s7661_s10 = smov (!%p1823_p9, %s5031_s10), 3 }
 0x23a   : > { %4771 = vmatprep.subr.bf16.mxu0 %v6145_v7  ;;  %v5501_v7 = vpack.c.bf16 %v4846_v6, %v4845_v5  ;;  %s1825_s23 = scalar_lea.vmem %s7652_s2, %s7661_s10 }
 0x23c   : > { %4526 = vmatpush1.bf16.msra.mxu1 %v6140_v10  ;;  %v4863_v10 = vld [vmem:[%s7576_s14 + $0xb0] sm:$0xff] }
 0x23d   : > { %4772 = vmatpush1.bf16.msra.mxu0 %v6143_v11  ;;  %4527 = vmatprep.subr.bf16.mxu1 %v6148_v12  ;;  %v4864_v11 = vld [vmem:[%s7576_s14 + $0xb8] sm:$0xff] }
 0x23e   : > { %4773 = vmatprep.subr.bf16.mxu0 %v6151_v13  ;;  %v5503_v12 = vpack.c.bf16 %v4864_v11, %v4863_v10  ;;  %v4847_v13 = vld [vmem:[%s7576_s14 + $0x30] sm:$0xff] }
 0x240   : > { %4528 = vmatpush1.bf16.msra.mxu1 %v6146_v14  ;;  %v4848_v14 = vld [vmem:[%s7576_s14 + $0x38] sm:$0xff] }
 0x241   : > { %4774 = vmatpush1.bf16.msra.mxu0 %v6149_v15  ;;  %4529 = vmatprep.subr.bf16.mxu1 %v6154_v16  ;;  %v5505_v15 = vpack.c.bf16 %v4848_v14, %v4847_v13  ;;  %v4865_v16 = vld [vmem:[%s7576_s14 + $0xc0] sm:$0xff] }
 0x242   : > { %4775 = vmatprep.subr.bf16.mxu0 %v6157_v17  ;;  %v4866_v17 = vld [vmem:[%s7576_s14 + $0xc8] sm:$0xff] }
 0x244   : > { %4530 = vmatpush1.bf16.msra.mxu1 %v6152_v18  ;;  %v4849_v18 = vld [vmem:[%s7576_s14 + $0x40] sm:$0xff] }
 0x245   : > { %4776 = vmatpush1.bf16.msra.mxu0 %v6155_v19  ;;  %4531 = vmatprep.subr.bf16.mxu1 %v6160_v20  ;;  %v5507_v19 = vpack.c.bf16 %v4866_v17, %v4865_v16  ;;  %v4850_v20 = vld [vmem:[%s7576_s14 + $0x48] sm:$0xff] }
 0x246   : > { %4777 = vmatprep.subr.bf16.mxu0 %v6163_v21  ;;  %v4867_v21 = vld [vmem:[%s7576_s14 + $0xd0] sm:$0xff] }
 0x248   : > { %4532 = vmatpush1.bf16.msra.mxu1 %v6158_v8  ;;  %v4868_v8 = vld [vmem:[%s7576_s14 + $0xd8] sm:$0xff] }
 0x249   : > { %4778 = vmatpush1.bf16.msra.mxu0 %v6161_v22  ;;  %4533 = vmatprep.subr.bf16.mxu1 %v6166_v9  ;;  %v5509_v22 = vpack.c.bf16 %v4850_v20, %v4849_v18  ;;  %v5511_v9 = vpack.c.bf16 %v4868_v8, %v4867_v21 }
 0x24a   : > { %4779 = vmatprep.subr.bf16.mxu0 %v6169_v23  ;;  %v4851_v23 = vld [vmem:[%s7576_s14 + $0x50] sm:$0xff] }
 0x24c   : > { %4534 = vmatpush1.bf16.msra.mxu1 %v6164_v24  ;;  %v4852_v24 = vld [vmem:[%s7576_s14 + $0x58] sm:$0xff] }
 0x24d   : > { %4780 = vmatpush1.bf16.msra.mxu0 %v6167_v26  ;;  %4535 = vmatprep.subr.bf16.mxu1 %v6172_v29  ;;  %v4869_v26 = vld [vmem:[%s7576_s14 + $0xe0] sm:$0xff]  ;;  %v4870_v29 = vld [vmem:[%s7576_s14 + $0xe8] sm:$0xff] }
 0x24e   : > { %4781 = vmatprep.subr.bf16.mxu0 %v6175_v30  ;;  %v5513_v30 = vpack.c.bf16 %v4852_v24, %v4851_v23 }
 0x250   : > { %4536 = vmatpush1.bf16.msra.mxu1 %v6170_v32  ;;  %v5515_v32 = vpack.c.bf16 %v4870_v29, %v4869_v26 }
 0x251   : > { %4782 = vmatpush1.bf16.msra.mxu0 %v6173_v33  ;;  %4537 = vmatprep.subr.bf16.mxu1 %v6178_v34  ;;  %v4853_v33 = vld [vmem:[%s7576_s14 + $0x60] sm:$0xff]  ;;  %v4854_v34 = vld [vmem:[%s7576_s14 + $0x68] sm:$0xff] }
 0x252   : > { %4783 = vmatprep.subr.bf16.mxu0 %v6181_v25  ;;  %v5517_v25 = vpack.c.bf16 %v4854_v34, %v4853_v33 }
 0x254   : > { %4538 = vmatpush1.bf16.msra.mxu1 %v6176_v28  ;;  %v4871_v28 = vld [vmem:[%s7576_s14 + $0xf0] sm:$0xff] }
 0x255   : > { %4784 = vmatpush1.bf16.msra.mxu0 %v6179_v35  ;;  %4539 = vmatprep.subr.bf16.mxu1 %v6184_v36  ;;  %v4872_v35 = vld [vmem:[%s7576_s14 + $0xf8] sm:$0xff] }
 0x256   : > { %4785 = vmatprep.subr.bf16.mxu0 %v6187_v37  ;;  %v5519_v36 = vpack.c.bf16 %v4872_v35, %v4871_v28  ;;  %v4855_v37 = vld [vmem:[%s7576_s14 + $0x70] sm:$0xff] }
 0x258   : > { %4540 = vmatpush1.bf16.msra.mxu1 %v6182_v27  ;;  %v4856_v27 = vld [vmem:[%s7576_s14 + $0x78] sm:$0xff] }
 0x259   : > { %4786 = vmatpush1.bf16.msra.mxu0 %v6185_v40  ;;  %4541 = vmatprep.subr.bf16.mxu1 %v6190_v31  ;;  %v5521_v40 = vpack.c.bf16 %v4856_v27, %v4855_v37  ;;  %v2245_v31 = vlaneseq }
 0x25a   : > { %4787 = vmatprep.subr.bf16.mxu0 %v6193_v41 }
 0x25c   : > { %4542 = vmatpush1.bf16.msra.mxu1 %v6188_v39  ;;  %v2246_v39 = vshrl.u32 %v2245_v31, 7 }
 0x25d   : > { %4788 = vmatpush1.bf16.msra.mxu0 %v6191_v45  ;;  %5492 = vmatprep.subr.bf16.mxu1 %v5491_v47  ;;  %v2243_v47 = vld [vmem:[%s1825_s23] sm:$0x3] }
 0x25e   : > { %4798 = vmatprep.subr.bf16.mxu0 %v6200_v46  ;;  %v2247_v46 = vsub.s32 0, %v2246_v39  ;;  %v2251_v48 = vsub.s32 1, %v2246_v39 }
 0x25f   : > { %4544 = vmatmul.mubr.bf16.vlgmr.msra.gmra.mrb[0].mxu1 %v5045_v50 }
 0x260   : > { %4790 = vmatmul.mubr.bf16.vlgmr.msra.gmra.mrb[0].mxu0 %v5057_v51  ;;  %5494 = vmatpush3.bf16.msra.mxu1 %v5493_v56  ;;  %v2248_v49 = vrot.slane %v2243_v47, %v2247_v46  ;;  %v2252_v50 = vrot.slane %v2243_v47, %v2251_v48 }
 0x261   : > { %4799 = vmatpush1.bf16.msra.mxu0 %v6198_v54  ;;  %4830 = vmatprep.mubr.bf16.mxu0 %v6235_v61 }
 0x262   : > { %4800 = vmatprep.subr.bf16.mxu0 %v6203_v55  ;;  %5496 = vmatprep.subr.bf16.mxu1 %v5495_v57 }
 0x264   : > { %5498 = vmatpush3.bf16.msra.mxu1 %v5497_v63 }
 0x265   : > { %4801 = vmatpush1.bf16.msra.mxu0 %v6201_v60  ;;  %5500 = vmatprep.subr.bf16.mxu1 %v5499_v0 }
 0x266   : > { %4802 = vmatprep.subr.bf16.mxu0 %v6206_v62 }
 0x268   : > { %5502 = vmatpush3.bf16.msra.mxu1 %v5501_v7 }
 0x269   : > { %4803 = vmatpush1.bf16.msra.mxu0 %v6204_v1  ;;  %5504 = vmatprep.subr.bf16.mxu1 %v5503_v12 }
 0x26a   : > { %4804 = vmatprep.subr.bf16.mxu0 %v6209_v2 }
 0x26c   : > { %5506 = vmatpush3.bf16.msra.mxu1 %v5505_v15 }
 0x26d   : > { %4805 = vmatpush1.bf16.msra.mxu0 %v6207_v3  ;;  %5508 = vmatprep.subr.bf16.mxu1 %v5507_v19 }
 0x270   : > { %5452 = vmatmul.mubr.msk.bf16.vlgmr.msra.gmra.mrb[0].mxu0 %vm4302_vm0, %v6210_v4  ;;  %5510 = vmatpush3.bf16.msra.mxu1 %v5509_v22 }
 0x271   : > { %5512 = vmatprep.subr.bf16.mxu1 %v5511_v9 }
 0x274   : > { %5514 = vmatpush3.bf16.msra.mxu1 %v5513_v30 }
 0x275   : > { %5516 = vmatprep.subr.bf16.mxu1 %v5515_v32 }
 0x278   : > { %5518 = vmatpush3.bf16.msra.mxu1 %v5517_v25 }
 0x279   : > { %5520 = vmatprep.subr.bf16.mxu1 %v5519_v36 }
 0x27c   : > { %5522 = vmatpush3.bf16.msra.mxu1 %v5521_v40 }
 0x332   : > { %v4545_v41 = vpop.f32.mrb[0].mxu1 }
 0x333   : > { %v4547_v44 = vpop.f32.mrb[1].mxu1  ;;  %v5523_v51 = vadd.f32 %v4545_v41, %v2248_v49 }
 0x334   : > { %v4549_v38 = vpop.f32.mrb[2].mxu1  ;;  %v5525_v52 = vadd.f32 %v4547_v44, %v2252_v50 }
 0x335   : > { %v4550_v45 = vpop.f32.mrb[3].mxu1 }
 0x343   : > { %v4832_v53 = vpop.f32.mrb[0].mxu0 }
 0x344   : > { %v5524_v54 = vadd.f32 %v5523_v51, %v4832_v53  ;;  %v4834_v55 = vpop.f32.mrb[1].mxu0 }
 0x345   : > { %v5526_v56 = vadd.f32 %v5525_v52, %v4834_v55  ;;  %v4836_v57 = vpop.f32.mrb[2].mxu0 }
 0x346   : > { %v4837_v58 = vpop.f32.mrb[3].mxu0  ;;  %v4839_v42 = vmax.f32 %v5524_v54, 0.0 }
 0x347   : > { %v4840_v59 = vmax.f32 %v5526_v56, 0.0 }
 0x349   : > { %4937 = vmatprep.mubr.f32.mxu1 %v4840_v59 }
 0x34a   : > { %4938 = vmatmul.mubr.f32.vlgmr.msra.gmra.mrb[4].mxu1 %v4839_v42 }
 0x41d   : > { %v5488_v43 = vpop.f32.mrb[4].mxu1 }
 0x41e   : > { %v5489_v60 = vpop.f32.mrb[5].mxu1 }
 0x41f   : > { %v5490_v61 = vadd.f32 %v5489_v60, %v5488_v43 }
 0x421   : > { %4943 = vst [vmem:[%s1836_s27] sm:$0xff] %v5490_v61 }
 0x422 PF: > { %p11_p11 = scmp.ge.s32.totalorder %s6280_s19, 4   ;;  %s7655_s15 = smov %s6229_s16 }
 0x423   : > { %s7656_s16 = smov %s6289_s22  ;;  %s7657_s17 = smov %s6280_s19 }
 0x424   :  { %13 = sbr.rel (!%p11_p11) target bundleno = 2 (0x2), region = 115 }

</bundles_post_ra>
